<compile_context>
chip_gen: v5e
topology: v5e:2x2
jax: 0.10.0
libtpu: 0.0.40
codegen_flags: <defaults>
</compile_context>

<pallas_src>
import functools

import jax
import jax.numpy as jnp
from jax.experimental import pallas as pl
from jax.experimental.pallas import tpu as pltpu


# ----------------------------- kernel-side helpers -------------------------- #
def _sigmoid_k(x):
    # exp -> EUP, approximate reciprocal -> single EUP op (no Newton-Raphson divide
    # competing with the scan's exp on the EUP).
    return pl.reciprocal(1.0 + jnp.exp(-x), approx=True)


def _silu_k(x):
    return x * _sigmoid_k(x)


def _softplus(x):
    return jnp.where(x > 20.0, x, jnp.log1p(jnp.exp(jnp.minimum(x, 20.0))))


# ----------------------------- Pallas kernel -------------------------------- #
def mamba_layer_kernel(
    x_ref,        # (1, T_L, d_model) f32
    winxz_hbm,    # ANY  (d_model, 2*d_inner) bf16   fused in_proj [x | z]
    convw_ref,    # (d_conv, d_inner) f32            depthwise conv weights
    convb_ref,    # (1, d_inner) f32                 conv bias
    wxp_ref,      # (d_inner, 2*d_state+dt_rank) bf16  fused x_proj [B | C | dt]
    wdtp_ref,     # (dt_rank, d_inner) f32           dt_proj weight
    bdtp_ref,     # (1, d_inner) f32                 dt_proj bias
    alogT_ref,    # (d_state, d_inner) f32           A_log (transposed layout)
    dvec_ref,     # (1, d_inner) f32                 D (skip)
    wout_hbm,     # ANY  (d_inner, d_model) bf16     out_proj
    lng_ref,      # (1, d_model) f32                 LayerNorm gamma
    lnb_ref,      # (1, d_model) f32                 LayerNorm beta
    out_ref,      # (1, d_model, T_L) f32            permute(0,2,1) fused
    winxz_s,      # VMEM (d_model, 2*d_inner) bf16   single resident weight copy
    wout_s,       # VMEM (d_inner, d_model) bf16
    convpad_s,    # VMEM (T_L+8, d_inner) f32        rows [8-pad,8) carry prev-tile tail
    z_s,          # VMEM (T_L, d_inner) f32          gating half of in_proj
    delta_s,      # VMEM (T_L, d_inner) f32
    u_s,          # VMEM (T_L, d_inner) f32
    y_s,          # VMEM (T_L, d_inner) f32
    bc_s,         # VMEM (T_L, 2*d_state) f32        [B | C] rows
    h_s,          # VMEM (d_state, d_inner) f32      scan state carried across L tiles
    *, t_c, cb,
):
    l_idx = pl.program_id(1)
    t_l = x_ref.shape[1]
    d_conv, d_inner = convw_ref.shape
    d_state = alogT_ref.shape[0]
    pad = d_conv - 1

    @pl.when(l_idx == 0)
    def _():
        # Grid-invariant weights: one resident VMEM copy (single-buffered) instead of
        # the default double-buffered pipeline reservation (key for v7x's 64 MiB VMEM).
        pltpu.sync_copy(winxz_hbm, winxz_s)
        pltpu.sync_copy(wout_hbm, wout_s)
        # Reset carried state at the start of every sequence.
        h_s[...] = jnp.zeros_like(h_s)
        convpad_s[0:8, :] = jnp.zeros((8, d_inner), jnp.float32)

    x = x_ref[0]                                              # (t_l, d_model) f32

    # ---- fused in_proj [x | z]  (bf16 MXU, f32 accumulation) ----
    xz = jnp.dot(x.astype(jnp.bfloat16), winxz_s[...],
                 preferred_element_type=jnp.float32)          # (t_l, 2*d_inner)
    z_s[...] = xz[:, d_inner:]        # park z; it is only needed again at the gate
    xc = xz[:, :d_inner]

    # ---- causal depthwise conv1d (sublane-aligned pad scratch, carried tail) ----
    convpad_s[8:8 + t_l, :] = xc                              # aligned store
    blk = convpad_s[...]                                      # single (t_l+8, d_inner) load
    w_conv = convw_ref[...]                                   # (d_conv, d_inner)
    conv = jnp.zeros((t_l, d_inner), jnp.float32)
    for k in range(d_conv):                                   # d_conv = 4, static
        conv = conv + blk[8 - pad + k:8 - pad + k + t_l, :] * w_conv[k:k + 1, :]
    u = _silu_k(conv + convb_ref[...])                        # (t_l, d_inner) f32
    u_s[...] = u
    # Save the last `pad` conv inputs for the next L tile (blk was already read).
    convpad_s[8 - pad:8, :] = xc[t_l - pad:t_l, :]

    # ---- fused x_proj [B | C | dt]  (bf16 MXU, f32 accumulation) ----
    dbc = jnp.dot(u.astype(jnp.bfloat16), wxp_ref[...],
                  preferred_element_type=jnp.float32)         # (t_l, 2*d_state+dt_rank)
    bc_s[...] = dbc[:, :2 * d_state]
    delta_s[...] = _softplus(
        jnp.dot(dbc[:, 2 * d_state:], wdtp_ref[...],
                preferred_element_type=jnp.float32) + bdtp_ref[...])   # (t_l, d_inner)

    # ---- selective scan (d_inner on lanes; channel-block tiled; hoisted chunk math) --
    A = -jnp.exp(alogT_ref[...])                              # (d_state, d_inner)
    n_chunks = t_l // t_c

    for cs in range(0, d_inner, cb):                          # static channel-block loop
        A_blk = A[:, cs:cs + cb]                              # (d_state, cb)

        def chunk_body(c, h, cs=cs, A_blk=A_blk):
            base = pl.multiple_of(c * t_c, t_c)
            d_chunk = delta_s[pl.ds(base, t_c), pl.ds(cs, cb)]      # (t_c, cb)
            u_chunk = u_s[pl.ds(base, t_c), pl.ds(cs, cb)]          # (t_c, cb)
            # One small (t_c, 2*d_state) -> (2*d_state, t_c) transpose per chunk; it is
            # off the h-dependency chain (a lane-transposed full-tile scratch would need
            # dynamic minor-dim slicing inside the fori body).
            bcT = bc_s[pl.ds(base, t_c), :].T                       # (2*d_state, t_c)

            # Hoist all h-independent work off the serial recurrence:
            dA = jnp.exp(d_chunk[:, None, :] * A_blk[None, :, :])   # (t_c, d_state, cb)
            du = d_chunk * u_chunk                                  # (t_c, cb)
            dBu = [du[j:j + 1, :] * bcT[:d_state, j:j + 1] for j in range(t_c)]

            y_rows = []
            for j in range(t_c):                 # serial path: FMA + C-reduction only
                h = dA[j] * h + dBu[j]                               # (d_state, cb)
                y_rows.append(jnp.sum(h * bcT[d_state:, j:j + 1],
                                      axis=0, keepdims=True))        # (1, cb)
            y_s[pl.ds(base, t_c), pl.ds(cs, cb)] = jnp.concatenate(y_rows, axis=0)
            return h

        h_s[:, pl.ds(cs, cb)] = jax.lax.fori_loop(
            0, n_chunks, chunk_body, h_s[:, pl.ds(cs, cb)])

    # ---- D skip, gating, out_proj ----
    y = y_s[...] + u_s[...] * dvec_ref[...]
    y = y * _silu_k(z_s[...])
    out_m = jnp.dot(y.astype(jnp.bfloat16), wout_s[...],
                    preferred_element_type=jnp.float32)       # (t_l, d_model)

    # ---- residual + LayerNorm (over d_model, eps=1e-5) + fused permute(0,2,1) ----
    res = x + out_m
    mean = jnp.mean(res, axis=1, keepdims=True)
    cen = res - mean
    var = jnp.mean(cen * cen, axis=1, keepdims=True)
    normed = cen * jax.lax.rsqrt(var + 1e-5) * lng_ref[...] + lnb_ref[...]
    out_ref[0] = normed.T                                     # (d_model, t_l) lane-dense


# ----------------------------- wrapper -------------------------------------- #
def _full_spec(arr):
    zeros = (0,) * arr.ndim
    return pl.BlockSpec(arr.shape, lambda b, l: zeros)


def _nbytes(shape, dtype):
    n = 1
    for s in shape:
        n *= int(s)
    return n * jnp.dtype(dtype).itemsize


@functools.partial(jax.jit, static_argnames=("t_l", "t_c", "cb_max"))
def mamba_layer_forward(x, weights, *, t_l=128, t_c=8, cb_max=128):
    (winxz, convw, convb, wxp, wdtp, bdtp, alogT, dvec, wout, lng, lnb) = weights
    B, L, d_model = x.shape
    d_conv, d_inner = convw.shape
    d_state = alogT.shape[0]
    f32 = jnp.float32

    t_l = min(t_l, L)
    assert L % t_l == 0 and t_l % t_c == 0 and t_l % 8 == 0
    # Channel block: with the hoisted chunk temporaries, t_c*d_state*cb/1024 vregs each
    # for dA and dBu -> cb=128 keeps the scan's live set comfortably under the 64-vreg file.
    cb = min(cb_max, d_inner)
    assert d_inner % cb == 0

    scratch_shapes = [
        pltpu.VMEM(winxz.shape, winxz.dtype),       # resident in_proj weights
        pltpu.VMEM(wout.shape, wout.dtype),         # resident out_proj weights
        pltpu.VMEM((t_l + 8, d_inner), f32),        # aligned conv pad (+ carried tail)
        pltpu.VMEM((t_l, d_inner), f32),            # z
        pltpu.VMEM((t_l, d_inner), f32),            # delta
        pltpu.VMEM((t_l, d_inner), f32),            # u (post conv+SiLU)
        pltpu.VMEM((t_l, d_inner), f32),            # scan output y
        pltpu.VMEM((t_l, 2 * d_state), f32),        # [B | C] rows
        pltpu.VMEM((d_state, d_inner), f32),        # carried scan state h
    ]

    # Explicit scoped-VMEM budget: scratch + double-buffered x/out blocks + small
    # (double-buffered) weights, with headroom.
    scratch_bytes = (
        _nbytes(winxz.shape, winxz.dtype) + _nbytes(wout.shape, wout.dtype)
        + _nbytes((t_l + 8, d_inner), f32) + 4 * _nbytes((t_l, d_inner), f32)
        + _nbytes((t_l, 2 * d_state), f32) + _nbytes((d_state, d_inner), f32))
    block_bytes = 2 * (_nbytes((t_l, d_model), f32) + _nbytes((d_model, t_l), f32))
    small_w_bytes = 2 * sum(_nbytes(w.shape, w.dtype) for w in
                            (convw, convb, wxp, wdtp, bdtp, alogT, dvec, lng, lnb))
    vmem_limit = max(int(1.5 * (scratch_bytes + block_bytes + small_w_bytes)),
                     32 * 1024 * 1024)

    in_specs = [
        pl.BlockSpec((1, t_l, d_model), lambda b, l: (b, l, 0)),
        pl.BlockSpec(memory_space=pl.ANY),          # winxz: copied once to VMEM scratch
        _full_spec(convw),
        _full_spec(convb),
        _full_spec(wxp),
        _full_spec(wdtp),
        _full_spec(bdtp),
        _full_spec(alogT),
        _full_spec(dvec),
        pl.BlockSpec(memory_space=pl.ANY),          # wout: copied once to VMEM scratch
        _full_spec(lng),
        _full_spec(lnb),
    ]

    grid_spec = pltpu.PrefetchScalarGridSpec(
        num_scalar_prefetch=0,
        grid=(B, L // t_l),
        in_specs=in_specs,
        out_specs=pl.BlockSpec((1, d_model, t_l), lambda b, l: (b, 0, l)),
        scratch_shapes=scratch_shapes,
    )
    kernel = functools.partial(mamba_layer_kernel, t_c=t_c, cb=cb)
    return pl.pallas_call(
        kernel,
        out_shape=jax.ShapeDtypeStruct((B, d_model, L), jnp.float32),
        grid_spec=grid_spec,
        compiler_params=pltpu.CompilerParams(
            dimension_semantics=("parallel", "arbitrary"),
            vmem_limit_bytes=vmem_limit),
    )(x, *weights)


# ----------------------------- parameter init ------------------------------- #
def init_params(key, d_model, d_state=16, d_conv=4, expand=2):
    d_inner = expand * d_model
    dt_rank = -(-d_model // 16)                     # ceil(d_model / 16)
    ks = jax.random.split(key, 10)
    s = 0.1
    win_x = jax.random.normal(ks[0], (d_model, d_inner), jnp.float32) * s
    win_z = jax.random.normal(ks[1], (d_model, d_inner), jnp.float32) * s
    winxz = jnp.concatenate([win_x, win_z], axis=1).astype(jnp.bfloat16)
    convw = jax.random.normal(ks[2], (d_conv, d_inner), jnp.float32) * s
    convb = jax.random.normal(ks[3], (1, d_inner), jnp.float32) * s
    wxb = jax.random.normal(ks[4], (d_inner, d_state), jnp.float32) * s
    wxc = jax.random.normal(ks[5], (d_inner, d_state), jnp.float32) * s
    wxdt = jax.random.normal(ks[6], (d_inner, dt_rank), jnp.float32) * s
    w_xproj = jnp.concatenate([wxb, wxc, wxdt], axis=1).astype(jnp.bfloat16)
    wdtp = jax.random.normal(ks[7], (dt_rank, d_inner), jnp.float32) * s
    bdtp = jnp.full((1, d_inner), 0.5, jnp.float32)
    # S4D-real style A init, stored transposed: alogT[s, ch] = log(s + 1)
    alogT = jnp.broadcast_to(
        jnp.log(jnp.arange(1, d_state + 1, dtype=jnp.float32))[:, None],
        (d_state, d_inner)).astype(jnp.float32)
    dvec = jnp.ones((1, d_inner), jnp.float32)
    wout = (jax.random.normal(ks[8], (d_inner, d_model), jnp.float32) * s).astype(jnp.bfloat16)
    lng = jnp.ones((1, d_model), jnp.float32)
    lnb = jnp.zeros((1, d_model), jnp.float32)
    return (winxz, convw, convb, w_xproj, wdtp, bdtp, alogT, dvec, wout, lng, lnb)


# ----------------------------- pure-JAX reference ---------------------------- #
def _silu_ref(x):
    return x * (1.0 / (1.0 + jnp.exp(-x)))


def reference(x, weights):
    (winxz, convw, convb, w_xproj, wdtp, bdtp, alogT, dvec, wout, lng, lnb) = weights
    B, L, d_model = x.shape
    d_conv, d_inner = convw.shape
    d_state = alogT.shape[0]

    xz = jnp.dot(x.astype(jnp.bfloat16), winxz, preferred_element_type=jnp.float32)
    xc = xz[..., :d_inner]
    z = xz[..., d_inner:]

    xpad = jnp.pad(xc, ((0, 0), (d_conv - 1, 0), (0, 0)))
    conv = sum(xpad[:, k:k + L, :] * convw[k] for k in range(d_conv)) + convb
    u = _silu_ref(conv)

    dbc = jnp.dot(u.astype(jnp.bfloat16), w_xproj, preferred_element_type=jnp.float32)
    Bm = dbc[..., :d_state]
    Cm = dbc[..., d_state:2 * d_state]
    dt_in = dbc[..., 2 * d_state:]
    delta = _softplus(jnp.dot(dt_in, wdtp, preferred_element_type=jnp.float32) + bdtp)
    A = -jnp.exp(alogT)                              # (d_state, d_inner)

    def step(h, inp):
        d_t, u_t, b_t, c_t = inp                     # (B,d_inner)x2, (B,d_state)x2
        h = jnp.exp(d_t[:, None, :] * A[None]) * h + (d_t * u_t)[:, None, :] * b_t[:, :, None]
        y = jnp.sum(h * c_t[:, :, None], axis=1)     # (B, d_inner)
        return h, y

    h0 = jnp.zeros((B, d_state, d_inner), jnp.float32)
    _, ys = jax.lax.scan(
        step, h0,
        (delta.transpose(1, 0, 2), u.transpose(1, 0, 2),
         Bm.transpose(1, 0, 2), Cm.transpose(1, 0, 2)))
    y = ys.transpose(1, 0, 2)
    y = y + u * dvec
    y = y * _silu_ref(z)
    out = jnp.dot(y.astype(jnp.bfloat16), wout, preferred_element_type=jnp.float32)

    res = x + out
    mean = res.mean(-1, keepdims=True)
    var = ((res - mean) ** 2).mean(-1, keepdims=True)
    normed = (res - mean) * jax.lax.rsqrt(var + 1e-5) * lng + lnb
    return normed.transpose(0, 2, 1)


# ----------------------------- main ----------------------------------------- #
if __name__ == "__main__":
    # Small shapes, chosen so the L-tiling (2 tiles of 128), the carried scan/conv
    # state, the channel-block loop (d_inner=256 -> 2 blocks) and the fused square
    # (128x128) output transpose are all exercised.
    B, L, d_model = 2, 256, 128

    key = jax.random.PRNGKey(0)
    kx, kp = jax.random.split(key)
    x = jax.random.normal(kx, (B, L, d_model), jnp.float32)
    weights = init_params(kp, d_model)

    out = mamba_layer_forward(x, weights)
    out = jax.block_until_ready(out)
    assert out.shape == (B, d_model, L), out.shape

    ref = reference(x, weights)
    max_err = float(jnp.max(jnp.abs(out - ref)))
    # Only deviation vs the reference is the approximate EUP reciprocal in the sigmoids.
    assert max_err < 1e-2, max_err

    print("KERNEL_OK")
</pallas_src>

<mosaic_0001>
module attributes {stable_mosaic.version = 11 : i64} {
  func.func @mamba_layer_kernel(%arg0: i32, %arg1: i32, %arg2: memref<1x128x128xf32, #tpu.memory_space<vmem>>, %arg3: memref<128x512xbf16, #tpu.memory_space<any>>, %arg4: memref<4x256xf32, #tpu.memory_space<vmem>>, %arg5: memref<1x256xf32, #tpu.memory_space<vmem>>, %arg6: memref<256x40xbf16, #tpu.memory_space<vmem>>, %arg7: memref<8x256xf32, #tpu.memory_space<vmem>>, %arg8: memref<1x256xf32, #tpu.memory_space<vmem>>, %arg9: memref<16x256xf32, #tpu.memory_space<vmem>>, %arg10: memref<1x256xf32, #tpu.memory_space<vmem>>, %arg11: memref<256x128xbf16, #tpu.memory_space<any>>, %arg12: memref<1x128xf32, #tpu.memory_space<vmem>>, %arg13: memref<1x128xf32, #tpu.memory_space<vmem>>, %arg14: memref<1x128x128xf32, #tpu.memory_space<vmem>>, %arg15: memref<128x512xbf16, #tpu.memory_space<vmem>>, %arg16: memref<256x128xbf16, #tpu.memory_space<vmem>>, %arg17: memref<136x256xf32, #tpu.memory_space<vmem>>, %arg18: memref<128x256xf32, #tpu.memory_space<vmem>>, %arg19: memref<128x256xf32, #tpu.memory_space<vmem>>, %arg20: memref<128x256xf32, #tpu.memory_space<vmem>>, %arg21: memref<128x256xf32, #tpu.memory_space<vmem>>, %arg22: memref<128x32xf32, #tpu.memory_space<vmem>>, %arg23: memref<16x256xf32, #tpu.memory_space<vmem>>) attributes {dimension_semantics = [#tpu.dimension_semantics<parallel>, #tpu.dimension_semantics<arbitrary>], iteration_bounds = array<i64: 2, 2>, scalar_prefetch = 0 : i64, scratch_operands = 9 : i64, tpu.core_type = #tpu.core_type<tc>, window_params = [{transform_indices = @transform_0, window_bounds = array<i64: 1, 128, 128>}, {}, {pipeline_mode = #tpu.pipeline_mode<synchronous>, transform_indices = @transform_2, window_bounds = array<i64: 4, 256>}, {pipeline_mode = #tpu.pipeline_mode<synchronous>, transform_indices = @transform_3, window_bounds = array<i64: 1, 256>}, {pipeline_mode = #tpu.pipeline_mode<synchronous>, transform_indices = @transform_4, window_bounds = array<i64: 256, 40>}, {pipeline_mode = #tpu.pipeline_mode<synchronous>, transform_indices = @transform_5, window_bounds = array<i64: 8, 256>}, {pipeline_mode = #tpu.pipeline_mode<synchronous>, transform_indices = @transform_6, window_bounds = array<i64: 1, 256>}, {pipeline_mode = #tpu.pipeline_mode<synchronous>, transform_indices = @transform_7, window_bounds = array<i64: 16, 256>}, {pipeline_mode = #tpu.pipeline_mode<synchronous>, transform_indices = @transform_8, window_bounds = array<i64: 1, 256>}, {}, {pipeline_mode = #tpu.pipeline_mode<synchronous>, transform_indices = @transform_10, window_bounds = array<i64: 1, 128>}, {pipeline_mode = #tpu.pipeline_mode<synchronous>, transform_indices = @transform_11, window_bounds = array<i64: 1, 128>}, {transform_indices = @transform_12, window_bounds = array<i64: 1, 128, 128>}]} {
    %c0_i32 = arith.constant 0 : i32
    %0 = arith.cmpi eq, %arg1, %c0_i32 : i32
    %1 = arith.extui %0 : i1 to i32
    %c0_i32_0 = arith.constant 0 : i32
    %2 = arith.cmpi ne, %1, %c0_i32_0 : i32
    scf.if %2 {
      "tpu.region"() ({
        %130 = tpu.sem_alloc : memref<!tpu.dma_semaphore, #tpu.memory_space<semaphore_mem>>
        tpu.enqueue_dma source(%arg3 : memref<128x512xbf16, #tpu.memory_space<any>>) target(%arg15 : memref<128x512xbf16, #tpu.memory_space<vmem>>) target_semaphore(%130 : memref<!tpu.dma_semaphore, #tpu.memory_space<semaphore_mem>>)
        tpu.wait_dma2 semaphore(%130 : memref<!tpu.dma_semaphore, #tpu.memory_space<semaphore_mem>>) src(%arg3 : memref<128x512xbf16, #tpu.memory_space<any>>) dst(%arg15 : memref<128x512xbf16, #tpu.memory_space<vmem>>)
        tpu.yield
      }) : () -> ()
      "tpu.region"() ({
        %130 = tpu.sem_alloc : memref<!tpu.dma_semaphore, #tpu.memory_space<semaphore_mem>>
        tpu.enqueue_dma source(%arg11 : memref<256x128xbf16, #tpu.memory_space<any>>) target(%arg16 : memref<256x128xbf16, #tpu.memory_space<vmem>>) target_semaphore(%130 : memref<!tpu.dma_semaphore, #tpu.memory_space<semaphore_mem>>)
        tpu.wait_dma2 semaphore(%130 : memref<!tpu.dma_semaphore, #tpu.memory_space<semaphore_mem>>) src(%arg11 : memref<256x128xbf16, #tpu.memory_space<any>>) dst(%arg16 : memref<256x128xbf16, #tpu.memory_space<vmem>>)
        tpu.yield
      }) : () -> ()
      %cst_75 = arith.constant 0.000000e+00 : f32
      %126 = vector.broadcast %cst_75 : f32 to vector<16x256xf32>
      %c0_76 = arith.constant 0 : index
      %c0_77 = arith.constant 0 : index
      %127 = vector.load %arg23[%c0_76, %c0_77] : memref<16x256xf32, #tpu.memory_space<vmem>>, vector<16x256xf32>
      tpu.vector_store %arg23[%c0_76, %c0_77], %126 {strides = array<i32>} : memref<16x256xf32, #tpu.memory_space<vmem>>, vector<16x256xf32>,
      %cst_78 = arith.constant 0.000000e+00 : f32
      %128 = vector.broadcast %cst_78 : f32 to vector<8x256xf32>
      %c0_79 = arith.constant 0 : index
      %c0_80 = arith.constant 0 : index
      %129 = vector.load %arg17[%c0_79, %c0_80] : memref<136x256xf32, #tpu.memory_space<vmem>>, vector<8x256xf32>
      tpu.vector_store %arg17[%c0_79, %c0_80], %128 {strides = array<i32>} : memref<136x256xf32, #tpu.memory_space<vmem>>, vector<8x256xf32>,
    } else {
    }
    %c0 = arith.constant 0 : index
    %c0_1 = arith.constant 0 : index
    %c0_2 = arith.constant 0 : index
    %3 = vector.load %arg2[%c0, %c0_1, %c0_2] : memref<1x128x128xf32, #tpu.memory_space<vmem>>, vector<1x128x128xf32>
    %4 = vector.shape_cast %3 : vector<1x128x128xf32> to vector<128x128xf32>
    %5 = arith.truncf %4 : vector<128x128xf32> to vector<128x128xbf16>
    %c0_3 = arith.constant 0 : index
    %c0_4 = arith.constant 0 : index
    %6 = vector.load %arg15[%c0_3, %c0_4] : memref<128x512xbf16, #tpu.memory_space<vmem>>, vector<128x512xbf16>
    %cst = arith.constant dense<0.000000e+00> : vector<128x512xf32>
    %7 = tpu.matmul %5, %6, %cst {dimension_numbers = #tpu.dot_dimension_numbers<[1], [0], [0], [1], [0, 0, 1, 1], [], []>} : vector<128x128xbf16>, vector<128x512xbf16>, vector<128x512xf32> -> vector<128x512xf32>
    %8 = vector.extract_strided_slice %7 {offsets = [0, 256], sizes = [128, 256], strides = [1, 1]} : vector<128x512xf32> to vector<128x256xf32>
    %c0_5 = arith.constant 0 : index
    %c0_6 = arith.constant 0 : index
    %9 = vector.load %arg18[%c0_5, %c0_6] : memref<128x256xf32, #tpu.memory_space<vmem>>, vector<128x256xf32>
    tpu.vector_store %arg18[%c0_5, %c0_6], %8 {strides = array<i32>} : memref<128x256xf32, #tpu.memory_space<vmem>>, vector<128x256xf32>,
    %10 = vector.extract_strided_slice %7 {offsets = [0, 0], sizes = [128, 256], strides = [1, 1]} : vector<128x512xf32> to vector<128x256xf32>
    %c8 = arith.constant 8 : index
    %c0_7 = arith.constant 0 : index
    %11 = vector.load %arg17[%c8, %c0_7] : memref<136x256xf32, #tpu.memory_space<vmem>>, vector<128x256xf32>
    tpu.vector_store %arg17[%c8, %c0_7], %10 {strides = array<i32>} : memref<136x256xf32, #tpu.memory_space<vmem>>, vector<128x256xf32>,
    %c0_8 = arith.constant 0 : index
    %c0_9 = arith.constant 0 : index
    %12 = vector.load %arg17[%c0_8, %c0_9] : memref<136x256xf32, #tpu.memory_space<vmem>>, vector<136x256xf32>
    %c0_10 = arith.constant 0 : index
    %c0_11 = arith.constant 0 : index
    %13 = vector.load %arg4[%c0_10, %c0_11] : memref<4x256xf32, #tpu.memory_space<vmem>>, vector<4x256xf32>
    %cst_12 = arith.constant 0.000000e+00 : f32
    %14 = vector.broadcast %cst_12 : f32 to vector<128x256xf32>
    %15 = vector.extract_strided_slice %12 {offsets = [5, 0], sizes = [128, 256], strides = [1, 1]} : vector<136x256xf32> to vector<128x256xf32>
    %16 = vector.extract_strided_slice %13 {offsets = [0, 0], sizes = [1, 256], strides = [1, 1]} : vector<4x256xf32> to vector<1x256xf32>
    %17 = vector.broadcast %16 : vector<1x256xf32> to vector<128x256xf32>
    %18 = arith.mulf %15, %17 : vector<128x256xf32>
    %19 = arith.addf %14, %18 : vector<128x256xf32>
    %20 = vector.extract_strided_slice %12 {offsets = [6, 0], sizes = [128, 256], strides = [1, 1]} : vector<136x256xf32> to vector<128x256xf32>
    %21 = vector.extract_strided_slice %13 {offsets = [1, 0], sizes = [1, 256], strides = [1, 1]} : vector<4x256xf32> to vector<1x256xf32>
    %22 = vector.broadcast %21 : vector<1x256xf32> to vector<128x256xf32>
    %23 = arith.mulf %20, %22 : vector<128x256xf32>
    %24 = arith.addf %19, %23 : vector<128x256xf32>
    %25 = vector.extract_strided_slice %12 {offsets = [7, 0], sizes = [128, 256], strides = [1, 1]} : vector<136x256xf32> to vector<128x256xf32>
    %26 = vector.extract_strided_slice %13 {offsets = [2, 0], sizes = [1, 256], strides = [1, 1]} : vector<4x256xf32> to vector<1x256xf32>
    %27 = vector.broadcast %26 : vector<1x256xf32> to vector<128x256xf32>
    %28 = arith.mulf %25, %27 : vector<128x256xf32>
    %29 = arith.addf %24, %28 : vector<128x256xf32>
    %30 = vector.extract_strided_slice %12 {offsets = [8, 0], sizes = [128, 256], strides = [1, 1]} : vector<136x256xf32> to vector<128x256xf32>
    %31 = vector.extract_strided_slice %13 {offsets = [3, 0], sizes = [1, 256], strides = [1, 1]} : vector<4x256xf32> to vector<1x256xf32>
    %32 = vector.broadcast %31 : vector<1x256xf32> to vector<128x256xf32>
    %33 = arith.mulf %30, %32 : vector<128x256xf32>
    %34 = arith.addf %29, %33 : vector<128x256xf32>
    %c0_13 = arith.constant 0 : index
    %c0_14 = arith.constant 0 : index
    %35 = vector.load %arg5[%c0_13, %c0_14] : memref<1x256xf32, #tpu.memory_space<vmem>>, vector<1x256xf32>
    %36 = vector.broadcast %35 : vector<1x256xf32> to vector<128x256xf32>
    %37 = arith.addf %34, %36 : vector<128x256xf32>
    %cst_15 = arith.constant 0.000000e+00 : f32
    %38 = vector.broadcast %cst_15 : f32 to vector<128x256xf32>
    %39 = arith.subf %38, %37 : vector<128x256xf32>
    %40 = math.exp %39 : vector<128x256xf32>
    %cst_16 = arith.constant 1.000000e+00 : f32
    %41 = vector.broadcast %cst_16 : f32 to vector<128x256xf32>
    %42 = arith.addf %41, %40 : vector<128x256xf32>
    %43 = tpu.reciprocal %42 {approx = true} : vector<128x256xf32> -> vector<128x256xf32>
    %44 = arith.mulf %37, %43 : vector<128x256xf32>
    %c0_17 = arith.constant 0 : index
    %c0_18 = arith.constant 0 : index
    %45 = vector.load %arg20[%c0_17, %c0_18] : memref<128x256xf32, #tpu.memory_space<vmem>>, vector<128x256xf32>
    tpu.vector_store %arg20[%c0_17, %c0_18], %44 {strides = array<i32>} : memref<128x256xf32, #tpu.memory_space<vmem>>, vector<128x256xf32>,
    %46 = vector.extract_strided_slice %10 {offsets = [125, 0], sizes = [3, 256], strides = [1, 1]} : vector<128x256xf32> to vector<3x256xf32>
    %c5 = arith.constant 5 : index
    %c0_19 = arith.constant 0 : index
    %47 = vector.load %arg17[%c5, %c0_19] : memref<136x256xf32, #tpu.memory_space<vmem>>, vector<3x256xf32>
    tpu.vector_store %arg17[%c5, %c0_19], %46 {strides = array<i32>} : memref<136x256xf32, #tpu.memory_space<vmem>>, vector<3x256xf32>,
    %48 = arith.truncf %44 : vector<128x256xf32> to vector<128x256xbf16>
    %c0_20 = arith.constant 0 : index
    %c0_21 = arith.constant 0 : index
    %49 = vector.load %arg6[%c0_20, %c0_21] : memref<256x40xbf16, #tpu.memory_space<vmem>>, vector<256x40xbf16>
    %cst_22 = arith.constant dense<0.000000e+00> : vector<128x40xf32>
    %50 = tpu.matmul %48, %49, %cst_22 {dimension_numbers = #tpu.dot_dimension_numbers<[1], [0], [0], [1], [0, 0, 1, 1], [], []>} : vector<128x256xbf16>, vector<256x40xbf16>, vector<128x40xf32> -> vector<128x40xf32>
    %51 = vector.extract_strided_slice %50 {offsets = [0, 0], sizes = [128, 32], strides = [1, 1]} : vector<128x40xf32> to vector<128x32xf32>
    %c0_23 = arith.constant 0 : index
    %c0_24 = arith.constant 0 : index
    %52 = vector.load %arg22[%c0_23, %c0_24] : memref<128x32xf32, #tpu.memory_space<vmem>>, vector<128x32xf32>
    tpu.vector_store %arg22[%c0_23, %c0_24], %51 {strides = array<i32>} : memref<128x32xf32, #tpu.memory_space<vmem>>, vector<128x32xf32>,
    %53 = vector.extract_strided_slice %50 {offsets = [0, 32], sizes = [128, 8], strides = [1, 1]} : vector<128x40xf32> to vector<128x8xf32>
    %c0_25 = arith.constant 0 : index
    %c0_26 = arith.constant 0 : index
    %54 = vector.load %arg7[%c0_25, %c0_26] : memref<8x256xf32, #tpu.memory_space<vmem>>, vector<8x256xf32>
    %cst_27 = arith.constant dense<0.000000e+00> : vector<128x256xf32>
    %55 = tpu.matmul %53, %54, %cst_27 {dimension_numbers = #tpu.dot_dimension_numbers<[1], [0], [0], [1], [0, 0, 1, 1], [], []>} : vector<128x8xf32>, vector<8x256xf32>, vector<128x256xf32> -> vector<128x256xf32>
    %c0_28 = arith.constant 0 : index
    %c0_29 = arith.constant 0 : index
    %56 = vector.load %arg8[%c0_28, %c0_29] : memref<1x256xf32, #tpu.memory_space<vmem>>, vector<1x256xf32>
    %57 = vector.broadcast %56 : vector<1x256xf32> to vector<128x256xf32>
    %58 = arith.addf %55, %57 : vector<128x256xf32>
    %cst_30 = arith.constant 2.000000e+01 : f32
    %59 = vector.broadcast %cst_30 : f32 to vector<128x256xf32>
    %60 = arith.cmpf ogt, %58, %59 : vector<128x256xf32>
    %cst_31 = arith.constant 2.000000e+01 : f32
    %61 = vector.broadcast %cst_31 : f32 to vector<128x256xf32>
    %62 = arith.minimumf %58, %61 : vector<128x256xf32>
    %63 = math.exp %62 : vector<128x256xf32>
    %64 = math.log1p %63 : vector<128x256xf32>
    %65 = arith.select %60, %58, %64 : vector<128x256xi1>, vector<128x256xf32>
    %c0_32 = arith.constant 0 : index
    %c0_33 = arith.constant 0 : index
    %66 = vector.load %arg19[%c0_32, %c0_33] : memref<128x256xf32, #tpu.memory_space<vmem>>, vector<128x256xf32>
    tpu.vector_store %arg19[%c0_32, %c0_33], %65 {strides = array<i32>} : memref<128x256xf32, #tpu.memory_space<vmem>>, vector<128x256xf32>,
    %c0_34 = arith.constant 0 : index
    %c0_35 = arith.constant 0 : index
    %67 = vector.load %arg9[%c0_34, %c0_35] : memref<16x256xf32, #tpu.memory_space<vmem>>, vector<16x256xf32>
    %68 = math.exp %67 : vector<16x256xf32>
    %cst_36 = arith.constant 0.000000e+00 : f32
    %69 = vector.broadcast %cst_36 : f32 to vector<16x256xf32>
    %70 = arith.subf %69, %68 : vector<16x256xf32>
    %71 = vector.extract_strided_slice %70 {offsets = [0, 0], sizes = [16, 128], strides = [1, 1]} : vector<16x256xf32> to vector<16x128xf32>
    %c0_37 = arith.constant 0 : index
    %c0_38 = arith.constant 0 : index
    %72 = vector.load %arg23[%c0_37, %c0_38] : memref<16x256xf32, #tpu.memory_space<vmem>>, vector<16x128xf32>
    %c0_i32_39 = arith.constant 0 : i32
    %c16_i32 = arith.constant 16 : i32
    %73 = arith.addi %c0_i32_39, %c16_i32 : i32
    %c1_i32 = arith.constant 1 : i32
    %74 = scf.for %arg24 = %c0_i32_39 to %73 step %c1_i32 iter_args(%arg25 = %72) -> (vector<16x128xf32>)  : i32 {
      %c8_i32 = arith.constant 8 : i32
      %126 = arith.muli %arg24, %c8_i32 : i32
      %127 = tpu.assume_multiple %126, 8 : i32
      %128 = arith.index_cast %127 : i32 to index
      %c0_75 = arith.constant 0 : index
      %129 = vector.load %arg19[%128, %c0_75] : memref<128x256xf32, #tpu.memory_space<vmem>>, vector<8x128xf32>
      %130 = arith.index_cast %127 : i32 to index
      %c0_76 = arith.constant 0 : index
      %131 = vector.load %arg20[%130, %c0_76] : memref<128x256xf32, #tpu.memory_space<vmem>>, vector<8x128xf32>
      %132 = arith.index_cast %127 : i32 to index
      %c0_77 = arith.constant 0 : index
      %133 = vector.load %arg22[%132, %c0_77] : memref<128x32xf32, #tpu.memory_space<vmem>>, vector<8x32xf32>
      %134 = tpu.transpose %133, [1, 0] : vector<8x32xf32> -> vector<32x8xf32>
      %135 = vector.shape_cast %129 : vector<8x128xf32> to vector<8x1x128xf32>
      %136 = vector.shape_cast %71 : vector<16x128xf32> to vector<1x16x128xf32>
      %137 = vector.broadcast %135 : vector<8x1x128xf32> to vector<8x16x128xf32>
      %138 = vector.broadcast %136 : vector<1x16x128xf32> to vector<8x16x128xf32>
      %139 = arith.mulf %137, %138 : vector<8x16x128xf32>
      %140 = math.exp %139 : vector<8x16x128xf32>
      %141 = arith.mulf %129, %131 : vector<8x128xf32>
      %142 = vector.extract_strided_slice %141 {offsets = [0, 0], sizes = [1, 128], strides = [1, 1]} : vector<8x128xf32> to vector<1x128xf32>
      %143 = vector.extract_strided_slice %134 {offsets = [0, 0], sizes = [16, 1], strides = [1, 1]} : vector<32x8xf32> to vector<16x1xf32>
      %144 = vector.broadcast %142 : vector<1x128xf32> to vector<16x128xf32>
      %145 = vector.broadcast %143 : vector<16x1xf32> to vector<16x128xf32>
      %146 = arith.mulf %144, %145 : vector<16x128xf32>
      %147 = vector.extract_strided_slice %141 {offsets = [1, 0], sizes = [1, 128], strides = [1, 1]} : vector<8x128xf32> to vector<1x128xf32>
      %148 = vector.extract_strided_slice %134 {offsets = [0, 1], sizes = [16, 1], strides = [1, 1]} : vector<32x8xf32> to vector<16x1xf32>
      %149 = vector.broadcast %147 : vector<1x128xf32> to vector<16x128xf32>
      %150 = vector.broadcast %148 : vector<16x1xf32> to vector<16x128xf32>
      %151 = arith.mulf %149, %150 : vector<16x128xf32>
      %152 = vector.extract_strided_slice %141 {offsets = [2, 0], sizes = [1, 128], strides = [1, 1]} : vector<8x128xf32> to vector<1x128xf32>
      %153 = vector.extract_strided_slice %134 {offsets = [0, 2], sizes = [16, 1], strides = [1, 1]} : vector<32x8xf32> to vector<16x1xf32>
      %154 = vector.broadcast %152 : vector<1x128xf32> to vector<16x128xf32>
      %155 = vector.broadcast %153 : vector<16x1xf32> to vector<16x128xf32>
      %156 = arith.mulf %154, %155 : vector<16x128xf32>
      %157 = vector.extract_strided_slice %141 {offsets = [3, 0], sizes = [1, 128], strides = [1, 1]} : vector<8x128xf32> to vector<1x128xf32>
      %158 = vector.extract_strided_slice %134 {offsets = [0, 3], sizes = [16, 1], strides = [1, 1]} : vector<32x8xf32> to vector<16x1xf32>
      %159 = vector.broadcast %157 : vector<1x128xf32> to vector<16x128xf32>
      %160 = vector.broadcast %158 : vector<16x1xf32> to vector<16x128xf32>
      %161 = arith.mulf %159, %160 : vector<16x128xf32>
      %162 = vector.extract_strided_slice %141 {offsets = [4, 0], sizes = [1, 128], strides = [1, 1]} : vector<8x128xf32> to vector<1x128xf32>
      %163 = vector.extract_strided_slice %134 {offsets = [0, 4], sizes = [16, 1], strides = [1, 1]} : vector<32x8xf32> to vector<16x1xf32>
      %164 = vector.broadcast %162 : vector<1x128xf32> to vector<16x128xf32>
      %165 = vector.broadcast %163 : vector<16x1xf32> to vector<16x128xf32>
      %166 = arith.mulf %164, %165 : vector<16x128xf32>
      %167 = vector.extract_strided_slice %141 {offsets = [5, 0], sizes = [1, 128], strides = [1, 1]} : vector<8x128xf32> to vector<1x128xf32>
      %168 = vector.extract_strided_slice %134 {offsets = [0, 5], sizes = [16, 1], strides = [1, 1]} : vector<32x8xf32> to vector<16x1xf32>
      %169 = vector.broadcast %167 : vector<1x128xf32> to vector<16x128xf32>
      %170 = vector.broadcast %168 : vector<16x1xf32> to vector<16x128xf32>
      %171 = arith.mulf %169, %170 : vector<16x128xf32>
      %172 = vector.extract_strided_slice %141 {offsets = [6, 0], sizes = [1, 128], strides = [1, 1]} : vector<8x128xf32> to vector<1x128xf32>
      %173 = vector.extract_strided_slice %134 {offsets = [0, 6], sizes = [16, 1], strides = [1, 1]} : vector<32x8xf32> to vector<16x1xf32>
      %174 = vector.broadcast %172 : vector<1x128xf32> to vector<16x128xf32>
      %175 = vector.broadcast %173 : vector<16x1xf32> to vector<16x128xf32>
      %176 = arith.mulf %174, %175 : vector<16x128xf32>
      %177 = vector.extract_strided_slice %141 {offsets = [7, 0], sizes = [1, 128], strides = [1, 1]} : vector<8x128xf32> to vector<1x128xf32>
      %178 = vector.extract_strided_slice %134 {offsets = [0, 7], sizes = [16, 1], strides = [1, 1]} : vector<32x8xf32> to vector<16x1xf32>
      %179 = vector.broadcast %177 : vector<1x128xf32> to vector<16x128xf32>
      %180 = vector.broadcast %178 : vector<16x1xf32> to vector<16x128xf32>
      %181 = arith.mulf %179, %180 : vector<16x128xf32>
      %182 = vector.extract_strided_slice %140 {offsets = [0, 0, 0], sizes = [1, 16, 128], strides = [1, 1, 1]} : vector<8x16x128xf32> to vector<1x16x128xf32>
      %183 = vector.shape_cast %182 : vector<1x16x128xf32> to vector<16x128xf32>
      %184 = arith.mulf %183, %arg25 : vector<16x128xf32>
      %185 = arith.addf %184, %146 : vector<16x128xf32>
      %186 = vector.extract_strided_slice %134 {offsets = [16, 0], sizes = [16, 1], strides = [1, 1]} : vector<32x8xf32> to vector<16x1xf32>
      %187 = vector.broadcast %186 : vector<16x1xf32> to vector<16x128xf32>
      %188 = arith.mulf %185, %187 : vector<16x128xf32>
      %cst_78 = arith.constant dense<0.000000e+00> : vector<128xf32>
      %189 = vector.multi_reduction <add>, %188, %cst_78 [0] : vector<16x128xf32> to vector<128xf32>
      %190 = vector.shape_cast %189 : vector<128xf32> to vector<1x128xf32>
      %191 = vector.extract_strided_slice %140 {offsets = [1, 0, 0], sizes = [1, 16, 128], strides = [1, 1, 1]} : vector<8x16x128xf32> to vector<1x16x128xf32>
      %192 = vector.shape_cast %191 : vector<1x16x128xf32> to vector<16x128xf32>
      %193 = arith.mulf %192, %185 : vector<16x128xf32>
      %194 = arith.addf %193, %151 : vector<16x128xf32>
      %195 = vector.extract_strided_slice %134 {offsets = [16, 1], sizes = [16, 1], strides = [1, 1]} : vector<32x8xf32> to vector<16x1xf32>
      %196 = vector.broadcast %195 : vector<16x1xf32> to vector<16x128xf32>
      %197 = arith.mulf %194, %196 : vector<16x128xf32>
      %cst_79 = arith.constant dense<0.000000e+00> : vector<128xf32>
      %198 = vector.multi_reduction <add>, %197, %cst_79 [0] : vector<16x128xf32> to vector<128xf32>
      %199 = vector.shape_cast %198 : vector<128xf32> to vector<1x128xf32>
      %200 = vector.extract_strided_slice %140 {offsets = [2, 0, 0], sizes = [1, 16, 128], strides = [1, 1, 1]} : vector<8x16x128xf32> to vector<1x16x128xf32>
      %201 = vector.shape_cast %200 : vector<1x16x128xf32> to vector<16x128xf32>
      %202 = arith.mulf %201, %194 : vector<16x128xf32>
      %203 = arith.addf %202, %156 : vector<16x128xf32>
      %204 = vector.extract_strided_slice %134 {offsets = [16, 2], sizes = [16, 1], strides = [1, 1]} : vector<32x8xf32> to vector<16x1xf32>
      %205 = vector.broadcast %204 : vector<16x1xf32> to vector<16x128xf32>
      %206 = arith.mulf %203, %205 : vector<16x128xf32>
      %cst_80 = arith.constant dense<0.000000e+00> : vector<128xf32>
      %207 = vector.multi_reduction <add>, %206, %cst_80 [0] : vector<16x128xf32> to vector<128xf32>
      %208 = vector.shape_cast %207 : vector<128xf32> to vector<1x128xf32>
      %209 = vector.extract_strided_slice %140 {offsets = [3, 0, 0], sizes = [1, 16, 128], strides = [1, 1, 1]} : vector<8x16x128xf32> to vector<1x16x128xf32>
      %210 = vector.shape_cast %209 : vector<1x16x128xf32> to vector<16x128xf32>
      %211 = arith.mulf %210, %203 : vector<16x128xf32>
      %212 = arith.addf %211, %161 : vector<16x128xf32>
      %213 = vector.extract_strided_slice %134 {offsets = [16, 3], sizes = [16, 1], strides = [1, 1]} : vector<32x8xf32> to vector<16x1xf32>
      %214 = vector.broadcast %213 : vector<16x1xf32> to vector<16x128xf32>
      %215 = arith.mulf %212, %214 : vector<16x128xf32>
      %cst_81 = arith.constant dense<0.000000e+00> : vector<128xf32>
      %216 = vector.multi_reduction <add>, %215, %cst_81 [0] : vector<16x128xf32> to vector<128xf32>
      %217 = vector.shape_cast %216 : vector<128xf32> to vector<1x128xf32>
      %218 = vector.extract_strided_slice %140 {offsets = [4, 0, 0], sizes = [1, 16, 128], strides = [1, 1, 1]} : vector<8x16x128xf32> to vector<1x16x128xf32>
      %219 = vector.shape_cast %218 : vector<1x16x128xf32> to vector<16x128xf32>
      %220 = arith.mulf %219, %212 : vector<16x128xf32>
      %221 = arith.addf %220, %166 : vector<16x128xf32>
      %222 = vector.extract_strided_slice %134 {offsets = [16, 4], sizes = [16, 1], strides = [1, 1]} : vector<32x8xf32> to vector<16x1xf32>
      %223 = vector.broadcast %222 : vector<16x1xf32> to vector<16x128xf32>
      %224 = arith.mulf %221, %223 : vector<16x128xf32>
      %cst_82 = arith.constant dense<0.000000e+00> : vector<128xf32>
      %225 = vector.multi_reduction <add>, %224, %cst_82 [0] : vector<16x128xf32> to vector<128xf32>
      %226 = vector.shape_cast %225 : vector<128xf32> to vector<1x128xf32>
      %227 = vector.extract_strided_slice %140 {offsets = [5, 0, 0], sizes = [1, 16, 128], strides = [1, 1, 1]} : vector<8x16x128xf32> to vector<1x16x128xf32>
      %228 = vector.shape_cast %227 : vector<1x16x128xf32> to vector<16x128xf32>
      %229 = arith.mulf %228, %221 : vector<16x128xf32>
      %230 = arith.addf %229, %171 : vector<16x128xf32>
      %231 = vector.extract_strided_slice %134 {offsets = [16, 5], sizes = [16, 1], strides = [1, 1]} : vector<32x8xf32> to vector<16x1xf32>
      %232 = vector.broadcast %231 : vector<16x1xf32> to vector<16x128xf32>
      %233 = arith.mulf %230, %232 : vector<16x128xf32>
      %cst_83 = arith.constant dense<0.000000e+00> : vector<128xf32>
      %234 = vector.multi_reduction <add>, %233, %cst_83 [0] : vector<16x128xf32> to vector<128xf32>
      %235 = vector.shape_cast %234 : vector<128xf32> to vector<1x128xf32>
      %236 = vector.extract_strided_slice %140 {offsets = [6, 0, 0], sizes = [1, 16, 128], strides = [1, 1, 1]} : vector<8x16x128xf32> to vector<1x16x128xf32>
      %237 = vector.shape_cast %236 : vector<1x16x128xf32> to vector<16x128xf32>
      %238 = arith.mulf %237, %230 : vector<16x128xf32>
      %239 = arith.addf %238, %176 : vector<16x128xf32>
      %240 = vector.extract_strided_slice %134 {offsets = [16, 6], sizes = [16, 1], strides = [1, 1]} : vector<32x8xf32> to vector<16x1xf32>
      %241 = vector.broadcast %240 : vector<16x1xf32> to vector<16x128xf32>
      %242 = arith.mulf %239, %241 : vector<16x128xf32>
      %cst_84 = arith.constant dense<0.000000e+00> : vector<128xf32>
      %243 = vector.multi_reduction <add>, %242, %cst_84 [0] : vector<16x128xf32> to vector<128xf32>
      %244 = vector.shape_cast %243 : vector<128xf32> to vector<1x128xf32>
      %245 = vector.extract_strided_slice %140 {offsets = [7, 0, 0], sizes = [1, 16, 128], strides = [1, 1, 1]} : vector<8x16x128xf32> to vector<1x16x128xf32>
      %246 = vector.shape_cast %245 : vector<1x16x128xf32> to vector<16x128xf32>
      %247 = arith.mulf %246, %239 : vector<16x128xf32>
      %248 = arith.addf %247, %181 : vector<16x128xf32>
      %249 = vector.extract_strided_slice %134 {offsets = [16, 7], sizes = [16, 1], strides = [1, 1]} : vector<32x8xf32> to vector<16x1xf32>
      %250 = vector.broadcast %249 : vector<16x1xf32> to vector<16x128xf32>
      %251 = arith.mulf %248, %250 : vector<16x128xf32>
      %cst_85 = arith.constant dense<0.000000e+00> : vector<128xf32>
      %252 = vector.multi_reduction <add>, %251, %cst_85 [0] : vector<16x128xf32> to vector<128xf32>
      %253 = vector.shape_cast %252 : vector<128xf32> to vector<1x128xf32>
      %254 = tpu.concatenate %190, %199, %208, %217, %226, %235, %244, %253 in 0 : vector<1x128xf32>, vector<1x128xf32>, vector<1x128xf32>, vector<1x128xf32>, vector<1x128xf32>, vector<1x128xf32>, vector<1x128xf32>, vector<1x128xf32> -> vector<8x128xf32>
      %255 = arith.index_cast %127 : i32 to index
      %c0_86 = arith.constant 0 : index
      %256 = vector.load %arg21[%255, %c0_86] : memref<128x256xf32, #tpu.memory_space<vmem>>, vector<8x128xf32>
      tpu.vector_store %arg21[%255, %c0_86], %254 {strides = array<i32>} : memref<128x256xf32, #tpu.memory_space<vmem>>, vector<8x128xf32>,
      scf.yield %248 : vector<16x128xf32>
    }
    %c16_i32_40 = arith.constant 16 : i32
    %c0_41 = arith.constant 0 : index
    %c0_42 = arith.constant 0 : index
    %75 = vector.load %arg23[%c0_41, %c0_42] : memref<16x256xf32, #tpu.memory_space<vmem>>, vector<16x128xf32>
    tpu.vector_store %arg23[%c0_41, %c0_42], %74 {strides = array<i32>} : memref<16x256xf32, #tpu.memory_space<vmem>>, vector<16x128xf32>,
    %76 = vector.extract_strided_slice %70 {offsets = [0, 128], sizes = [16, 128], strides = [1, 1]} : vector<16x256xf32> to vector<16x128xf32>
    %c0_43 = arith.constant 0 : index
    %c128 = arith.constant 128 : index
    %77 = vector.load %arg23[%c0_43, %c128] : memref<16x256xf32, #tpu.memory_space<vmem>>, vector<16x128xf32>
    %c0_i32_44 = arith.constant 0 : i32
    %c16_i32_45 = arith.constant 16 : i32
    %78 = arith.addi %c0_i32_44, %c16_i32_45 : i32
    %c1_i32_46 = arith.constant 1 : i32
    %79 = scf.for %arg24 = %c0_i32_44 to %78 step %c1_i32_46 iter_args(%arg25 = %77) -> (vector<16x128xf32>)  : i32 {
      %c8_i32 = arith.constant 8 : i32
      %126 = arith.muli %arg24, %c8_i32 : i32
      %127 = tpu.assume_multiple %126, 8 : i32
      %128 = arith.index_cast %127 : i32 to index
      %c128_75 = arith.constant 128 : index
      %129 = vector.load %arg19[%128, %c128_75] : memref<128x256xf32, #tpu.memory_space<vmem>>, vector<8x128xf32>
      %130 = arith.index_cast %127 : i32 to index
      %c128_76 = arith.constant 128 : index
      %131 = vector.load %arg20[%130, %c128_76] : memref<128x256xf32, #tpu.memory_space<vmem>>, vector<8x128xf32>
      %132 = arith.index_cast %127 : i32 to index
      %c0_77 = arith.constant 0 : index
      %133 = vector.load %arg22[%132, %c0_77] : memref<128x32xf32, #tpu.memory_space<vmem>>, vector<8x32xf32>
      %134 = tpu.transpose %133, [1, 0] : vector<8x32xf32> -> vector<32x8xf32>
      %135 = vector.shape_cast %129 : vector<8x128xf32> to vector<8x1x128xf32>
      %136 = vector.shape_cast %76 : vector<16x128xf32> to vector<1x16x128xf32>
      %137 = vector.broadcast %135 : vector<8x1x128xf32> to vector<8x16x128xf32>
      %138 = vector.broadcast %136 : vector<1x16x128xf32> to vector<8x16x128xf32>
      %139 = arith.mulf %137, %138 : vector<8x16x128xf32>
      %140 = math.exp %139 : vector<8x16x128xf32>
      %141 = arith.mulf %129, %131 : vector<8x128xf32>
      %142 = vector.extract_strided_slice %141 {offsets = [0, 0], sizes = [1, 128], strides = [1, 1]} : vector<8x128xf32> to vector<1x128xf32>
      %143 = vector.extract_strided_slice %134 {offsets = [0, 0], sizes = [16, 1], strides = [1, 1]} : vector<32x8xf32> to vector<16x1xf32>
      %144 = vector.broadcast %142 : vector<1x128xf32> to vector<16x128xf32>
      %145 = vector.broadcast %143 : vector<16x1xf32> to vector<16x128xf32>
      %146 = arith.mulf %144, %145 : vector<16x128xf32>
      %147 = vector.extract_strided_slice %141 {offsets = [1, 0], sizes = [1, 128], strides = [1, 1]} : vector<8x128xf32> to vector<1x128xf32>
      %148 = vector.extract_strided_slice %134 {offsets = [0, 1], sizes = [16, 1], strides = [1, 1]} : vector<32x8xf32> to vector<16x1xf32>
      %149 = vector.broadcast %147 : vector<1x128xf32> to vector<16x128xf32>
      %150 = vector.broadcast %148 : vector<16x1xf32> to vector<16x128xf32>
      %151 = arith.mulf %149, %150 : vector<16x128xf32>
      %152 = vector.extract_strided_slice %141 {offsets = [2, 0], sizes = [1, 128], strides = [1, 1]} : vector<8x128xf32> to vector<1x128xf32>
      %153 = vector.extract_strided_slice %134 {offsets = [0, 2], sizes = [16, 1], strides = [1, 1]} : vector<32x8xf32> to vector<16x1xf32>
      %154 = vector.broadcast %152 : vector<1x128xf32> to vector<16x128xf32>
      %155 = vector.broadcast %153 : vector<16x1xf32> to vector<16x128xf32>
      %156 = arith.mulf %154, %155 : vector<16x128xf32>
      %157 = vector.extract_strided_slice %141 {offsets = [3, 0], sizes = [1, 128], strides = [1, 1]} : vector<8x128xf32> to vector<1x128xf32>
      %158 = vector.extract_strided_slice %134 {offsets = [0, 3], sizes = [16, 1], strides = [1, 1]} : vector<32x8xf32> to vector<16x1xf32>
      %159 = vector.broadcast %157 : vector<1x128xf32> to vector<16x128xf32>
      %160 = vector.broadcast %158 : vector<16x1xf32> to vector<16x128xf32>
      %161 = arith.mulf %159, %160 : vector<16x128xf32>
      %162 = vector.extract_strided_slice %141 {offsets = [4, 0], sizes = [1, 128], strides = [1, 1]} : vector<8x128xf32> to vector<1x128xf32>
      %163 = vector.extract_strided_slice %134 {offsets = [0, 4], sizes = [16, 1], strides = [1, 1]} : vector<32x8xf32> to vector<16x1xf32>
      %164 = vector.broadcast %162 : vector<1x128xf32> to vector<16x128xf32>
      %165 = vector.broadcast %163 : vector<16x1xf32> to vector<16x128xf32>
      %166 = arith.mulf %164, %165 : vector<16x128xf32>
      %167 = vector.extract_strided_slice %141 {offsets = [5, 0], sizes = [1, 128], strides = [1, 1]} : vector<8x128xf32> to vector<1x128xf32>
      %168 = vector.extract_strided_slice %134 {offsets = [0, 5], sizes = [16, 1], strides = [1, 1]} : vector<32x8xf32> to vector<16x1xf32>
      %169 = vector.broadcast %167 : vector<1x128xf32> to vector<16x128xf32>
      %170 = vector.broadcast %168 : vector<16x1xf32> to vector<16x128xf32>
      %171 = arith.mulf %169, %170 : vector<16x128xf32>
      %172 = vector.extract_strided_slice %141 {offsets = [6, 0], sizes = [1, 128], strides = [1, 1]} : vector<8x128xf32> to vector<1x128xf32>
      %173 = vector.extract_strided_slice %134 {offsets = [0, 6], sizes = [16, 1], strides = [1, 1]} : vector<32x8xf32> to vector<16x1xf32>
      %174 = vector.broadcast %172 : vector<1x128xf32> to vector<16x128xf32>
      %175 = vector.broadcast %173 : vector<16x1xf32> to vector<16x128xf32>
      %176 = arith.mulf %174, %175 : vector<16x128xf32>
      %177 = vector.extract_strided_slice %141 {offsets = [7, 0], sizes = [1, 128], strides = [1, 1]} : vector<8x128xf32> to vector<1x128xf32>
      %178 = vector.extract_strided_slice %134 {offsets = [0, 7], sizes = [16, 1], strides = [1, 1]} : vector<32x8xf32> to vector<16x1xf32>
      %179 = vector.broadcast %177 : vector<1x128xf32> to vector<16x128xf32>
      %180 = vector.broadcast %178 : vector<16x1xf32> to vector<16x128xf32>
      %181 = arith.mulf %179, %180 : vector<16x128xf32>
      %182 = vector.extract_strided_slice %140 {offsets = [0, 0, 0], sizes = [1, 16, 128], strides = [1, 1, 1]} : vector<8x16x128xf32> to vector<1x16x128xf32>
      %183 = vector.shape_cast %182 : vector<1x16x128xf32> to vector<16x128xf32>
      %184 = arith.mulf %183, %arg25 : vector<16x128xf32>
      %185 = arith.addf %184, %146 : vector<16x128xf32>
      %186 = vector.extract_strided_slice %134 {offsets = [16, 0], sizes = [16, 1], strides = [1, 1]} : vector<32x8xf32> to vector<16x1xf32>
      %187 = vector.broadcast %186 : vector<16x1xf32> to vector<16x128xf32>
      %188 = arith.mulf %185, %187 : vector<16x128xf32>
      %cst_78 = arith.constant dense<0.000000e+00> : vector<128xf32>
      %189 = vector.multi_reduction <add>, %188, %cst_78 [0] : vector<16x128xf32> to vector<128xf32>
      %190 = vector.shape_cast %189 : vector<128xf32> to vector<1x128xf32>
      %191 = vector.extract_strided_slice %140 {offsets = [1, 0, 0], sizes = [1, 16, 128], strides = [1, 1, 1]} : vector<8x16x128xf32> to vector<1x16x128xf32>
      %192 = vector.shape_cast %191 : vector<1x16x128xf32> to vector<16x128xf32>
      %193 = arith.mulf %192, %185 : vector<16x128xf32>
      %194 = arith.addf %193, %151 : vector<16x128xf32>
      %195 = vector.extract_strided_slice %134 {offsets = [16, 1], sizes = [16, 1], strides = [1, 1]} : vector<32x8xf32> to vector<16x1xf32>
      %196 = vector.broadcast %195 : vector<16x1xf32> to vector<16x128xf32>
      %197 = arith.mulf %194, %196 : vector<16x128xf32>
      %cst_79 = arith.constant dense<0.000000e+00> : vector<128xf32>
      %198 = vector.multi_reduction <add>, %197, %cst_79 [0] : vector<16x128xf32> to vector<128xf32>
      %199 = vector.shape_cast %198 : vector<128xf32> to vector<1x128xf32>
      %200 = vector.extract_strided_slice %140 {offsets = [2, 0, 0], sizes = [1, 16, 128], strides = [1, 1, 1]} : vector<8x16x128xf32> to vector<1x16x128xf32>
      %201 = vector.shape_cast %200 : vector<1x16x128xf32> to vector<16x128xf32>
      %202 = arith.mulf %201, %194 : vector<16x128xf32>
      %203 = arith.addf %202, %156 : vector<16x128xf32>
      %204 = vector.extract_strided_slice %134 {offsets = [16, 2], sizes = [16, 1], strides = [1, 1]} : vector<32x8xf32> to vector<16x1xf32>
      %205 = vector.broadcast %204 : vector<16x1xf32> to vector<16x128xf32>
      %206 = arith.mulf %203, %205 : vector<16x128xf32>
      %cst_80 = arith.constant dense<0.000000e+00> : vector<128xf32>
      %207 = vector.multi_reduction <add>, %206, %cst_80 [0] : vector<16x128xf32> to vector<128xf32>
      %208 = vector.shape_cast %207 : vector<128xf32> to vector<1x128xf32>
      %209 = vector.extract_strided_slice %140 {offsets = [3, 0, 0], sizes = [1, 16, 128], strides = [1, 1, 1]} : vector<8x16x128xf32> to vector<1x16x128xf32>
      %210 = vector.shape_cast %209 : vector<1x16x128xf32> to vector<16x128xf32>
      %211 = arith.mulf %210, %203 : vector<16x128xf32>
      %212 = arith.addf %211, %161 : vector<16x128xf32>
      %213 = vector.extract_strided_slice %134 {offsets = [16, 3], sizes = [16, 1], strides = [1, 1]} : vector<32x8xf32> to vector<16x1xf32>
      %214 = vector.broadcast %213 : vector<16x1xf32> to vector<16x128xf32>
      %215 = arith.mulf %212, %214 : vector<16x128xf32>
      %cst_81 = arith.constant dense<0.000000e+00> : vector<128xf32>
      %216 = vector.multi_reduction <add>, %215, %cst_81 [0] : vector<16x128xf32> to vector<128xf32>
      %217 = vector.shape_cast %216 : vector<128xf32> to vector<1x128xf32>
      %218 = vector.extract_strided_slice %140 {offsets = [4, 0, 0], sizes = [1, 16, 128], strides = [1, 1, 1]} : vector<8x16x128xf32> to vector<1x16x128xf32>
      %219 = vector.shape_cast %218 : vector<1x16x128xf32> to vector<16x128xf32>
      %220 = arith.mulf %219, %212 : vector<16x128xf32>
      %221 = arith.addf %220, %166 : vector<16x128xf32>
      %222 = vector.extract_strided_slice %134 {offsets = [16, 4], sizes = [16, 1], strides = [1, 1]} : vector<32x8xf32> to vector<16x1xf32>
      %223 = vector.broadcast %222 : vector<16x1xf32> to vector<16x128xf32>
      %224 = arith.mulf %221, %223 : vector<16x128xf32>
      %cst_82 = arith.constant dense<0.000000e+00> : vector<128xf32>
      %225 = vector.multi_reduction <add>, %224, %cst_82 [0] : vector<16x128xf32> to vector<128xf32>
      %226 = vector.shape_cast %225 : vector<128xf32> to vector<1x128xf32>
      %227 = vector.extract_strided_slice %140 {offsets = [5, 0, 0], sizes = [1, 16, 128], strides = [1, 1, 1]} : vector<8x16x128xf32> to vector<1x16x128xf32>
      %228 = vector.shape_cast %227 : vector<1x16x128xf32> to vector<16x128xf32>
      %229 = arith.mulf %228, %221 : vector<16x128xf32>
      %230 = arith.addf %229, %171 : vector<16x128xf32>
      %231 = vector.extract_strided_slice %134 {offsets = [16, 5], sizes = [16, 1], strides = [1, 1]} : vector<32x8xf32> to vector<16x1xf32>
      %232 = vector.broadcast %231 : vector<16x1xf32> to vector<16x128xf32>
      %233 = arith.mulf %230, %232 : vector<16x128xf32>
      %cst_83 = arith.constant dense<0.000000e+00> : vector<128xf32>
      %234 = vector.multi_reduction <add>, %233, %cst_83 [0] : vector<16x128xf32> to vector<128xf32>
      %235 = vector.shape_cast %234 : vector<128xf32> to vector<1x128xf32>
      %236 = vector.extract_strided_slice %140 {offsets = [6, 0, 0], sizes = [1, 16, 128], strides = [1, 1, 1]} : vector<8x16x128xf32> to vector<1x16x128xf32>
      %237 = vector.shape_cast %236 : vector<1x16x128xf32> to vector<16x128xf32>
      %238 = arith.mulf %237, %230 : vector<16x128xf32>
      %239 = arith.addf %238, %176 : vector<16x128xf32>
      %240 = vector.extract_strided_slice %134 {offsets = [16, 6], sizes = [16, 1], strides = [1, 1]} : vector<32x8xf32> to vector<16x1xf32>
      %241 = vector.broadcast %240 : vector<16x1xf32> to vector<16x128xf32>
      %242 = arith.mulf %239, %241 : vector<16x128xf32>
      %cst_84 = arith.constant dense<0.000000e+00> : vector<128xf32>
      %243 = vector.multi_reduction <add>, %242, %cst_84 [0] : vector<16x128xf32> to vector<128xf32>
      %244 = vector.shape_cast %243 : vector<128xf32> to vector<1x128xf32>
      %245 = vector.extract_strided_slice %140 {offsets = [7, 0, 0], sizes = [1, 16, 128], strides = [1, 1, 1]} : vector<8x16x128xf32> to vector<1x16x128xf32>
      %246 = vector.shape_cast %245 : vector<1x16x128xf32> to vector<16x128xf32>
      %247 = arith.mulf %246, %239 : vector<16x128xf32>
      %248 = arith.addf %247, %181 : vector<16x128xf32>
      %249 = vector.extract_strided_slice %134 {offsets = [16, 7], sizes = [16, 1], strides = [1, 1]} : vector<32x8xf32> to vector<16x1xf32>
      %250 = vector.broadcast %249 : vector<16x1xf32> to vector<16x128xf32>
      %251 = arith.mulf %248, %250 : vector<16x128xf32>
      %cst_85 = arith.constant dense<0.000000e+00> : vector<128xf32>
      %252 = vector.multi_reduction <add>, %251, %cst_85 [0] : vector<16x128xf32> to vector<128xf32>
      %253 = vector.shape_cast %252 : vector<128xf32> to vector<1x128xf32>
      %254 = tpu.concatenate %190, %199, %208, %217, %226, %235, %244, %253 in 0 : vector<1x128xf32>, vector<1x128xf32>, vector<1x128xf32>, vector<1x128xf32>, vector<1x128xf32>, vector<1x128xf32>, vector<1x128xf32>, vector<1x128xf32> -> vector<8x128xf32>
      %255 = arith.index_cast %127 : i32 to index
      %c128_86 = arith.constant 128 : index
      %256 = vector.load %arg21[%255, %c128_86] : memref<128x256xf32, #tpu.memory_space<vmem>>, vector<8x128xf32>
      tpu.vector_store %arg21[%255, %c128_86], %254 {strides = array<i32>} : memref<128x256xf32, #tpu.memory_space<vmem>>, vector<8x128xf32>,
      scf.yield %248 : vector<16x128xf32>
    }
    %c16_i32_47 = arith.constant 16 : i32
    %c0_48 = arith.constant 0 : index
    %c128_49 = arith.constant 128 : index
    %80 = vector.load %arg23[%c0_48, %c128_49] : memref<16x256xf32, #tpu.memory_space<vmem>>, vector<16x128xf32>
    tpu.vector_store %arg23[%c0_48, %c128_49], %79 {strides = array<i32>} : memref<16x256xf32, #tpu.memory_space<vmem>>, vector<16x128xf32>,
    %c0_50 = arith.constant 0 : index
    %c0_51 = arith.constant 0 : index
    %81 = vector.load %arg21[%c0_50, %c0_51] : memref<128x256xf32, #tpu.memory_space<vmem>>, vector<128x256xf32>
    %c0_52 = arith.constant 0 : index
    %c0_53 = arith.constant 0 : index
    %82 = vector.load %arg20[%c0_52, %c0_53] : memref<128x256xf32, #tpu.memory_space<vmem>>, vector<128x256xf32>
    %c0_54 = arith.constant 0 : index
    %c0_55 = arith.constant 0 : index
    %83 = vector.load %arg10[%c0_54, %c0_55] : memref<1x256xf32, #tpu.memory_space<vmem>>, vector<1x256xf32>
    %84 = vector.broadcast %83 : vector<1x256xf32> to vector<128x256xf32>
    %85 = arith.mulf %82, %84 : vector<128x256xf32>
    %86 = arith.addf %81, %85 : vector<128x256xf32>
    %c0_56 = arith.constant 0 : index
    %c0_57 = arith.constant 0 : index
    %87 = vector.load %arg18[%c0_56, %c0_57] : memref<128x256xf32, #tpu.memory_space<vmem>>, vector<128x256xf32>
    %cst_58 = arith.constant 0.000000e+00 : f32
    %88 = vector.broadcast %cst_58 : f32 to vector<128x256xf32>
    %89 = arith.subf %88, %87 : vector<128x256xf32>
    %90 = math.exp %89 : vector<128x256xf32>
    %cst_59 = arith.constant 1.000000e+00 : f32
    %91 = vector.broadcast %cst_59 : f32 to vector<128x256xf32>
    %92 = arith.addf %91, %90 : vector<128x256xf32>
    %93 = tpu.reciprocal %92 {approx = true} : vector<128x256xf32> -> vector<128x256xf32>
    %94 = arith.mulf %87, %93 : vector<128x256xf32>
    %95 = arith.mulf %86, %94 : vector<128x256xf32>
    %96 = arith.truncf %95 : vector<128x256xf32> to vector<128x256xbf16>
    %c0_60 = arith.constant 0 : index
    %c0_61 = arith.constant 0 : index
    %97 = vector.load %arg16[%c0_60, %c0_61] : memref<256x128xbf16, #tpu.memory_space<vmem>>, vector<256x128xbf16>
    %cst_62 = arith.constant dense<0.000000e+00> : vector<128x128xf32>
    %98 = tpu.matmul %96, %97, %cst_62 {dimension_numbers = #tpu.dot_dimension_numbers<[1], [0], [0], [1], [0, 0, 1, 1], [], []>} : vector<128x256xbf16>, vector<256x128xbf16>, vector<128x128xf32> -> vector<128x128xf32>
    %99 = arith.addf %4, %98 : vector<128x128xf32>
    %cst_63 = arith.constant dense<0.000000e+00> : vector<128xf32>
    %100 = vector.multi_reduction <add>, %99, %cst_63 [1] : vector<128x128xf32> to vector<128xf32>
    %101 = vector.shape_cast %100 : vector<128xf32> to vector<128x1xf32>
    %cst_64 = arith.constant 1.280000e+02 : f32
    %102 = vector.broadcast %cst_64 : f32 to vector<128x1xf32>
    %103 = arith.divf %101, %102 : vector<128x1xf32>
    %104 = vector.broadcast %103 : vector<128x1xf32> to vector<128x128xf32>
    %105 = arith.subf %99, %104 : vector<128x128xf32>
    %106 = arith.mulf %105, %105 : vector<128x128xf32>
    %cst_65 = arith.constant dense<0.000000e+00> : vector<128xf32>
    %107 = vector.multi_reduction <add>, %106, %cst_65 [1] : vector<128x128xf32> to vector<128xf32>
    %108 = vector.shape_cast %107 : vector<128xf32> to vector<128x1xf32>
    %cst_66 = arith.constant 1.280000e+02 : f32
    %109 = vector.broadcast %cst_66 : f32 to vector<128x1xf32>
    %110 = arith.divf %108, %109 : vector<128x1xf32>
    %cst_67 = arith.constant 9.99999974E-6 : f32
    %111 = vector.broadcast %cst_67 : f32 to vector<128x1xf32>
    %112 = arith.addf %110, %111 : vector<128x1xf32>
    %113 = math.rsqrt %112 : vector<128x1xf32>
    %114 = vector.broadcast %113 : vector<128x1xf32> to vector<128x128xf32>
    %115 = arith.mulf %105, %114 : vector<128x128xf32>
    %c0_68 = arith.constant 0 : index
    %c0_69 = arith.constant 0 : index
    %116 = vector.load %arg12[%c0_68, %c0_69] : memref<1x128xf32, #tpu.memory_space<vmem>>, vector<1x128xf32>
    %117 = vector.broadcast %116 : vector<1x128xf32> to vector<128x128xf32>
    %118 = arith.mulf %115, %117 : vector<128x128xf32>
    %c0_70 = arith.constant 0 : index
    %c0_71 = arith.constant 0 : index
    %119 = vector.load %arg13[%c0_70, %c0_71] : memref<1x128xf32, #tpu.memory_space<vmem>>, vector<1x128xf32>
    %120 = vector.broadcast %119 : vector<1x128xf32> to vector<128x128xf32>
    %121 = arith.addf %118, %120 : vector<128x128xf32>
    %122 = tpu.transpose %121, [1, 0] : vector<128x128xf32> -> vector<128x128xf32>
    %c0_72 = arith.constant 0 : index
    %c0_73 = arith.constant 0 : index
    %c0_74 = arith.constant 0 : index
    %123 = vector.load %arg14[%c0_72, %c0_73, %c0_74] : memref<1x128x128xf32, #tpu.memory_space<vmem>>, vector<1x128x128xf32>
    %124 = vector.shape_cast %123 : vector<1x128x128xf32> to vector<128x128xf32>
    %125 = vector.shape_cast %122 : vector<128x128xf32> to vector<1x128x128xf32>
    tpu.vector_store %arg14[%c0_72, %c0_73, %c0_74], %125 {strides = array<i32>} : memref<1x128x128xf32, #tpu.memory_space<vmem>>, vector<1x128x128xf32>,
    return
  }
  func.func @transform_0(%arg0: i32, %arg1: i32) -> (i32, i32, i32) {
    %c0_i32 = arith.constant 0 : i32
    %c0_i32_0 = arith.constant 0 : i32
    return %arg0, %arg1, %c0_i32 : i32, i32, i32
  }
  func.func @transform_2(%arg0: i32, %arg1: i32) -> (i32, i32) {
    %c0_i32 = arith.constant 0 : i32
    %c0_i32_0 = arith.constant 0 : i32
    %c0_i32_1 = arith.constant 0 : i32
    return %c0_i32, %c0_i32_0 : i32, i32
  }
  func.func @transform_3(%arg0: i32, %arg1: i32) -> (i32, i32) {
    %c0_i32 = arith.constant 0 : i32
    %c0_i32_0 = arith.constant 0 : i32
    %c0_i32_1 = arith.constant 0 : i32
    return %c0_i32, %c0_i32_0 : i32, i32
  }
  func.func @transform_4(%arg0: i32, %arg1: i32) -> (i32, i32) {
    %c0_i32 = arith.constant 0 : i32
    %c0_i32_0 = arith.constant 0 : i32
    %c0_i32_1 = arith.constant 0 : i32
    return %c0_i32, %c0_i32_0 : i32, i32
  }
  func.func @transform_5(%arg0: i32, %arg1: i32) -> (i32, i32) {
    %c0_i32 = arith.constant 0 : i32
    %c0_i32_0 = arith.constant 0 : i32
    %c0_i32_1 = arith.constant 0 : i32
    return %c0_i32, %c0_i32_0 : i32, i32
  }
  func.func @transform_6(%arg0: i32, %arg1: i32) -> (i32, i32) {
    %c0_i32 = arith.constant 0 : i32
    %c0_i32_0 = arith.constant 0 : i32
    %c0_i32_1 = arith.constant 0 : i32
    return %c0_i32, %c0_i32_0 : i32, i32
  }
  func.func @transform_7(%arg0: i32, %arg1: i32) -> (i32, i32) {
    %c0_i32 = arith.constant 0 : i32
    %c0_i32_0 = arith.constant 0 : i32
    %c0_i32_1 = arith.constant 0 : i32
    return %c0_i32, %c0_i32_0 : i32, i32
  }
  func.func @transform_8(%arg0: i32, %arg1: i32) -> (i32, i32) {
    %c0_i32 = arith.constant 0 : i32
    %c0_i32_0 = arith.constant 0 : i32
    %c0_i32_1 = arith.constant 0 : i32
    return %c0_i32, %c0_i32_0 : i32, i32
  }
  func.func @transform_10(%arg0: i32, %arg1: i32) -> (i32, i32) {
    %c0_i32 = arith.constant 0 : i32
    %c0_i32_0 = arith.constant 0 : i32
    %c0_i32_1 = arith.constant 0 : i32
    return %c0_i32, %c0_i32_0 : i32, i32
  }
  func.func @transform_11(%arg0: i32, %arg1: i32) -> (i32, i32) {
    %c0_i32 = arith.constant 0 : i32
    %c0_i32_0 = arith.constant 0 : i32
    %c0_i32_1 = arith.constant 0 : i32
    return %c0_i32, %c0_i32_0 : i32, i32
  }
  func.func @transform_12(%arg0: i32, %arg1: i32) -> (i32, i32, i32) {
    %c0_i32 = arith.constant 0 : i32
    %c0_i32_0 = arith.constant 0 : i32
    return %arg0, %c0_i32, %arg1 : i32, i32, i32
  }
}

</mosaic_0001>

<bundles_post_ra>
// kernel: mamba_layer_forward.1
= control target key start
LH: loop header
LB: loop body
LE: loop exit
PB: predicated region body
PF: predicated region fallthrough
CT: control target
= control target key end

     0   :  { %s9801_s0 = inlined_call_operand.hbm [shape: f32[2,256,128], index: 0, kind: input, shape index: {}]   ;;  %s9802_s1 = inlined_call_operand.hbm [shape: bf16[128,512], index: 1, kind: input, shape index: {}]   ;;  %s9803_s2 = inlined_call_operand.hbm [shape: f32[4,256], index: 2, kind: input, shape index: {}]   ;;  %s9804_s3 = inlined_call_operand.hbm [shape: f32[1,256], index: 3, kind: input, shape index: {}]   ;;  %s9805_s4 = inlined_call_operand.vmem [shape: bf16[256,40], index: 4, kind: input, shape index: {}]   ;;  %s9806_s5 = inlined_call_operand.vmem [shape: f32[8,256], index: 5, kind: input, shape index: {}]   ;;  %s9807_s6 = inlined_call_operand.hbm [shape: f32[1,256], index: 6, kind: input, shape index: {}]   ;;  %s9808_s7 = inlined_call_operand.vmem [shape: f32[16,256], index: 7, kind: input, shape index: {}]   ;;  %s9809_s8 = inlined_call_operand.hbm [shape: f32[1,256], index: 8, kind: input, shape index: {}]   ;;  %s9810_s9 = inlined_call_operand.vmem [shape: bf16[256,128], index: 9, kind: input, shape index: {}]   ;;  %s9811_s10 = inlined_call_operand.vmem [shape: f32[1,128], index: 10, kind: input, shape index: {}]   ;;  %s9812_s11 = inlined_call_operand.hbm [shape: f32[1,128], index: 11, kind: input, shape index: {}]   ;;  %s9813_s12 = inlined_call_operand.hbm [shape: f32[2,128,256], index: 12, kind: output, shape index: {}]  }
   0x1   :  { %9874 = sst [smem:[#allocation59_spill]] %s9803_s2 }
   0x2   :  { %9875 = sst [smem:[#allocation60_spill]] %s9804_s3 }
   0x3   :  { %9876 = sst [smem:[#allocation61_spill]] %s9807_s6 }
   0x4   :  { %9877 = sst [smem:[#allocation62_spill]] %s9808_s7 }
   0x5   :  { %9878 = sst [smem:[#allocation63_spill]] %s9809_s8 }
   0x6   :  { %9879 = sst [smem:[#allocation64_spill]] %s9811_s10 }
   0x7   :  { %9880 = sst [smem:[#allocation65_spill]] %s9812_s11 }
   0x8   :  { %9881 = sst [smem:[#allocation66_spill]] %s9813_s12 }
   0x9   :  { %17 = vsyncpa [#allocation12], 0 }
   0xa   :  { %19 = vsyncpa [#allocation12 + $0x1], 0 }
   0xb   :  { %20 = vsyncpa [#allocation15], 0 }
   0xc   :  { %21 = vsyncpa [#allocation18], 0 }
   0xd   :  { %22 = vsyncpa [#allocation21], 0 }
   0xe   :  { %23 = vsyncpa [#allocation13], 0 }
   0xf   :  { %25 = vsyncpa [#allocation13 + $0x1], 0  ;;  %s7029_s21 = smov 0   ;;  %s7031_s22 = smov 0  }
  0x10   :  { %s7033_s23 = smov 0   ;;  %s7035_s24 = smov 0  }
  0x11   :  { %s7037_s25 = smov 0   ;;  %s7039_s26 = smov 0  }
  0x12   :  { %s7041_s27 = smov 0   ;;  %s7043_s28 = smov 0  }
  0x13 LB: > { %9882 = sst [smem:[#allocation37_spill]] %s6880_s21  ;;  %s9814_s29 = sadd.s32 4294967295, %s6908_s28   ;;  %s6908_s28 = sphi %s7043_s28, %s31_s28   ;;  %s6904_s27 = sphi %s7041_s27, %s10015_s27   ;;  %s6900_s26 = sphi %s7039_s26, %s10014_s26   ;;  %s6896_s25 = sphi %s7037_s25, %s10013_s25   ;;  %s6892_s24 = sphi %s7035_s24, %s10012_s24   ;;  %s6888_s23 = sphi %s7033_s23, %s10011_s23   ;;  %s6884_s22 = sphi %s7031_s22, %s10010_s22   ;;  %s6880_s21 = sphi %s7029_s21, %s10009_s21  }
  0x14   : > { %9883 = sst [smem:[#allocation38_spill]] %s6896_s25  ;;  %p5387_p0 = scmp.ge.s32.totalorder %s6908_s28, 1 }
  0x15   : > { %9884 = sst [smem:[#allocation39_spill]] %s6908_s28  ;;  %p7073_p1 = scmp.eq.s32.totalorder %s9814_s29, 0 }
  0x16   : > { %p293_p2 = scmp.lt.s32.totalorder %s6908_s28, 5  ;;  %s9886_s2 = sld [smem:[#allocation59_spill]] }
  0x17   : > { %s6934_s17 = smov [#allocation14]   ;;  %s9888_s6 = sld [smem:[#allocation61_spill]] }
  0x18   : > { %p7081_p3 = pnand %p5387_p0, %p293_p2  ;;  %s307_s18 = sshll.u32 %s6934_s17, 4  ;;  %s308_s18 = int_to_ptr.vmem [resolvable:$true] %s307_s18 }
  0x19   : > { %s9890_s3 = sld [smem:[#allocation60_spill]]  ;;  %s6935_s25 = smov [#allocation17]  }
  0x1a   : > { %p5820_p4 = pneg %p7081_p3  ;;  %s337_s17 = sshll.u32 %s6935_s25, 4  ;;  %s338_s17 = int_to_ptr.vmem [resolvable:$true] %s337_s17 }
  0x1b   : > { %s9891_s8 = sld [smem:[#allocation63_spill]]  ;;  %s6936_s10 = smov [#allocation16]  }
  0x1c   : > { %s305_s15 = sshll.u32 %s9886_s2, 4  ;;  %p7092_p5 = pnand %p5820_p4, %p7073_p1  ;;  %s306_s15 = int_to_ptr.hbm [resolvable:$true] %s305_s15 }
  0x1d   : > { %s335_s29 = sshll.u32 %s9888_s6, 4  ;;  %s319_s7 = sshll.u32 %s6936_s10, 4  ;;  %s336_s29 = int_to_ptr.hbm [resolvable:$true] %s335_s29  ;;  %s320_s7 = int_to_ptr.vmem [resolvable:$true] %s319_s7 }
  0x1e   : > { %5823 = dma.hbm_to_vmem [thread:$0]  (!%p7092_p5), %s306_s15, 128, %s308_s18, [#allocation15]  }
  0x1f   : > { %s317_s2 = sshll.u32 %s9890_s3, 4  ;;  %s6937_s25 = smov [#allocation19]   ;;  %s318_s2 = int_to_ptr.hbm [resolvable:$true] %s317_s2 }
  0x20   : > { %5829 = dma.hbm_to_vmem [thread:$0]  (!%p7092_p5), %s336_s29, 32, %s338_s17, [#allocation18]  }
  0x21   : > { %s350_s6 = sshll.u32 %s9891_s8, 4  ;;  %s352_s29 = sshll.u32 %s6937_s25, 4  ;;  %s351_s6 = int_to_ptr.hbm [resolvable:$true] %s350_s6  ;;  %s353_s29 = int_to_ptr.vmem [resolvable:$true] %s352_s29 }
  0x22   : > { %5826 = dma.hbm_to_vmem [thread:$0]  (!%p7092_p5), %s318_s2, 32, %s320_s7, [#allocation15]  }
  0x23   : > { %s9892_s11 = sld [smem:[#allocation65_spill]]  ;;  %s6938_s10 = smov [#allocation20]  }
  0x24   : > { %5832 = dma.hbm_to_vmem [thread:$0]  (!%p7092_p5), %s351_s6, 32, %s353_s29, [#allocation18]  }
  0x25   : > { %s367_s14 = sshll.u32 %s6938_s10, 4  ;;  %s5386_s2 = sadd.s32 4294967294, %s6908_s28   ;;  %s368_s14 = int_to_ptr.vmem [resolvable:$true] %s367_s14 }
  0x26   : > { %s40_s7 = sadd.s32 1, %s6900_s26  ;;  %s43_s17 = sadd.s32 1, %s6904_s27 }
  0x27   : > { %p41_p6 = scmp.ge.s32.totalorder %s40_s7, 2  ;;  %s52_s19 = sadd.s32 1, %s6888_s23 }
  0x28   : > { %p59_p7 = scmp.ne.s32.totalorder %s6888_s23, %s6884_s22  ;;  %p60_p8 = scmp.eq.s32.totalorder %s6908_s28, 0 }
  0x29   : > { %s365_s13 = sshll.u32 %s9892_s11, 4  ;;  %s10017_s7 = smov (%p41_p6, %s40_s7), 0  ;;  %s366_s13 = int_to_ptr.hbm [resolvable:$true] %s365_s13 }
  0x2a   : > { %5835 = dma.hbm_to_vmem [thread:$0]  (!%p7092_p5), %s366_s13, 16, %s368_s14, [#allocation21]  }
  0x2b   : > { %9893 = sst [smem:[#allocation40_spill]] %s10017_s7  ;;  %s10019_s17 = smov (!%p41_p6, %s43_s17), %s6904_s27 }
  0x2c   : > { %s48_s6 = ssub.s32 %s6900_s26, %s10017_s7  ;;  %p7127_p9 = por %p60_p8, %p59_p7 }
  0x2d   : > { %p45_p10 = scmp.ge.s32.totalorder %s10019_s17, 2  ;;  %p65_p11 = scmp.ne.s32.totalorder %s6884_s22, %s6880_s21 }
  0x2e   : > { %s9895_s20 = sadd.s32 4294967295, %s6908_s28   ;;  %p286_p13 = scmp.eq.s32.totalorder %s5386_s2, 3 }
  0x2f   : > { %p280_p12 = scmp.eq.s32.totalorder %s9895_s20, 3  ;;  %s10021_s17 = smov (%p45_p10, %s10019_s17), 0 }
  0x30   : > { %9896 = sst [smem:[#allocation41_spill]] %s10021_s17  ;;  %p7139_p0 = por %p7073_p1, %p65_p11 }
  0x31   : > { %p7143_p2 = por %p280_p12, %p59_p7  ;;  %s47_s15 = ssub.s32 %s6904_s27, %s10021_s17 }
  0x32   : > { %p7149_p4 = por %p286_p13, %p65_p11  ;;  %s49_s13 = sor.u32 %s48_s6, %s47_s15 }
  0x33   : > { %s9898_s29 = scalar_select %p7143_p2, 1, 0 }
  0x34   : > { %s9900_s18 = scalar_select %p7149_p4, 1, 0 }
  0x35   : > { %9899 = sst [smem:[#allocation42_spill]] %s9898_s29  ;;  %p5849_p5 = scmp.lt.s32.totalorder %s6908_s28, 4 }
  0x36   : > { %9901 = sst [smem:[#allocation43_spill]] %s9900_s18  ;;  %p50_p6 = scmp.eq.s32.totalorder %s49_s13, 0 }
  0x37   : > { %s378_s10 = sand.u32 1, %s6888_s23   ;;  %s5395_s20 = sshll.u32 %s6900_s26, 4 }
  0x38   : > { %s5394_s14 = sshll.u32 %s378_s10, 7  ;;  %s5396_s3 = sshll.u32 %s6904_s27, 5 }
  0x39   : > { %s7156_s2 = scalar_select %p50_p6, %s6888_s23, %s52_s19  }
  0x3a   : > { %s382_s8 = scalar_lea.vmem [#allocation11], %s5394_s14  ;;  %s387_s7 = sadd.s32 %s5396_s3, %s5395_s20 }
  0x3b   : > { %s392_s11 = sshll.u32 %s382_s8, 4  ;;  %s5397_s21 = sshll.u32 %s387_s7, 3  ;;  %s393_s11 = int_to_ptr.vmem [resolvable:$true] %s392_s11 }
  0x3c   : > { %p5837_p7 = pnand %p5849_p5, %p7127_p9  ;;  %s389_s18 = scalar_lea.hbm %s9801_s0, %s5397_s21 }
  0x3d   : > { %s390_s6 = sshll.u32 %s389_s18, 4  ;;  %s379_s15 = scalar_lea.sflag [#allocation12], %s378_s10  ;;  %s391_s6 = int_to_ptr.hbm [resolvable:$true] %s390_s6 }
  0x3e   : > { %s6939_s13 = smov 128   ;;  %s6940_s28 = smov 8  }
  0x3f   : > { %5839 = dma.hbm_to_vmem [thread:$0]  (!%p5837_p7), %s391_s6, 2048, %s393_s11, %s379_s15, %s6939_s13, %s6939_s13, %s6940_s28  }
  0x40   : > { %404 = sbr.rel (%p7081_p3) target bundleno = 2512 (0x9d0), region = 60 }
  0x45   : > { %s7168_s3 = sand.u32 1, %s6884_s22  }
  0x46   : > { %s5399_s8 = sshll.u32 %s7168_s3, 7  ;;  %s407_s7 = scalar_lea.sflag [#allocation12], %s7168_s3 }
  0x47   : > { %s7172_s19 = scalar_lea.vmem [#allocation11], %s5399_s8 }
  0x48   : > { %6855 = dma.done.wait (%p7139_p0), %s407_s7, 2048  }
  0x49   : > { %6857 = vsyncadd (%p7139_p0), %s407_s7, 4294965248 }
  0x4a   : > { %6859 = dma.done.wait (%p7073_p1), [#allocation15], 160  }
  0x4b   : > { %6861 = vsyncadd (%p7073_p1), [#allocation15], 4294967136 }
  0x4c   : > { %6863 = dma.done.wait (%p7073_p1), [#allocation18], 64  }
  0x4d   : > { %6865 = vsyncadd (%p7073_p1), [#allocation18], 4294967232 }
  0x4e   : > { %6867 = dma.done.wait (%p7073_p1), [#allocation21], 16  }
  0x4f   : > { %6869 = vsyncadd (%p7073_p1), [#allocation21], 4294967280  ;;  %s7190_s11 = scalar_lea.vmem [#allocation22], %s5399_s8  ;;  %p5406_p3 = scmp.ne.s32.totalorder %s6892_s24, 0 }
  0x51   : > { %477 = sbr.rel (%p5406_p3) target bundleno = 117 (0x75), region = 88 }
  0x56   : > { %s485_s16 = sshll.u32 %s9802_s1, 4  ;;  %s6941_s17 = smov [#allocation2]   ;;  %s486_s16 = int_to_ptr.hbm [resolvable:$true] %s485_s16 }
  0x57   : > { %s487_s12 = sshll.u32 %s6941_s17, 4  ;;  %s488_s12 = int_to_ptr.vmem [resolvable:$true] %s487_s12 }
  0x58   : > { %490 = dma.hbm_to_vmem [thread:$0]  %s486_s16, 4096, %s488_s12, [#allocation23] }
  0x59   : > { %6870 = dma.done.wait [#allocation23], 4096 }
  0x5a   : > { %6871 = vsyncadd [#allocation23], 4294963200 }
  0x5b   : > { %v505_v0 = vld [vmem:[%s9810_s9] sm:$0xff]  ;;  %v507_v1 = vld [vmem:[%s9810_s9 + $0x8] sm:$0xff]  ;;  %v509_v2 = vld [vmem:[%s9810_s9 + $0x10] sm:$0xff] }
  0x5c   : > { %506 = vst [vmem:[#allocation3 + $0x30] sm:$0xff] %v505_v0  ;;  %v511_v3 = vld [vmem:[%s9810_s9 + $0x18] sm:$0xff]  ;;  %v513_v4 = vld [vmem:[%s9810_s9 + $0x20] sm:$0xff]  ;;  %v515_v5 = vld [vmem:[%s9810_s9 + $0x28] sm:$0xff] }
  0x5d   : > { %508 = vst [vmem:[#allocation3] sm:$0xff] %v507_v1  ;;  %v517_v6 = vld [vmem:[%s9810_s9 + $0x30] sm:$0xff]  ;;  %v519_v7 = vld [vmem:[%s9810_s9 + $0x38] sm:$0xff]  ;;  %v521_v8 = vld [vmem:[%s9810_s9 + $0x40] sm:$0xff] }
  0x5e   : > { %510 = vst [vmem:[#allocation3 + $0x58] sm:$0xff] %v509_v2  ;;  %v523_v9 = vld [vmem:[%s9810_s9 + $0x48] sm:$0xff]  ;;  %v525_v10 = vld [vmem:[%s9810_s9 + $0x50] sm:$0xff]  ;;  %v527_v11 = vld [vmem:[%s9810_s9 + $0x58] sm:$0xff] }
  0x5f   : > { %512 = vst [vmem:[#allocation3 + $0x18] sm:$0xff] %v511_v3  ;;  %v529_v12 = vld [vmem:[%s9810_s9 + $0x60] sm:$0xff]  ;;  %v531_v13 = vld [vmem:[%s9810_s9 + $0x68] sm:$0xff]  ;;  %v533_v14 = vld [vmem:[%s9810_s9 + $0x70] sm:$0xff] }
  0x60   : > { %514 = vst [vmem:[#allocation3 + $0x50] sm:$0xff] %v513_v4  ;;  %v535_v15 = vld [vmem:[%s9810_s9 + $0x78] sm:$0xff] }
  0x61   : > { %516 = vst [vmem:[#allocation3 + $0x68] sm:$0xff] %v515_v5 }
  0x62   : > { %518 = vst [vmem:[#allocation3 + $0x8] sm:$0xff] %v517_v6 }
  0x63   : > { %520 = vst [vmem:[#allocation3 + $0x48] sm:$0xff] %v519_v7 }
  0x64   : > { %522 = vst [vmem:[#allocation3 + $0x40] sm:$0xff] %v521_v8 }
  0x65   : > { %524 = vst [vmem:[#allocation3 + $0x20] sm:$0xff] %v523_v9 }
  0x66   : > { %526 = vst [vmem:[#allocation3 + $0x10] sm:$0xff] %v525_v10 }
  0x67   : > { %528 = vst [vmem:[#allocation3 + $0x38] sm:$0xff] %v527_v11 }
  0x68   : > { %530 = vst [vmem:[#allocation3 + $0x60] sm:$0xff] %v529_v12 }
  0x69   : > { %532 = vst [vmem:[#allocation3 + $0x70] sm:$0xff] %v531_v13 }
  0x6a   : > { %534 = vst [vmem:[#allocation3 + $0x78] sm:$0xff] %v533_v14 }
  0x6b   : > { %536 = vst [vmem:[#allocation3 + $0x28] sm:$0xff] %v535_v15 }
  0x6c   : > { %542 = vsyncadd [#allocation28], 2048 }
  0x6d   : > { %6872 = dma.done.wait [#allocation28], 2048 }
  0x6e   : > { %6873 = vsyncadd [#allocation28], 4294965248  ;;  %v6942_v16 = vmov 0.0  }
  0x6f   : > { %547 = vst [vmem:[#allocation10 + $0x18] sm:$0xff] %v6942_v16 }
  0x70   : > { %548 = vst [vmem:[#allocation10 + $0x10] sm:$0xff] %v6942_v16 }
  0x71   : > { %549 = vst [vmem:[#allocation10 + $0x8] sm:$0xff] %v6942_v16 }
  0x72   : > { %550 = vst [vmem:[#allocation10] sm:$0xff] %v6942_v16 }
  0x73   : > { %551 = vst [vmem:[#allocation4 + $0xa8] sm:$0xff] %v6942_v16 }
  0x74   : > { %552 = vst [vmem:[#allocation4 + $0x68] sm:$0xff] %v6942_v16 }
  0x75 PF: > { %v5521_v17 = vld [vmem:[#allocation2 + $0xe0] sm:$0xf]  ;;  %v5740_v18 = vld [vmem:[#allocation2 + $0xec] sm:$0xf0]  ;;  %v5738_v19 = vld [vmem:[#allocation2 + $0xe4] sm:$0xf] }
  0x76   : > { %v5522_v20 = vor.u32 %v5740_v18, %v5521_v17  ;;  %v5523_v21 = vld [vmem:[#allocation2 + $0xf0] sm:$0xf0]  ;;  %v5505_v22 = vld [vmem:[#allocation2 + $0xc0] sm:$0xf]  ;;  %v5736_v23 = vld [vmem:[#allocation2 + $0xcc] sm:$0xf0] }
  0x77   : > { %v5526_v24 = vor.u32 %v5738_v19, %v5523_v21  ;;  %v5734_v25 = vld [vmem:[#allocation2 + $0xc4] sm:$0xf]  ;;  %v5507_v26 = vld [vmem:[#allocation2 + $0xd0] sm:$0xf0]  ;;  %v5506_v27 = vor.u32 %v5736_v23, %v5505_v22  ;;  %v5489_v29 = vld [vmem:[#allocation2 + $0xa0] sm:$0xf] }
  0x78   : > { %769 = vmatpush.bf16.msra.mxu0 %v5522_v20  ;;  %5780 = vmatpush.bf16.msra.mxu2 %v5522_v20  ;;  %v5510_v28 = vor.u32 %v5734_v25, %v5507_v26  ;;  %v5732_v30 = vld [vmem:[#allocation2 + $0xac] sm:$0xf0]  ;;  %v5730_v31 = vld [vmem:[#allocation2 + $0xa4] sm:$0xf]  ;;  %v5491_v32 = vld [vmem:[#allocation2 + $0xb0] sm:$0xf0] }
  0x79   : > { %818 = vmatpush.bf16.msra.mxu1 %v5526_v24  ;;  %5788 = vmatpush.bf16.msra.mxu3 %v5526_v24  ;;  %v5490_v33 = vor.u32 %v5732_v30, %v5489_v29  ;;  %v5494_v34 = vor.u32 %v5730_v31, %v5491_v32  ;;  %v5473_v35 = vld [vmem:[#allocation2 + $0x80] sm:$0xf]  ;;  %v5728_v36 = vld [vmem:[#allocation2 + $0x8c] sm:$0xf0]  ;;  %v5726_v37 = vld [vmem:[#allocation2 + $0x84] sm:$0xf] }
  0x7a   : > { %v5475_v38 = vld [vmem:[#allocation2 + $0x90] sm:$0xf0]  ;;  %v5474_v39 = vor.u32 %v5728_v36, %v5473_v35  ;;  %v5457_v41 = vld [vmem:[#allocation2 + $0x60] sm:$0xf]  ;;  %v5724_v42 = vld [vmem:[#allocation2 + $0x6c] sm:$0xf0] }
  0x7b   : > { %v5478_v40 = vor.u32 %v5726_v37, %v5475_v38  ;;  %v5722_v43 = vld [vmem:[#allocation2 + $0x64] sm:$0xf]  ;;  %v5459_v44 = vld [vmem:[#allocation2 + $0x70] sm:$0xf0]  ;;  %v5458_v45 = vor.u32 %v5724_v42, %v5457_v41  ;;  %v5441_v47 = vld [vmem:[#allocation2 + $0x40] sm:$0xf] }
  0x7c   : > { %770 = vmatpush.bf16.msra.mxu0 %v5506_v27  ;;  %5781 = vmatpush.bf16.msra.mxu2 %v5506_v27  ;;  %v5462_v46 = vor.u32 %v5722_v43, %v5459_v44  ;;  %v5720_v48 = vld [vmem:[#allocation2 + $0x4c] sm:$0xf0]  ;;  %v5718_v49 = vld [vmem:[#allocation2 + $0x44] sm:$0xf]  ;;  %v5443_v50 = vld [vmem:[#allocation2 + $0x50] sm:$0xf0] }
  0x7d   : > { %819 = vmatpush.bf16.msra.mxu1 %v5510_v28  ;;  %5789 = vmatpush.bf16.msra.mxu3 %v5510_v28  ;;  %v5442_v51 = vor.u32 %v5720_v48, %v5441_v47  ;;  %v5446_v52 = vor.u32 %v5718_v49, %v5443_v50  ;;  %v5425_v53 = vld [vmem:[#allocation2 + $0x20] sm:$0xf]  ;;  %v5716_v54 = vld [vmem:[#allocation2 + $0x2c] sm:$0xf0]  ;;  %v5714_v55 = vld [vmem:[#allocation2 + $0x24] sm:$0xf] }
  0x7e   : > { %v5427_v56 = vld [vmem:[#allocation2 + $0x30] sm:$0xf0]  ;;  %v5426_v57 = vor.u32 %v5716_v54, %v5425_v53  ;;  %v5409_v59 = vld [vmem:[#allocation2] sm:$0xf]  ;;  %v5712_v60 = vld [vmem:[#allocation2 + $0xc] sm:$0xf0] }
  0x7f   : > { %v5430_v58 = vor.u32 %v5714_v55, %v5427_v56  ;;  %v5710_v61 = vld [vmem:[#allocation2 + $0x4] sm:$0xf]  ;;  %v5411_v62 = vld [vmem:[#allocation2 + $0x10] sm:$0xf0]  ;;  %v5410_v0 = vor.u32 %v5712_v60, %v5409_v59  ;;  %v7248_v1 = vld [vmem:[%s7172_s19 + $0x8] sm:$0xff]  ;;  %vm1213_vm0 = vcmask 1046528  }
  0x80   : > { %771 = vmatpush.bf16.msra.mxu0 %v5490_v33  ;;  %5782 = vmatpush.bf16.msra.mxu2 %v5490_v33  ;;  %v7245_v63 = vld [vmem:[%s7172_s19] sm:$0xff]  ;;  %9902 = vst [vmem:[#allocation44_spill] sm:$0xff] %v7248_v1  ;;  %v7254_v3 = vld [vmem:[%s7172_s19 + $0x48] sm:$0xff]  ;;  %v5414_v4 = vor.u32 %v5710_v61, %v5411_v62  ;;  %v7269_v7 = vld [vmem:[%s7172_s19 + $0x10] sm:$0xff]  ;;  %vm1422_vm1 = vcmask 1045504   ;;  %vm1627_vm2 = vcmask 1044480  }
  0x81   : > { %820 = vmatpush.bf16.msra.mxu1 %v5494_v34  ;;  %5790 = vmatpush.bf16.msra.mxu3 %v5494_v34  ;;  %v7251_v2 = vld [vmem:[%s7172_s19 + $0x40] sm:$0xff]  ;;  %9904 = vst [vmem:[#allocation46_spill] sm:$0xff] %v7254_v3  ;;  %v7258_v5 = vpack.c.bf16 %v7248_v1, %v7245_v63  ;;  %v7272_v8 = vld [vmem:[%s7172_s19 + $0x18] sm:$0xff]  ;;  %v7275_v9 = vld [vmem:[%s7172_s19 + $0x50] sm:$0xff]  ;;  %vm2036_vm3 = vcmask 1042432   ;;  %vm2590_vm5 = vcmask 261120  }
  0x82   : > { %9903 = vst [vmem:[#allocation45_spill] sm:$0xff] %v7251_v2  ;;  %v7262_v6 = vpack.c.bf16 %v7254_v3, %v7251_v2  ;;  %v7278_v10 = vld [vmem:[%s7172_s19 + $0x58] sm:$0xff]  ;;  %v7282_v11 = vpack.c.bf16 %v7272_v8, %v7269_v7  ;;  %v7293_v13 = vld [vmem:[%s7172_s19 + $0x20] sm:$0xff]  ;;  %v7296_v14 = vld [vmem:[%s7172_s19 + $0x28] sm:$0xff]  ;;  %vm2219_vm4 = vsmask.f32 5376 }
  0x83   : > { %9905 = vst [vmem:[#allocation47_spill] sm:$0xff] %v7269_v7  ;;  %v7286_v12 = vpack.c.bf16 %v7278_v10, %v7275_v9  ;;  %v7299_v15 = vld [vmem:[%s7172_s19 + $0x60] sm:$0xff]  ;;  %v7302_v16 = vld [vmem:[%s7172_s19 + $0x68] sm:$0xff]  ;;  %v7306_v17 = vpack.c.bf16 %v7296_v14, %v7293_v13  ;;  %v7317_v19 = vld [vmem:[%s7172_s19 + $0x30] sm:$0xff]  ;;  %s6943_s17 = smov 96   ;;  %vm2663_vm6 = vcmask 64512  }
  0x84   : > { %772 = vmatpush.bf16.msra.mxu0 %v5474_v39  ;;  %5783 = vmatpush.bf16.msra.mxu2 %v5474_v39  ;;  %9906 = vst [vmem:[#allocation48_spill] sm:$0xff] %v7272_v8  ;;  %v7310_v18 = vpack.c.bf16 %v7302_v16, %v7299_v15  ;;  %v7320_v20 = vld [vmem:[%s7172_s19 + $0x38] sm:$0xff]  ;;  %v7323_v21 = vld [vmem:[%s7172_s19 + $0x70] sm:$0xff]  ;;  %v5749_v25 = vld [vmem:[%s9805_s4 + $0x38] sm:$0xff]  ;;  %s9972_s25 = sld [smem:[#allocation62_spill]]  ;;  %s8883_s15 = smov 0  }
  0x85   : > { %821 = vmatpush.bf16.msra.mxu1 %v5478_v40  ;;  %5791 = vmatpush.bf16.msra.mxu3 %v5478_v40  ;;  %9907 = vst [vmem:[#allocation49_spill] sm:$0xff] %v7275_v9  ;;  %v7326_v22 = vld [vmem:[%s7172_s19 + $0x78] sm:$0xff]  ;;  %v7330_v23 = vpack.c.bf16 %v7320_v20, %v7317_v19  ;;  %v5757_v26 = vld [vmem:[%s9805_s4 + $0x78] sm:$0xff]  ;;  %v5748_v27 = vld [vmem:[%s9805_s4 + $0x30] sm:$0xff] }
  0x86   : > { %9908 = vst [vmem:[#allocation50_spill] sm:$0xff] %v7278_v10  ;;  %v7334_v24 = vpack.c.bf16 %v7326_v22, %v7323_v21  ;;  %v5756_v28 = vld [vmem:[%s9805_s4 + $0x70] sm:$0xff]  ;;  %v5747_v35 = vld [vmem:[%s9805_s4 + $0x28] sm:$0xff]  ;;  %v5746_v59 = vld [vmem:[%s9805_s4 + $0x20] sm:$0xff] }
  0x87   : > { %9909 = vst [vmem:[#allocation51_spill] sm:$0xff] %v7293_v13  ;;  %v1063_v29 = vld [vmem:[#allocation14] sm:$0xff]  ;;  %v5755_v36 = vld [vmem:[%s9805_s4 + $0x68] sm:$0xff]  ;;  %v5754_v60 = vld [vmem:[%s9805_s4 + $0x60] sm:$0xff] }
  0x88   : > { %773 = vmatpush.bf16.msra.mxu0 %v5458_v45  ;;  %5784 = vmatpush.bf16.msra.mxu2 %v5458_v45  ;;  %9910 = vst [vmem:[#allocation52_spill] sm:$0xff] %v7296_v14  ;;  %v1139_v30 = vperm.slane %v1063_v29, 1  ;;  %v1140_v31 = vperm.slane %v1063_v29, 5  ;;  %v1348_v32 = vperm.slane %v1063_v29, 2  ;;  %v1349_v33 = vperm.slane %v1063_v29, 6  ;;  %v1029_v37 = vld [vmem:[#allocation4 + $0xa8] sm:$0xff] }
  0x89   : > { %822 = vmatpush.bf16.msra.mxu1 %v5462_v46  ;;  %5792 = vmatpush.bf16.msra.mxu3 %v5462_v46  ;;  %9911 = vst [vmem:[#allocation53_spill] sm:$0xff] %v7299_v15  ;;  %v1065_v39 = vperm.slane %v1063_v29, 0  ;;  %v1030_v41 = vld [vmem:[#allocation4 + $0x68] sm:$0xff]  ;;  %v1066_v42 = vperm.slane %v1063_v29, 4  ;;  %v1557_v44 = vperm.slane %v1063_v29, 3  ;;  %v1558_v53 = vperm.slane %v1063_v29, 7 }
  0x8a   : > { %9912 = vst [vmem:[#allocation54_spill] sm:$0xff] %v7302_v16  ;;  %v7352_v34 = vperm.slane %v1139_v30, 1  ;;  %v7360_v38 = vperm.slane %v1140_v31, 1  ;;  %v7362_v40 = vperm.slane %v1348_v32, 2  ;;  %v7364_v43 = vperm.slane %v1349_v33, 2  ;;  %s9973_s29 = smov %s9972_s25 }
  0x8b   : > { %9913 = vst [vmem:[#allocation55_spill] sm:$0xff] %v7317_v19  ;;  %v7368_v47 = vperm.slane %v1065_v39, 0  ;;  %v7371_v50 = vperm.slane %v1066_v42, 0  ;;  %v1758_v30 = vld [vmem:[#allocation16] sm:$0x3]  ;;  %v7398_v31 = vperm.slane %v1558_v53, 3 }
  0x8c   : > { %774 = vmatpush.bf16.msra.mxu0 %v5442_v51  ;;  %5785 = vmatpush.bf16.msra.mxu2 %v5442_v51  ;;  %9914 = vst [vmem:[#allocation56_spill] sm:$0xff] %v7320_v20  ;;  %v1145_v45 = vmul.f32 %v7352_v34, %v1029_v37  ;;  %v1146_v46 = vmul.f32 %v7360_v38, %v1030_v41 }
  0x8d   : > { %823 = vmatpush.bf16.msra.mxu1 %v5446_v52  ;;  %5793 = vmatpush.bf16.msra.mxu3 %v5446_v52  ;;  %9915 = vst [vmem:[#allocation57_spill] sm:$0xff] %v7323_v21  ;;  %v1354_v48 = vmul.f32 %v7362_v40, %v1029_v37  ;;  %v1355_v51 = vmul.f32 %v7364_v43, %v1030_v41  ;;  %v7374_v52 = vperm.slane %v1557_v44, 3 }
  0x8e   : > { %9916 = vst [vmem:[#allocation58_spill] sm:$0xff] %v7326_v22  ;;  %v1071_v55 = vmul.f32 %v7368_v47, %v1029_v37  ;;  %v1217_v62 = vrot.slane %v1146_v46, 1 }
  0x8f   : > { %v1426_v33 = vrot.slane %v1355_v51, 2 }
  0x90   : > { %775 = vmatpush.bf16.msra.mxu0 %v5426_v57  ;;  %5786 = vmatpush.bf16.msra.mxu2 %v5426_v57  ;;  %v1214_v57 = vrot.slane %v1145_v45, 1  ;;  %v7404_v45 = vperm.slane %v1758_v30, 0 }
  0x91   : > { %824 = vmatpush.bf16.msra.mxu1 %v5430_v58  ;;  %5794 = vmatpush.bf16.msra.mxu3 %v5430_v58 }
  0x94   : > { %776 = vmatpush.bf16.msra.mxu0 %v5410_v0  ;;  %5787 = vmatpush.bf16.msra.mxu2 %v5410_v0 }
  0x95   : > { %825 = vmatpush.bf16.msra.mxu1 %v5414_v4  ;;  %5795 = vmatpush.bf16.msra.mxu3 %v5414_v4 }
  0x97   : > { %777 = vmatmul.bf16.vlgmr.msra.gmra.mxu0 %v7258_v5  ;;  %797 = vmatmul.bf16.vlgmr.msra.gmra.mxu2 %v7262_v6 }
  0x98   : > { %826 = vmatmul.bf16.vlgmr.msra.gmra.mxu1 %v7258_v5  ;;  %846 = vmatmul.bf16.vlgmr.msra.gmra.mxu3 %v7262_v6 }
  0x99   : > { %2492 = vmatpush.bf16.msrb.mxu0 %v5749_v25  ;;  %2541 = vmatpush.bf16.msrb.mxu1 %v5757_v26  ;;  %v1423_v25 = vrot.slane %v1354_v48, 2 }
  0x9d   : > { %2493 = vmatpush.bf16.msrb.mxu0 %v5748_v27  ;;  %2542 = vmatpush.bf16.msrb.mxu1 %v5756_v28  ;;  %v1072_v27 = vmul.f32 %v7371_v50, %v1030_v41 }
  0xa1   : > { %2494 = vmatpush.bf16.msrb.mxu0 %v5747_v35  ;;  %2543 = vmatpush.bf16.msrb.mxu1 %v5755_v36 }
  0xa5   : > { %2495 = vmatpush.bf16.msrb.mxu0 %v5746_v59  ;;  %2544 = vmatpush.bf16.msrb.mxu1 %v5754_v60 }
  0xa7   : > { %782 = vmatmul.bf16.gmra.mxu0 %v7282_v11  ;;  %802 = vmatmul.bf16.gmra.mxu2 %v7286_v12 }
  0xa8   : > { %831 = vmatmul.bf16.gmra.mxu1 %v7282_v11  ;;  %851 = vmatmul.bf16.gmra.mxu3 %v7286_v12 }
  0xb7   : > { %787 = vmatmul.bf16.gmra.mxu0 %v7306_v17  ;;  %807 = vmatmul.bf16.gmra.mxu2 %v7310_v18 }
  0xb8   : > { %836 = vmatmul.bf16.gmra.mxu1 %v7306_v17  ;;  %856 = vmatmul.bf16.gmra.mxu3 %v7310_v18 }
  0xc7   : > { %792 = vmatmul.bf16.gmra.mxu0 %v7330_v23  ;;  %812 = vmatmul.bf16.gmra.mxu2 %v7334_v24 }
  0xc8   : > { %841 = vmatmul.bf16.gmra.mxu1 %v7330_v23  ;;  %861 = vmatmul.bf16.gmra.mxu3 %v7334_v24 }
 0x114   : > { %v778_v49 = vpop.f32.mrf.mxu0 }
 0x115   : > { %v7376_v54 = vpop.f32.mrf.mxu1  ;;  %v1147_v56 = vmul.f32 %v7352_v34, %v778_v49  ;;  %v7381_v58 = vmul.f32 %v7362_v40, %v778_v49  ;;  %v1563_v29 = vmul.f32 %v7374_v52, %v778_v49 }
 0x116   : > { %v1148_v61 = vmul.f32 %v7360_v38, %v7376_v54  ;;  %v7393_v0 = vmul.f32 %v7364_v43, %v7376_v54  ;;  %v1564_v51 = vmul.f32 %v7398_v31, %v7376_v54 }
 0x117   : > { %v1215_v4 = vrot.slane %v1147_v56, 1  ;;  %v1424_v26 = vrot.slane %v7381_v58, 2  ;;  %v1628_v53 = vrot.slane %v1563_v29, 3  ;;  %v7408_v56 = vperm.slane %v1758_v30, 1 }
 0x118   : > { %v1218_v28 = vrot.slane %v1148_v61, 1  ;;  %v1427_v35 = vrot.slane %v7393_v0, 2  ;;  %v1073_v58 = vmul.f32 %v7368_v47, %v778_v49  ;;  %v5745_v61 = vld [vmem:[%s9805_s4 + $0x18] sm:$0xff] }
 0x119   : > { %v1216_v32 = vsel %vm1213_vm0, %v1214_v57, %v1215_v4  ;;  %v1425_v42 = vsel %vm1422_vm1, %v1423_v25, %v1424_v26  ;;  %2496 = vmatpush.bf16.msrb.mxu0 %v5745_v61 }
 0x11a   : > { %v798_v36 = vpop.f32.mrf.mxu2  ;;  %v1314_v37 = vadd.f32 %v1216_v32, %v1071_v55  ;;  %v1219_v39 = vsel %vm1213_vm0, %v1217_v62, %v1218_v28  ;;  %v1428_v57 = vsel %vm1422_vm1, %v1426_v33, %v1427_v35  ;;  %v5753_v62 = vld [vmem:[%s9805_s4 + $0x58] sm:$0xff] }
 0x11b   : > { %1013 = vst [vmem:[#allocation4 + $0xd8] sm:$0xff] %v798_v36  ;;  %v847_v41 = vpop.f32.mrf.mxu3  ;;  %v1315_v44 = vadd.f32 %v1219_v39, %v1072_v27  ;;  %2545 = vmatpush.bf16.msrb.mxu1 %v5753_v62 }
 0x11c   : > { %1014 = vst [vmem:[#allocation4 + $0x58] sm:$0xff] %v847_v41  ;;  %v780_v46 = vpop.f32.mrf.mxu0  ;;  %v1523_v48 = vadd.f32 %v1425_v42, %v1314_v37  ;;  %v1629_v41 = vrot.slane %v1564_v51, 3 }
 0x11d   : > { %v829_v55 = vpop.f32.mrf.mxu1  ;;  %v7413_v59 = vmul.f32 %v7352_v34, %v780_v46  ;;  %v7416_v60 = vmul.f32 %v7362_v40, %v780_v46  ;;  %v1524_v0 = vadd.f32 %v1428_v57, %v1315_v44  ;;  %v7425_v25 = vmul.f32 %v7374_v52, %v780_v46 }
 0x11e   : > { %v1724_v27 = vadd.f32 %v1628_v53, %v1523_v48  ;;  %v7428_v49 = vmul.f32 %v7360_v38, %v829_v55  ;;  %v7433_v32 = vmul.f32 %v7364_v43, %v829_v55  ;;  %v7436_v33 = vmul.f32 %v7398_v31, %v829_v55 }
 0x11f   : > { %v1220_v29 = vrot.slane %v7413_v59, 1  ;;  %v1429_v30 = vrot.slane %v7416_v60, 2  ;;  %v1630_v36 = vrot.slane %v7425_v25, 3  ;;  %v1074_v44 = vmul.f32 %v7371_v50, %v7376_v54 }
 0x120   : > { %v7440_v37 = vadd.f32 %v7404_v45, %v1724_v27  ;;  %v1222_v39 = vrot.slane %v7428_v49, 1  ;;  %v1431_v48 = vrot.slane %v7433_v32, 2  ;;  %v1725_v25 = vadd.f32 %v1629_v41, %v1524_v0 }
 0x121   : > { %v1221_v42 = vsel %vm1213_vm0, %v1215_v4, %v1220_v29  ;;  %v1075_v51 = vmul.f32 %v7368_v47, %v780_v46  ;;  %v1430_v4 = vsel %vm1422_vm1, %v1424_v26, %v1429_v30  ;;  %v1631_v49 = vsel %vm1627_vm2, %v1628_v53, %v1630_v36 }
 0x122   : > { %v800_v59 = vpop.f32.mrf.mxu2  ;;  %v1316_v60 = vadd.f32 %v1221_v42, %v1073_v58  ;;  %v1798_v61 = vsub.f32 0.0, %v7440_v37  ;;  %v1223_v62 = vsel %vm1213_vm0, %v1218_v28, %v1222_v39  ;;  %v1076_v54 = vmul.f32 %v7371_v50, %v829_v55  ;;  %v5744_v55 = vld [vmem:[%s9805_s4 + $0x10] sm:$0xff] }
 0x123   : > { %1015 = vst [vmem:[#allocation4 + $0xb8] sm:$0xff] %v800_v59  ;;  %v849_v27 = vpop.f32.mrf.mxu3  ;;  %v1317_v58 = vadd.f32 %v1223_v62, %v1074_v44  ;;  %v1432_v42 = vsel %vm1422_vm1, %v1427_v35, %v1431_v48  ;;  %v9917_v46 = vrot.slane %v7436_v33, 3  ;;  %v5752_v35 = vld [vmem:[%s9805_s4 + $0x50] sm:$0xff]  ;;  %2497 = vmatpush.bf16.msrb.mxu0 %v5744_v55 }
 0x124   : > { %1016 = vst [vmem:[#allocation4 + $0x108] sm:$0xff] %v849_v27  ;;  %v783_v32 = vpop.f32.mrf.mxu0  ;;  %v1525_v57 = vadd.f32 %v1430_v4, %v1316_v60  ;;  %v1832_v22 = vmul.f32 1.442695, %v1798_v61  ;;  %v7477_v60 = vadd.f32 %v7408_v56, %v1725_v25  ;;  %2546 = vmatpush.bf16.msrb.mxu1 %v5752_v35 }
 0x125   : > { %v832_v21 = vpop.f32.mrf.mxu1  ;;  %v7456_v28 = vmul.f32 %v7352_v34, %v783_v32  ;;  %v7459_v0 = vmul.f32 %v7362_v40, %v783_v32  ;;  %v7462_v26 = vmul.f32 %v7374_v52, %v783_v32  ;;  %v1633_v53 = vsel %vm1627_vm2, %v1629_v41, %v9917_v46 }
 0x126   : > { %v1726_v44 = vadd.f32 %v1631_v49, %v1525_v57  ;;  %6000 = vpow2.f32 %v1832_v22  ;;  %v7474_v59 = vmul.f32 %v7360_v38, %v832_v21  ;;  %v7483_v27 = vmul.f32 %v7364_v43, %v832_v21 }
 0x127   : > { %v1224_v61 = vrot.slane %v7456_v28, 1  ;;  %v1433_v41 = vrot.slane %v7459_v0, 2  ;;  %v1634_v62 = vrot.slane %v7462_v26, 3  ;;  %v1526_v4 = vadd.f32 %v1432_v42, %v1317_v58 }
 0x128   : > { %v7486_v57 = vadd.f32 %v7404_v45, %v1726_v44  ;;  %v1226_v22 = vrot.slane %v7474_v59, 1  ;;  %v7490_v25 = vmul.f32 %v7398_v31, %v832_v21  ;;  %v1077_v49 = vmul.f32 %v7368_v47, %v783_v32 }
 0x129   : > { %v1225_v28 = vsel %vm1213_vm0, %v1220_v29, %v1224_v61  ;;  %v1078_v0 = vmul.f32 %v7371_v50, %v832_v21  ;;  %v1435_v26 = vrot.slane %v7483_v27, 2  ;;  %v1434_v35 = vsel %vm1422_vm1, %v1429_v30, %v1433_v41 }
 0x12a   : > { %v803_v46 = vpop.f32.mrf.mxu2  ;;  %v1318_v55 = vadd.f32 %v1225_v28, %v1075_v51  ;;  %v1800_v44 = vsub.f32 0.0, %v7486_v57  ;;  %v1227_v59 = vsel %vm1213_vm0, %v1222_v39, %v1226_v22  ;;  %v1635_v42 = vsel %vm1627_vm2, %v1630_v36, %v1634_v62 }
 0x12b   : > { %1017 = vst [vmem:[#allocation4 + $0x50] sm:$0xff] %v803_v46  ;;  %v852_v58 = vpop.f32.mrf.mxu3  ;;  %v1319_v16 = vadd.f32 %v1227_v59, %v1076_v54  ;;  %v1436_v32 = vsel %vm1422_vm1, %v1431_v48, %v1435_v26  ;;  %v1636_v29 = vrot.slane %v7490_v25, 3  ;;  %v1727_v30 = vadd.f32 %v1633_v53, %v1526_v4  ;;  %v5743_v53 = vld [vmem:[%s9805_s4 + $0x8] sm:$0xff] }
 0x12c   : > { %v6001_v21 = vpop.eup %6000  ;;  %1018 = vst [vmem:[#allocation4 + $0xa0] sm:$0xff] %v852_v58  ;;  %v7502_v27 = vpop.f32.mrf.mxu0  ;;  %v1527_v51 = vadd.f32 %v1434_v35, %v1318_v55  ;;  %v1836_v28 = vmul.f32 1.442695, %v1800_v44  ;;  %v1799_v15 = vsub.f32 0.0, %v7477_v60  ;;  %v5751_v4 = vld [vmem:[%s9805_s4 + $0x48] sm:$0xff]  ;;  %2498 = vmatpush.bf16.msrb.mxu0 %v5743_v53  ;;  %v9918_v53 = vrot.slane %v7436_v33, 3 }
 0x12d   : > { %v7505_v10 = vpop.f32.mrf.mxu1  ;;  %v7509_v39 = vmul.f32 %v7352_v34, %v7502_v27  ;;  %v7513_v36 = vmul.f32 %v7362_v40, %v7502_v27  ;;  %v7517_v48 = vmul.f32 %v7374_v52, %v7502_v27  ;;  %v1900_v54 = vadd.f32 1.0, %v6001_v21  ;;  %2547 = vmatpush.bf16.msrb.mxu1 %v5751_v4 }
 0x12e   : > { %v1728_v25 = vadd.f32 %v1635_v42, %v1527_v51  ;;  %6002 = vpow2.f32 %v1836_v28  ;;  %v7527_v46 = vmul.f32 %v7360_v38, %v7505_v10  ;;  %v7531_v55 = vmul.f32 %v7364_v43, %v7505_v10 }
 0x12f   : > { %v9832_v35 = vrot.slane %v7509_v39, 1  ;;  %v9831_v44 = vrot.slane %v7513_v36, 2  ;;  %v9834_v59 = vrot.slane %v7517_v48, 3  ;;  %6004 = vrcp.f32 %v1900_v54 }
 0x130   : > { %v7537_v58 = vadd.f32 %v7404_v45, %v1728_v25  ;;  %v1528_v51 = vadd.f32 %v1436_v32, %v1319_v16  ;;  %v7549_v54 = vmul.f32 %v7398_v31, %v7505_v10  ;;  %v1637_v4 = vsel %vm1627_vm2, %v9918_v53, %v1636_v29 }
 0x131   : > { %v1229_v28 = vsel %vm1213_vm0, %v1224_v61, %v9832_v35  ;;  %v1438_v9 = vsel %vm1422_vm1, %v1433_v41, %v9831_v44  ;;  %v1639_v16 = vsel %vm1627_vm2, %v1634_v62, %v9834_v59  ;;  %v9919_v32 = vrot.slane %v7527_v46, 1 }
 0x132   : > { %v805_v25 = vpop.f32.mrf.mxu2  ;;  %v1320_v42 = vadd.f32 %v1229_v28, %v1077_v49  ;;  %v1802_v61 = vsub.f32 0.0, %v7537_v58  ;;  %v9837_v21 = vrot.slane %v7549_v54, 3  ;;  %v1729_v33 = vadd.f32 %v1637_v4, %v1528_v51 }
 0x133   : > { %v1231_v41 = vsel %vm1213_vm0, %v1226_v22, %v9919_v32  ;;  %1019 = vst [vmem:[#allocation4 + $0x28] sm:$0xff] %v805_v25  ;;  %v854_v44 = vpop.f32.mrf.mxu3  ;;  %v7563_v53 = vadd.f32 %v7408_v56, %v1727_v30  ;;  %v9920_v59 = vrot.slane %v7531_v55, 2  ;;  %v1834_v20 = vmul.f32 1.442695, %v1799_v15  ;;  %v5750_v15 = vld [vmem:[%s9805_s4 + $0x40] sm:$0xff] }
 0x134   : > { %v1321_v35 = vadd.f32 %v1231_v41, %v1078_v0  ;;  %v6003_v49 = vpop.eup %6002  ;;  %1020 = vst [vmem:[#allocation4 + $0x60] sm:$0xff] %v854_v44  ;;  %v788_v28 = vpop.f32.mrf.mxu0  ;;  %v1529_v3 = vadd.f32 %v1438_v9, %v1320_v42  ;;  %v1840_v62 = vmul.f32 1.442695, %v1802_v61  ;;  %v1641_v30 = vsel %vm1627_vm2, %v1636_v29, %v9837_v21  ;;  %v5742_v9 = vld [vmem:[%s9805_s4] sm:$0xff]  ;;  %2548 = vmatpush.bf16.msrb.mxu1 %v5750_v15 }
 0x135   : > { %v1440_v2 = vsel %vm1422_vm1, %v1435_v26, %v9920_v59  ;;  %v6005_v22 = vpop.eup %6004  ;;  %v7568_v25 = vpop.f32.mrf.mxu1  ;;  %v1902_v0 = vadd.f32 1.0, %v6003_v49  ;;  %v7574_v51 = vadd.f32 %v7408_v56, %v1729_v33  ;;  %v1079_v59 = vmul.f32 %v7368_v47, %v7502_v27  ;;  %2499 = vmatpush.bf16.msrb.mxu0 %v5742_v9 }
 0x136   : > { %v1530_v32 = vadd.f32 %v1440_v2, %v1321_v35  ;;  %v1730_v26 = vadd.f32 %v1639_v16, %v1529_v3  ;;  %6006 = vpow2.f32 %v1840_v62  ;;  %v7583_v44 = vmul.f32 %v6005_v22, %v7440_v37 }
 0x137   : > { %v1801_v2 = vsub.f32 0.0, %v7563_v53  ;;  %6008 = vrcp.f32 %v1902_v0  ;;  %v1803_v35 = vsub.f32 0.0, %v7574_v51  ;;  %v1081_v61 = vmul.f32 %v7368_v47, %v788_v28 }
 0x138   : > { %v1731_v29 = vadd.f32 %v1641_v30, %v1530_v32  ;;  %v7590_v42 = vadd.f32 %v7404_v45, %v1730_v26  ;;  %v2037_v3 = vrot.slane %v7583_v44, 5  ;;  %6010 = vpow2.f32 %v1834_v20 }
 0x139   : > { %v1838_v37 = vmul.f32 1.442695, %v1801_v2  ;;  %v1842_v16 = vmul.f32 1.442695, %v1803_v35  ;;  %v1155_v41 = vmul.f32 %v7352_v34, %v788_v28  ;;  %v1364_v49 = vmul.f32 %v7362_v40, %v788_v28 }
 0x13a   : > { %v7594_v4 = vadd.f32 %v7408_v56, %v1731_v29  ;;  %v808_v33 = vpop.f32.mrf.mxu2  ;;  %v1804_v27 = vsub.f32 0.0, %v7590_v42  ;;  %v7601_v62 = vmul.f32 %v7374_v52, %v788_v28  ;;  %v7606_v32 = vmul.f32 %v7371_v50, %v7505_v10 }
 0x13b   : > { %6012 = vpow2.f32 %v1838_v37  ;;  %1021 = vst [vmem:[#allocation4 + $0x40] sm:$0xff] %v808_v33  ;;  %v857_v20 = vpop.f32.mrf.mxu3  ;;  %v1232_v0 = vrot.slane %v1155_v41, 1  ;;  %v1441_v26 = vrot.slane %v1364_v49, 2  ;;  %v7613_v28 = vmul.f32 %v7371_v50, %v7568_v25 }
 0x13c   : > { %v1805_v22 = vsub.f32 0.0, %v7594_v4  ;;  %6014 = vpow2.f32 %v1842_v16  ;;  %v6007_v30 = vpop.eup %6006  ;;  %1022 = vst [vmem:[#allocation4 + $0x8] sm:$0xff] %v857_v20  ;;  %v7608_v9 = vpop.f32.mrf.mxu0  ;;  %v1844_v15 = vmul.f32 1.442695, %v1804_v27  ;;  %v1642_v2 = vrot.slane %v7601_v62, 3 }
 0x13d   : > { %v6009_v29 = vpop.eup %6008  ;;  %v7615_v35 = vpop.f32.mrf.mxu1  ;;  %v1904_v37 = vadd.f32 1.0, %v6007_v30  ;;  %v7619_v10 = vmul.f32 %v7352_v34, %v7608_v9  ;;  %v9921_v41 = vrot.slane %v7509_v39, 1  ;;  %v7629_v20 = vmul.f32 %v7362_v40, %v7608_v9 }
 0x13e   : > { %v1846_v16 = vmul.f32 1.442695, %v1805_v22  ;;  %v6011_v27 = vpop.eup %6010  ;;  %6016 = vpow2.f32 %v1844_v15  ;;  %v7625_v49 = vmul.f32 %v6009_v29, %v7486_v57  ;;  %v9922_v21 = vrot.slane %v7513_v36, 2 }
 0x13f   : > { %v1233_v33 = vsel %vm1213_vm0, %v9921_v41, %v1232_v0  ;;  %6018 = vrcp.f32 %v1904_v37  ;;  %v1901_v22 = vadd.f32 1.0, %v6011_v27  ;;  %v9844_v30 = vrot.slane %v7619_v10, 1 }
 0x140   : > { %v1322_v62 = vadd.f32 %v1233_v33, %v1079_v59  ;;  %v1442_v39 = vsel %vm1422_vm1, %v9922_v21, %v1441_v26  ;;  %v2038_v41 = vrot.slane %v7625_v49, 5  ;;  %v2169_v57 = vpack.c.bf16 %v7625_v49, %v7583_v44 }
 0x141   : > { %v6013_v19 = vpop.eup %6012  ;;  %6020 = vpow2.f32 %v1846_v16  ;;  %v9842_v59 = vrot.slane %v7629_v20, 2  ;;  %v1237_v37 = vsel %vm1213_vm0, %v1232_v0, %v9844_v30  ;;  %v7648_v16 = vmul.f32 %v7374_v52, %v7608_v9 }
 0x142   : > { %v6015_v15 = vpop.eup %6014  ;;  %v1903_v29 = vadd.f32 1.0, %v6013_v19  ;;  %6022 = vrcp.f32 %v1901_v22  ;;  %v1531_v33 = vadd.f32 %v1442_v39, %v1322_v62  ;;  %v810_v36 = vpop.f32.mrf.mxu2  ;;  %v2039_v21 = vsel %vm2036_vm3, %v2037_v3, %v2038_v41 }
 0x143   : > { %v2221_v27 = vshrl.u32 %v2169_v57, 16  ;;  %v2224_v14 = vshll.u32 %v2169_v57, 16  ;;  %v1905_v13 = vadd.f32 1.0, %v6015_v15  ;;  %1023 = vst [vmem:[#allocation4 + $0x20] sm:$0xff] %v810_v36  ;;  %v859_v8 = vpop.f32.mrf.mxu3  ;;  %v1324_v44 = vadd.f32 %v1237_v37, %v1081_v61 }
 0x144   : > { %6024 = vrcp.f32 %v1903_v29  ;;  %v1446_v19 = vsel %vm1422_vm1, %v1441_v26, %v9842_v59  ;;  %v6017_v0 = vpop.eup %6016  ;;  %1024 = vst [vmem:[#allocation4 + $0x90] sm:$0xff] %v859_v8  ;;  %v7650_v49 = vpop.f32.mrf.mxu0  ;;  %v9923_v22 = vrot.slane %v7517_v48, 3  ;;  %v9843_v29 = vrot.slane %v7648_v16, 3 }
 0x145   : > { %v7652_v3 = vrot.slane %v2221_v27, 2  ;;  %v7654_v62 = vrot.slane %v2224_v14, 3  ;;  %6026 = vrcp.f32 %v1905_v13  ;;  %v6019_v39 = vpop.eup %6018  ;;  %v7659_v57 = vpop.f32.mrf.mxu1  ;;  %v1906_v26 = vadd.f32 1.0, %v6017_v0  ;;  %2135 = vst [vmem:[#allocation7] sm:$0xff] %v2039_v21 }
 0x146   : > { %v1643_v61 = vsel %vm1627_vm2, %v9923_v22, %v1642_v2  ;;  %v1533_v15 = vadd.f32 %v1446_v19, %v1324_v44  ;;  %v7663_v36 = vmul.f32 %v6019_v39, %v7537_v58  ;;  %v1156_v13 = vmul.f32 %v7360_v38, %v7568_v25 }
 0x147   : > { %v1732_v37 = vadd.f32 %v1643_v61, %v1531_v33  ;;  %v6021_v8 = vpop.eup %6020  ;;  %v7671_v48 = vmul.f32 %v7360_v38, %v7615_v35  ;;  %6028 = vrcp.f32 %v1906_v26  ;;  %v1647_v33 = vsel %vm1627_vm2, %v1642_v2, %v9843_v29 }
 0x148   : > { %v6023_v27 = vpop.eup %6022  ;;  %v1907_v44 = vadd.f32 1.0, %v6021_v8  ;;  %v2043_v19 = vrot.slane %v7663_v36, 5  ;;  %v1734_v22 = vadd.f32 %v1647_v33, %v1533_v15  ;;  %v1234_v61 = vrot.slane %v1156_v13, 1 }
 0x149   : > { %v7677_v58 = vadd.f32 %v7404_v45, %v1732_v37  ;;  %v1969_v0 = vmul.f32 %v6023_v27, %v7477_v60  ;;  %v9846_v21 = vrot.slane %v7671_v48, 1  ;;  %v1365_v26 = vmul.f32 %v7364_v43, %v7568_v25 }
 0x14a   : > { %v6025_v39 = vpop.eup %6024  ;;  %6030 = vrcp.f32 %v1907_v44  ;;  %v813_v2 = vpop.f32.mrf.mxu2  ;;  %v2044_v37 = vsel %vm2036_vm3, %v2038_v41, %v2043_v19  ;;  %v7688_v60 = vadd.f32 %v7404_v45, %v1734_v22  ;;  %v9924_v44 = vrot.slane %v7527_v46, 1 }
 0x14b   : > { %v1806_v59 = vsub.f32 0.0, %v7677_v58  ;;  %v6027_v8 = vpop.eup %6026  ;;  %v1971_v29 = vmul.f32 %v6025_v39, %v7563_v53  ;;  %v2040_v30 = vrot.slane %v1969_v0, 5  ;;  %1025 = vst [vmem:[#allocation4] sm:$0xff] %v813_v2  ;;  %v862_v15 = vpop.f32.mrf.mxu3  ;;  %v1239_v14 = vsel %vm1213_vm0, %v1234_v61, %v9846_v21 }
 0x14c   : > { %v1973_v13 = vmul.f32 %v6027_v8, %v7574_v51  ;;  %v1235_v33 = vsel %vm1213_vm0, %v9924_v44, %v1234_v61  ;;  %1026 = vst [vmem:[#allocation4 + $0x98] sm:$0xff] %v862_v15  ;;  %v7697_v41 = vpop.f32.mrf.mxu0  ;;  %v1808_v22 = vsub.f32 0.0, %v7688_v60  ;;  %v7706_v61 = vmul.f32 %v7364_v43, %v7615_v35 }
 0x14d   : > { %v1848_v27 = vmul.f32 1.442695, %v1806_v59  ;;  %v2041_v53 = vrot.slane %v1971_v29, 5  ;;  %v2170_v39 = vpack.c.bf16 %v1971_v29, %v1969_v0  ;;  %v1323_v2 = vadd.f32 %v1235_v33, %v7606_v32  ;;  %v6029_v7 = vpop.eup %6028  ;;  %v7701_v51 = vpop.f32.mrf.mxu1  ;;  %2137 = vst [vmem:[#allocation7 + $0x10] sm:$0xff] %v2044_v37 }
 0x14e   : > { %v2045_v46 = vrot.slane %v1973_v13, 5  ;;  %v1325_v59 = vadd.f32 %v1239_v14, %v7613_v28  ;;  %v7709_v8 = vmul.f32 %v6029_v7, %v7590_v42  ;;  %v1852_v33 = vmul.f32 1.442695, %v1808_v22 }
 0x14f   : > { %6032 = vpow2.f32 %v1848_v27  ;;  %v2042_v29 = vsel %vm2036_vm3, %v2040_v30, %v2041_v53  ;;  %v2238_v0 = vshrl.u32 %v2170_v39, 16  ;;  %v2241_v15 = vshll.u32 %v2170_v39, 16 }
 0x150   : > { %v6031_v32 = vpop.eup %6030  ;;  %v2046_v44 = vsel %vm2036_vm3, %v2041_v53, %v2045_v46  ;;  %v1443_v21 = vrot.slane %v1365_v26, 2  ;;  %v9847_v27 = vrot.slane %v7706_v61, 2  ;;  %v9848_v28 = vrot.slane %v7709_v8, 5  ;;  %2136 = vst [vmem:[#allocation7 + $0x8] sm:$0xff] %v2042_v29 }
 0x151   : > { %v2171_v14 = vpack.c.bf16 %v7709_v8, %v7663_v36  ;;  %v7718_v7 = vmul.f32 %v6031_v32, %v7594_v4  ;;  %v2240_v42 = vrot.slane %v2238_v0, 2  ;;  %2138 = vst [vmem:[#allocation7 + $0x18] sm:$0xff] %v2046_v44  ;;  %v2243_v30 = vrot.slane %v2241_v15, 3 }
 0x152   : > { %6034 = vpow2.f32 %v1852_v33  ;;  %v9925_v37 = vrot.slane %v7531_v55, 2  ;;  %v1448_v26 = vsel %vm1422_vm1, %v1443_v21, %v9847_v27  ;;  %v815_v39 = vpop.f32.mrf.mxu2  ;;  %v2048_v36 = vsel %vm2036_vm3, %v2043_v19, %v9848_v28 }
 0x153   : > { %v2229_v4 = vshrl.u32 %v2171_v14, 16  ;;  %v2232_v22 = vshll.u32 %v2171_v14, 16  ;;  %v9854_v29 = vrot.slane %v7718_v7, 5  ;;  %1027 = vst [vmem:[#allocation4 + $0xe8] sm:$0xff] %v815_v39  ;;  %v864_v15 = vpop.f32.mrf.mxu3  ;;  %v2172_v55 = vpack.c.bf16 %v7718_v7, %v1973_v13 }
 0x154   : > { %v1444_v53 = vsel %vm1422_vm1, %v9925_v37, %v1443_v21  ;;  %v2244_v32 = vor.u32 %v2243_v30, %v2240_v42  ;;  %v1534_v33 = vadd.f32 %v1448_v26, %v1325_v59  ;;  %2167 = vst [vmem:[#allocation4 + $0xa8] sm:$0xe0] %v815_v39  ;;  %v1572_v1 = vmul.f32 %v7398_v31, %v7568_v25 }
 0x155   : > { %v6033_v0 = vpop.eup %6032  ;;  %v1532_v44 = vadd.f32 %v1444_v53, %v1323_v2  ;;  %v2231_v37 = vrot.slane %v2229_v4, 2  ;;  %v2234_v21 = vrot.slane %v2232_v22, 3  ;;  %v2050_v27 = vsel %vm2036_vm3, %v2045_v46, %v9854_v29  ;;  %1028 = vst [vmem:[#allocation4 + $0xe0] sm:$0xff] %v864_v15 }
 0x156   : > { %v1908_v19 = vadd.f32 1.0, %v6033_v0  ;;  %v2246_v14 = vshrl.u32 %v2172_v55, 16  ;;  %v2249_v28 = vshll.u32 %v2172_v55, 16  ;;  %v7738_v13 = vmul.f32 %v7398_v31, %v7615_v35  ;;  %2168 = vst [vmem:[#allocation4 + $0x68] sm:$0xe0] %v864_v15 }
 0x157   : > { %v7740_v2 = vor.u32 %v2234_v21, %v2231_v37  ;;  %v1083_v59 = vmul.f32 %v7368_v47, %v7608_v9  ;;  %v1085_v46 = vmul.f32 %v7368_v47, %v7650_v49  ;;  %2139 = vst [vmem:[#allocation7 + $0x20] sm:$0xff] %v2048_v36  ;;  %v1644_v26 = vrot.slane %v1572_v1, 3 }
 0x158   : > { %6036 = vrcp.f32 %v1908_v19  ;;  %v6035_v42 = vpop.eup %6034  ;;  %v2248_v30 = vrot.slane %v2246_v14, 2  ;;  %v2251_v53 = vrot.slane %v2249_v28, 3  ;;  %v1648_v25 = vrot.slane %v7738_v13, 3  ;;  %2140 = vst [vmem:[#allocation7 + $0x28] sm:$0xff] %v2050_v27 }
 0x159   : > { %v9926_v39 = vor.u32 %v7654_v62, %v7652_v3  ;;  %v1910_v22 = vadd.f32 1.0, %v6035_v42  ;;  %v1159_v9 = vmul.f32 %v7352_v34, %v7650_v49  ;;  %v7756_v0 = vmul.f32 %v7352_v34, %v7697_v41 }
 0x15a   : > { %v7758_v28 = vor.u32 %v2251_v53, %v2248_v30  ;;  %v9927_v1 = vrot.slane %v7549_v54, 3  ;;  %v1649_v3 = vsel %vm1627_vm2, %v1644_v26, %v1648_v25  ;;  %v1368_v62 = vmul.f32 %v7362_v40, %v7650_v49 }
 0x15b   : > { %v2236_v4 = vsel %vm2219_vm4, %v9926_v39, %v7740_v2  ;;  %6038 = vrcp.f32 %v1910_v22  ;;  %v1735_v15 = vadd.f32 %v1649_v3, %v1534_v33  ;;  %v1240_v55 = vrot.slane %v1159_v9, 1 }
 0x15c   : > { %2500 = vmatmul.bf16.vlgmr.msrb.gmra.mxu0 %v2236_v4  ;;  %v1645_v36 = vsel %vm1627_vm2, %v9927_v1, %v1644_v26  ;;  %v2253_v37 = vsel %vm2219_vm4, %v2244_v32, %v7758_v28  ;;  %v1244_v21 = vrot.slane %v7756_v0, 1  ;;  %v7773_v54 = vmul.f32 %v7362_v40, %v7697_v41 }
 0x15d   : > { %v1733_v27 = vadd.f32 %v1645_v36, %v1532_v44  ;;  %v1449_v19 = vrot.slane %v1368_v62, 2  ;;  %2549 = vmatmul.bf16.vlgmr.msrb.gmra.mxu1 %v2253_v37  ;;  %v7779_v30 = vadd.f32 %v7408_v56, %v1735_v15  ;;  %v9928_v44 = vrot.slane %v7619_v10, 1 }
 0x15e   : > { %v6037_v14 = vpop.eup %6036  ;;  %v1575_v32 = vmul.f32 %v7374_v52, %v7650_v49  ;;  %v1245_v26 = vsel %vm1213_vm0, %v1240_v55, %v1244_v21  ;;  %v9929_v4 = vrot.slane %v7629_v20, 2  ;;  %v1453_v36 = vrot.slane %v7773_v54, 2 }
 0x15f   : > { %v7776_v42 = vadd.f32 %v7408_v56, %v1733_v27  ;;  %v1241_v33 = vsel %vm1213_vm0, %v9928_v44, %v1240_v55  ;;  %v1976_v53 = vmul.f32 %v6037_v14, %v7677_v58  ;;  %v1809_v10 = vsub.f32 0.0, %v7779_v30 }
 0x160   : > { %v1326_v39 = vadd.f32 %v1241_v33, %v1083_v59  ;;  %v1450_v22 = vsel %vm1422_vm1, %v9929_v4, %v1449_v19  ;;  %v1328_v1 = vadd.f32 %v1245_v26, %v1085_v46  ;;  %v7798_v58 = vmul.f32 %v7374_v52, %v7697_v41 }
 0x161   : > { %v1807_v9 = vsub.f32 0.0, %v7776_v42  ;;  %v2051_v3 = vrot.slane %v1976_v53, 5  ;;  %v1650_v62 = vrot.slane %v1575_v32, 3  ;;  %v6039_v27 = vpop.eup %6038  ;;  %v1854_v15 = vmul.f32 1.442695, %v1809_v10 }
 0x162   : > { %v1535_v49 = vadd.f32 %v1450_v22, %v1326_v39  ;;  %v1454_v20 = vsel %vm1422_vm1, %v1449_v19, %v1453_v36  ;;  %v1084_v55 = vmul.f32 %v7371_v50, %v7615_v35  ;;  %v7806_v46 = vmul.f32 %v6039_v27, %v7688_v60 }
 0x163   : > { %v1850_v59 = vmul.f32 1.442695, %v1807_v9  ;;  %v9930_v37 = vrot.slane %v7709_v8, 5  ;;  %v1537_v44 = vadd.f32 %v1454_v20, %v1328_v1  ;;  %v9931_v33 = vrot.slane %v7648_v16, 3 }
 0x164   : > { %v9853_v26 = vrot.slane %v7798_v58, 3  ;;  %v1086_v35 = vmul.f32 %v7371_v50, %v7659_v57  ;;  %v9852_v60 = vrot.slane %v7806_v46, 5  ;;  %v2173_v39 = vpack.c.bf16 %v7806_v46, %v1976_v53 }
 0x165   : > { %v2052_v14 = vsel %vm2036_vm3, %v9930_v37, %v2051_v3  ;;  %v1651_v32 = vsel %vm1627_vm2, %v9931_v33, %v1650_v62  ;;  %6040 = vpow2.f32 %v1850_v59  ;;  %v1160_v8 = vmul.f32 %v7360_v38, %v7659_v57 }
 0x166   : > { %2141 = vst [vmem:[#allocation7 + $0x30] sm:$0xff] %v2052_v14  ;;  %v1736_v19 = vadd.f32 %v1651_v32, %v1535_v49  ;;  %6042 = vpow2.f32 %v1854_v15  ;;  %v1655_v16 = vsel %vm1627_vm2, %v1650_v62, %v9853_v26  ;;  %v7829_v22 = vmul.f32 %v7360_v38, %v7701_v51 }
 0x167   : > { %v1369_v9 = vmul.f32 %v7364_v43, %v7659_v57  ;;  %v2056_v53 = vsel %vm2036_vm3, %v2051_v3, %v9852_v60  ;;  %v2255_v10 = vshrl.u32 %v2173_v39, 16  ;;  %v2258_v1 = vshll.u32 %v2173_v39, 16 }
 0x168   : > { %v7825_v4 = vadd.f32 %v7404_v45, %v1736_v19  ;;  %v1738_v49 = vadd.f32 %v1655_v16, %v1537_v44  ;;  %2143 = vst [vmem:[#allocation7 + $0x40] sm:$0xff] %v2056_v53  ;;  %v1242_v27 = vrot.slane %v1160_v8, 1  ;;  %v9850_v59 = vrot.slane %v7829_v22, 1 }
 0x169   : > { %v7840_v15 = vmul.f32 %v7364_v43, %v7701_v51  ;;  %v2257_v20 = vrot.slane %v2255_v10, 2  ;;  %v2260_v37 = vrot.slane %v2258_v1, 3  ;;  %v1451_v33 = vrot.slane %v1369_v9, 2 }
 0x16a   : > { %v1810_v62 = vsub.f32 0.0, %v7825_v4  ;;  %v7843_v14 = vadd.f32 %v7404_v45, %v1738_v49  ;;  %v9932_v44 = vrot.slane %v7671_v48, 1  ;;  %v1247_v39 = vsel %vm1213_vm0, %v1242_v27, %v9850_v59 }
 0x16b   : > { %v6041_v3 = vpop.eup %6040  ;;  %v9851_v8 = vrot.slane %v7840_v15, 2  ;;  %v7852_v53 = vor.u32 %v2260_v37, %v2257_v20  ;;  %v9933_v48 = vrot.slane %v7706_v61, 2  ;;  %v1047_v37 = vld [vmem:[#allocation4 + $0xd8] sm:$0xff]  ;;  %v1576_v61 = vmul.f32 %v7398_v31, %v7659_v57 }
 0x16c   : > { %v1856_v32 = vmul.f32 1.442695, %v1810_v62  ;;  %v1243_v19 = vsel %vm1213_vm0, %v9932_v44, %v1242_v27  ;;  %v6043_v16 = vpop.eup %6042  ;;  %v1909_v10 = vadd.f32 1.0, %v6041_v3  ;;  %v1812_v1 = vsub.f32 0.0, %v7843_v14  ;;  %v7864_v3 = vld [vmem:[#allocation4 + $0xb8] sm:$0xff] }
 0x16d   : > { %v1327_v49 = vadd.f32 %v1243_v19, %v1084_v55  ;;  %v1911_v9 = vadd.f32 1.0, %v6043_v16  ;;  %v1329_v62 = vadd.f32 %v1247_v39, %v1086_v35  ;;  %v1452_v44 = vsel %vm1422_vm1, %v9933_v48, %v1451_v33 }
 0x16e   : > { %6044 = vpow2.f32 %v1856_v32  ;;  %v2262_v27 = vsel %vm2219_vm4, %v7740_v2, %v7852_v53  ;;  %v1860_v59 = vmul.f32 1.442695, %v1812_v1  ;;  %v1456_v20 = vsel %vm1422_vm1, %v1451_v33, %v9851_v8 }
 0x16f   : > { %6046 = vrcp.f32 %v1909_v10  ;;  %2505 = vmatmul.bf16.gmra.mxu0 %v2262_v27  ;;  %v1536_v55 = vadd.f32 %v1452_v44, %v1327_v49  ;;  %v1538_v35 = vadd.f32 %v1456_v20, %v1329_v62  ;;  %v7870_v2 = vmul.f32 %v7398_v31, %v7701_v51 }
 0x170   : > { %6048 = vrcp.f32 %v1911_v9  ;;  %v1087_v32 = vmul.f32 %v7368_v47, %v7697_v41  ;;  %v1089_v33 = vmul.f32 %v7368_v47, %v1047_v37  ;;  %v1652_v19 = vrot.slane %v1576_v61, 3 }
 0x171   : > { %6050 = vpow2.f32 %v1860_v59  ;;  %v1163_v39 = vmul.f32 %v7352_v34, %v1047_v37  ;;  %v7878_v16 = vmul.f32 %v7352_v34, %v7864_v3  ;;  %v1372_v10 = vmul.f32 %v7362_v40, %v1047_v37 }
 0x172   : > { %v1656_v57 = vrot.slane %v7870_v2, 3  ;;  %v7884_v59 = vmul.f32 %v7362_v40, %v7864_v3  ;;  %v1579_v1 = vmul.f32 %v7374_v52, %v1047_v37  ;;  %v7889_v41 = vmul.f32 %v7374_v52, %v7864_v3 }
 0x173   : > { %v1653_v9 = vsel %vm1627_vm2, %v1648_v25, %v1652_v19  ;;  %v1248_v62 = vrot.slane %v1163_v39, 1  ;;  %v9857_v48 = vrot.slane %v7878_v16, 1  ;;  %v1457_v44 = vrot.slane %v1372_v10, 2 }
 0x174   : > { %v6045_v49 = vpop.eup %6044  ;;  %v1657_v61 = vsel %vm1627_vm2, %v1652_v19, %v1656_v57  ;;  %v1737_v37 = vadd.f32 %v1653_v9, %v1536_v55  ;;  %v9856_v8 = vrot.slane %v7884_v59, 2 }
 0x175   : > { %v6047_v27 = vpop.eup %6046  ;;  %v1912_v20 = vadd.f32 1.0, %v6045_v49  ;;  %v1739_v29 = vadd.f32 %v1657_v61, %v1538_v35  ;;  %v1249_v13 = vsel %vm1213_vm0, %v1244_v21, %v1248_v62  ;;  %v1253_v25 = vsel %vm1213_vm0, %v1248_v62, %v9857_v48 }
 0x176   : > { %v6049_v60 = vpop.eup %6048  ;;  %v1977_v26 = vmul.f32 %v6047_v27, %v7776_v42  ;;  %v7910_v55 = vadd.f32 %v7408_v56, %v1737_v37  ;;  %v1330_v19 = vadd.f32 %v1249_v13, %v1087_v32  ;;  %v1332_v0 = vadd.f32 %v1253_v25, %v1089_v33 }
 0x177   : > { %v6051_v39 = vpop.eup %6050  ;;  %v7907_v10 = vmul.f32 %v6049_v60, %v7779_v30  ;;  %6052 = vrcp.f32 %v1912_v20  ;;  %v7913_v35 = vadd.f32 %v7408_v56, %v1739_v29  ;;  %v1458_v30 = vsel %vm1422_vm1, %v1453_v36, %v1457_v44 }
 0x178   : > { %v2053_v49 = vrot.slane %v1977_v26, 5  ;;  %v1914_v42 = vadd.f32 1.0, %v6051_v39  ;;  %v1811_v62 = vsub.f32 0.0, %v7910_v55  ;;  %v9934_v60 = vrot.slane %v7718_v7, 5 }
 0x179   : > { %v9859_v21 = vrot.slane %v7907_v10, 5  ;;  %v2174_v9 = vpack.c.bf16 %v7907_v10, %v1977_v26  ;;  %v1813_v27 = vsub.f32 0.0, %v7913_v35  ;;  %v1462_v29 = vsel %vm1422_vm1, %v1457_v44, %v9856_v8  ;;  %v1048_v44 = vld [vmem:[#allocation4 + $0x58] sm:$0xff] }
 0x17a   : > { %v2054_v32 = vsel %vm2036_vm3, %v9934_v60, %v2053_v49  ;;  %6054 = vrcp.f32 %v1914_v42  ;;  %v1858_v20 = vmul.f32 1.442695, %v1811_v62  ;;  %v1539_v7 = vadd.f32 %v1458_v30, %v1330_v19  ;;  %v7932_v60 = vld [vmem:[#allocation4 + $0x108] sm:$0xff] }
 0x17b   : > { %v2058_v26 = vsel %vm2036_vm3, %v2053_v49, %v9859_v21  ;;  %2142 = vst [vmem:[#allocation7 + $0x38] sm:$0xff] %v2054_v32  ;;  %v2264_v33 = vshrl.u32 %v2174_v9, 16  ;;  %v2267_v54 = vshll.u32 %v2174_v9, 16  ;;  %v1862_v36 = vmul.f32 1.442695, %v1813_v27 }
 0x17c   : > { %2144 = vst [vmem:[#allocation7 + $0x48] sm:$0xff] %v2058_v26  ;;  %v1541_v61 = vadd.f32 %v1462_v29, %v1332_v0  ;;  %v1658_v37 = vrot.slane %v1579_v1, 3  ;;  %6056 = vpow2.f32 %v1858_v20  ;;  %v9855_v42 = vrot.slane %v7889_v41, 3 }
 0x17d   : > { %v6053_v13 = vpop.eup %6052  ;;  %v2266_v25 = vrot.slane %v2264_v33, 2  ;;  %v2269_v39 = vrot.slane %v2267_v54, 3  ;;  %6058 = vpow2.f32 %v1862_v36  ;;  %v9935_v9 = vrot.slane %v7798_v58, 3 }
 0x17e   : > { %v1980_v49 = vmul.f32 %v6053_v13, %v7825_v4  ;;  %v1088_v19 = vmul.f32 %v7371_v50, %v7701_v51  ;;  %v1663_v0 = vsel %vm1627_vm2, %v1658_v37, %v9855_v42  ;;  %v1090_v32 = vmul.f32 %v7371_v50, %v1048_v44 }
 0x17f   : > { %v1659_v62 = vsel %vm1627_vm2, %v9935_v9, %v1658_v37  ;;  %v7940_v1 = vor.u32 %v2269_v39, %v2266_v25  ;;  %v1742_v4 = vadd.f32 %v1663_v0, %v1541_v61  ;;  %v1164_v26 = vmul.f32 %v7360_v38, %v1048_v44 }
 0x180   : > { %v1740_v30 = vadd.f32 %v1659_v62, %v1539_v7  ;;  %v6055_v27 = vpop.eup %6054  ;;  %v2059_v29 = vrot.slane %v1980_v49, 5  ;;  %v7949_v58 = vmul.f32 %v7360_v38, %v7932_v60  ;;  %v1373_v20 = vmul.f32 %v7364_v43, %v1048_v44 }
 0x181   : > { %v2271_v51 = vsel %vm2219_vm4, %v7758_v28, %v7940_v1  ;;  %v7955_v33 = vmul.f32 %v6055_v27, %v7843_v14  ;;  %v9936_v36 = vrot.slane %v7806_v46, 5  ;;  %v7965_v61 = vadd.f32 %v7404_v45, %v1742_v4 }
 0x182   : > { %v7958_v54 = vadd.f32 %v7404_v45, %v1740_v30  ;;  %2554 = vmatmul.bf16.gmra.mxu1 %v2271_v51  ;;  %v1250_v37 = vrot.slane %v1164_v26, 1  ;;  %v9858_v13 = vrot.slane %v7949_v58, 1  ;;  %v6057_v28 = vpop.eup %6056  ;;  %v7973_v9 = vmul.f32 %v7364_v43, %v7932_v60 }
 0x183   : > { %v2060_v7 = vsel %vm2036_vm3, %v9936_v36, %v2059_v29  ;;  %v9863_v14 = vrot.slane %v7955_v33, 5  ;;  %v2175_v25 = vpack.c.bf16 %v7955_v33, %v1980_v49  ;;  %v6059_v46 = vpop.eup %6058  ;;  %v1913_v62 = vadd.f32 1.0, %v6057_v28 }
 0x184   : > { %2145 = vst [vmem:[#allocation7 + $0x50] sm:$0xff] %v2060_v7  ;;  %v1814_v39 = vsub.f32 0.0, %v7958_v54  ;;  %v1816_v0 = vsub.f32 0.0, %v7965_v61  ;;  %v9937_v30 = vrot.slane %v7829_v22, 1  ;;  %v1255_v4 = vsel %vm1213_vm0, %v1250_v37, %v9858_v13 }
 0x185   : > { %v2064_v49 = vsel %vm2036_vm3, %v2059_v29, %v9863_v14  ;;  %v2273_v26 = vshrl.u32 %v2175_v25, 16  ;;  %v2276_v51 = vshll.u32 %v2175_v25, 16  ;;  %v1915_v36 = vadd.f32 1.0, %v6059_v46  ;;  %v7993_v25 = vld [vmem:[#allocation4 + $0x50] sm:$0xff] }
 0x186   : > { %v1251_v27 = vsel %vm1213_vm0, %v9937_v30, %v1250_v37  ;;  %2147 = vst [vmem:[#allocation7 + $0x60] sm:$0xff] %v2064_v49  ;;  %6060 = vrcp.f32 %v1913_v62  ;;  %v1864_v7 = vmul.f32 1.442695, %v1814_v39  ;;  %v1868_v28 = vmul.f32 1.442695, %v1816_v0 }
 0x187   : > { %v1331_v42 = vadd.f32 %v1251_v27, %v1088_v19  ;;  %v2275_v8 = vrot.slane %v2273_v26, 2  ;;  %v2278_v22 = vrot.slane %v2276_v51, 3  ;;  %6062 = vrcp.f32 %v1915_v36  ;;  %v7995_v19 = vld [vmem:[#allocation4 + $0x28] sm:$0xff] }
 0x188   : > { %v1333_v30 = vadd.f32 %v1255_v4, %v1090_v32  ;;  %6064 = vpow2.f32 %v1864_v7  ;;  %v1459_v48 = vrot.slane %v1373_v20, 2  ;;  %v9862_v37 = vrot.slane %v7973_v9, 2 }
 0x189   : > { %v1580_v13 = vmul.f32 %v7398_v31, %v1048_v44  ;;  %v7987_v21 = vor.u32 %v2278_v22, %v2275_v8  ;;  %6066 = vpow2.f32 %v1868_v28  ;;  %v7991_v29 = vmul.f32 %v7398_v31, %v7932_v60 }
 0x18a   : > { %v1091_v32 = vmul.f32 %v7368_v47, %v7864_v3  ;;  %v9938_v20 = vrot.slane %v7840_v15, 2  ;;  %v1464_v8 = vsel %vm1422_vm1, %v1459_v48, %v9862_v37  ;;  %v1093_v46 = vmul.f32 %v7368_v47, %v7993_v25 }
 0x18b   : > { %v1660_v44 = vrot.slane %v1580_v13, 3  ;;  %v2280_v62 = vsel %vm2219_vm4, %v7852_v53, %v7987_v21  ;;  %v1542_v27 = vadd.f32 %v1464_v8, %v1333_v30  ;;  %v9860_v3 = vrot.slane %v7991_v29, 3 }
 0x18c   : > { %v1460_v39 = vsel %vm1422_vm1, %v9938_v20, %v1459_v48  ;;  %v6061_v4 = vpop.eup %6060  ;;  %2510 = vmatmul.bf16.gmra.mxu0 %v2280_v62  ;;  %v1167_v48 = vmul.f32 %v7352_v34, %v7993_v25  ;;  %v8018_v13 = vmul.f32 %v7352_v34, %v7995_v19  ;;  %v8022_v53 = vmul.f32 %v7362_v40, %v7993_v25 }
 0x18d   : > { %v1540_v0 = vadd.f32 %v1460_v39, %v1331_v42  ;;  %v1661_v15 = vsel %vm1627_vm2, %v1656_v57, %v1660_v44  ;;  %v6063_v42 = vpop.eup %6062  ;;  %v1981_v49 = vmul.f32 %v6061_v4, %v7910_v55  ;;  %v1665_v2 = vsel %vm1627_vm2, %v1660_v44, %v9860_v3  ;;  %v5739_v3 = vld [vmem:[#allocation2 + $0xec] sm:$0xf] }
 0x18e   : > { %v8030_v57 = vmul.f32 %v7362_v40, %v7995_v19  ;;  %v6065_v51 = vpop.eup %6064  ;;  %v8033_v36 = vmul.f32 %v6063_v42, %v7913_v35  ;;  %v1743_v7 = vadd.f32 %v1665_v2, %v1542_v27  ;;  %v1256_v28 = vrot.slane %v1167_v48, 1 }
 0x18f   : > { %v1741_v26 = vadd.f32 %v1661_v15, %v1540_v0  ;;  %v1260_v22 = vrot.slane %v8018_v13, 1  ;;  %v6067_v30 = vpop.eup %6066  ;;  %v2061_v20 = vrot.slane %v1981_v49, 5  ;;  %v1916_v55 = vadd.f32 1.0, %v6065_v51  ;;  %v8199_v13 = vld [vmem:[#allocation4 + $0x90] sm:$0xff] }
 0x190   : > { %v1465_v8 = vrot.slane %v8022_v53, 2  ;;  %v9861_v44 = vrot.slane %v8033_v36, 5  ;;  %v2176_v62 = vpack.c.bf16 %v8033_v36, %v1981_v49  ;;  %v1918_v0 = vadd.f32 1.0, %v6067_v30 }
 0x191   : > { %v8037_v39 = vadd.f32 %v7408_v56, %v1741_v26  ;;  %v8043_v35 = vadd.f32 %v7408_v56, %v1743_v7  ;;  %v9939_v27 = vrot.slane %v7907_v10, 5  ;;  %6068 = vrcp.f32 %v1916_v55  ;;  %v5529_v26 = vld [vmem:[#allocation2 + $0xe8] sm:$0xf]  ;;  %v5741_v7 = vld [vmem:[#allocation2 + $0xf4] sm:$0xf0] }
 0x192   : > { %v9940_v48 = vrot.slane %v7878_v16, 1  ;;  %v2066_v53 = vsel %vm2036_vm3, %v2061_v20, %v9861_v44  ;;  %v2282_v49 = vshrl.u32 %v2176_v62, 16  ;;  %v2285_v2 = vshll.u32 %v2176_v62, 16  ;;  %v5513_v44 = vld [vmem:[#allocation2 + $0xc8] sm:$0xf] }
 0x193   : > { %v2062_v4 = vsel %vm2036_vm3, %v9939_v27, %v2061_v20  ;;  %v1815_v15 = vsub.f32 0.0, %v8037_v39  ;;  %6070 = vrcp.f32 %v1918_v0  ;;  %2148 = vst [vmem:[#allocation7 + $0x68] sm:$0xff] %v2066_v53  ;;  %v1817_v10 = vsub.f32 0.0, %v8043_v35  ;;  %v5531_v20 = vld [vmem:[#allocation2 + $0xf8] sm:$0xf0] }
 0x194   : > { %v1257_v42 = vsel %vm1213_vm0, %v9940_v48, %v1256_v28  ;;  %2146 = vst [vmem:[#allocation7 + $0x58] sm:$0xff] %v2062_v4  ;;  %v1261_v16 = vsel %vm1213_vm0, %v1256_v28, %v1260_v22  ;;  %v2284_v55 = vrot.slane %v2282_v49, 2  ;;  %v2287_v27 = vrot.slane %v2285_v2, 3  ;;  %v5737_v53 = vld [vmem:[#allocation2 + $0xd4] sm:$0xf0] }
 0x195   : > { %v1866_v51 = vmul.f32 1.442695, %v1815_v15  ;;  %v1334_v30 = vadd.f32 %v1257_v42, %v1091_v32  ;;  %v5530_v48 = vor.u32 %v5741_v7, %v5529_v26  ;;  %v1336_v4 = vadd.f32 %v1261_v16, %v1093_v46  ;;  %v5735_v32 = vld [vmem:[#allocation2 + $0xcc] sm:$0xf]  ;;  %v5515_v42 = vld [vmem:[#allocation2 + $0xd8] sm:$0xf0] }
 0x196   : > { %v1870_v62 = vmul.f32 1.442695, %v1817_v10  ;;  %v5534_v0 = vor.u32 %v5739_v3, %v5531_v20  ;;  %v9941_v37 = vrot.slane %v7884_v59, 2  ;;  %v8062_v14 = vor.u32 %v2287_v27, %v2284_v55  ;;  %v8071_v10 = vld [vmem:[#allocation4 + $0x60] sm:$0xff] }
 0x197   : > { %6072 = vpow2.f32 %v1866_v51  ;;  %867 = vmatpush.bf16.msrb.mxu2 %v5530_v48  ;;  %v5514_v28 = vor.u32 %v5737_v53, %v5513_v44  ;;  %v1469_v49 = vrot.slane %v8030_v57, 2  ;;  %v6069_v26 = vpop.eup %6068  ;;  %v5518_v46 = vor.u32 %v5735_v32, %v5515_v42 }
 0x198   : > { %v1466_v15 = vsel %vm1422_vm1, %v9941_v37, %v1465_v8  ;;  %6074 = vpow2.f32 %v1870_v62  ;;  %916 = vmatpush.bf16.msrb.mxu3 %v5534_v0  ;;  %v1583_v3 = vmul.f32 %v7374_v52, %v7993_v25  ;;  %v8069_v59 = vmul.f32 %v7374_v52, %v7995_v19  ;;  %v1052_v37 = vld [vmem:[#allocation4 + $0xa0] sm:$0xff] }
 0x199   : > { %v1543_v2 = vadd.f32 %v1466_v15, %v1334_v30  ;;  %v6071_v44 = vpop.eup %6070  ;;  %v2289_v51 = vsel %vm2219_vm4, %v7940_v1, %v8062_v14  ;;  %v1984_v7 = vmul.f32 %v6069_v26, %v7958_v54  ;;  %v1470_v16 = vsel %vm1422_vm1, %v1465_v8, %v1469_v49 }
 0x19a   : > { %v1092_v25 = vmul.f32 %v7371_v50, %v7932_v60  ;;  %2559 = vmatmul.bf16.gmra.mxu1 %v2289_v51  ;;  %v8083_v30 = vmul.f32 %v6071_v44, %v7965_v61  ;;  %v1545_v55 = vadd.f32 %v1470_v16, %v1336_v4  ;;  %v1666_v27 = vrot.slane %v1583_v3, 3 }
 0x19b   : > { %v9870_v48 = vrot.slane %v8069_v59, 3  ;;  %v2067_v20 = vrot.slane %v1984_v7, 5  ;;  %868 = vmatpush.bf16.msrb.mxu2 %v5514_v28  ;;  %v1094_v1 = vmul.f32 %v7371_v50, %v1052_v37  ;;  %v1168_v54 = vmul.f32 %v7360_v38, %v1052_v37 }
 0x19c   : > { %v8090_v8 = vmul.f32 %v7360_v38, %v8071_v10  ;;  %v9868_v60 = vrot.slane %v8083_v30, 5  ;;  %v2177_v61 = vpack.c.bf16 %v8083_v30, %v1984_v7  ;;  %917 = vmatpush.bf16.msrb.mxu3 %v5518_v46  ;;  %v9942_v4 = vrot.slane %v7889_v41, 3 }
 0x19d   : > { %v6073_v62 = vpop.eup %6072  ;;  %v1671_v53 = vsel %vm1627_vm2, %v1666_v27, %v9870_v48  ;;  %v9943_v15 = vrot.slane %v7955_v33, 5  ;;  %v1258_v51 = vrot.slane %v1168_v54, 1 }
 0x19e   : > { %v1667_v0 = vsel %vm1627_vm2, %v9942_v4, %v1666_v27  ;;  %v1917_v32 = vadd.f32 1.0, %v6073_v62  ;;  %v1746_v26 = vadd.f32 %v1671_v53, %v1545_v55  ;;  %v6075_v3 = vpop.eup %6074  ;;  %v2072_v46 = vsel %vm2036_vm3, %v2067_v20, %v9868_v60 }
 0x19f   : > { %v2068_v28 = vsel %vm2036_vm3, %v9943_v15, %v2067_v20  ;;  %v1744_v42 = vadd.f32 %v1667_v0, %v1543_v2  ;;  %v2291_v41 = vshrl.u32 %v2177_v61, 16  ;;  %v2294_v44 = vshll.u32 %v2177_v61, 16  ;;  %2151 = vst [vmem:[#allocation7 + $0x80] sm:$0xff] %v2072_v46 }
 0x1a0   : > { %2149 = vst [vmem:[#allocation7 + $0x70] sm:$0xff] %v2068_v28  ;;  %v1919_v7 = vadd.f32 1.0, %v6075_v3  ;;  %6076 = vrcp.f32 %v1917_v32  ;;  %v8110_v33 = vadd.f32 %v7404_v45, %v1746_v26  ;;  %v9944_v27 = vrot.slane %v7949_v58, 1 }
 0x1a1   : > { %v8107_v16 = vadd.f32 %v7404_v45, %v1744_v42  ;;  %v2293_v2 = vrot.slane %v2291_v41, 2  ;;  %v2296_v55 = vrot.slane %v2294_v44, 3  ;;  %v9866_v20 = vrot.slane %v8090_v8, 1  ;;  %v8137_v44 = vld [vmem:[#allocation4 + $0x40] sm:$0xff] }
 0x1a2   : > { %v1259_v62 = vsel %vm1213_vm0, %v9944_v27, %v1258_v51  ;;  %6078 = vrcp.f32 %v1919_v7  ;;  %v1820_v61 = vsub.f32 0.0, %v8110_v33  ;;  %v1377_v15 = vmul.f32 %v7364_v43, %v1052_v37 }
 0x1a3   : > { %v1818_v54 = vsub.f32 0.0, %v8107_v16  ;;  %v1335_v4 = vadd.f32 %v1259_v62, %v1092_v25  ;;  %v8118_v0 = vor.u32 %v2296_v55, %v2293_v2  ;;  %v1263_v53 = vsel %vm1213_vm0, %v1258_v51, %v9866_v20  ;;  %v5733_v20 = vld [vmem:[#allocation2 + $0xb4] sm:$0xf0] }
 0x1a4   : > { %v8126_v58 = vmul.f32 %v7364_v43, %v8071_v10  ;;  %v1876_v32 = vmul.f32 1.442695, %v1820_v61  ;;  %v1337_v42 = vadd.f32 %v1263_v53, %v1094_v1  ;;  %v1584_v26 = vmul.f32 %v7398_v31, %v1052_v37  ;;  %v8139_v1 = vld [vmem:[#allocation4 + $0x20] sm:$0xff] }
 0x1a5   : > { %v1872_v28 = vmul.f32 1.442695, %v1818_v54  ;;  %v2298_v25 = vsel %vm2219_vm4, %v7987_v21, %v8118_v0  ;;  %v1467_v3 = vrot.slane %v1377_v15, 2  ;;  %v8135_v41 = vmul.f32 %v7398_v31, %v8071_v10 }
 0x1a6   : > { %v9865_v46 = vrot.slane %v8126_v58, 2  ;;  %v6077_v51 = vpop.eup %6076  ;;  %2515 = vmatmul.bf16.gmra.mxu0 %v2298_v25  ;;  %v1668_v7 = vrot.slane %v1584_v26, 3  ;;  %v1095_v37 = vmul.f32 %v7368_v47, %v7995_v19  ;;  %v1097_v21 = vmul.f32 %v7368_v47, %v8137_v44 }
 0x1a7   : > { %6080 = vpow2.f32 %v1872_v28  ;;  %v1985_v2 = vmul.f32 %v6077_v51, %v8037_v39  ;;  %v9945_v55 = vrot.slane %v7973_v9, 2  ;;  %v9946_v15 = vrot.slane %v7991_v29, 3 }
 0x1a8   : > { %6082 = vpow2.f32 %v1876_v32  ;;  %v1472_v62 = vsel %vm1422_vm1, %v1467_v3, %v9865_v46  ;;  %v6079_v54 = vpop.eup %6078  ;;  %v9864_v28 = vrot.slane %v8135_v41, 3  ;;  %v1171_v9 = vmul.f32 %v7352_v34, %v8137_v44 }
 0x1a9   : > { %v1468_v27 = vsel %vm1422_vm1, %v9945_v55, %v1467_v3  ;;  %v1546_v53 = vadd.f32 %v1472_v62, %v1337_v42  ;;  %v1669_v19 = vsel %vm1627_vm2, %v9946_v15, %v1668_v7  ;;  %v8157_v39 = vmul.f32 %v6079_v54, %v8043_v35 }
 0x1aa   : > { %v1544_v61 = vadd.f32 %v1468_v27, %v1335_v4  ;;  %v2069_v32 = vrot.slane %v1985_v2, 5  ;;  %v8163_v26 = vmul.f32 %v7352_v34, %v8139_v1  ;;  %v1673_v4 = vsel %vm1627_vm2, %v1668_v7, %v9864_v28 }
 0x1ab   : > { %v1380_v42 = vmul.f32 %v7362_v40, %v8137_v44  ;;  %v8172_v35 = vmul.f32 %v7362_v40, %v8139_v1  ;;  %v9947_v25 = vrot.slane %v8033_v36, 5  ;;  %v9867_v51 = vrot.slane %v8157_v39, 5 }
 0x1ac   : > { %v1745_v29 = vadd.f32 %v1669_v19, %v1544_v61  ;;  %v2178_v55 = vpack.c.bf16 %v8157_v39, %v1985_v2  ;;  %v1747_v27 = vadd.f32 %v1673_v4, %v1546_v53  ;;  %v1264_v54 = vrot.slane %v1171_v9, 1 }
 0x1ad   : > { %v2070_v3 = vsel %vm2036_vm3, %v9947_v25, %v2069_v32  ;;  %v6081_v62 = vpop.eup %6080  ;;  %v9869_v61 = vrot.slane %v8163_v26, 1  ;;  %v1473_v15 = vrot.slane %v1380_v42, 2  ;;  %v2074_v36 = vsel %vm2036_vm3, %v2069_v32, %v9867_v51 }
 0x1ae   : > { %2150 = vst [vmem:[#allocation7 + $0x78] sm:$0xff] %v2070_v3  ;;  %v8180_v7 = vadd.f32 %v7408_v56, %v1745_v29  ;;  %v6083_v19 = vpop.eup %6082  ;;  %v2300_v25 = vshrl.u32 %v2178_v55, 16  ;;  %v2303_v28 = vshll.u32 %v2178_v55, 16  ;;  %v1920_v46 = vadd.f32 1.0, %v6081_v62  ;;  %v5497_v3 = vld [vmem:[#allocation2 + $0xa8] sm:$0xf] }
 0x1af   : > { %2152 = vst [vmem:[#allocation7 + $0x88] sm:$0xff] %v2074_v36  ;;  %v1922_v2 = vadd.f32 1.0, %v6083_v19  ;;  %v8187_v53 = vadd.f32 %v7408_v56, %v1747_v27  ;;  %v1265_v9 = vsel %vm1213_vm0, %v1260_v22, %v1264_v54  ;;  %v1269_v32 = vsel %vm1213_vm0, %v1264_v54, %v9869_v61  ;;  %v5731_v19 = vld [vmem:[#allocation2 + $0xac] sm:$0xf]  ;;  %v5483_v61 = vld [vmem:[#allocation2 + $0x98] sm:$0xf0] }
 0x1b0   : > { %v1819_v4 = vsub.f32 0.0, %v8180_v7  ;;  %v2302_v29 = vrot.slane %v2300_v25, 2  ;;  %v2305_v42 = vrot.slane %v2303_v28, 3  ;;  %6084 = vrcp.f32 %v1920_v46  ;;  %v8197_v36 = vld [vmem:[#allocation4 + $0x8] sm:$0xff]  ;;  %v5499_v28 = vld [vmem:[#allocation2 + $0xb8] sm:$0xf0] }
 0x1b1   : > { %6086 = vrcp.f32 %v1922_v2  ;;  %v1821_v55 = vsub.f32 0.0, %v8187_v53  ;;  %v5498_v62 = vor.u32 %v5733_v20, %v5497_v3  ;;  %v5481_v46 = vld [vmem:[#allocation2 + $0x88] sm:$0xf]  ;;  %v5729_v25 = vld [vmem:[#allocation2 + $0x94] sm:$0xf0]  ;;  %v1338_v51 = vadd.f32 %v1265_v9, %v1095_v37 }
 0x1b2   : > { %v1874_v27 = vmul.f32 1.442695, %v1819_v4  ;;  %v8201_v22 = vor.u32 %v2305_v42, %v2302_v29  ;;  %v1340_v60 = vadd.f32 %v1269_v32, %v1097_v21  ;;  %v1474_v54 = vsel %vm1422_vm1, %v1469_v49, %v1473_v15  ;;  %v5727_v3 = vld [vmem:[#allocation2 + $0x8c] sm:$0xf] }
 0x1b3   : > { %v1878_v2 = vmul.f32 1.442695, %v1821_v55  ;;  %869 = vmatpush.bf16.msrb.mxu2 %v5498_v62  ;;  %v5502_v20 = vor.u32 %v5731_v19, %v5499_v28  ;;  %v5482_v4 = vor.u32 %v5729_v25, %v5481_v46  ;;  %v5486_v42 = vor.u32 %v5727_v3, %v5483_v61 }
 0x1b4   : > { %6088 = vpow2.f32 %v1874_v27  ;;  %v2307_v29 = vsel %vm2219_vm4, %v8062_v14, %v8201_v22  ;;  %v1477_v48 = vrot.slane %v8172_v35, 2  ;;  %v1547_v37 = vadd.f32 %v1474_v54, %v1338_v51 }
 0x1b5   : > { %2564 = vmatmul.bf16.gmra.mxu1 %v2307_v29  ;;  %6090 = vpow2.f32 %v1878_v2  ;;  %918 = vmatpush.bf16.msrb.mxu3 %v5502_v20  ;;  %v1587_v57 = vmul.f32 %v7374_v52, %v8137_v44  ;;  %v8214_v49 = vmul.f32 %v7374_v52, %v8139_v1  ;;  %v1096_v21 = vmul.f32 %v7371_v50, %v8071_v10 }
 0x1b6   : > { %v6085_v9 = vpop.eup %6084  ;;  %v1478_v14 = vsel %vm1422_vm1, %v1473_v15, %v1477_v48  ;;  %v1098_v51 = vmul.f32 %v7371_v50, %v8197_v36  ;;  %v1172_v61 = vmul.f32 %v7360_v38, %v8197_v36  ;;  %v8227_v44 = vmul.f32 %v7360_v38, %v8199_v13 }
 0x1b7   : > { %v6087_v32 = vpop.eup %6086  ;;  %v1988_v55 = vmul.f32 %v6085_v9, %v8107_v16  ;;  %870 = vmatpush.bf16.msrb.mxu2 %v5482_v4  ;;  %v1549_v10 = vadd.f32 %v1478_v14, %v1340_v60  ;;  %v1674_v27 = vrot.slane %v1587_v57, 3  ;;  %v1678_v62 = vrot.slane %v8214_v49, 3 }
 0x1b8   : > { %v8232_v15 = vmul.f32 %v6087_v32, %v8110_v33  ;;  %v1266_v19 = vrot.slane %v1172_v61, 1  ;;  %v1270_v28 = vrot.slane %v8227_v44, 1  ;;  %v1381_v46 = vmul.f32 %v7364_v43, %v8197_v36 }
 0x1b9   : > { %v2075_v54 = vrot.slane %v1988_v55, 5  ;;  %919 = vmatpush.bf16.msrb.mxu3 %v5486_v42  ;;  %v9948_v2 = vrot.slane %v8069_v59, 3  ;;  %v1679_v60 = vsel %vm1627_vm2, %v1674_v27, %v1678_v62  ;;  %v8245_v33 = vmul.f32 %v7364_v43, %v8199_v13 }
 0x1ba   : > { %v6089_v25 = vpop.eup %6088  ;;  %v2079_v20 = vrot.slane %v8232_v15, 5  ;;  %v2179_v4 = vpack.c.bf16 %v8232_v15, %v1988_v55  ;;  %v9949_v42 = vrot.slane %v8083_v30, 5  ;;  %v1750_v9 = vadd.f32 %v1679_v60, %v1549_v10 }
 0x1bb   : > { %v1675_v16 = vsel %vm1627_vm2, %v9948_v2, %v1674_v27  ;;  %v1921_v3 = vadd.f32 1.0, %v6089_v25  ;;  %v6091_v57 = vpop.eup %6090  ;;  %v9950_v14 = vrot.slane %v8090_v8, 1  ;;  %v1271_v32 = vsel %vm1213_vm0, %v1266_v19, %v1270_v28 }
 0x1bc   : > { %v1748_v29 = vadd.f32 %v1675_v16, %v1547_v37  ;;  %v2076_v59 = vsel %vm2036_vm3, %v9949_v42, %v2075_v54  ;;  %v2080_v55 = vsel %vm2036_vm3, %v2075_v54, %v2079_v20  ;;  %v2309_v37 = vshrl.u32 %v2179_v4, 16 }
 0x1bd   : > { %v1267_v61 = vsel %vm1213_vm0, %v9950_v14, %v1266_v19  ;;  %2153 = vst [vmem:[#allocation7 + $0x90] sm:$0xff] %v2076_v59  ;;  %v2312_v27 = vshll.u32 %v2179_v4, 16  ;;  %v1923_v25 = vadd.f32 1.0, %v6091_v57  ;;  %6092 = vrcp.f32 %v1921_v3 }
 0x1be   : > { %2155 = vst [vmem:[#allocation7 + $0xa0] sm:$0xff] %v2080_v55  ;;  %v8262_v30 = vadd.f32 %v7404_v45, %v1748_v29  ;;  %v8265_v8 = vadd.f32 %v7404_v45, %v1750_v9  ;;  %v1339_v10 = vadd.f32 %v1267_v61, %v1096_v21  ;;  %v2311_v2 = vrot.slane %v2309_v37, 2  ;;  %v1059_v21 = vld [vmem:[#allocation4] sm:$0xff] }
 0x1bf   : > { %v2314_v16 = vrot.slane %v2312_v27, 3  ;;  %6094 = vrcp.f32 %v1923_v25  ;;  %v1341_v19 = vadd.f32 %v1271_v32, %v1098_v51  ;;  %v1475_v42 = vrot.slane %v1381_v46, 2  ;;  %v8286_v32 = vld [vmem:[#allocation4 + $0xe8] sm:$0xff] }
 0x1c0   : > { %v1822_v60 = vsub.f32 0.0, %v8262_v30  ;;  %v1824_v54 = vsub.f32 0.0, %v8265_v8  ;;  %v1479_v4 = vrot.slane %v8245_v33, 2  ;;  %v1588_v3 = vmul.f32 %v7398_v31, %v8197_v36 }
 0x1c1   : > { %v8270_v57 = vor.u32 %v2314_v16, %v2311_v2  ;;  %v8276_v29 = vmul.f32 %v7398_v31, %v8199_v13  ;;  %v1099_v51 = vmul.f32 %v7368_v47, %v8139_v1  ;;  %v9951_v14 = vrot.slane %v8126_v58, 2 }
 0x1c2   : > { %v1880_v59 = vmul.f32 1.442695, %v1822_v60  ;;  %v1884_v9 = vmul.f32 1.442695, %v1824_v54  ;;  %v1480_v61 = vsel %vm1422_vm1, %v1475_v42, %v1479_v4  ;;  %v1676_v27 = vrot.slane %v1588_v3, 3 }
 0x1c3   : > { %v1476_v46 = vsel %vm1422_vm1, %v9951_v14, %v1475_v42  ;;  %v2316_v36 = vsel %vm2219_vm4, %v8118_v0, %v8270_v57  ;;  %v1550_v37 = vadd.f32 %v1480_v61, %v1341_v19  ;;  %v6093_v1 = vpop.eup %6092  ;;  %v9872_v58 = vrot.slane %v8276_v29, 3 }
 0x1c4   : > { %v1548_v55 = vadd.f32 %v1476_v46, %v1339_v10  ;;  %2520 = vmatmul.bf16.gmra.mxu0 %v2316_v36  ;;  %6096 = vpow2.f32 %v1880_v59  ;;  %v1101_v25 = vmul.f32 %v7368_v47, %v1059_v21  ;;  %v1175_v2 = vmul.f32 %v7352_v34, %v1059_v21 }
 0x1c5   : > { %v6095_v16 = vpop.eup %6094  ;;  %v1989_v60 = vmul.f32 %v6093_v1, %v8180_v7  ;;  %6098 = vpow2.f32 %v1884_v9  ;;  %v9952_v54 = vrot.slane %v8135_v41, 3  ;;  %v8300_v10 = vmul.f32 %v7352_v34, %v8286_v32 }
 0x1c6   : > { %v8303_v19 = vmul.f32 %v6095_v16, %v8187_v53  ;;  %v1681_v42 = vsel %vm1627_vm2, %v1676_v27, %v9872_v58  ;;  %v1272_v59 = vrot.slane %v1175_v2, 1  ;;  %v1384_v41 = vmul.f32 %v7362_v40, %v1059_v21 }
 0x1c7   : > { %v1677_v0 = vsel %vm1627_vm2, %v9952_v54, %v1676_v27  ;;  %v2077_v14 = vrot.slane %v1989_v60, 5  ;;  %v1751_v7 = vadd.f32 %v1681_v42, %v1550_v37  ;;  %v9873_v9 = vrot.slane %v8300_v10, 1 }
 0x1c8   : > { %v1749_v3 = vadd.f32 %v1677_v0, %v1548_v55  ;;  %v9871_v46 = vrot.slane %v8303_v19, 5  ;;  %v2180_v34 = vpack.c.bf16 %v8303_v19, %v1989_v60  ;;  %v9953_v53 = vrot.slane %v8163_v26, 1 }
 0x1c9   : > { %v9954_v55 = vrot.slane %v8157_v39, 5  ;;  %v8322_v37 = vadd.f32 %v7408_v56, %v1751_v7  ;;  %v1277_v1 = vsel %vm1213_vm0, %v1272_v59, %v9873_v9  ;;  %v5465_v7 = vld [vmem:[#allocation2 + $0x68] sm:$0xf]  ;;  %v1591_v58 = vmul.f32 %v7374_v52, %v1059_v21  ;;  %v5719_v21 = vld [vmem:[#allocation2 + $0x4c] sm:$0xf] }
 0x1ca   : > { %v8313_v61 = vadd.f32 %v7408_v56, %v1749_v3  ;;  %v1273_v36 = vsel %vm1213_vm0, %v9953_v53, %v1272_v59  ;;  %v6097_v16 = vpop.eup %6096  ;;  %v2082_v60 = vsel %vm2036_vm3, %v2077_v14, %v9871_v46  ;;  %v2318_v26 = vshrl.u32 %v2180_v34, 16  ;;  %v5723_v46 = vld [vmem:[#allocation2 + $0x6c] sm:$0xf] }
 0x1cb   : > { %v2078_v27 = vsel %vm2036_vm3, %v9954_v55, %v2077_v14  ;;  %v1342_v2 = vadd.f32 %v1273_v36, %v1099_v51  ;;  %v2321_v54 = vshll.u32 %v2180_v34, 16  ;;  %v6099_v0 = vpop.eup %6098  ;;  %2156 = vst [vmem:[#allocation7 + $0xa8] sm:$0xff] %v2082_v60  ;;  %v1924_v42 = vadd.f32 1.0, %v6097_v16  ;;  %v5725_v34 = vld [vmem:[#allocation2 + $0x74] sm:$0xf0] }
 0x1cc   : > { %2154 = vst [vmem:[#allocation7 + $0x98] sm:$0xff] %v2078_v27  ;;  %v1823_v39 = vsub.f32 0.0, %v8313_v61  ;;  %v1825_v3 = vsub.f32 0.0, %v8322_v37  ;;  %v1344_v53 = vadd.f32 %v1277_v1, %v1101_v25  ;;  %v8334_v51 = vmul.f32 %v7362_v40, %v8286_v32  ;;  %v8341_v60 = vld [vmem:[#allocation4 + $0x98] sm:$0xff] }
 0x1cd   : > { %v2320_v59 = vrot.slane %v2318_v26, 2  ;;  %v2323_v36 = vrot.slane %v2321_v54, 3  ;;  %v1926_v55 = vadd.f32 1.0, %v6099_v0  ;;  %6100 = vrcp.f32 %v1924_v42  ;;  %v5467_v1 = vld [vmem:[#allocation2 + $0x78] sm:$0xf0] }
 0x1ce   : > { %v1882_v14 = vmul.f32 1.442695, %v1823_v39  ;;  %v1886_v27 = vmul.f32 1.442695, %v1825_v3  ;;  %v8339_v16 = vmul.f32 %v7374_v52, %v8286_v32  ;;  %v5466_v40 = vor.u32 %v5725_v34, %v5465_v7  ;;  %v5449_v26 = vld [vmem:[#allocation2 + $0x48] sm:$0xf] }
 0x1cf   : > { %v8343_v25 = vor.u32 %v2323_v36, %v2320_v59  ;;  %6102 = vrcp.f32 %v1926_v55  ;;  %v5721_v54 = vld [vmem:[#allocation2 + $0x54] sm:$0xf0]  ;;  %v1100_v39 = vmul.f32 %v7371_v50, %v8199_v13  ;;  %v5470_v0 = vor.u32 %v5723_v46, %v5467_v1  ;;  %v5451_v3 = vld [vmem:[#allocation2 + $0x58] sm:$0xf0]  ;;  %v8347_v52 = vld [vmem:[#allocation4 + $0xe0] sm:$0xff] }
 0x1d0   : > { %6104 = vpow2.f32 %v1882_v14  ;;  %v5450_v42 = vor.u32 %v5721_v54, %v5449_v26  ;;  %v1481_v9 = vrot.slane %v1384_v41, 2  ;;  %871 = vmatpush.bf16.msrb.mxu2 %v5466_v40  ;;  %v5454_v7 = vor.u32 %v5719_v21, %v5451_v3 }
 0x1d1   : > { %v2325_v59 = vsel %vm2219_vm4, %v8201_v22, %v8343_v25  ;;  %6106 = vpow2.f32 %v1886_v27  ;;  %v1485_v36 = vrot.slane %v8334_v51, 2  ;;  %920 = vmatpush.bf16.msrb.mxu3 %v5470_v0  ;;  %v1682_v46 = vrot.slane %v1591_v58, 3 }
 0x1d2   : > { %2569 = vmatmul.bf16.gmra.mxu1 %v2325_v59  ;;  %v1482_v13 = vsel %vm1422_vm1, %v1477_v48, %v1481_v9  ;;  %v1686_v41 = vrot.slane %v8339_v16, 3  ;;  %v1102_v55 = vmul.f32 %v7371_v50, %v8341_v60  ;;  %v1176_v27 = vmul.f32 %v7360_v38, %v8341_v60 }
 0x1d3   : > { %v1486_v22 = vsel %vm1422_vm1, %v1481_v9, %v1485_v36  ;;  %v1551_v14 = vadd.f32 %v1482_v13, %v1342_v2  ;;  %v8366_v34 = vmul.f32 %v7360_v38, %v8347_v52  ;;  %v6101_v35 = vpop.eup %6100  ;;  %v1683_v58 = vsel %vm1627_vm2, %v1678_v62, %v1682_v46 }
 0x1d4   : > { %v1553_v48 = vadd.f32 %v1486_v22, %v1344_v53  ;;  %v1687_v40 = vsel %vm1627_vm2, %v1682_v46, %v1686_v41  ;;  %v1385_v9 = vmul.f32 %v7364_v43, %v8341_v60  ;;  %v1992_v1 = vmul.f32 %v6101_v35, %v8262_v30  ;;  %872 = vmatpush.bf16.msrb.mxu2 %v5450_v42 }
 0x1d5   : > { %v6103_v2 = vpop.eup %6102  ;;  %v1752_v26 = vadd.f32 %v1683_v58, %v1551_v14  ;;  %v1274_v38 = vrot.slane %v1176_v27, 1  ;;  %v1278_v54 = vrot.slane %v8366_v34, 1  ;;  %921 = vmatpush.bf16.msrb.mxu3 %v5454_v7  ;;  %v1387_v0 = vmul.f32 %v7364_v43, %v8347_v52 }
 0x1d6   : > { %v6105_v53 = vpop.eup %6104  ;;  %v8379_v49 = vmul.f32 %v6103_v2, %v8265_v8  ;;  %v1754_v62 = vadd.f32 %v1687_v40, %v1553_v48  ;;  %v1483_v21 = vrot.slane %v1385_v9, 2  ;;  %v2083_v59 = vrot.slane %v1992_v1, 5 }
 0x1d7   : > { %v6107_v3 = vpop.eup %6106  ;;  %v1925_v13 = vadd.f32 1.0, %v6105_v53  ;;  %v8384_v30 = vadd.f32 %v7404_v45, %v1752_v26  ;;  %v1275_v42 = vsel %vm1213_vm0, %v1270_v28, %v1274_v38  ;;  %v1279_v27 = vsel %vm1213_vm0, %v1274_v38, %v1278_v54 }
 0x1d8   : > { %v2087_v46 = vrot.slane %v8379_v49, 5  ;;  %v2181_v8 = vpack.c.bf16 %v8379_v49, %v1992_v1  ;;  %v1927_v7 = vadd.f32 1.0, %v6107_v3  ;;  %v8392_v22 = vadd.f32 %v7404_v45, %v1754_v62 }
 0x1d9   : > { %v2084_v43 = vsel %vm2036_vm3, %v2079_v20, %v2083_v59  ;;  %6108 = vrcp.f32 %v1925_v13  ;;  %v1826_v14 = vsub.f32 0.0, %v8384_v30  ;;  %v1343_v15 = vadd.f32 %v1275_v42, %v1100_v39 }
 0x1da   : > { %v2088_v44 = vsel %vm2036_vm3, %v2083_v59, %v2087_v46  ;;  %2157 = vst [vmem:[#allocation7 + $0xb0] sm:$0xff] %v2084_v43  ;;  %v2327_v28 = vshrl.u32 %v2181_v8, 16  ;;  %v2330_v34 = vshll.u32 %v2181_v8, 16  ;;  %6110 = vrcp.f32 %v1927_v7 }
 0x1db   : > { %2159 = vst [vmem:[#allocation7 + $0xc0] sm:$0xff] %v2088_v44  ;;  %v1828_v35 = vsub.f32 0.0, %v8392_v22  ;;  %v1888_v48 = vmul.f32 1.442695, %v1826_v14  ;;  %v1345_v58 = vadd.f32 %v1279_v27, %v1102_v55  ;;  %v1484_v9 = vsel %vm1422_vm1, %v1479_v4, %v1483_v21 }
 0x1dc   : > { %v2329_v20 = vrot.slane %v2327_v28, 2  ;;  %v2332_v40 = vrot.slane %v2330_v34, 3  ;;  %v1487_v2 = vrot.slane %v1387_v0, 2  ;;  %v1552_v26 = vadd.f32 %v1484_v9, %v1343_v15 }
 0x1dd   : > { %6112 = vpow2.f32 %v1888_v48  ;;  %v1892_v1 = vmul.f32 1.442695, %v1828_v35  ;;  %v1592_v38 = vmul.f32 %v7398_v31, %v8341_v60  ;;  %v1594_v39 = vmul.f32 %v7398_v31, %v8347_v52 }
 0x1de   : > { %v8408_v53 = vor.u32 %v2332_v40, %v2329_v20  ;;  %v1488_v62 = vsel %vm1422_vm1, %v1483_v21, %v1487_v2  ;;  %v1103_v55 = vmul.f32 %v7368_v47, %v8286_v32  ;;  %v1104_v3 = vmul.f32 %v7371_v50, %v8347_v52  ;;  %v5433_v20 = vld [vmem:[#allocation2 + $0x28] sm:$0xf] }
 0x1df   : > { %v6109_v33 = vpop.eup %6108  ;;  %6114 = vpow2.f32 %v1892_v1  ;;  %v1554_v4 = vadd.f32 %v1488_v62, %v1345_v58  ;;  %v1684_v0 = vrot.slane %v1592_v38, 3  ;;  %v1688_v13 = vrot.slane %v1594_v39, 3  ;;  %v5715_v62 = vld [vmem:[#allocation2 + $0x2c] sm:$0xf]  ;;  %v5435_v39 = vld [vmem:[#allocation2 + $0x38] sm:$0xf0] }
 0x1e0   : > { %v6111_v59 = vpop.eup %6110  ;;  %v2334_v60 = vsel %vm2219_vm4, %v8270_v57, %v8408_v53  ;;  %v1993_v21 = vmul.f32 %v6109_v33, %v8313_v61  ;;  %v9955_v31 = vrot.slane %v8300_v10, 1  ;;  %v9956_v32 = vrot.slane %v8276_v29, 3 }
 0x1e1   : > { %2525 = vmatmul.bf16.gmra.mxu0 %v2334_v60  ;;  %v8424_v47 = vmul.f32 %v6111_v59, %v8322_v37  ;;  %v1347_v50 = vadd.f32 %v1278_v54, %v1104_v3  ;;  %v1689_v7 = vsel %vm1627_vm2, %v1684_v0, %v1688_v13  ;;  %v9957_v44 = vrot.slane %v8303_v19, 5  ;;  %v5713_v3 = vld [vmem:[#allocation2 + $0x14] sm:$0xf0]  ;;  %v5711_v60 = vld [vmem:[#allocation2 + $0xc] sm:$0xf] }
 0x1e2   : > { %v1346_v42 = vadd.f32 %v9955_v31, %v1103_v55  ;;  %v1685_v8 = vsel %vm1627_vm2, %v9956_v32, %v1684_v0  ;;  %v2085_v52 = vrot.slane %v1993_v21, 5  ;;  %v1755_v27 = vadd.f32 %v1689_v7, %v1554_v4  ;;  %v5417_v0 = vld [vmem:[#allocation2 + $0x8] sm:$0xf] }
 0x1e3   : > { %v1753_v43 = vadd.f32 %v1685_v8, %v1552_v26  ;;  %v6113_v61 = vpop.eup %6112  ;;  %v2089_v10 = vrot.slane %v8424_v47, 5  ;;  %v2182_v14 = vpack.c.bf16 %v8424_v47, %v1993_v21  ;;  %v1556_v37 = vadd.f32 %v1487_v2, %v1347_v50  ;;  %v5717_v2 = vld [vmem:[#allocation2 + $0x34] sm:$0xf0]  ;;  %v5419_v21 = vld [vmem:[#allocation2 + $0x18] sm:$0xf0] }
 0x1e4   : > { %v1555_v57 = vadd.f32 %v1485_v36, %v1346_v42  ;;  %v2086_v29 = vsel %vm2036_vm3, %v9957_v44, %v2085_v52  ;;  %v1928_v28 = vadd.f32 1.0, %v6113_v61  ;;  %v8446_v15 = vadd.f32 %v7408_v56, %v1755_v27 }
 0x1e5   : > { %v8438_v54 = vadd.f32 %v7408_v56, %v1753_v43  ;;  %v6115_v51 = vpop.eup %6114  ;;  %v2090_v36 = vsel %vm2036_vm3, %v2085_v52, %v2089_v10  ;;  %2158 = vst [vmem:[#allocation7 + $0xb8] sm:$0xff] %v2086_v29  ;;  %v2336_v35 = vshrl.u32 %v2182_v14, 16  ;;  %v2339_v48 = vshll.u32 %v2182_v14, 16 }
 0x1e6   : > { %v1756_v34 = vadd.f32 %v1686_v41, %v1555_v57  ;;  %2160 = vst [vmem:[#allocation7 + $0xc8] sm:$0xff] %v2090_v36  ;;  %v1930_v19 = vadd.f32 1.0, %v6115_v51  ;;  %6116 = vrcp.f32 %v1928_v28  ;;  %v1829_v9 = vsub.f32 0.0, %v8446_v15 }
 0x1e7   : > { %v1827_v58 = vsub.f32 0.0, %v8438_v54  ;;  %v2338_v41 = vrot.slane %v2336_v35, 2  ;;  %v2341_v40 = vrot.slane %v2339_v48, 3  ;;  %v1757_v1 = vadd.f32 %v1688_v13, %v1556_v37  ;;  %v2607_v48 = vld [vmem:[%s9806_s5] sm:$0xff] }
 0x1e8   : > { %v8450_v16 = vadd.f32 %v7404_v45, %v1756_v34  ;;  %6118 = vrcp.f32 %v1930_v19  ;;  %v5434_v38 = vor.u32 %v5717_v2, %v5433_v20  ;;  %v1894_v33 = vmul.f32 1.442695, %v1829_v9  ;;  %v2501_v19 = vpop.f32.mrf.mxu0 }
 0x1e9   : > { %v1890_v26 = vmul.f32 1.442695, %v1827_v58  ;;  %v8453_v55 = vor.u32 %v2341_v40, %v2338_v41  ;;  %v5438_v4 = vor.u32 %v5715_v62, %v5435_v39  ;;  %v8456_v45 = vadd.f32 %v7408_v56, %v1757_v1  ;;  %v2550_v58 = vpop.f32.mrf.mxu1 }
 0x1ea   : > { %873 = vmatpush.bf16.msrb.mxu2 %v5434_v38  ;;  %v5418_v59 = vor.u32 %v5713_v3, %v5417_v0  ;;  %v1830_v13 = vsub.f32 0.0, %v8450_v16  ;;  %v5422_v42 = vor.u32 %v5711_v60, %v5419_v21  ;;  %v2551_v41 = vadd.f32 %v2550_v58, %v2501_v19 }
 0x1eb   : > { %6120 = vpow2.f32 %v1890_v26  ;;  %v2343_v31 = vsel %vm2219_vm4, %v8343_v25, %v8453_v55  ;;  %922 = vmatpush.bf16.msrb.mxu3 %v5438_v4  ;;  %v1831_v32 = vsub.f32 0.0, %v8456_v45 }
 0x1ec   : > { %6122 = vpow2.f32 %v1894_v33  ;;  %v6117_v8 = vpop.eup %6116  ;;  %2574 = vmatmul.bf16.gmra.mxu1 %v2343_v31  ;;  %v1896_v56 = vmul.f32 1.442695, %v1830_v13  ;;  %2591 = vst.msk [vmem:[#allocation9] sm:$0xff] %vm2590_vm5, %v2551_v41  ;;  %2631 = vrot.lane.b32.xlu0 %v2551_v41, %s6943_s17 }
 0x1ed   : > { %v1996_v50 = vmul.f32 %v6117_v8, %v8384_v30  ;;  %v1898_v52 = vmul.f32 1.442695, %v1831_v32 }
 0x1ee   : > { %v6119_v7 = vpop.eup %6118  ;;  %874 = vmatpush.bf16.msrb.mxu2 %v5418_v59  ;;  %6124 = vpow2.f32 %v1896_v56 }
 0x1ef   : > { %v8465_v43 = vmul.f32 %v6119_v7, %v8392_v22  ;;  %v2091_v57 = vrot.slane %v1996_v50, 5  ;;  %923 = vmatpush.bf16.msrb.mxu3 %v5422_v42  ;;  %6126 = vpow2.f32 %v1898_v52 }
 0x1f0   : > { %v2503_v3 = vpop.f32.mrf.mxu0 }
 0x1f1   : > { %v6121_v25 = vpop.eup %6120  ;;  %v2092_v14 = vsel %vm2036_vm3, %v2087_v46, %v2091_v57  ;;  %v2095_v27 = vrot.slane %v8465_v43, 5  ;;  %v2183_v30 = vpack.c.bf16 %v8465_v43, %v1996_v50  ;;  %875 = vmatmul.bf16.vlgmr.msrb.gmra.mxu2 %v7258_v5  ;;  %v2552_v59 = vpop.f32.mrf.mxu1 }
 0x1f2   : > { %v6123_v61 = vpop.eup %6122  ;;  %v1929_v37 = vadd.f32 1.0, %v6121_v25  ;;  %2161 = vst [vmem:[#allocation7 + $0xd0] sm:$0xff] %v2092_v14  ;;  %924 = vmatmul.bf16.vlgmr.msrb.gmra.mxu3 %v7258_v5  ;;  %v2608_v5 = vld [vmem:[%s9806_s5 + $0x8] sm:$0xff]  ;;  %2711 = vmatpush.msra.mxu2 %v2607_v48  ;;  %v2553_v42 = vadd.f32 %v2552_v59, %v2503_v3 }
 0x1f3   : > { %v1931_v44 = vadd.f32 1.0, %v6123_v61  ;;  %v2096_v22 = vsel %vm2036_vm3, %v2091_v57, %v2095_v27  ;;  %v2345_v29 = vshrl.u32 %v2183_v30, 16  ;;  %v2348_v28 = vshll.u32 %v2183_v30, 16  ;;  %2776 = vmatpush.msra.mxu3 %v2608_v5 }
 0x1f4   : > { %6128 = vrcp.f32 %v1929_v37  ;;  %v6125_v34 = vpop.eup %6124  ;;  %2163 = vst [vmem:[#allocation7 + $0xe0] sm:$0xff] %v2096_v22  ;;  %2633 = vrot.lane.b32.xlu0 %v2553_v42, %s6943_s17 }
 0x1f5   : > { %6130 = vrcp.f32 %v1931_v44  ;;  %v6127_v49 = vpop.eup %6126  ;;  %v2347_v46 = vrot.slane %v2345_v29, 2  ;;  %v2350_v51 = vrot.slane %v2348_v28, 3  ;;  %v1932_v36 = vadd.f32 1.0, %v6125_v34  ;;  %2592 = vst.msk [vmem:[#allocation9 + $0x8] sm:$0xff] %vm2590_vm5, %v2553_v42 }
 0x1f6   : > { %v1933_v35 = vadd.f32 1.0, %v6127_v49 }
 0x1f7   : > { %v2351_v20 = vor.u32 %v2350_v51, %v2347_v46  ;;  %6132 = vrcp.f32 %v1932_v36 }
 0x1f8   : > { %6134 = vrcp.f32 %v1933_v35  ;;  %v2506_v61 = vpop.f32.mrf.mxu0 }
 0x1f9   : > { %v2352_v9 = vsel %vm2219_vm4, %v8408_v53, %v2351_v20 }
 0x1fa   : > { %v6129_v40 = vpop.eup %6128  ;;  %2530 = vmatmul.bf16.gmra.mxu0 %v2352_v9 }
 0x1fb   : > { %v6131_v2 = vpop.eup %6130  ;;  %v1997_v1 = vmul.f32 %v6129_v40, %v8438_v54 }
 0x1fc   : > { %v1999_v26 = vmul.f32 %v6131_v2, %v8446_v15 }
 0x1fd   : > { %v2093_v38 = vrot.slane %v1997_v1, 5  ;;  %v6133_v62 = vpop.eup %6132 }
 0x1fe   : > { %v2097_v39 = vrot.slane %v1999_v26, 5  ;;  %v2184_v33 = vpack.c.bf16 %v1999_v26, %v1997_v1  ;;  %v6135_v4 = vpop.eup %6134  ;;  %v2000_v0 = vmul.f32 %v6133_v62, %v8450_v16 }
 0x1ff   : > { %v2094_v53 = vsel %vm2036_vm3, %v2089_v10, %v2093_v38  ;;  %v2001_v15 = vmul.f32 %v6135_v4, %v8456_v45  ;;  %v2555_v14 = vpop.f32.mrf.mxu1 }
 0x200   : > { %v2098_v60 = vsel %vm2036_vm3, %v2093_v38, %v2097_v39  ;;  %2162 = vst [vmem:[#allocation7 + $0xd8] sm:$0xff] %v2094_v53  ;;  %v2354_v21 = vshrl.u32 %v2184_v33, 16  ;;  %v2357_v54 = vshll.u32 %v2184_v33, 16  ;;  %v2099_v13 = vrot.slane %v2000_v0, 5  ;;  %v2508_v29 = vpop.f32.mrf.mxu0 }
 0x201   : > { %2164 = vst [vmem:[#allocation7 + $0xe8] sm:$0xff] %v2098_v60  ;;  %v2185_v31 = vpack.c.bf16 %v2000_v0, %v2000_v0  ;;  %v2101_v47 = vrot.slane %v2001_v15, 5  ;;  %880 = vmatmul.bf16.gmra.mxu2 %v7282_v11  ;;  %v2186_v57 = vpack.c.bf16 %v2001_v15, %v2001_v15 }
 0x202   : > { %v2356_v32 = vrot.slane %v2354_v21, 2  ;;  %v2359_v8 = vrot.slane %v2357_v54, 3  ;;  %v2100_v10 = vsel %vm2036_vm3, %v2095_v27, %v2099_v13  ;;  %929 = vmatmul.bf16.gmra.mxu3 %v7282_v11  ;;  %v2556_v11 = vadd.f32 %v2555_v14, %v2506_v61 }
 0x203   : > { %v2363_v16 = vshrl.u32 %v2185_v31, 16  ;;  %v2366_v56 = vshll.u32 %v2185_v31, 16  ;;  %2165 = vst [vmem:[#allocation7 + $0xf0] sm:$0xff] %v2100_v10  ;;  %v2102_v50 = vsel %vm2036_vm3, %v2097_v39, %v2101_v47  ;;  %v2372_v30 = vshrl.u32 %v2186_v57, 16 }
 0x204   : > { %v2360_v45 = vor.u32 %v2359_v8, %v2356_v32  ;;  %2166 = vst [vmem:[#allocation7 + $0xf8] sm:$0xff] %v2102_v50  ;;  %v2375_v37 = vshll.u32 %v2186_v57, 16  ;;  %2635 = vrot.lane.b32.xlu1 %v2556_v11, %s6943_s17 }
 0x205   : > { %v2365_v52 = vrot.slane %v2363_v16, 2  ;;  %v2368_v7 = vrot.slane %v2366_v56, 3  ;;  %2593 = vst.msk [vmem:[#allocation9 + $0x10] sm:$0xff] %vm2590_vm5, %v2556_v11  ;;  %v2374_v44 = vrot.slane %v2372_v30, 2 }
 0x206   : > { %v2361_v43 = vsel %vm2219_vm4, %v8453_v55, %v2360_v45  ;;  %v2377_v22 = vrot.slane %v2375_v37, 3 }
 0x207   : > { %2579 = vmatmul.bf16.gmra.mxu1 %v2361_v43  ;;  %v2369_v25 = vor.u32 %v2368_v7, %v2365_v52  ;;  %v2557_v28 = vpop.f32.mrf.mxu1 }
 0x208   : > { %v2558_v55 = vadd.f32 %v2557_v28, %v2508_v29  ;;  %v2378_v34 = vor.u32 %v2377_v22, %v2374_v44 }
 0x209   : > { %v2370_v27 = vsel %vm2219_vm4, %v2351_v20, %v2369_v25  ;;  %v2511_v46 = vpop.f32.mrf.mxu0 }
 0x20a   : > { %2535 = vmatmul.bf16.gmra.mxu0 %v2370_v27  ;;  %2594 = vst.msk [vmem:[#allocation9 + $0x18] sm:$0xff] %vm2590_vm5, %v2558_v55  ;;  %v2379_v49 = vsel %vm2219_vm4, %v2360_v45, %v2378_v34 }
 0x20c   : > { %2637 = vrot.lane.b32.xlu1 %v2558_v55, %s6943_s17 }
 0x211   : > { %885 = vmatmul.bf16.gmra.mxu2 %v7306_v17  ;;  %v2513_v35 = vpop.f32.mrf.mxu0 }
 0x212   : > { %934 = vmatmul.bf16.gmra.mxu3 %v7306_v17 }
 0x217   : > { %2584 = vmatmul.bf16.gmra.mxu1 %v2379_v49  ;;  %v2560_v51 = vpop.f32.mrf.mxu1 }
 0x218   : > { %v2561_v36 = vadd.f32 %v2560_v51, %v2511_v46 }
 0x21a   : > { %2595 = vst.msk [vmem:[#allocation9 + $0x20] sm:$0xff] %vm2590_vm5, %v2561_v36  ;;  %2639 = vrot.lane.b32.xlu2 %v2561_v36, %s6943_s17 }
 0x21f   : > { %v2562_v48 = vpop.f32.mrf.mxu1 }
 0x220   : > { %v2563_v5 = vadd.f32 %v2562_v48, %v2513_v35 }
 0x221   : > { %890 = vmatmul.bf16.gmra.mxu2 %v7330_v23 }
 0x222   : > { %939 = vmatmul.bf16.gmra.mxu3 %v7330_v23  ;;  %2596 = vst.msk [vmem:[#allocation9 + $0x28] sm:$0xff] %vm2590_vm5, %v2563_v5  ;;  %2641 = vrot.lane.b32.xlu2 %v2563_v5, %s6943_s17 }
 0x223   : > { %v2516_v17 = vpop.f32.mrf.mxu0 }
 0x22b   : > { %v2518_v20 = vpop.f32.mrf.mxu0 }
 0x231   : > { %895 = vmatmul.bf16.gmra.mxu2 %v7262_v6 }
 0x232   : > { %944 = vmatmul.bf16.gmra.mxu3 %v7262_v6  ;;  %v2565_v19 = vpop.f32.mrf.mxu1 }
 0x233   : > { %v2566_v58 = vadd.f32 %v2565_v19, %v2516_v17 }
 0x235   : > { %2597 = vst.msk [vmem:[#allocation9 + $0x30] sm:$0xff] %vm2590_vm5, %v2566_v58  ;;  %2643 = vrot.lane.b32.xlu0 %v2566_v58, %s6943_s17 }
 0x23a   : > { %v2567_v41 = vpop.f32.mrf.mxu1 }
 0x23b   : > { %v2568_v23 = vadd.f32 %v2567_v41, %v2518_v20 }
 0x23d   : > { %2598 = vst.msk [vmem:[#allocation9 + $0x38] sm:$0xff] %vm2590_vm5, %v2568_v23  ;;  %2645 = vrot.lane.b32.xlu1 %v2568_v23, %s6943_s17 }
 0x241   : > { %900 = vmatmul.bf16.gmra.mxu2 %v7286_v12  ;;  %v2521_v40 = vpop.f32.mrf.mxu0 }
 0x242   : > { %949 = vmatmul.bf16.gmra.mxu3 %v7286_v12 }
 0x249   : > { %v2523_v2 = vpop.f32.mrf.mxu0 }
 0x24f   : > { %v2570_v9 = vpop.f32.mrf.mxu1 }
 0x250   : > { %v2571_v6 = vadd.f32 %v2570_v9, %v2521_v40 }
 0x251   : > { %905 = vmatmul.bf16.gmra.mxu2 %v7310_v18 }
 0x252   : > { %2599 = vst.msk [vmem:[#allocation9 + $0x40] sm:$0xff] %vm2590_vm5, %v2571_v6  ;;  %2647 = vrot.lane.b32.xlu2 %v2571_v6, %s6943_s17  ;;  %954 = vmatmul.bf16.gmra.mxu3 %v7310_v18 }
 0x257   : > { %v2572_v1 = vpop.f32.mrf.mxu1 }
 0x258   : > { %v2573_v26 = vadd.f32 %v2572_v1, %v2523_v2 }
 0x25a   : > { %2600 = vst.msk [vmem:[#allocation9 + $0x48] sm:$0xff] %vm2590_vm5, %v2573_v26  ;;  %2649 = vrot.lane.b32.xlu0 %v2573_v26, %s6943_s17  ;;  %v2609_v26 = vld [vmem:[#allocation17] sm:$0x3] }
 0x25e   : > { %v2526_v12 = vpop.f32.mrf.mxu0  ;;  %v2632_v0 = vpop.permute.xlu0 %2631 }
 0x261   : > { %910 = vmatmul.bf16.gmra.mxu2 %v7334_v24 }
 0x262   : > { %959 = vmatmul.bf16.gmra.mxu3 %v7334_v24 }
 0x266   : > { %v2528_v39 = vpop.f32.mrf.mxu0  ;;  %v2634_v60 = vpop.permute.xlu0 %2633 }
 0x269   : > { %v2575_v38 = vpop.f32.mrf.mxu1 }
 0x26a   : > { %v2576_v62 = vadd.f32 %v2575_v38, %v2526_v12  ;;  %v8567_v38 = vperm.slane %v2609_v26, 0 }
 0x26c   : > { %2601 = vst.msk [vmem:[#allocation9 + $0x50] sm:$0xff] %vm2590_vm5, %v2576_v62  ;;  %2651 = vrot.lane.b32.xlu1 %v2576_v62, %s6943_s17  ;;  %v8569_v62 = vperm.slane %v2609_v26, 1 }
 0x271   : > { %v2577_v18 = vpop.f32.mrf.mxu1  ;;  %5599 = vmatmul.msk.f32.vlgmr.msra.gmra.mxu2 %vm2663_vm6, %v2632_v0 }
 0x272   : > { %v2578_v33 = vadd.f32 %v2577_v18, %v2528_v39  ;;  %5615 = vmatmul.msk.f32.vlgmr.msra.gmra.mxu3 %vm2663_vm6, %v2632_v0 }
 0x274   : > { %2602 = vst.msk [vmem:[#allocation9 + $0x58] sm:$0xff] %vm2590_vm5, %v2578_v33  ;;  %2653 = vrot.lane.b32.xlu2 %v2578_v33, %s6943_s17  ;;  %v876_v4 = vpop.f32.mrf.mxu2  ;;  %v2640_v52 = vpop.permute.xlu2 %2639 }
 0x275   : > { %v925_v53 = vpop.f32.mrf.mxu3  ;;  %965 = vst [vmem:[#allocation5 + $0x98] sm:$0xff] %v876_v4 }
 0x276   : > { %966 = vst [vmem:[#allocation5 + $0xb8] sm:$0xff] %v925_v53  ;;  %v2636_v54 = vpop.permute.xlu1 %2635 }
 0x277   : > { %v2531_v24 = vpop.f32.mrf.mxu0 }
 0x279   : > { %5600 = vmatmul.msk.f32.gmra.mxu2 %vm2663_vm6, %v2634_v60 }
 0x27a   : > { %5616 = vmatmul.msk.f32.gmra.mxu3 %vm2663_vm6, %v2634_v60 }
 0x27c   : > { %v878_v3 = vpop.f32.mrf.mxu2  ;;  %v2642_v27 = vpop.permute.xlu2 %2641 }
 0x27d   : > { %v927_v59 = vpop.f32.mrf.mxu3  ;;  %967 = vst [vmem:[#allocation5 + $0xc8] sm:$0xff] %v878_v3 }
 0x27e   : > { %968 = vst [vmem:[#allocation5 + $0xc0] sm:$0xff] %v927_v59  ;;  %v2638_v47 = vpop.permute.xlu1 %2637 }
 0x27f   : > { %v2533_v13 = vpop.f32.mrf.mxu0 }
 0x281   : > { %5601 = vmatmul.msk.f32.gmra.mxu2 %vm2663_vm6, %v2636_v54 }
 0x282   : > { %5617 = vmatmul.msk.f32.gmra.mxu3 %vm2663_vm6, %v2636_v54 }
 0x284   : > { %v2580_v21 = vpop.f32.mrf.mxu1  ;;  %v881_v31 = vpop.f32.mrf.mxu2 }
 0x285   : > { %v2581_v15 = vadd.f32 %v2580_v21, %v2531_v24  ;;  %v930_v42 = vpop.f32.mrf.mxu3  ;;  %969 = vst [vmem:[#allocation5] sm:$0xff] %v881_v31 }
 0x286   : > { %970 = vst [vmem:[#allocation5 + $0x30] sm:$0xff] %v930_v42 }
 0x287   : > { %2603 = vst.msk [vmem:[#allocation9 + $0x60] sm:$0xff] %vm2590_vm5, %v2581_v15  ;;  %2655 = vrot.lane.b32.xlu0 %v2581_v15, %s6943_s17  ;;  %v2536_v56 = vpop.f32.mrf.mxu0 }
 0x289   : > { %5602 = vmatmul.msk.f32.gmra.mxu2 %vm2663_vm6, %v2638_v47 }
 0x28a   : > { %5618 = vmatmul.msk.f32.gmra.mxu3 %vm2663_vm6, %v2638_v47 }
 0x28c   : > { %v2582_v32 = vpop.f32.mrf.mxu1  ;;  %v883_v10 = vpop.f32.mrf.mxu2 }
 0x28d   : > { %v2583_v8 = vadd.f32 %v2582_v32, %v2533_v13  ;;  %v932_v16 = vpop.f32.mrf.mxu3  ;;  %971 = vst [vmem:[#allocation5 + $0x20] sm:$0xff] %v883_v10 }
 0x28e   : > { %972 = vst [vmem:[#allocation5 + $0x50] sm:$0xff] %v932_v16 }
 0x28f   : > { %2604 = vst.msk [vmem:[#allocation9 + $0x68] sm:$0xff] %vm2590_vm5, %v2583_v8  ;;  %2657 = vrot.lane.b32.xlu1 %v2583_v8, %s6943_s17  ;;  %v2538_v57 = vpop.f32.mrf.mxu0 }
 0x291   : > { %5603 = vmatmul.msk.f32.gmra.mxu2 %vm2663_vm6, %v2640_v52 }
 0x292   : > { %5619 = vmatmul.msk.f32.gmra.mxu3 %vm2663_vm6, %v2640_v52 }
 0x294   : > { %v2585_v45 = vpop.f32.mrf.mxu1  ;;  %v886_v7 = vpop.f32.mrf.mxu2 }
 0x295   : > { %v2586_v50 = vadd.f32 %v2585_v45, %v2536_v56  ;;  %v935_v43 = vpop.f32.mrf.mxu3  ;;  %973 = vst [vmem:[#allocation5 + $0x10] sm:$0xff] %v886_v7 }
 0x296   : > { %974 = vst [vmem:[#allocation5 + $0x80] sm:$0xff] %v935_v43 }
 0x297   : > { %2605 = vst.msk [vmem:[#allocation9 + $0x70] sm:$0xff] %vm2590_vm5, %v2586_v50  ;;  %2659 = vrot.lane.b32.xlu2 %v2586_v50, %s6943_s17 }
 0x299   : > { %5604 = vmatmul.msk.f32.gmra.mxu2 %vm2663_vm6, %v2642_v27 }
 0x29a   : > { %5620 = vmatmul.msk.f32.gmra.mxu3 %vm2663_vm6, %v2642_v27 }
 0x29c   : > { %v2587_v25 = vpop.f32.mrf.mxu1  ;;  %v888_v14 = vpop.f32.mrf.mxu2 }
 0x29d   : > { %v2588_v61 = vadd.f32 %v2587_v25, %v2538_v57  ;;  %v937_v11 = vpop.f32.mrf.mxu3  ;;  %975 = vst [vmem:[#allocation5 + $0x8] sm:$0xff] %v888_v14 }
 0x29e   : > { %976 = vst [vmem:[#allocation5 + $0xb0] sm:$0xff] %v937_v11 }
 0x29f   : > { %2606 = vst.msk [vmem:[#allocation9 + $0x78] sm:$0xff] %vm2590_vm5, %v2588_v61  ;;  %2661 = vrot.lane.b32.xlu0 %v2588_v61, %s6943_s17 }
 0x2a4   : > { %v891_v30 = vpop.f32.mrf.mxu2 }
 0x2a5   : > { %v940_v37 = vpop.f32.mrf.mxu3  ;;  %977 = vst [vmem:[#allocation5 + $0x88] sm:$0xff] %v891_v30 }
 0x2a6   : > { %978 = vst [vmem:[#allocation5 + $0xa0] sm:$0xff] %v940_v37 }
 0x2a7   : > { %v2644_v44 = vpop.permute.xlu0 %2643 }
 0x2a8   : > { %5605 = vmatmul.msk.f32.gmra.mxu2 %vm2663_vm6, %v2644_v44  ;;  %5621 = vmatmul.msk.f32.gmra.mxu3 %vm2663_vm6, %v2644_v44 }
 0x2ac   : > { %v893_v22 = vpop.f32.mrf.mxu2  ;;  %v2648_v49 = vpop.permute.xlu2 %2647 }
 0x2ad   : > { %v942_v29 = vpop.f32.mrf.mxu3  ;;  %979 = vst [vmem:[#allocation5 + $0xf0] sm:$0xff] %v893_v22 }
 0x2ae   : > { %980 = vst [vmem:[#allocation5 + $0xe0] sm:$0xff] %v942_v29 }
 0x2af   : > { %v2646_v28 = vpop.permute.xlu1 %2645 }
 0x2b0   : > { %5606 = vmatmul.msk.f32.gmra.mxu2 %vm2663_vm6, %v2646_v28  ;;  %5622 = vmatmul.msk.f32.gmra.mxu3 %vm2663_vm6, %v2646_v28 }
 0x2b4   : > { %v896_v55 = vpop.f32.mrf.mxu2 }
 0x2b5   : > { %v945_v34 = vpop.f32.mrf.mxu3  ;;  %981 = vst [vmem:[#allocation5 + $0x40] sm:$0xff] %v896_v55 }
 0x2b6   : > { %982 = vst [vmem:[#allocation5 + $0xf8] sm:$0xff] %v945_v34 }
 0x2b8   : > { %5607 = vmatmul.msk.f32.gmra.mxu2 %vm2663_vm6, %v2648_v49  ;;  %5623 = vmatmul.msk.f32.gmra.mxu3 %vm2663_vm6, %v2648_v49 }
 0x2bc   : > { %v898_v46 = vpop.f32.mrf.mxu2 }
 0x2bd   : > { %v947_v51 = vpop.f32.mrf.mxu3  ;;  %983 = vst [vmem:[#allocation5 + $0x70] sm:$0xff] %v898_v46 }
 0x2be   : > { %984 = vst [vmem:[#allocation5 + $0x78] sm:$0xff] %v947_v51 }
 0x2c4   : > { %v901_v36 = vpop.f32.mrf.mxu2 }
 0x2c5   : > { %v950_v35 = vpop.f32.mrf.mxu3  ;;  %985 = vst [vmem:[#allocation5 + $0xd0] sm:$0xff] %v901_v36 }
 0x2c6   : > { %986 = vst [vmem:[#allocation5 + $0xd8] sm:$0xff] %v950_v35 }
 0x2cc   : > { %v2650_v48 = vpop.permute.xlu0 %2649  ;;  %v903_v5 = vpop.f32.mrf.mxu2 }
 0x2cd   : > { %5608 = vmatmul.msk.f32.gmra.mxu2 %vm2663_vm6, %v2650_v48  ;;  %5624 = vmatmul.msk.f32.gmra.mxu3 %vm2663_vm6, %v2650_v48  ;;  %987 = vst [vmem:[#allocation5 + $0x28] sm:$0xff] %v903_v5  ;;  %v952_v17 = vpop.f32.mrf.mxu3 }
 0x2ce   : > { %988 = vst [vmem:[#allocation5 + $0x58] sm:$0xff] %v952_v17  ;;  %v2654_v40 = vpop.permute.xlu2 %2653 }
 0x2d4   : > { %v906_v19 = vpop.f32.mrf.mxu2 }
 0x2d5   : > { %989 = vst [vmem:[#allocation5 + $0x48] sm:$0xff] %v906_v19  ;;  %v955_v58 = vpop.f32.mrf.mxu3 }
 0x2d6   : > { %990 = vst [vmem:[#allocation5 + $0x68] sm:$0xff] %v955_v58 }
 0x2dc   : > { %v908_v41 = vpop.f32.mrf.mxu2 }
 0x2dd   : > { %991 = vst [vmem:[#allocation5 + $0x90] sm:$0xff] %v908_v41  ;;  %v957_v23 = vpop.f32.mrf.mxu3 }
 0x2de   : > { %v2652_v20 = vpop.permute.xlu1 %2651  ;;  %992 = vst [vmem:[#allocation5 + $0x18] sm:$0xff] %v957_v23 }
 0x2df   : > { %5609 = vmatmul.msk.f32.gmra.mxu2 %vm2663_vm6, %v2652_v20  ;;  %5625 = vmatmul.msk.f32.gmra.mxu3 %vm2663_vm6, %v2652_v20 }
 0x2e4   : > { %v911_v9 = vpop.f32.mrf.mxu2 }
 0x2e5   : > { %993 = vst [vmem:[#allocation5 + $0xe8] sm:$0xff] %v911_v9  ;;  %v960_v6 = vpop.f32.mrf.mxu3 }
 0x2e6   : > { %994 = vst [vmem:[#allocation5 + $0x60] sm:$0xff] %v960_v6 }
 0x2e7   : > { %5610 = vmatmul.msk.f32.gmra.mxu2 %vm2663_vm6, %v2654_v40  ;;  %5626 = vmatmul.msk.f32.gmra.mxu3 %vm2663_vm6, %v2654_v40 }
 0x2ec   : > { %v913_v2 = vpop.f32.mrf.mxu2 }
 0x2ed   : > { %995 = vst [vmem:[#allocation5 + $0x38] sm:$0xff] %v913_v2  ;;  %v962_v1 = vpop.f32.mrf.mxu3 }
 0x2ee   : > { %996 = vst [vmem:[#allocation5 + $0xa8] sm:$0xff] %v962_v1 }
 0x2f1   : > { %v2660_v32 = vpop.permute.xlu2 %2659 }
 0x2f4   : > { %v2713_v39 = vpop.f32.mrf.mxu2 }
 0x2f5   : > { %v2778_v18 = vpop.f32.mrf.mxu3  ;;  %v8574_v33 = vadd.f32 %v2713_v39, %v8567_v38 }
 0x2f6   : > { %v8577_v4 = vadd.f32 %v2778_v18, %v8569_v62 }
 0x2f7   : > { %v2858_v53 = vmin.f32 %v8574_v33, 20.0  ;;  %vm2826_vm7 = vcmp.gt.f32.partialorder %v8574_v33, 20.0 }
 0x2f8   : > { %v2859_v0 = vmin.f32 %v8577_v4, 20.0  ;;  %vm2827_vm8 = vcmp.gt.f32.partialorder %v8577_v4, 20.0 }
 0x2f9   : > { %v2656_v12 = vpop.permute.xlu0 %2655  ;;  %v2890_v3 = vmul.f32 1.442695, %v2858_v53 }
 0x2fa   : > { %5611 = vmatmul.msk.f32.gmra.mxu2 %vm2663_vm6, %v2656_v12  ;;  %5627 = vmatmul.msk.f32.gmra.mxu3 %vm2663_vm6, %v2656_v12  ;;  %v2892_v59 = vmul.f32 1.442695, %v2859_v0 }
 0x2fb   : > { %6136 = vpow2.f32 %v2890_v3 }
 0x2fc   : > { %6138 = vpow2.f32 %v2892_v59  ;;  %v2716_v60 = vpop.f32.mrf.mxu2 }
 0x2fd   : > { %v2781_v21 = vpop.f32.mrf.mxu3  ;;  %v8584_v54 = vadd.f32 %v2716_v60, %v8567_v38 }
 0x2fe   : > { %v8587_v15 = vadd.f32 %v2781_v21, %v8569_v62 }
 0x2ff   : > { %v2860_v13 = vmin.f32 %v8584_v54, 20.0  ;;  %vm2828_vm11 = vcmp.gt.f32.partialorder %v8584_v54, 20.0 }
 0x300   : > { %v2861_v31 = vmin.f32 %v8587_v15, 20.0  ;;  %vm2829_vm13 = vcmp.gt.f32.partialorder %v8587_v15, 20.0 }
 0x301   : > { %v2658_v24 = vpop.permute.xlu1 %2657  ;;  %v6137_v42 = vpop.eup %6136  ;;  %v2894_v8 = vmul.f32 1.442695, %v2860_v13 }
 0x302   : > { %5612 = vmatmul.msk.f32.gmra.mxu2 %vm2663_vm6, %v2658_v24  ;;  %5628 = vmatmul.msk.f32.gmra.mxu3 %vm2663_vm6, %v2658_v24  ;;  %v6139_v47 = vpop.eup %6138  ;;  %v2954_v10 = vadd.f32 1.0, %v6137_v42  ;;  %v2896_v16 = vmul.f32 1.442695, %v2861_v31  ;;  %v2957_v56 = vmul.f32 -0.5, %v6137_v42  ;;  %v2960_v14 = vand.u32 2147483647, %v6137_v42 }
 0x303   : > { %v2963_v45 = vadd.f32 1.0, %v6139_v47  ;;  %6140 = vpow2.f32 %v2894_v8  ;;  %v2966_v50 = vmul.f32 -0.5, %v6139_v47  ;;  %v2969_v44 = vand.u32 2147483647, %v6139_v47 }
 0x304   : > { %6142 = vlog2.f32 %v2954_v10  ;;  %v2719_v52 = vpop.f32.mrf.mxu2  ;;  %v2958_v25 = vadd.f32 1.0, %v2957_v56  ;;  %vm2961_vm9 = vcmp.lt.f32.partialorder %v2960_v14, 0.0004427343 }
 0x305   : > { %v2784_v7 = vpop.f32.mrf.mxu3  ;;  %6144 = vlog2.f32 %v2963_v45  ;;  %v8594_v43 = vadd.f32 %v2719_v52, %v8567_v38  ;;  %v2967_v11 = vadd.f32 1.0, %v2966_v50  ;;  %vm2970_vm10 = vcmp.lt.f32.partialorder %v2969_v44, 0.0004427343 }
 0x306   : > { %6146 = vpow2.f32 %v2896_v16  ;;  %v8597_v57 = vadd.f32 %v2784_v7, %v8569_v62  ;;  %v2959_v51 = vmul.f32 %v6137_v42, %v2958_v25 }
 0x307   : > { %v2862_v61 = vmin.f32 %v8594_v43, 20.0  ;;  %v2968_v48 = vmul.f32 %v6139_v47, %v2967_v11  ;;  %vm2830_vm4 = vcmp.gt.f32.partialorder %v8594_v43, 20.0 }
 0x308   : > { %v2863_v27 = vmin.f32 %v8597_v57, 20.0  ;;  %vm2831_vm5 = vcmp.gt.f32.partialorder %v8597_v57, 20.0 }
 0x309   : > { %v6141_v30 = vpop.eup %6140  ;;  %v2898_v22 = vmul.f32 1.442695, %v2862_v61 }
 0x30a   : > { %5613 = vmatmul.msk.f32.gmra.mxu2 %vm2663_vm6, %v2660_v32  ;;  %5629 = vmatmul.msk.f32.gmra.mxu3 %vm2663_vm6, %v2660_v32  ;;  %v6143_v29 = vpop.eup %6142  ;;  %v2972_v28 = vadd.f32 1.0, %v6141_v30  ;;  %v2975_v55 = vmul.f32 -0.5, %v6141_v30  ;;  %v2900_v34 = vmul.f32 1.442695, %v2863_v27  ;;  %v2978_v6 = vand.u32 2147483647, %v6141_v30 }
 0x30b   : > { %v6145_v49 = vpop.eup %6144  ;;  %v2956_v46 = vmul.f32 0.6931472, %v6143_v29  ;;  %6148 = vpow2.f32 %v2898_v22 }
 0x30c   : > { %v6147_v36 = vpop.eup %6146  ;;  %v2965_v35 = vmul.f32 0.6931472, %v6145_v49  ;;  %6150 = vlog2.f32 %v2972_v28  ;;  %v2722_v5 = vpop.f32.mrf.mxu2  ;;  %v2976_v40 = vadd.f32 1.0, %v2975_v55  ;;  %vm2979_vm12 = vcmp.lt.f32.partialorder %v2978_v6, 0.0004427343 }
 0x30d   : > { %v2787_v17 = vpop.f32.mrf.mxu3  ;;  %v2962_v19 = vsel %vm2961_vm9, %v2959_v51, %v2956_v46  ;;  %v2981_v58 = vadd.f32 1.0, %v6147_v36  ;;  %v2984_v20 = vmul.f32 -0.5, %v6147_v36  ;;  %6152 = vpow2.f32 %v2900_v34 }
 0x30e   : > { %v3242_v41 = vsel %vm2826_vm7, %v8574_v33, %v2962_v19  ;;  %v2971_v23 = vsel %vm2970_vm10, %v2968_v48, %v2965_v35  ;;  %v8612_v2 = vadd.f32 %v2722_v5, %v8567_v38  ;;  %v8615_v1 = vadd.f32 %v2787_v17, %v8569_v62 }
 0x30f   : > { %3274 = vst [vmem:[#allocation6] sm:$0xff] %v3242_v41  ;;  %v3243_v9 = vsel %vm2827_vm8, %v8577_v4, %v2971_v23  ;;  %6154 = vlog2.f32 %v2981_v58  ;;  %v2985_v12 = vadd.f32 1.0, %v2984_v20  ;;  %v2987_v39 = vand.u32 2147483647, %v6147_v36 }
 0x310   : > { %3275 = vst [vmem:[#allocation6 + $0x8] sm:$0xff] %v3243_v9  ;;  %v2977_v33 = vmul.f32 %v6141_v30, %v2976_v40  ;;  %v2864_v3 = vmin.f32 %v8612_v2, 20.0  ;;  %v2865_v4 = vmin.f32 %v8615_v1, 20.0  ;;  %vm2832_vm7 = vcmp.gt.f32.partialorder %v8612_v2, 20.0 }
 0x311   : > { %v2662_v37 = vpop.permute.xlu0 %2661  ;;  %v6149_v26 = vpop.eup %6148  ;;  %v2986_v42 = vmul.f32 %v6147_v36, %v2985_v12  ;;  %vm8621_vm14 = vcmp.lt.f32.partialorder %v2987_v39, 0.0004427343  ;;  %vm2833_vm8 = vcmp.gt.f32.partialorder %v8615_v1, 20.0 }
 0x312   : > { %5614 = vmatmul.msk.f32.gmra.mxu2 %vm2663_vm6, %v2662_v37  ;;  %5630 = vmatmul.msk.f32.gmra.mxu3 %vm2663_vm6, %v2662_v37  ;;  %v6151_v18 = vpop.eup %6150  ;;  %v2990_v53 = vadd.f32 1.0, %v6149_v26  ;;  %v2993_v24 = vmul.f32 -0.5, %v6149_v26  ;;  %v2902_v56 = vmul.f32 1.442695, %v2864_v3  ;;  %v2996_v50 = vand.u32 2147483647, %v6149_v26 }
 0x313   : > { %v2974_v0 = vmul.f32 0.6931472, %v6151_v18  ;;  %v6153_v59 = vpop.eup %6152  ;;  %v2904_v52 = vmul.f32 1.442695, %v2865_v4 }
 0x314   : > { %6156 = vlog2.f32 %v2990_v53  ;;  %v2725_v60 = vpop.f32.mrf.mxu2  ;;  %v2999_v8 = vadd.f32 1.0, %v6153_v59  ;;  %v3002_v16 = vmul.f32 -0.5, %v6153_v59  ;;  %v2994_v45 = vadd.f32 1.0, %v2993_v24 }
 0x315   : > { %v2790_v21 = vpop.f32.mrf.mxu3  ;;  %v6155_v13 = vpop.eup %6154  ;;  %v2980_v31 = vsel %vm2979_vm12, %v2977_v33, %v2974_v0  ;;  %v8629_v25 = vadd.f32 %v2725_v60, %v8567_v38  ;;  %v3005_v14 = vand.u32 2147483647, %v6153_v59  ;;  %vm2997_vm15 = vcmp.lt.f32.partialorder %v2996_v50, 0.0004427343 }
 0x316   : > { %v3244_v47 = vsel %vm2828_vm11, %v8584_v54, %v2980_v31  ;;  %v2983_v10 = vmul.f32 0.6931472, %v6155_v13  ;;  %6158 = vlog2.f32 %v2999_v8  ;;  %v8632_v61 = vadd.f32 %v2790_v21, %v8569_v62 }
 0x317   : > { %3276 = vst [vmem:[#allocation6 + $0x10] sm:$0xff] %v3244_v47  ;;  %6160 = vpow2.f32 %v2902_v56  ;;  %v3003_v27 = vadd.f32 1.0, %v3002_v16  ;;  %v2866_v30 = vmin.f32 %v8629_v25, 20.0  ;;  %v2995_v22 = vmul.f32 %v6149_v26, %v2994_v45 }
 0x318   : > { %v2989_v7 = vsel %vm8621_vm14, %v2986_v42, %v2983_v10  ;;  %6162 = vpow2.f32 %v2904_v52  ;;  %v2867_v37 = vmin.f32 %v8632_v61, 20.0  ;;  %vm8641_vm6 = vcmp.lt.f32.partialorder %v3005_v14, 0.0004427343 }
 0x319   : > { %v3245_v54 = vsel %vm2829_vm13, %v8587_v15, %v2989_v7  ;;  %v2906_v29 = vmul.f32 1.442695, %v2866_v30  ;;  %v3004_v48 = vmul.f32 %v6153_v59, %v3003_v27  ;;  %vm2834_vm11 = vcmp.gt.f32.partialorder %v8629_v25, 20.0 }
 0x31a   : > { %v6157_v11 = vpop.eup %6156  ;;  %3277 = vst [vmem:[#allocation6 + $0x18] sm:$0xff] %v3245_v54  ;;  %v2908_v28 = vmul.f32 1.442695, %v2867_v37  ;;  %vm2835_vm12 = vcmp.gt.f32.partialorder %v8632_v61, 20.0 }
 0x31b   : > { %v2992_v44 = vmul.f32 0.6931472, %v6157_v11  ;;  %6164 = vpow2.f32 %v2906_v29 }
 0x31c   : > { %v2728_v55 = vpop.f32.mrf.mxu2  ;;  %v6159_v34 = vpop.eup %6158  ;;  %6166 = vpow2.f32 %v2908_v28 }
 0x31d   : > { %v2998_v49 = vsel %vm2997_vm15, %v2995_v22, %v2992_v44  ;;  %v2793_v46 = vpop.f32.mrf.mxu3  ;;  %v6161_v51 = vpop.eup %6160  ;;  %v3001_v35 = vmul.f32 0.6931472, %v6159_v34  ;;  %v8647_v19 = vadd.f32 %v2728_v55, %v8567_v38 }
 0x31e   : > { %v3246_v36 = vsel %vm2830_vm4, %v8594_v43, %v2998_v49  ;;  %v6163_v5 = vpop.eup %6162  ;;  %v3008_v17 = vadd.f32 1.0, %v6161_v51  ;;  %v8650_v58 = vadd.f32 %v2793_v46, %v8569_v62  ;;  %v3011_v41 = vmul.f32 -0.5, %v6161_v51 }
 0x31f   : > { %3278 = vst [vmem:[#allocation6 + $0x20] sm:$0xff] %v3246_v36  ;;  %v3007_v20 = vsel %vm8641_vm6, %v3004_v48, %v3001_v35  ;;  %v3017_v23 = vadd.f32 1.0, %v6163_v5  ;;  %v3020_v40 = vmul.f32 -0.5, %v6163_v5  ;;  %v3014_v9 = vand.u32 2147483647, %v6161_v51 }
 0x320   : > { %v3247_v43 = vsel %vm2831_vm5, %v8597_v57, %v3007_v20  ;;  %6168 = vlog2.f32 %v3008_v17  ;;  %v3023_v6 = vand.u32 2147483647, %v6163_v5  ;;  %v2868_v26 = vmin.f32 %v8647_v19, 20.0 }
 0x321   : > { %3279 = vst [vmem:[#allocation6 + $0x28] sm:$0xff] %v3247_v43  ;;  %6170 = vlog2.f32 %v3017_v23  ;;  %v2869_v12 = vmin.f32 %v8650_v58, 20.0  ;;  %v6165_v39 = vpop.eup %6164  ;;  %v3012_v18 = vadd.f32 1.0, %v3011_v41  ;;  %v3021_v33 = vadd.f32 1.0, %v3020_v40 }
 0x322   : > { %v6167_v53 = vpop.eup %6166  ;;  %v3026_v0 = vadd.f32 1.0, %v6165_v39  ;;  %v2910_v24 = vmul.f32 1.442695, %v2868_v26  ;;  %vm8661_vm9 = vcmp.lt.f32.partialorder %v3014_v9, 0.0004427343  ;;  %v3029_v3 = vmul.f32 -0.5, %v6165_v39 }
 0x323   : > { %v3035_v4 = vadd.f32 1.0, %v6167_v53  ;;  %v2912_v59 = vmul.f32 1.442695, %v2869_v12  ;;  %vm8665_vm10 = vcmp.lt.f32.partialorder %v3023_v6, 0.0004427343  ;;  %v3038_v42 = vmul.f32 -0.5, %v6167_v53 }
 0x324   : > { %6172 = vlog2.f32 %v3026_v0  ;;  %v3013_v10 = vmul.f32 %v6161_v51, %v3012_v18  ;;  %v3022_v16 = vmul.f32 %v6163_v5, %v3021_v33  ;;  %v3032_v45 = vand.u32 2147483647, %v6165_v39 }
 0x325   : > { %6174 = vlog2.f32 %v3035_v4  ;;  %v3041_v50 = vand.u32 2147483647, %v6167_v53  ;;  %v3030_v7 = vadd.f32 1.0, %v3029_v3  ;;  %v3039_v27 = vadd.f32 1.0, %v3038_v42 }
 0x326   : > { %v6169_v13 = vpop.eup %6168  ;;  %6176 = vpow2.f32 %v2910_v24  ;;  %vm3033_vm13 = vcmp.lt.f32.partialorder %v3032_v45, 0.0004427343  ;;  %vm2836_vm15 = vcmp.gt.f32.partialorder %v8647_v19, 20.0  ;;  %vm2837_vm4 = vcmp.gt.f32.partialorder %v8650_v58, 20.0 }
 0x327   : > { %v6171_v8 = vpop.eup %6170  ;;  %v3010_v47 = vmul.f32 0.6931472, %v6169_v13  ;;  %6178 = vpow2.f32 %v2912_v59  ;;  %v3031_v55 = vmul.f32 %v6165_v39, %v3030_v7  ;;  %v3040_v51 = vmul.f32 %v6167_v53, %v3039_v27 }
 0x328   : > { %v3019_v56 = vmul.f32 0.6931472, %v6171_v8  ;;  %vm3042_vm14 = vcmp.lt.f32.partialorder %v3041_v50, 0.0004427343 }
 0x329   : > { %v3016_v52 = vsel %vm8661_vm9, %v3013_v10, %v3010_v47 }
 0x32a   : > { %v3248_v14 = vsel %vm2832_vm7, %v8612_v2, %v3016_v52  ;;  %v3025_v11 = vsel %vm8665_vm10, %v3022_v16, %v3019_v56  ;;  %v6173_v22 = vpop.eup %6172 }
 0x32b   : > { %v2731_v60 = vpop.f32.mrf.mxu2  ;;  %v2796_v21 = vpop.f32.mrf.mxu3  ;;  %3280 = vst [vmem:[#allocation6 + $0x30] sm:$0xff] %v3248_v14  ;;  %v3249_v37 = vsel %vm2833_vm8, %v8615_v1, %v3025_v11  ;;  %v3028_v28 = vmul.f32 0.6931472, %v6173_v22 }
 0x32c   : > { %v8670_v32 = vadd.f32 %v2731_v60, %v8567_v38  ;;  %v8681_v30 = vadd.f32 %v2796_v21, %v8569_v62  ;;  %3281 = vst [vmem:[#allocation6 + $0x38] sm:$0xff] %v3249_v37  ;;  %v6175_v29 = vpop.eup %6174 }
 0x32d   : > { %v6177_v15 = vpop.eup %6176  ;;  %v3037_v46 = vmul.f32 0.6931472, %v6175_v29  ;;  %v3034_v35 = vsel %vm3033_vm13, %v3031_v55, %v3028_v28 }
 0x32e   : > { %v2870_v54 = vmin.f32 %v8670_v32, 20.0  ;;  %v2871_v2 = vmin.f32 %v8681_v30, 20.0  ;;  %v6179_v36 = vpop.eup %6178  ;;  %v3044_v48 = vadd.f32 1.0, %v6177_v15  ;;  %v3047_v5 = vmul.f32 -0.5, %v6177_v15 }
 0x32f   : > { %v3250_v20 = vsel %vm2834_vm11, %v8629_v25, %v3034_v35  ;;  %v3043_v41 = vsel %vm3042_vm14, %v3040_v51, %v3037_v46  ;;  %v3053_v23 = vadd.f32 1.0, %v6179_v36  ;;  %v3056_v40 = vmul.f32 -0.5, %v6179_v36 }
 0x330   : > { %v2914_v44 = vmul.f32 1.442695, %v2870_v54  ;;  %v2916_v1 = vmul.f32 1.442695, %v2871_v2  ;;  %3282 = vst [vmem:[#allocation6 + $0x40] sm:$0xff] %v3250_v20  ;;  %v3251_v43 = vsel %vm2835_vm12, %v8632_v61, %v3043_v41  ;;  %v3048_v26 = vadd.f32 1.0, %v3047_v5 }
 0x331   : > { %3283 = vst [vmem:[#allocation6 + $0x48] sm:$0xff] %v3251_v43  ;;  %v3050_v12 = vand.u32 2147483647, %v6177_v15  ;;  %v3057_v39 = vadd.f32 1.0, %v3056_v40  ;;  %v3059_v18 = vand.u32 2147483647, %v6179_v36 }
 0x332   : > { %6180 = vpow2.f32 %v2914_v44  ;;  %v3049_v60 = vmul.f32 %v6177_v15, %v3048_v26  ;;  %vm2838_vm7 = vcmp.gt.f32.partialorder %v8670_v32, 20.0  ;;  %vm2839_vm10 = vcmp.gt.f32.partialorder %v8681_v30, 20.0 }
 0x333   : > { %v2734_v34 = vpop.f32.mrf.mxu2  ;;  %v2799_v49 = vpop.f32.mrf.mxu3  ;;  %6182 = vlog2.f32 %v3044_v48  ;;  %vm8711_vm5 = vcmp.lt.f32.partialorder %v3050_v12, 0.0004427343  ;;  %v3058_v8 = vmul.f32 %v6179_v36, %v3057_v39  ;;  %vm8715_vm6 = vcmp.lt.f32.partialorder %v3059_v18, 0.0004427343 }
 0x334   : > { %v8690_v17 = vadd.f32 %v2734_v34, %v8567_v38  ;;  %v8699_v9 = vadd.f32 %v2799_v49, %v8569_v62  ;;  %6184 = vlog2.f32 %v3053_v23 }
 0x335   : > { %6186 = vpow2.f32 %v2916_v1 }
 0x336   : > { %v2872_v25 = vmin.f32 %v8690_v17, 20.0  ;;  %v2873_v61 = vmin.f32 %v8699_v9, 20.0  ;;  %vm2840_vm11 = vcmp.gt.f32.partialorder %v8690_v17, 20.0  ;;  %vm2841_vm13 = vcmp.gt.f32.partialorder %v8699_v9, 20.0 }
 0x338   : > { %v6181_v6 = vpop.eup %6180  ;;  %v2918_v0 = vmul.f32 1.442695, %v2872_v25  ;;  %v2920_v13 = vmul.f32 1.442695, %v2873_v61 }
 0x339   : > { %v3062_v33 = vadd.f32 1.0, %v6181_v6  ;;  %v3065_v53 = vmul.f32 -0.5, %v6181_v6  ;;  %v6183_v59 = vpop.eup %6182  ;;  %v3068_v7 = vand.u32 2147483647, %v6181_v6 }
 0x33a   : > { %v6185_v31 = vpop.eup %6184  ;;  %v3046_v42 = vmul.f32 0.6931472, %v6183_v59 }
 0x33b   : > { %v2737_v24 = vpop.f32.mrf.mxu2  ;;  %v2802_v57 = vpop.f32.mrf.mxu3  ;;  %6188 = vlog2.f32 %v3062_v33  ;;  %v3055_v56 = vmul.f32 0.6931472, %v6185_v31  ;;  %v3066_v45 = vadd.f32 1.0, %v3065_v53  ;;  %vm3069_vm8 = vcmp.lt.f32.partialorder %v3068_v7, 0.0004427343 }
 0x33c   : > { %v8706_v3 = vadd.f32 %v2737_v24, %v8567_v38  ;;  %v8709_v4 = vadd.f32 %v2802_v57, %v8569_v62  ;;  %6190 = vpow2.f32 %v2918_v0  ;;  %v6187_v16 = vpop.eup %6186  ;;  %v3052_v52 = vsel %vm8711_vm5, %v3049_v60, %v3046_v42 }
 0x33d   : > { %6192 = vpow2.f32 %v2920_v13  ;;  %v3071_v54 = vadd.f32 1.0, %v6187_v16  ;;  %v3074_v14 = vmul.f32 -0.5, %v6187_v16  ;;  %v3252_v11 = vsel %vm2836_vm15, %v8647_v19, %v3052_v52 }
 0x33e   : > { %v2874_v10 = vmin.f32 %v8706_v3, 20.0  ;;  %v2875_v50 = vmin.f32 %v8709_v4, 20.0  ;;  %v3061_v27 = vsel %vm8715_vm6, %v3058_v8, %v3055_v56  ;;  %3284 = vst [vmem:[#allocation6 + $0x50] sm:$0xff] %v3252_v11  ;;  %v3067_v55 = vmul.f32 %v6181_v6, %v3066_v45 }
 0x33f   : > { %v3253_v2 = vsel %vm2837_vm4, %v8650_v58, %v3061_v27  ;;  %6194 = vlog2.f32 %v3071_v54  ;;  %v3075_v15 = vadd.f32 1.0, %v3074_v14  ;;  %v3077_v1 = vand.u32 2147483647, %v6187_v16 }
 0x340   : > { %v2922_v37 = vmul.f32 1.442695, %v2874_v10  ;;  %v2924_v44 = vmul.f32 1.442695, %v2875_v50  ;;  %3285 = vst [vmem:[#allocation6 + $0x58] sm:$0xff] %v3253_v2  ;;  %vm2842_vm4 = vcmp.gt.f32.partialorder %v8706_v3, 20.0 }
 0x341   : > { %v6189_v22 = vpop.eup %6188  ;;  %v3076_v20 = vmul.f32 %v6187_v16, %v3075_v15  ;;  %vm3078_vm9 = vcmp.lt.f32.partialorder %v3077_v1, 0.0004427343  ;;  %vm2843_vm6 = vcmp.gt.f32.partialorder %v8709_v4, 20.0 }
 0x342   : > { %v6191_v29 = vpop.eup %6190  ;;  %v3064_v28 = vmul.f32 0.6931472, %v6189_v22  ;;  %6196 = vpow2.f32 %v2922_v37 }
 0x343   : > { %v3080_v19 = vadd.f32 1.0, %v6191_v29  ;;  %v6193_v34 = vpop.eup %6192  ;;  %v3083_v46 = vmul.f32 -0.5, %v6191_v29  ;;  %6198 = vpow2.f32 %v2924_v44  ;;  %v3086_v23 = vand.u32 2147483647, %v6191_v29 }
 0x344   : > { %v3070_v49 = vsel %vm3069_vm8, %v3067_v55, %v3064_v28  ;;  %v3089_v58 = vadd.f32 1.0, %v6193_v34  ;;  %v3092_v35 = vmul.f32 -0.5, %v6193_v34  ;;  %v3095_v33 = vand.u32 2147483647, %v6193_v34 }
 0x345   : > { %v3254_v51 = vsel %vm2838_vm7, %v8670_v32, %v3070_v49  ;;  %6200 = vlog2.f32 %v3080_v19  ;;  %v6195_v36 = vpop.eup %6194  ;;  %v3084_v41 = vadd.f32 1.0, %v3083_v46  ;;  %vm3087_vm12 = vcmp.lt.f32.partialorder %v3086_v23, 0.0004427343 }
 0x346   : > { %3286 = vst [vmem:[#allocation6 + $0x60] sm:$0xff] %v3254_v51  ;;  %v3073_v5 = vmul.f32 0.6931472, %v6195_v36  ;;  %6202 = vlog2.f32 %v3089_v58  ;;  %v3093_v25 = vadd.f32 1.0, %v3092_v35  ;;  %vm3096_vm14 = vcmp.lt.f32.partialorder %v3095_v33, 0.0004427343 }
 0x347   : > { %v3085_v18 = vmul.f32 %v6191_v29, %v3084_v41 }
 0x348   : > { %v6197_v48 = vpop.eup %6196  ;;  %v3079_v26 = vsel %vm3078_vm9, %v3076_v20, %v3073_v5  ;;  %v3094_v42 = vmul.f32 %v6193_v34, %v3093_v25 }
 0x349   : > { %v3098_v40 = vadd.f32 1.0, %v6197_v48  ;;  %v3101_v43 = vmul.f32 -0.5, %v6197_v48  ;;  %v6199_v6 = vpop.eup %6198  ;;  %v3255_v12 = vsel %vm2839_vm10, %v8681_v30, %v3079_v26  ;;  %v3104_v21 = vand.u32 2147483647, %v6197_v48 }
 0x34a   : > { %3287 = vst [vmem:[#allocation6 + $0x68] sm:$0xff] %v3255_v12  ;;  %v3107_v53 = vadd.f32 1.0, %v6199_v6  ;;  %v3110_v61 = vmul.f32 -0.5, %v6199_v6  ;;  %v3113_v7 = vand.u32 2147483647, %v6199_v6 }
 0x34b   : > { %v6201_v32 = vpop.eup %6200  ;;  %6204 = vlog2.f32 %v3098_v40  ;;  %v3102_v0 = vadd.f32 1.0, %v3101_v43  ;;  %vm3105_vm15 = vcmp.lt.f32.partialorder %v3104_v21, 0.0004427343 }
 0x34c   : > { %v3082_v39 = vmul.f32 0.6931472, %v6201_v32  ;;  %v6203_v59 = vpop.eup %6202  ;;  %6206 = vlog2.f32 %v3107_v53  ;;  %v3111_v45 = vadd.f32 1.0, %v3110_v61  ;;  %vm3114_vm5 = vcmp.lt.f32.partialorder %v3113_v7, 0.0004427343 }
 0x34d   : > { %v3091_v31 = vmul.f32 0.6931472, %v6203_v59  ;;  %v3103_v56 = vmul.f32 %v6197_v48, %v3102_v0 }
 0x34e   : > { %v3088_v60 = vsel %vm3087_vm12, %v3085_v18, %v3082_v39  ;;  %v3112_v22 = vmul.f32 %v6199_v6, %v3111_v45 }
 0x34f   : > { %v3256_v13 = vsel %vm2840_vm11, %v8690_v17, %v3088_v60  ;;  %v3097_v16 = vsel %vm3096_vm14, %v3094_v42, %v3091_v31 }
 0x350   : > { %v2740_v24 = vpop.f32.mrf.mxu2  ;;  %v2805_v57 = vpop.f32.mrf.mxu3  ;;  %3288 = vst [vmem:[#allocation6 + $0x70] sm:$0xff] %v3256_v13  ;;  %v3257_v52 = vsel %vm2841_vm13, %v8699_v9, %v3097_v16 }
 0x351   : > { %v8737_v30 = vadd.f32 %v2740_v24, %v8567_v38  ;;  %v8741_v8 = vadd.f32 %v2805_v57, %v8569_v62  ;;  %v6205_v10 = vpop.eup %6204  ;;  %3289 = vst [vmem:[#allocation6 + $0x78] sm:$0xff] %v3257_v52 }
 0x352   : > { %v3100_v17 = vmul.f32 0.6931472, %v6205_v10  ;;  %v6207_v11 = vpop.eup %6206 }
 0x353   : > { %v2876_v47 = vmin.f32 %v8737_v30, 20.0  ;;  %v2877_v50 = vmin.f32 %v8741_v8, 20.0  ;;  %v3109_v44 = vmul.f32 0.6931472, %v6207_v11  ;;  %vm2844_vm8 = vcmp.gt.f32.partialorder %v8737_v30, 20.0 }
 0x354   : > { %v3106_v27 = vsel %vm3105_vm15, %v3103_v56, %v3100_v17  ;;  %vm2845_vm10 = vcmp.gt.f32.partialorder %v8741_v8, 20.0 }
 0x355   : > { %v2926_v54 = vmul.f32 1.442695, %v2876_v47  ;;  %v2928_v14 = vmul.f32 1.442695, %v2877_v50  ;;  %v3258_v37 = vsel %vm2842_vm4, %v8706_v3, %v3106_v27  ;;  %v3115_v9 = vsel %vm3114_vm5, %v3112_v22, %v3109_v44 }
 0x356   : > { %3290 = vst [vmem:[#allocation6 + $0x80] sm:$0xff] %v3258_v37  ;;  %v3259_v2 = vsel %vm2843_vm6, %v8709_v4, %v3115_v9 }
 0x357   : > { %6208 = vpow2.f32 %v2926_v54  ;;  %3291 = vst [vmem:[#allocation6 + $0x88] sm:$0xff] %v3259_v2 }
 0x358   : > { %6210 = vpow2.f32 %v2928_v14 }
 0x35d   : > { %v6209_v29 = vpop.eup %6208 }
 0x35e   : > { %v6211_v28 = vpop.eup %6210  ;;  %v3116_v55 = vadd.f32 1.0, %v6209_v29  ;;  %v3119_v19 = vmul.f32 -0.5, %v6209_v29  ;;  %v3122_v58 = vand.u32 2147483647, %v6209_v29 }
 0x35f   : > { %v3125_v34 = vadd.f32 1.0, %v6211_v28  ;;  %v3128_v49 = vmul.f32 -0.5, %v6211_v28  ;;  %v3131_v36 = vand.u32 2147483647, %v6211_v28 }
 0x360   : > { %6212 = vlog2.f32 %v3116_v55  ;;  %v3120_v46 = vadd.f32 1.0, %v3119_v19  ;;  %vm3123_vm7 = vcmp.lt.f32.partialorder %v3122_v58, 0.0004427343 }
 0x361   : > { %6214 = vlog2.f32 %v3125_v34  ;;  %v3129_v4 = vadd.f32 1.0, %v3128_v49  ;;  %vm3132_vm9 = vcmp.lt.f32.partialorder %v3131_v36, 0.0004427343 }
 0x362   : > { %v2743_v3 = vpop.f32.mrf.mxu2  ;;  %v2808_v15 = vpop.f32.mrf.mxu3  ;;  %v3121_v23 = vmul.f32 %v6209_v29, %v3120_v46 }
 0x363   : > { %v8752_v51 = vadd.f32 %v2743_v3, %v8567_v38  ;;  %v8755_v1 = vadd.f32 %v2808_v15, %v8569_v62  ;;  %v3130_v26 = vmul.f32 %v6211_v28, %v3129_v4 }
 0x365   : > { %v2878_v35 = vmin.f32 %v8752_v51, 20.0  ;;  %v2879_v48 = vmin.f32 %v8755_v1, 20.0  ;;  %vm2846_vm12 = vcmp.gt.f32.partialorder %v8752_v51, 20.0  ;;  %vm2847_vm14 = vcmp.gt.f32.partialorder %v8755_v1, 20.0 }
 0x366   : > { %v6213_v5 = vpop.eup %6212 }
 0x367   : > { %v6215_v20 = vpop.eup %6214  ;;  %v3118_v41 = vmul.f32 0.6931472, %v6213_v5  ;;  %v2930_v40 = vmul.f32 1.442695, %v2878_v35  ;;  %v2932_v43 = vmul.f32 1.442695, %v2879_v48 }
 0x368   : > { %v3127_v6 = vmul.f32 0.6931472, %v6215_v20 }
 0x369   : > { %v3124_v32 = vsel %vm3123_vm7, %v3121_v23, %v3118_v41  ;;  %6216 = vpow2.f32 %v2930_v40 }
 0x36a   : > { %v3260_v12 = vsel %vm2844_vm8, %v8737_v30, %v3124_v32  ;;  %v3133_v25 = vsel %vm3132_vm9, %v3130_v26, %v3127_v6  ;;  %6218 = vpow2.f32 %v2932_v43  ;;  %v2746_v39 = vpop.f32.mrf.mxu2  ;;  %v2811_v18 = vpop.f32.mrf.mxu3 }
 0x36b   : > { %3292 = vst [vmem:[#allocation6 + $0x90] sm:$0xff] %v3260_v12  ;;  %v3261_v33 = vsel %vm2845_vm10, %v8741_v8, %v3133_v25  ;;  %v8764_v53 = vadd.f32 %v2746_v39, %v8567_v38  ;;  %v8767_v0 = vadd.f32 %v2811_v18, %v8569_v62 }
 0x36c   : > { %3293 = vst [vmem:[#allocation6 + $0x98] sm:$0xff] %v3261_v33 }
 0x36d   : > { %v2880_v61 = vmin.f32 %v8764_v53, 20.0  ;;  %v2881_v24 = vmin.f32 %v8767_v0, 20.0  ;;  %vm2848_vm4 = vcmp.gt.f32.partialorder %v8764_v53, 20.0  ;;  %vm2849_vm6 = vcmp.gt.f32.partialorder %v8767_v0, 20.0 }
 0x36f   : > { %v6217_v57 = vpop.eup %6216  ;;  %v2934_v59 = vmul.f32 1.442695, %v2880_v61  ;;  %v2936_v30 = vmul.f32 1.442695, %v2881_v24 }
 0x370   : > { %v6219_v60 = vpop.eup %6218  ;;  %v3134_v21 = vadd.f32 1.0, %v6217_v57  ;;  %v3137_v13 = vmul.f32 -0.5, %v6217_v57  ;;  %v3140_v47 = vand.u32 2147483647, %v6217_v57 }
 0x371   : > { %v3143_v31 = vadd.f32 1.0, %v6219_v60  ;;  %6220 = vpow2.f32 %v2934_v59  ;;  %v3146_v42 = vmul.f32 -0.5, %v6219_v60  ;;  %v3149_v56 = vand.u32 2147483647, %v6219_v60 }
 0x372   : > { %6222 = vlog2.f32 %v3134_v21  ;;  %v3138_v8 = vadd.f32 1.0, %v3137_v13  ;;  %vm3141_vm11 = vcmp.lt.f32.partialorder %v3140_v47, 0.0004427343 }
 0x373   : > { %6224 = vlog2.f32 %v3143_v31  ;;  %v3147_v10 = vadd.f32 1.0, %v3146_v42  ;;  %vm3150_vm13 = vcmp.lt.f32.partialorder %v3149_v56, 0.0004427343 }
 0x374   : > { %6226 = vpow2.f32 %v2936_v30  ;;  %v3139_v7 = vmul.f32 %v6217_v57, %v3138_v8 }
 0x375   : > { %v3148_v27 = vmul.f32 %v6219_v60, %v3147_v10 }
 0x377   : > { %v6221_v16 = vpop.eup %6220 }
 0x378   : > { %v6223_v45 = vpop.eup %6222  ;;  %v3152_v50 = vadd.f32 1.0, %v6221_v16  ;;  %v3155_v54 = vmul.f32 -0.5, %v6221_v16  ;;  %v3158_v34 = vand.u32 2147483647, %v6221_v16 }
 0x379   : > { %v6225_v52 = vpop.eup %6224  ;;  %v3136_v17 = vmul.f32 0.6931472, %v6223_v45 }
 0x37a   : > { %v6227_v14 = vpop.eup %6226  ;;  %v3145_v11 = vmul.f32 0.6931472, %v6225_v52  ;;  %6228 = vlog2.f32 %v3152_v50  ;;  %v3156_v19 = vadd.f32 1.0, %v3155_v54  ;;  %vm3159_vm15 = vcmp.lt.f32.partialorder %v3158_v34, 0.0004427343 }
 0x37b   : > { %v3142_v37 = vsel %vm3141_vm11, %v3139_v7, %v3136_v17  ;;  %v3161_v44 = vadd.f32 1.0, %v6227_v14  ;;  %v3164_v2 = vmul.f32 -0.5, %v6227_v14  ;;  %v3167_v35 = vand.u32 2147483647, %v6227_v14 }
 0x37c   : > { %v3262_v22 = vsel %vm2846_vm12, %v8752_v51, %v3142_v37  ;;  %v3151_v9 = vsel %vm3150_vm13, %v3148_v27, %v3145_v11  ;;  %v3157_v36 = vmul.f32 %v6221_v16, %v3156_v19 }
 0x37d   : > { %v2749_v29 = vpop.f32.mrf.mxu2  ;;  %v2814_v28 = vpop.f32.mrf.mxu3  ;;  %3294 = vst [vmem:[#allocation6 + $0xa0] sm:$0xff] %v3262_v22  ;;  %v3263_v55 = vsel %vm2847_vm14, %v8755_v1, %v3151_v9  ;;  %6230 = vlog2.f32 %v3161_v44  ;;  %v3165_v46 = vadd.f32 1.0, %v3164_v2  ;;  %vm3168_vm5 = vcmp.lt.f32.partialorder %v3167_v35, 0.0004427343 }
 0x37e   : > { %3295 = vst [vmem:[#allocation6 + $0xa8] sm:$0xff] %v3263_v55  ;;  %v8776_v49 = vadd.f32 %v2749_v29, %v8567_v38  ;;  %v8779_v3 = vadd.f32 %v2814_v28, %v8569_v62 }
 0x37f   : > { %v3166_v40 = vmul.f32 %v6227_v14, %v3165_v46 }
 0x380   : > { %v6229_v15 = vpop.eup %6228  ;;  %v2882_v51 = vmin.f32 %v8776_v49, 20.0  ;;  %v2883_v58 = vmin.f32 %v8779_v3, 20.0  ;;  %vm2850_vm7 = vcmp.gt.f32.partialorder %v8776_v49, 20.0  ;;  %vm2851_vm9 = vcmp.gt.f32.partialorder %v8779_v3, 20.0 }
 0x381   : > { %v3154_v4 = vmul.f32 0.6931472, %v6229_v15  ;;  %v3306_v15 = vld [vmem:[%s9972_s25] sm:$0xff] }
 0x382   : > { %v2938_v1 = vmul.f32 1.442695, %v2882_v51  ;;  %v2940_v48 = vmul.f32 1.442695, %v2883_v58  ;;  %v8818_v58 = vld [vmem:[#allocation10 + $0x18] sm:$0xff]  }
 0x383   : > { %v6231_v5 = vpop.eup %6230  ;;  %v3160_v20 = vsel %vm3159_vm15, %v3157_v36, %v3154_v4 }
 0x384   : > { %v3264_v41 = vsel %vm2848_vm4, %v8764_v53, %v3160_v20  ;;  %v3163_v23 = vmul.f32 0.6931472, %v6231_v5  ;;  %6232 = vpow2.f32 %v2938_v1 }
 0x385   : > { %v2752_v43 = vpop.f32.mrf.mxu2  ;;  %v2817_v6 = vpop.f32.mrf.mxu3  ;;  %3296 = vst [vmem:[#allocation6 + $0xb0] sm:$0xff] %v3264_v41  ;;  %6234 = vpow2.f32 %v2940_v48  ;;  %v8826_v48 = vld [vmem:[#allocation10 + $0x8] sm:$0xff]   ;;  %v3310_v41 = vmul.f32 1.442695, %v3306_v15 }
 0x386   : > { %v8786_v26 = vadd.f32 %v2752_v43, %v8567_v38  ;;  %v8789_v32 = vadd.f32 %v2817_v6, %v8569_v62  ;;  %v3169_v12 = vsel %vm3168_vm5, %v3166_v40, %v3163_v23 }
 0x387   : > { %v3265_v25 = vsel %vm2849_vm6, %v8767_v0, %v3169_v12  ;;  %v3307_v12 = vld [vmem:[%s9973_s29 + $0x8] sm:$0xff] }
 0x388   : > { %v2884_v39 = vmin.f32 %v8786_v26, 20.0  ;;  %3297 = vst [vmem:[#allocation6 + $0xb8] sm:$0xff] %v3265_v25  ;;  %v2885_v18 = vmin.f32 %v8789_v32, 20.0  ;;  %vm2852_vm10 = vcmp.gt.f32.partialorder %v8786_v26, 20.0  ;;  %vm2853_vm14 = vcmp.gt.f32.partialorder %v8789_v32, 20.0  ;;  %v3308_v25 = vld [vmem:[%s9973_s29 + $0x10] sm:$0xff] }
 0x38a   : > { %v2942_v33 = vmul.f32 1.442695, %v2884_v39  ;;  %v6233_v53 = vpop.eup %6232  ;;  %v2944_v61 = vmul.f32 1.442695, %v2885_v18 }
 0x38b   : > { %v6235_v24 = vpop.eup %6234  ;;  %v3170_v57 = vadd.f32 1.0, %v6233_v53  ;;  %v3173_v59 = vmul.f32 -0.5, %v6233_v53  ;;  %v3176_v31 = vand.u32 2147483647, %v6233_v53 }
 0x38c   : > { %6236 = vpow2.f32 %v2942_v33  ;;  %v3179_v60 = vadd.f32 1.0, %v6235_v24  ;;  %v3182_v13 = vmul.f32 -0.5, %v6235_v24  ;;  %v3185_v45 = vand.u32 2147483647, %v6235_v24 }
 0x38d   : > { %6238 = vpow2.f32 %v2944_v61  ;;  %v2755_v21 = vpop.f32.mrf.mxu2  ;;  %v2820_v30 = vpop.f32.mrf.mxu3  ;;  %v3174_v8 = vadd.f32 1.0, %v3173_v59  ;;  %vm8804_vm8 = vcmp.lt.f32.partialorder %v3176_v31, 0.0004427343  ;;  %v3314_v31 = vmul.f32 1.442695, %v3308_v25 }
 0x38e   : > { %6240 = vlog2.f32 %v3170_v57  ;;  %v8796_v0 = vadd.f32 %v2755_v21, %v8567_v38  ;;  %v8799_v42 = vadd.f32 %v2820_v30, %v8569_v62  ;;  %v3183_v56 = vadd.f32 1.0, %v3182_v13  ;;  %v3309_v30 = vld [vmem:[%s9973_s29 + $0x18] sm:$0xff] }
 0x38f   : > { %6242 = vlog2.f32 %v3179_v60  ;;  %v3175_v11 = vmul.f32 %v6233_v53, %v3174_v8  ;;  %vm3186_vm11 = vcmp.lt.f32.partialorder %v3185_v45, 0.0004427343  ;;  %v3312_v13 = vmul.f32 1.442695, %v3307_v12 }
 0x390   : > { %v2886_v47 = vmin.f32 %v8796_v0, 20.0  ;;  %v2887_v10 = vmin.f32 %v8799_v42, 20.0  ;;  %v3184_v19 = vmul.f32 %v6235_v24, %v3183_v56  ;;  %vm2854_vm4 = vcmp.gt.f32.partialorder %v8796_v0, 20.0 }
 0x391   : > { %vm2855_vm6 = vcmp.gt.f32.partialorder %v8799_v42, 20.0 }
 0x392   : > { %v6237_v16 = vpop.eup %6236  ;;  %v2946_v50 = vmul.f32 1.442695, %v2886_v47  ;;  %v2948_v54 = vmul.f32 1.442695, %v2887_v10 }
 0x393   : > { %v6239_v52 = vpop.eup %6238  ;;  %v3188_v7 = vadd.f32 1.0, %v6237_v16  ;;  %v3191_v27 = vmul.f32 -0.5, %v6237_v16  ;;  %v3194_v9 = vand.u32 2147483647, %v6237_v16 }
 0x394   : > { %v6241_v14 = vpop.eup %6240  ;;  %v3197_v37 = vadd.f32 1.0, %v6239_v52  ;;  %6244 = vpow2.f32 %v2946_v50  ;;  %v3200_v2 = vmul.f32 -0.5, %v6239_v52  ;;  %v3203_v34 = vand.u32 2147483647, %v6239_v52 }
 0x395   : > { %v6243_v44 = vpop.eup %6242  ;;  %v3172_v22 = vmul.f32 0.6931472, %v6241_v14  ;;  %6246 = vlog2.f32 %v3188_v7  ;;  %v2758_v29 = vpop.f32.mrf.mxu2  ;;  %v3192_v35 = vadd.f32 1.0, %v3191_v27  ;;  %vm8832_vm12 = vcmp.lt.f32.partialorder %v3194_v9, 0.0004427343 }
 0x396   : > { %v2823_v28 = vpop.f32.mrf.mxu3  ;;  %v3181_v55 = vmul.f32 0.6931472, %v6243_v44  ;;  %6248 = vlog2.f32 %v3197_v37  ;;  %v8816_v51 = vadd.f32 %v2758_v29, %v8567_v38  ;;  %v3201_v38 = vadd.f32 1.0, %v3200_v2 }
 0x397   : > { %v3178_v46 = vsel %vm8804_vm8, %v3175_v11, %v3172_v22  ;;  %6250 = vpow2.f32 %v2948_v54  ;;  %v8824_v1 = vadd.f32 %v2823_v28, %v8569_v62  ;;  %vm8836_vm13 = vcmp.lt.f32.partialorder %v3203_v34, 0.0004427343 }
 0x398   : > { %v3266_v4 = vsel %vm2850_vm7, %v8776_v49, %v3178_v46  ;;  %v3187_v36 = vsel %vm3186_vm11, %v3184_v19, %v3181_v55  ;;  %v2888_v20 = vmin.f32 %v8816_v51, 20.0  ;;  %v3193_v33 = vmul.f32 %v6237_v16, %v3192_v35 }
 0x399   : > { %3298 = vst [vmem:[#allocation6 + $0xc0] sm:$0xff] %v3266_v4  ;;  %v3267_v5 = vsel %vm2851_vm9, %v8779_v3, %v3187_v36  ;;  %v2889_v40 = vmin.f32 %v8824_v1, 20.0  ;;  %6252 = vpow2.f32 %v3310_v41  ;;  %v3202_v57 = vmul.f32 %v6239_v52, %v3201_v38 }
 0x39a   : > { %v6245_v23 = vpop.eup %6244  ;;  %3299 = vst [vmem:[#allocation6 + $0xc8] sm:$0xff] %v3267_v5  ;;  %v2950_v6 = vmul.f32 1.442695, %v2888_v20  ;;  %v3316_v50 = vmul.f32 1.442695, %v3309_v30  ;;  %vm2856_vm8 = vcmp.gt.f32.partialorder %v8816_v51, 20.0 }
 0x39b   : > { %v6247_v43 = vpop.eup %6246  ;;  %v3206_v3 = vadd.f32 1.0, %v6245_v23  ;;  %v3209_v53 = vmul.f32 -0.5, %v6245_v23  ;;  %v2952_v59 = vmul.f32 1.442695, %v2889_v40  ;;  %v3212_v45 = vand.u32 2147483647, %v6245_v23 }
 0x39c   : > { %v6249_v39 = vpop.eup %6248  ;;  %v3190_v18 = vmul.f32 0.6931472, %v6247_v43 }
 0x39d   : > { %v6251_v61 = vpop.eup %6250  ;;  %v3199_v24 = vmul.f32 0.6931472, %v6249_v39  ;;  %6254 = vlog2.f32 %v3206_v3  ;;  %v3210_v56 = vadd.f32 1.0, %v3209_v53  ;;  %vm3213_vm15 = vcmp.lt.f32.partialorder %v3212_v45, 0.0004427343 }
 0x39e   : > { %v3196_v60 = vsel %vm8832_vm12, %v3193_v33, %v3190_v18  ;;  %v3215_v21 = vadd.f32 1.0, %v6251_v61  ;;  %v3218_v10 = vmul.f32 -0.5, %v6251_v61  ;;  %6256 = vpow2.f32 %v2950_v6 }
 0x39f   : > { %v3268_v8 = vsel %vm2852_vm10, %v8786_v26, %v3196_v60  ;;  %v3205_v47 = vsel %vm8836_vm13, %v3202_v57, %v3199_v24  ;;  %v6253_v52 = vpop.eup %6252  ;;  %v3211_v14 = vmul.f32 %v6245_v23, %v3210_v56  ;;  %v3221_v11 = vand.u32 2147483647, %v6251_v61 }
 0x3a0   : > { %3300 = vst [vmem:[#allocation6 + $0xd0] sm:$0xff] %v3268_v8  ;;  %v3269_v16 = vsel %vm2853_vm14, %v8789_v32, %v3205_v47  ;;  %6258 = vlog2.f32 %v3215_v21  ;;  %v3219_v26 = vadd.f32 1.0, %v3218_v10  ;;  %v8861_v7 = vsub.f32 0.0, %v6253_v52 }
 0x3a1   : > { %3301 = vst [vmem:[#allocation6 + $0xd8] sm:$0xff] %v3269_v16  ;;  %6260 = vpow2.f32 %v2952_v59  ;;  %vm3222_vm5 = vcmp.lt.f32.partialorder %v3221_v11, 0.0004427343  ;;  %vm2857_vm10 = vcmp.gt.f32.partialorder %v8824_v1, 20.0 }
 0x3a2   : > { %6262 = vpow2.f32 %v3312_v13  ;;  %v3220_v29 = vmul.f32 %v6251_v61, %v3219_v26 }
 0x3a3   : > { %v6255_v17 = vpop.eup %6254  ;;  %6264 = vpow2.f32 %v3314_v31 }
 0x3a4   : > { %v3208_v54 = vmul.f32 0.6931472, %v6255_v17  ;;  %6266 = vpow2.f32 %v3316_v50  ;;  %v6257_v27 = vpop.eup %6256 }
 0x3a5   : > { %v3224_v44 = vadd.f32 1.0, %v6257_v27  ;;  %v3227_v28 = vmul.f32 -0.5, %v6257_v27  ;;  %v3230_v20 = vand.u32 2147483647, %v6257_v27 }
 0x3a6   : > { %v6259_v32 = vpop.eup %6258  ;;  %v3214_v37 = vsel %vm3213_vm15, %v3211_v14, %v3208_v54 }
 0x3a7   : > { %v6261_v22 = vpop.eup %6260  ;;  %v3270_v9 = vsel %vm2854_vm4, %v8796_v0, %v3214_v37  ;;  %v3217_v2 = vmul.f32 0.6931472, %v6259_v32  ;;  %6268 = vlog2.f32 %v3224_v44  ;;  %v3228_v5 = vadd.f32 1.0, %v3227_v28 }
 0x3a8   : > { %v6263_v55 = vpop.eup %6262  ;;  %3302 = vst [vmem:[#allocation6 + $0xe0] sm:$0xff] %v3270_v9  ;;  %v3233_v19 = vadd.f32 1.0, %v6261_v22  ;;  %v3236_v46 = vmul.f32 -0.5, %v6261_v22  ;;  %v3239_v49 = vand.u32 2147483647, %v6261_v22 }
 0x3a9   : > { %v6265_v34 = vpop.eup %6264  ;;  %v3223_v15 = vsel %vm3222_vm5, %v3220_v29, %v3217_v2  ;;  %v8866_v4 = vsub.f32 0.0, %v6263_v55  ;;  %v3229_v40 = vmul.f32 %v6257_v27, %v3228_v5  ;;  %vm3231_vm7 = vcmp.lt.f32.partialorder %v3230_v20, 0.0004427343 }
 0x3aa   : > { %v6267_v36 = vpop.eup %6266  ;;  %v3271_v35 = vsel %vm2855_vm6, %v8799_v42, %v3223_v15  ;;  %6270 = vlog2.f32 %v3233_v19  ;;  %v8869_v0 = vsub.f32 0.0, %v6265_v34  ;;  %v3237_v41 = vadd.f32 1.0, %v3236_v46 }
 0x3ab   : > { %3303 = vst [vmem:[#allocation6 + $0xe8] sm:$0xff] %v3271_v35  ;;  %v8871_v38 = vsub.f32 0.0, %v6267_v36  ;;  %vm3240_vm9 = vcmp.lt.f32.partialorder %v3239_v49, 0.0004427343 }
 0x3ac   : > { %v3238_v42 = vmul.f32 %v6261_v22, %v3237_v41 }
 0x3ad   : > { %v6269_v23 = vpop.eup %6268 }
 0x3ae   : > { %v3226_v62 = vmul.f32 0.6931472, %v6269_v23 }
 0x3b0   : > { %v6271_v43 = vpop.eup %6270  ;;  %v3232_v3 = vsel %vm3231_vm7, %v3229_v40, %v3226_v62 }
 0x3b1   : > { %v3235_v6 = vmul.f32 0.6931472, %v6271_v43  ;;  %v3272_v12 = vsel %vm2856_vm8, %v8816_v51, %v3232_v3 }
 0x3b2   : > { %3304 = vst [vmem:[#allocation6 + $0xf0] sm:$0xff] %v3272_v12 }
 0x3b3   : > { %v3241_v25 = vsel %vm3240_vm9, %v3238_v42, %v3235_v6 }
 0x3b4   : > { %v3273_v39 = vsel %vm2857_vm10, %v8824_v1, %v3241_v25 }
 0x3b5   : > { %3305 = vst [vmem:[#allocation6 + $0xf8] sm:$0xff] %v3273_v39 }
 0x3b6 LB: >> { %v6944_v51 = vmov 2   ;;  %v6945_v1 = vmov 1   ;;  %s5631_s13 = sshll.u32 %s6920_s15, 3  ;;  %v6946_v33 = vmov 0   ;;  %v6947_v24 = vmov 3   ;;  %s3329_s15 = sadd.s32 1, %s6920_s15   ;;  %s6920_s15 = sphi %s8883_s15, %s3329_s15   ;;  %v6916_v58 = vphi %v8818_v58, %v9980_v58   ;;  %v6912_v48 = vphi %v8826_v48, %v9979_v48  }
 0x3b7   : >> { %6274 = vset.pattern.permute.xlu2 %v6944_v51  ;;  %6273 = vset.pattern.permute.xlu1 %v6945_v1  ;;  %s3342_s8 = scalar_lea.vmem [#allocation9], %s5631_s13  ;;  %v6948_v57 = vmov 7   ;;  %v6949_v59 = vmov 4   ;;  %v6950_v60 = vmov 5   ;;  %v6951_v21 = vmov 6   ;;  %s3333_s7 = sshra.s32 %s5631_s13, 3 }
 0x3b8   : >> { %v3343_v18 = vld [vmem:[%s3342_s8] sm:$0xff]  ;;  %s8917_s21 = sshll.u32 %s3333_s7, 4  ;;  %vm3709_vm11 = vcmask 1040384   ;;  %vm3711_vm12 = vcmask 1041408   ;;  %vm3714_vm13 = vcmask 1043456   ;;  %p3326_p1 = scmp.ge.s32.totalorder %s3329_s15, 16  }
 0x3b9   : >> { %3344 = vxpose.xlu0.b32.start.end [1/1] (short) (narrow) %v3343_v18, 32  ;;  %s3337_s28 = scalar_lea.vmem [#allocation6], %s8917_s21  ;;  %s3340_s16 = scalar_lea.vmem [#allocation7], %s8917_s21 }
 0x3ba   : >> { %v3341_v8 = vld [vmem:[%s3340_s16] sm:$0xff]  ;;  %s3720_s17 = scalar_lea.vmem [#allocation8], %s8917_s21  ;;  %s9117_s12 = smov (%p3326_p1), 0  }
 0x3bc   : >> { %v8920_v31 = vld [vmem:[%s3337_s28] sm:$0xff] }
 0x3bd   : >> { %v8927_v47 = vmul.f32 %v3341_v8, %v8920_v31  ;;  %v3384_v45 = vperm.slane %v8920_v31, 0  ;;  %v3377_v50 = vrot.slane %v8920_v31, 1  ;;  %v3378_v14 = vrot.slane %v8920_v31, 2 }
 0x3be   : >> { %v3379_v32 = vrot.slane %v8920_v31, 3  ;;  %v3380_v28 = vrot.slane %v8920_v31, 4  ;;  %v3381_v23 = vrot.slane %v8920_v31, 5 }
 0x3bf   : >> { %v3473_v10 = vperm.slane %v8927_v47, 2  ;;  %v3484_v52 = vperm.slane %v8927_v47, 3  ;;  %v3400_v17 = vmul.f32 %v3384_v45, %v8861_v7  ;;  %v3385_v26 = vperm.slane %v3377_v50, 0 }
 0x3c0   : >> { %v8951_v44 = vperm.slane %v3378_v14, 0  ;;  %v3495_v22 = vperm.slane %v8927_v47, 4  ;;  %v8954_v9 = vperm.slane %v3379_v32, 0  ;;  %v3401_v2 = vmul.f32 %v3384_v45, %v8869_v0 }
 0x3c1   : >> { %v3416_v27 = vmul.f32 1.442695, %v3400_v17  ;;  %v3402_v37 = vmul.f32 %v3385_v26, %v8861_v7  ;;  %v8970_v36 = vperm.slane %v3380_v28, 0  ;;  %v3403_v35 = vmul.f32 %v3385_v26, %v8869_v0 }
 0x3c2   : >> { %v3404_v55 = vmul.f32 %v8951_v44, %v8861_v7  ;;  %v3406_v15 = vmul.f32 %v8954_v9, %v8861_v7  ;;  %v3418_v46 = vmul.f32 1.442695, %v3401_v2  ;;  %v3462_v20 = vperm.slane %v8927_v47, 1 }
 0x3c3   : >> { %6305 = vpow2.f32 %v3416_v27  ;;  %v3420_v29 = vmul.f32 1.442695, %v3402_v37  ;;  %v3449_v49 = vperm.slane %v8927_v47, 0  ;;  %v3506_v43 = vperm.slane %v8927_v47, 5 }
 0x3c4   : >> { %v3424_v41 = vmul.f32 1.442695, %v3404_v55  ;;  %v3428_v62 = vmul.f32 1.442695, %v3406_v15  ;;  %v3408_v6 = vmul.f32 %v8970_v36, %v8861_v7  ;;  %v3422_v42 = vmul.f32 1.442695, %v3403_v35 }
 0x3c5   : >> { %6307 = vpow2.f32 %v3420_v29  ;;  %v8982_v39 = vperm.slane %v3381_v23, 0  ;;  %v3517_v14 = vperm.slane %v8927_v47, 6  ;;  %v3528_v23 = vperm.slane %v8927_v47, 7 }
 0x3c6   : >> { %6309 = vpow2.f32 %v3418_v46 }
 0x3c7   : >> { %6311 = vpow2.f32 %v3424_v41 }
 0x3c8   : >> { %6313 = vpow2.f32 %v3428_v62  ;;  %v3405_v62 = vmul.f32 %v8951_v44, %v8869_v0  ;;  %v3407_v44 = vmul.f32 %v8954_v9, %v8869_v0 }
 0x3c9   : >> { %v6306_v5 = vpop.eup %6305  ;;  %6315 = vpow2.f32 %v3422_v42 }
 0x3ca   : >> { %v3539_v3 = vmul.f32 %v6916_v58, %v6306_v5 }
 0x420   : >> { %6272 = vset.pattern.permute.xlu0 %v6946_v33 }
 0x45d   : >> { %v3360_v53 = vpop.trf.xlu0 }
 0x45e   : >> { %3475 = vperm.xlu2 %6274, %v3360_v53   ;;  %3464 = vperm.xlu1 %6273, %v3360_v53  }
 0x45f   : >> { %3452 = vperm.xlu0 %6272, %v3360_v53  }
 0x465   : >> { %v3361_v61 = vpop.trf.xlu0 }
 0x466   : >> { %6275 = vset.pattern.permute.xlu2 %v6947_v24  ;;  %6280 = vset.pattern.permute.xlu1 %v6946_v33 }
 0x467   : >> { %3486 = vperm.xlu2 %6275, %v3360_v53   ;;  %3457 = vperm.xlu1 %6280, %v3361_v61  }
 0x468   : >> { %6304 = vset.pattern.permute.xlu0 %v6948_v57 }
 0x46d   : >> { %v8907_v30 = vpop.trf.xlu0 }
 0x46f   : >> { %6276 = vset.pattern.permute.xlu2 %v6949_v59  ;;  %6282 = vset.pattern.permute.xlu1 %v6944_v51 }
 0x470   : >> { %3497 = vperm.xlu2 %6276, %v3360_v53   ;;  %3479 = vperm.xlu1 %6282, %v3361_v61  }
 0x475   : >> { %v8911_v13 = vpop.trf.xlu0 }
 0x478   : >> { %6277 = vset.pattern.permute.xlu2 %v6950_v60  ;;  %6283 = vset.pattern.permute.xlu1 %v6947_v24 }
 0x479   : >> { %3508 = vperm.xlu2 %6277, %v3360_v53   ;;  %3490 = vperm.xlu1 %6283, %v3361_v61  }
 0x481   : >> { %6278 = vset.pattern.permute.xlu2 %v6951_v21  ;;  %6284 = vset.pattern.permute.xlu1 %v6949_v59 }
 0x482   : >> { %3519 = vperm.xlu2 %6278, %v3360_v53   ;;  %3501 = vperm.xlu1 %6284, %v3361_v61  }
 0x48a   : >> { %6279 = vset.pattern.permute.xlu2 %v6948_v57  ;;  %6285 = vset.pattern.permute.xlu1 %v6950_v60 }
 0x48b   : >> { %3530 = vperm.xlu2 %6279, %v3360_v53   ;;  %3512 = vperm.xlu1 %6285, %v3361_v61  }
 0x493   : >> { %6281 = vset.pattern.permute.xlu2 %v6945_v1  ;;  %6286 = vset.pattern.permute.xlu1 %v6951_v21 }
 0x494   : >> { %3468 = vperm.xlu2 %6281, %v3361_v61   ;;  %3523 = vperm.xlu1 %6286, %v3361_v61  }
 0x49c   : >> { %6288 = vset.pattern.permute.xlu2 %v6946_v33  ;;  %6287 = vset.pattern.permute.xlu1 %v6948_v57 }
 0x49d   : >> { %3534 = vperm.xlu1 %6287, %v3361_v61   ;;  %3545 = vperm.xlu2 %6288, %v8907_v30   ;;  %v3432_v61 = vmul.f32 1.442695, %v3408_v6 }
 0x49f   : >> { %6317 = vpow2.f32 %v3432_v61 }
 0x4a5   : >> { %6291 = vset.pattern.permute.xlu1 %v6946_v33  ;;  %6289 = vset.pattern.permute.xlu2 %v6945_v1 }
 0x4a6   : >> { %3567 = vperm.xlu2 %6289, %v8907_v30   ;;  %3550 = vperm.xlu1 %6291, %v8911_v13  }
 0x4ae   : >> { %6290 = vset.pattern.permute.xlu2 %v6944_v51  ;;  %6292 = vset.pattern.permute.xlu1 %v6945_v1  ;;  %v6308_v1 = vpop.eup %6307 }
 0x4af   : >> { %3588 = vperm.xlu2 %6290, %v8907_v30   ;;  %3571 = vperm.xlu1 %6292, %v8911_v13  }
 0x4b7   : >> { %6294 = vset.pattern.permute.xlu2 %v6947_v24  ;;  %6293 = vset.pattern.permute.xlu1 %v6944_v51  ;;  %v3382_v51 = vrot.slane %v8920_v31, 6 }
 0x4b8   : >> { %v3476_v16 = vpop.permute.xlu2 %3475  ;;  %3609 = vperm.xlu2 %6294, %v8907_v30   ;;  %3592 = vperm.xlu1 %6293, %v8911_v13  }
 0x4b9   : >> { %v8935_v56 = vmul.f32 %v3476_v16, %v3473_v10  ;;  %v8995_v8 = vperm.slane %v3382_v51, 0 }
 0x4bb   : >> { %v3412_v32 = vmul.f32 %v8995_v8, %v8861_v7 }
 0x4bd   : >> { %v3440_v15 = vmul.f32 1.442695, %v3412_v32 }
 0x4c0   : >> { %6296 = vset.pattern.permute.xlu2 %v6949_v59  ;;  %6295 = vset.pattern.permute.xlu1 %v6947_v24  ;;  %v6310_v24 = vpop.eup %6309 }
 0x4c1   : >> { %v3487_v54 = vpop.permute.xlu2 %3486  ;;  %3630 = vperm.xlu2 %6296, %v8907_v30   ;;  %3613 = vperm.xlu1 %6295, %v8911_v13   ;;  %v6312_v45 = vpop.eup %6311  ;;  %v3540_v17 = vmul.f32 %v6912_v48, %v6310_v24 }
 0x4c2   : >> { %v8947_v11 = vmul.f32 %v3487_v54, %v3484_v52  ;;  %v6314_v26 = vpop.eup %6313 }
 0x4c3   : >> { %v6316_v2 = vpop.eup %6315 }
 0x4c4   : >> { %v6318_v35 = vpop.eup %6317 }
 0x4c9   : >> { %6298 = vset.pattern.permute.xlu2 %v6950_v60  ;;  %6297 = vset.pattern.permute.xlu1 %v6949_v59  ;;  %v3410_v59 = vmul.f32 %v8982_v39, %v8861_v7 }
 0x4ca   : >> { %v3498_v19 = vpop.permute.xlu2 %3497  ;;  %3651 = vperm.xlu2 %6298, %v8907_v30   ;;  %3634 = vperm.xlu1 %6297, %v8911_v13  }
 0x4cb   : >> { %v8966_v34 = vmul.f32 %v3498_v19, %v3495_v22  ;;  %v3436_v27 = vmul.f32 1.442695, %v3410_v59  ;;  %v3411_v59 = vmul.f32 %v8982_v39, %v8869_v0 }
 0x4cd   : >> { %6319 = vpow2.f32 %v3436_v27 }
 0x4ce   : >> { %6321 = vpow2.f32 %v3440_v15 }
 0x4d0   : >> { %v3465_v40 = vpop.permute.xlu1 %3464 }
 0x4d1   : >> { %v3471_v12 = vmul.f32 %v3465_v40, %v3462_v20  ;;  %v3453_v25 = vpop.permute.xlu0 %3452 }
 0x4d2   : >> { %v3460_v18 = vmul.f32 %v3453_v25, %v3449_v49  ;;  %6300 = vset.pattern.permute.xlu2 %v6951_v21  ;;  %6299 = vset.pattern.permute.xlu1 %v6950_v60  ;;  %v3383_v60 = vrot.slane %v8920_v31, 7  ;;  %v3426_v25 = vmul.f32 1.442695, %v3405_v62 }
 0x4d3   : >> { %v3509_v58 = vpop.permute.xlu2 %3508  ;;  %3672 = vperm.xlu2 %6300, %v8907_v30   ;;  %3655 = vperm.xlu1 %6299, %v8911_v13   ;;  %v6320_v40 = vpop.eup %6319 }
 0x4d4   : >> { %v3515_v33 = vmul.f32 %v3509_v58, %v3506_v43  ;;  %v8991_v53 = vadd.f32 %v3539_v3, %v3460_v18  ;;  %v9005_v37 = vperm.slane %v3383_v60, 0  ;;  %v6322_v51 = vpop.eup %6321 }
 0x4d6   : >> { %v3562_v16 = vmul.f32 %v6308_v1, %v8991_v53  ;;  %v3414_v46 = vmul.f32 %v9005_v37, %v8861_v7 }
 0x4d8   : >> { %v8999_v50 = vadd.f32 %v3562_v16, %v3471_v12 }
 0x4d9   : >> { %v3458_v54 = vpop.permute.xlu1 %3457 }
 0x4da   : >> { %v3461_v31 = vmul.f32 %v3458_v54, %v3449_v49  ;;  %v3583_v29 = vmul.f32 %v6312_v45, %v8999_v50 }
 0x4db   : >> { %6302 = vset.pattern.permute.xlu2 %v6948_v57  ;;  %6301 = vset.pattern.permute.xlu1 %v6951_v21 }
 0x4dc   : >> { %v3520_v48 = vpop.permute.xlu2 %3519  ;;  %3693 = vperm.xlu2 %6302, %v8907_v30   ;;  %3676 = vperm.xlu1 %6301, %v8911_v13   ;;  %v9013_v28 = vadd.f32 %v3583_v29, %v8935_v56  ;;  %v9015_v55 = vadd.f32 %v3540_v17, %v3461_v31  ;;  %v3444_v56 = vmul.f32 1.442695, %v3414_v46  ;;  %v3438_v17 = vmul.f32 1.442695, %v3411_v59 }
 0x4dd   : >> { %v3526_v19 = vmul.f32 %v3520_v48, %v3517_v14  ;;  %v3415_v48 = vmul.f32 %v9005_v37, %v8869_v0 }
 0x4de   : >> { %v3604_v21 = vmul.f32 %v6314_v26, %v9013_v28  ;;  %v3563_v30 = vmul.f32 %v6316_v2, %v9015_v55  ;;  %6323 = vpow2.f32 %v3444_v56 }
 0x4df   : >> { %6325 = vpow2.f32 %v3426_v25 }
 0x4e0   : >> { %v9024_v5 = vadd.f32 %v3604_v21, %v8947_v11  ;;  %v3446_v21 = vmul.f32 1.442695, %v3415_v48 }
 0x4e2   : >> { %v3480_v41 = vpop.permute.xlu1 %3479  ;;  %v3625_v49 = vmul.f32 %v6318_v35, %v9024_v5 }
 0x4e3   : >> { %v3483_v3 = vmul.f32 %v3480_v41, %v3473_v10 }
 0x4e4   : >> { %6303 = vset.pattern.permute.xlu1 %v6948_v57  ;;  %v9034_v6 = vadd.f32 %v3625_v49, %v8966_v34  ;;  %v3430_v34 = vmul.f32 1.442695, %v3407_v44  ;;  %v6324_v1 = vpop.eup %6323 }
 0x4e5   : >> { %v3531_v11 = vpop.permute.xlu2 %3530  ;;  %3697 = vperm.xlu1 %6303, %v8911_v13   ;;  %v3409_v13 = vmul.f32 %v8970_v36, %v8869_v0  ;;  %v6326_v16 = vpop.eup %6325 }
 0x4e6   : >> { %v3537_v42 = vmul.f32 %v3531_v11, %v3528_v23  ;;  %v3646_v12 = vmul.f32 %v6320_v40, %v9034_v6  ;;  %6327 = vpow2.f32 %v3430_v34 }
 0x4e8   : >> { %v9042_v10 = vadd.f32 %v3646_v12, %v3515_v33  ;;  %v3434_v33 = vmul.f32 1.442695, %v3409_v13 }
 0x4ea   : >> { %v3667_v57 = vmul.f32 %v6322_v51, %v9042_v10  ;;  %6329 = vpow2.f32 %v3434_v33 }
 0x4eb   : >> { %v3491_v18 = vpop.permute.xlu1 %3490  ;;  %6331 = vpow2.f32 %v3438_v17 }
 0x4ec   : >> { %v3494_v58 = vmul.f32 %v3491_v18, %v3484_v52  ;;  %v9049_v61 = vadd.f32 %v3667_v57, %v3526_v19  ;;  %v3413_v52 = vmul.f32 %v8995_v8, %v8869_v0  ;;  %v6328_v54 = vpop.eup %6327 }
 0x4ee   : >> { %v3469_v24 = vpop.permute.xlu2 %3468  ;;  %v3688_v9 = vmul.f32 %v6324_v1, %v9049_v61  ;;  %v3442_v39 = vmul.f32 1.442695, %v3413_v52 }
 0x4ef   : >> { %v3472_v60 = vmul.f32 %v3469_v24, %v3462_v20 }
 0x4f0   : >> { %v9056_v36 = vadd.f32 %v3688_v9, %v3537_v42   ;;  %v6330_v20 = vpop.eup %6329  ;;  %6333 = vpow2.f32 %v3442_v39 }
 0x4f1   : >> { %v3565_v45 = vadd.f32 %v3563_v30, %v3472_v60  ;;  %v6332_v15 = vpop.eup %6331  ;;  %6335 = vpow2.f32 %v3446_v21 }
 0x4f2   : > { %3722 = vst [vmem:[#allocation10 + $0x18] sm:$0xff] (%p3326_p1), %v9056_v36 }
 0x4f3   : >> { %v3584_v26 = vmul.f32 %v6326_v16, %v3565_v45 }
 0x4f4   : >> { %v3502_v27 = vpop.permute.xlu1 %3501 }
 0x4f5   : >> { %v3505_v32 = vmul.f32 %v3502_v27, %v3495_v22  ;;  %v3586_v2 = vadd.f32 %v3584_v26, %v3483_v3 }
 0x4f6   : >> { %v6334_v30 = vpop.eup %6333 }
 0x4f7   : >> { %v3605_v31 = vmul.f32 %v6328_v54, %v3586_v2  ;;  %v6336_v62 = vpop.eup %6335  ;;  %v3546_v11 = vpop.permute.xlu2 %3545 }
 0x4f8   : >> { %v3553_v44 = vmul.f32 %v3546_v11, %v8991_v53 }
 0x4f9   : >> { %v3607_v29 = vadd.f32 %v3605_v31, %v3494_v58 }
 0x4fb   : >> { %v3626_v19 = vmul.f32 %v6330_v20, %v3607_v29 }
 0x4fd   : >> { %v3513_v46 = vpop.permute.xlu1 %3512  ;;  %v9064_v8 = vadd.f32 %v3626_v19, %v3505_v32 }
 0x4fe   : >> { %v3516_v35 = vmul.f32 %v3513_v46, %v3506_v43 }
 0x4ff   : >> { %v3647_v22 = vmul.f32 %v6332_v15, %v9064_v8 }
 0x500   : >> { %v3568_v51 = vpop.permute.xlu2 %3567 }
 0x501   : >> { %v9069_v56 = vadd.f32 %v3647_v22, %v3516_v35  ;;  %v3574_v18 = vmul.f32 %v3568_v51, %v8999_v50 }
 0x503   : >> { %v3668_v41 = vmul.f32 %v6334_v30, %v9069_v56 }
 0x506   : >> { %v3524_v49 = vpop.permute.xlu1 %3523 }
 0x507   : >> { %v3527_v37 = vmul.f32 %v3524_v49, %v3517_v14 }
 0x509   : >> { %v9074_v40 = vadd.f32 %v3668_v41, %v3527_v37  ;;  %v3589_v24 = vpop.permute.xlu2 %3588 }
 0x50a   : >> { %v3595_v53 = vmul.f32 %v3589_v24, %v9013_v28 }
 0x50b   : >> { %v3689_v3 = vmul.f32 %v6336_v62, %v9074_v40 }
 0x50f   : >> { %v3535_v43 = vpop.permute.xlu1 %3534 }
 0x510   : >> { %v3538_v42 = vmul.f32 %v3535_v43, %v3528_v23 }
 0x512   : >> { %v9079_v48 = vadd.f32 %v3689_v3, %v3538_v42   ;;  %v3610_v26 = vpop.permute.xlu2 %3609 }
 0x513   : >> { %v3616_v19 = vmul.f32 %v3610_v26, %v9024_v5 }
 0x514   : >> { %v9978_v12 = vmov %v9079_v48 }
 0x515   : > { %3723 = vst [vmem:[#allocation10 + $0x8] sm:$0xff] (%p3326_p1), %v9978_v12 }
 0x518   : >> { %v3551_v25 = vpop.permute.xlu1 %3550 }
 0x519   : >> { %v3554_v57 = vmul.f32 %v3551_v25, %v9015_v55 }
 0x51b   : >> { %v3555_v34 = vadd.f32 %v3554_v57, %v3553_v44 }
 0x51d   : >> { %v3556_v14 = vrot.slane %v3555_v34, 4 }
 0x51f   : >> { %v3557_v13 = vadd.f32 %v3556_v14, %v3555_v34 }
 0x521   : >> { %v3572_v1 = vpop.permute.xlu1 %3571  ;;  %v3558_v9 = vrot.slane %v3557_v13, 2 }
 0x522   : >> { %v3575_v58 = vmul.f32 %v3572_v1, %v3565_v45 }
 0x523   : >> { %v3559_v23 = vadd.f32 %v3558_v9, %v3557_v13 }
 0x524   : >> { %v3576_v33 = vadd.f32 %v3575_v58, %v3574_v18 }
 0x525   : >> { %v3560_v52 = vrot.slane %v3559_v23, 1 }
 0x526   : >> { %v3577_v47 = vrot.slane %v3576_v33, 4 }
 0x527   : >> { %v3561_v50 = vadd.f32 %v3560_v52, %v3559_v23 }
 0x528   : >> { %v3578_v59 = vadd.f32 %v3577_v47, %v3576_v33 }
 0x52a   : >> { %v3579_v60 = vrot.slane %v3578_v59, 2  ;;  %v3593_v16 = vpop.permute.xlu1 %3592 }
 0x52b   : >> { %v3596_v17 = vmul.f32 %v3593_v16, %v3586_v2  ;;  %v3631_v2 = vpop.permute.xlu2 %3630 }
 0x52c   : >> { %v3580_v55 = vadd.f32 %v3579_v60, %v3578_v59  ;;  %v3637_v62 = vmul.f32 %v3631_v2, %v9034_v6 }
 0x52d   : >> { %v3597_v54 = vadd.f32 %v3596_v17, %v3595_v53 }
 0x52e   : >> { %v3581_v27 = vrot.slane %v3580_v55, 1 }
 0x52f   : >> { %v3598_v32 = vrot.slane %v3597_v54, 4 }
 0x530   : >> { %v3582_v45 = vadd.f32 %v3581_v27, %v3580_v55 }
 0x531   : >> { %v3599_v39 = vadd.f32 %v3598_v32, %v3597_v54 }
 0x532   : >> { %v3710_v31 = vsel %vm3709_vm11, %v3561_v50, %v3582_v45 }
 0x533   : >> { %v3600_v20 = vrot.slane %v3599_v39, 2  ;;  %v3614_v48 = vpop.permute.xlu1 %3613 }
 0x534   : >> { %v3617_v15 = vmul.f32 %v3614_v48, %v3607_v29  ;;  %v3652_v29 = vpop.permute.xlu2 %3651 }
 0x535   : >> { %v3601_v46 = vadd.f32 %v3600_v20, %v3599_v39  ;;  %v3658_v14 = vmul.f32 %v3652_v29, %v9042_v10 }
 0x536   : >> { %v3618_v28 = vadd.f32 %v3617_v15, %v3616_v19 }
 0x537   : >> { %v3602_v35 = vrot.slane %v3601_v46, 1 }
 0x538   : >> { %v3619_v21 = vrot.slane %v3618_v28, 4 }
 0x539   : >> { %v3603_v22 = vadd.f32 %v3602_v35, %v3601_v46  ;;  %v3724_v35 = vld [vmem:[#allocation10 + $0x10] sm:$0xff] (%p3326_p1)  }
 0x53a   : >> { %v3620_v30 = vadd.f32 %v3619_v21, %v3618_v28  ;;  %v3725_v21 = vld [vmem:[#allocation10] sm:$0xff] (%p3326_p1)  }
 0x53b   : >> { %v3712_v41 = vsel %vm3711_vm12, %v3710_v31, %v3603_v22 }
 0x53c   : >> { %v3621_v49 = vrot.slane %v3620_v30, 2  ;;  %v3635_v37 = vpop.permute.xlu1 %3634  ;;  %v3673_v58 = vpop.permute.xlu2 %3672 }
 0x53d   : >> { %v3638_v3 = vmul.f32 %v3635_v37, %v9064_v8  ;;  %v3679_v59 = vmul.f32 %v3673_v58, %v9049_v61  ;;  %v9980_v58 = vmov %v9056_v36 }
 0x53e   : >> { %v3622_v11 = vadd.f32 %v3621_v49, %v3620_v30 }
 0x53f   : >> { %v3639_v43 = vadd.f32 %v3638_v3, %v3637_v62 }
 0x540   : >> { %v3623_v5 = vrot.slane %v3622_v11, 1 }
 0x541   : >> { %v3640_v42 = vrot.slane %v3639_v43, 4 }
 0x542   : >> { %v3624_v25 = vadd.f32 %v3623_v5, %v3622_v11 }
 0x543   : >> { %v3641_v44 = vadd.f32 %v3640_v42, %v3639_v43 }
 0x544   : >> { %v3713_v51 = vsel %vm2036_vm3, %v3712_v41, %v3624_v25  ;;  %v3694_v52 = vpop.permute.xlu2 %3693 }
 0x545   : >> { %v3642_v57 = vrot.slane %v3641_v44, 2  ;;  %v3656_v34 = vpop.permute.xlu1 %3655  ;;  %v3700_v32 = vmul.f32 %v3694_v52, %v9056_v36 }
 0x546   : >> { %v3659_v13 = vmul.f32 %v3656_v34, %v9069_v56 }
 0x547   : >> { %v3643_v1 = vadd.f32 %v3642_v57, %v3641_v44 }
 0x548   : >> { %v3660_v18 = vadd.f32 %v3659_v13, %v3658_v14 }
 0x549   : >> { %v3644_v6 = vrot.slane %v3643_v1, 1 }
 0x54a   : >> { %v3661_v8 = vrot.slane %v3660_v18, 4 }
 0x54b   : >> { %v3645_v24 = vadd.f32 %v3644_v6, %v3643_v1 }
 0x54c   : >> { %v3662_v9 = vadd.f32 %v3661_v8, %v3660_v18 }
 0x54d   : >> { %v3715_v33 = vsel %vm3714_vm13, %v3713_v51, %v3645_v24 }
 0x54e   : >> { %v3663_v47 = vrot.slane %v3662_v9, 2  ;;  %v3677_v23 = vpop.permute.xlu1 %3676 }
 0x54f   : >> { %v3680_v60 = vmul.f32 %v3677_v23, %v9074_v40 }
 0x550   : >> { %v3664_v16 = vadd.f32 %v3663_v47, %v3662_v9 }
 0x551   : >> { %v3681_v10 = vadd.f32 %v3680_v60, %v3679_v59 }
 0x552   : >> { %v3665_v53 = vrot.slane %v3664_v16, 1 }
 0x553   : >> { %v3682_v56 = vrot.slane %v3681_v10, 4 }
 0x554   : >> { %v3666_v17 = vadd.f32 %v3665_v53, %v3664_v16 }
 0x555   : >> { %v3683_v55 = vadd.f32 %v3682_v56, %v3681_v10 }
 0x556   : >> { %v3716_v26 = vsel %vm1627_vm2, %v3715_v33, %v3666_v17 }
 0x557   : >> { %v3684_v54 = vrot.slane %v3683_v55, 2  ;;  %v3698_v27 = vpop.permute.xlu1 %3697 }
 0x558   : >> { %v3701_v50 = vmul.f32 %v3698_v27, %v9978_v12 }
 0x559   : >> { %v3685_v45 = vadd.f32 %v3684_v54, %v3683_v55 }
 0x55a   : >> { %v3702_v61 = vadd.f32 %v3701_v50, %v3700_v32 }
 0x55b   : >> { %v3686_v39 = vrot.slane %v3685_v45, 1 }
 0x55c   : >> { %v3703_v40 = vrot.slane %v3702_v61, 4 }
 0x55d   : >> { %v3687_v31 = vadd.f32 %v3686_v39, %v3685_v45 }
 0x55e   : >> { %v3704_v20 = vadd.f32 %v3703_v40, %v3702_v61 }
 0x55f   : >> { %v3717_v48 = vsel %vm1422_vm1, %v3716_v26, %v3687_v31 }
 0x560   : >> { %v3705_v19 = vrot.slane %v3704_v20, 2 }
 0x562   : >> { %v3706_v15 = vadd.f32 %v3705_v19, %v3704_v20 }
 0x564   : >> { %v3707_v46 = vrot.slane %v3706_v15, 1 }
 0x565   : > { %3328 = sbr.rel (!%p3326_p1) target bundleno = 950 (0x3b6), region = 180 }
 0x566   : >> { %v3708_v28 = vadd.f32 %v3707_v46, %v3706_v15 }
 0x568   : >> { %v3718_v2 = vsel %vm1213_vm0, %v3717_v48, %v3708_v28  ;;  %v9979_v48 = vmov %v9978_v12 }
 0x569   : >> { %3721 = vst [vmem:[%s3720_s17] sm:$0xff] %v3718_v2 }
 0x56a LB: >> { %v6952_v7 = vmov 2   ;;  %v6953_v0 = vmov 1   ;;  %s5636_s19 = sshll.u32 %s6932_s12, 3  ;;  %v6954_v12 = vmov 0   ;;  %v6955_v41 = vmov 3   ;;  %s3731_s12 = sadd.s32 1, %s6932_s12   ;;  %s6932_s12 = sphi %s9117_s12, %s3731_s12   ;;  %v6928_v35 = vphi %v3724_v35, %v9984_v35   ;;  %v6924_v21 = vphi %v3725_v21, %v9983_v21  }
 0x56b   : >> { %6339 = vset.pattern.permute.xlu2 %v6952_v7  ;;  %6338 = vset.pattern.permute.xlu1 %v6953_v0  ;;  %s3744_s25 = scalar_lea.vmem [#allocation9], %s5636_s19  ;;  %v6956_v49 = vmov 7   ;;  %v6957_v37 = vmov 4   ;;  %v6958_v62 = vmov 5   ;;  %v6959_v3 = vmov 6   ;;  %s3735_s30 = sshra.s32 %s5636_s19, 3 }
 0x56c   : >> { %v3745_v36 = vld [vmem:[%s3744_s25] sm:$0xff]  ;;  %s9151_s18 = sshll.u32 %s3735_s30, 4  ;;  %p3728_p8 = scmp.ge.s32.totalorder %s3731_s12, 16  }
 0x56d   : >> { %3746 = vxpose.xlu0.b32.start.end [1/1] (short) (narrow) %v3745_v36, 32  ;;  %s3739_s10 = scalar_lea.vmem [#allocation6], %s9151_s18  ;;  %s3742_s14 = scalar_lea.vmem [#allocation7], %s9151_s18 }
 0x56e   : >> { %v9154_v5 = vld [vmem:[%s3739_s10 + $0x8] sm:$0xff]  ;;  %s4122_s20 = scalar_lea.vmem [#allocation8], %s9151_s18  ;;  %s10000_s13 = sld [smem:[#allocation64_spill]] (%p3728_p8) }
 0x56f   : >> { %v3743_v29 = vld [vmem:[%s3742_s14 + $0x8] sm:$0xff]  ;;  %v3786_v57 = vperm.slane %v9154_v5, 0  ;;  %v3779_v34 = vrot.slane %v9154_v5, 1  ;;  %v3780_v6 = vrot.slane %v9154_v5, 2  ;;  %v3781_v24 = vrot.slane %v9154_v5, 3  ;;  %s10001_s8 = sld [smem:[#allocation38_spill]] (%p3728_p8) }
 0x570   : >> { %v9161_v42 = vmul.f32 %v3743_v29, %v9154_v5  ;;  %v3782_v16 = vrot.slane %v9154_v5, 4  ;;  %v3783_v50 = vrot.slane %v9154_v5, 5  ;;  %v3784_v28 = vrot.slane %v9154_v5, 6  ;;  %s10003_s19 = sld [smem:[#allocation66_spill]] (%p3728_p8)  ;;  %s5203_s30 = sshll.u32 (%p3728_p8), %s7190_s11, 4  ;;  %s5204_s30 = int_to_ptr.vmem [resolvable:$true] %s5203_s30 }
 0x571   : >> { %v3802_v13 = vmul.f32 %v3786_v57, %v8866_v4  ;;  %v3787_v1 = vperm.slane %v3779_v34, 0  ;;  %v9185_v33 = vperm.slane %v3780_v6, 0  ;;  %v9188_v23 = vperm.slane %v3781_v24, 0  ;;  %s5190_s10 = scalar_lea.sflag (%p3728_p8), [#allocation13], %s7168_s3 }
 0x572   : >> { %v3875_v25 = vperm.slane %v9161_v42, 2  ;;  %v3886_v14 = vperm.slane %v9161_v42, 3  ;;  %v3897_v47 = vperm.slane %v9161_v42, 4  ;;  %v3803_v59 = vmul.f32 %v3786_v57, %v8871_v38 }
 0x573   : >> { %v3818_v58 = vmul.f32 1.442695, %v3802_v13  ;;  %v3804_v9 = vmul.f32 %v3787_v1, %v8866_v4  ;;  %v3806_v10 = vmul.f32 %v9185_v33, %v8866_v4  ;;  %v3808_v17 = vmul.f32 %v9188_v23, %v8866_v4 }
 0x574   : >> { %v3820_v52 = vmul.f32 1.442695, %v3803_v59  ;;  %v9204_v55 = vperm.slane %v3782_v16, 0  ;;  %v3805_v26 = vmul.f32 %v3787_v1, %v8871_v38  ;;  %v3864_v27 = vperm.slane %v9161_v42, 1 }
 0x575   : >> { %6370 = vpow2.f32 %v3818_v58  ;;  %v3822_v60 = vmul.f32 1.442695, %v3804_v9  ;;  %v3826_v32 = vmul.f32 1.442695, %v3806_v10  ;;  %v3851_v45 = vperm.slane %v9161_v42, 0  ;;  %s5706_s7 = sshll.u32 (%p3728_p8), %s10001_s8, 5 }
 0x576   : >> { %v3830_v61 = vmul.f32 1.442695, %v3808_v17  ;;  %v3908_v40 = vperm.slane %v9161_v42, 5  ;;  %v3810_v20 = vmul.f32 %v9204_v55, %v8866_v4  ;;  %v3824_v48 = vmul.f32 1.442695, %v3805_v26  ;;  %s5200_s21 = sadd.s32 (%p3728_p8), %s6892_s24, %s5706_s7  ;;  %s6790_s15 = scalar_lea.hbm (%p3728_p8), %s10003_s19, 512 }
 0x577   : >> { %6372 = vpow2.f32 %v3822_v60  ;;  %v9216_v46 = vperm.slane %v3783_v50, 0  ;;  %v3919_v1 = vperm.slane %v9161_v42, 6  ;;  %v3807_v50 = vmul.f32 %v9185_v33, %v8871_v38  ;;  %s5707_s16 = sshll.u32 (%p3728_p8), %s5200_s21, 3 }
 0x578   : >> { %6374 = vpow2.f32 %v3820_v52  ;;  %v3809_v33 = vmul.f32 %v9188_v23, %v8871_v38  ;;  %s5202_s25 = scalar_lea.hbm (%p3728_p8), %s10003_s19, %s5707_s16 }
 0x579   : >> { %6376 = vpow2.f32 %v3826_v32  ;;  %s5205_s18 = sshll.u32 (%p3728_p8), %s5202_s25, 4  ;;  %s5206_s18 = int_to_ptr.hbm [resolvable:$true] %s5205_s18 }
 0x57a   : >> { %6378 = vpow2.f32 %v3830_v61  ;;  %s6784_s14 = sshra.s32 (%p3728_p8), %s5206_s18, 4  ;;  %s6785_s14 = int_to_ptr.hbm [resolvable:$true] %s6784_s14 }
 0x57b   : >> { %v6371_v54 = vpop.eup %6370  ;;  %6380 = vpow2.f32 %v3824_v48  ;;  %v3828_v48 = vmul.f32 1.442695, %v3807_v50  ;;  %p6791_p12 = scmp.lt.s32.totalorder (%p3728_p8), %s6785_s14, %s10003_s19 }
 0x57c   : >> { %v3941_v31 = vmul.f32 %v6928_v35, %v6371_v54  ;;  %v3930_v54 = vperm.slane %v9161_v42, 7 }
 0x57d   : >> { %v6373_v2 = vpop.eup %6372 }
 0x5d4   : >> { %6337 = vset.pattern.permute.xlu0 %v6954_v12 }
 0x611   : >> { %v3762_v22 = vpop.trf.xlu0 }
 0x612   : >> { %3877 = vperm.xlu2 %6339, %v3762_v22   ;;  %3866 = vperm.xlu1 %6338, %v3762_v22  }
 0x613   : >> { %3854 = vperm.xlu0 %6337, %v3762_v22  }
 0x619   : >> { %v3763_v30 = vpop.trf.xlu0 }
 0x61a   : >> { %6340 = vset.pattern.permute.xlu2 %v6955_v41  ;;  %6345 = vset.pattern.permute.xlu1 %v6954_v12 }
 0x61b   : >> { %3888 = vperm.xlu2 %6340, %v3762_v22   ;;  %3859 = vperm.xlu1 %6345, %v3763_v30  }
 0x61c   : >> { %6369 = vset.pattern.permute.xlu0 %v6956_v49 }
 0x621   : >> { %v9141_v11 = vpop.trf.xlu0 }
 0x623   : >> { %6341 = vset.pattern.permute.xlu2 %v6957_v37  ;;  %6347 = vset.pattern.permute.xlu1 %v6952_v7 }
 0x624   : >> { %3899 = vperm.xlu2 %6341, %v3762_v22   ;;  %3881 = vperm.xlu1 %6347, %v3763_v30  }
 0x629   : >> { %v9145_v43 = vpop.trf.xlu0 }
 0x62c   : >> { %6342 = vset.pattern.permute.xlu2 %v6958_v62  ;;  %6348 = vset.pattern.permute.xlu1 %v6955_v41 }
 0x62d   : >> { %3910 = vperm.xlu2 %6342, %v3762_v22   ;;  %3892 = vperm.xlu1 %6348, %v3763_v30  }
 0x635   : >> { %6343 = vset.pattern.permute.xlu2 %v6959_v3  ;;  %6349 = vset.pattern.permute.xlu1 %v6957_v37 }
 0x636   : >> { %3921 = vperm.xlu2 %6343, %v3762_v22   ;;  %3903 = vperm.xlu1 %6349, %v3763_v30  }
 0x63e   : >> { %6344 = vset.pattern.permute.xlu2 %v6956_v49  ;;  %6350 = vset.pattern.permute.xlu1 %v6958_v62 }
 0x63f   : >> { %3932 = vperm.xlu2 %6344, %v3762_v22   ;;  %3914 = vperm.xlu1 %6350, %v3763_v30   ;;  %v6375_v22 = vpop.eup %6374 }
 0x640   : >> { %v6377_v29 = vpop.eup %6376  ;;  %v3942_v57 = vmul.f32 %v6924_v21, %v6375_v22 }
 0x641   : >> { %v6379_v34 = vpop.eup %6378 }
 0x642   : >> { %v6381_v24 = vpop.eup %6380 }
 0x647   : >> { %6346 = vset.pattern.permute.xlu2 %v6953_v0  ;;  %6351 = vset.pattern.permute.xlu1 %v6959_v3 }
 0x648   : >> { %3870 = vperm.xlu2 %6346, %v3763_v30   ;;  %3925 = vperm.xlu1 %6351, %v3763_v30  }
 0x650   : >> { %6353 = vset.pattern.permute.xlu2 %v6954_v12  ;;  %6352 = vset.pattern.permute.xlu1 %v6956_v49 }
 0x651   : >> { %3936 = vperm.xlu1 %6352, %v3763_v30   ;;  %3947 = vperm.xlu2 %6353, %v9141_v11   ;;  %v3812_v30 = vmul.f32 %v9216_v46, %v8866_v4 }
 0x659   : >> { %6356 = vset.pattern.permute.xlu1 %v6954_v12  ;;  %6354 = vset.pattern.permute.xlu2 %v6953_v0  ;;  %v3834_v12 = vmul.f32 1.442695, %v3810_v20 }
 0x65a   : >> { %3969 = vperm.xlu2 %6354, %v9141_v11   ;;  %3952 = vperm.xlu1 %6356, %v9145_v43  }
 0x65b   : >> { %6382 = vpow2.f32 %v3834_v12  ;;  %v3813_v12 = vmul.f32 %v9216_v46, %v8871_v38 }
 0x661   : >> { %v6383_v17 = vpop.eup %6382 }
 0x662   : >> { %6355 = vset.pattern.permute.xlu2 %v6952_v7  ;;  %6357 = vset.pattern.permute.xlu1 %v6953_v0 }
 0x663   : >> { %3990 = vperm.xlu2 %6355, %v9141_v11   ;;  %3973 = vperm.xlu1 %6357, %v9145_v43  }
 0x66b   : >> { %6359 = vset.pattern.permute.xlu2 %v6955_v41  ;;  %6358 = vset.pattern.permute.xlu1 %v6952_v7 }
 0x66c   : >> { %v3878_v44 = vpop.permute.xlu2 %3877  ;;  %4011 = vperm.xlu2 %6359, %v9141_v11   ;;  %3994 = vperm.xlu1 %6358, %v9145_v43  }
 0x66d   : >> { %v9169_v51 = vmul.f32 %v3878_v44, %v3875_v25 }
 0x674   : >> { %6361 = vset.pattern.permute.xlu2 %v6957_v37  ;;  %6360 = vset.pattern.permute.xlu1 %v6955_v41  ;;  %v9229_v41 = vperm.slane %v3784_v28, 0 }
 0x675   : >> { %v3889_v18 = vpop.permute.xlu2 %3888  ;;  %4032 = vperm.xlu2 %6361, %v9141_v11   ;;  %4015 = vperm.xlu1 %6360, %v9145_v43  }
 0x676   : >> { %v9181_v8 = vmul.f32 %v3889_v18, %v3886_v14  ;;  %v3838_v18 = vmul.f32 1.442695, %v3812_v30  ;;  %v3814_v6 = vmul.f32 %v9229_v41, %v8866_v4 }
 0x678   : >> { %6384 = vpow2.f32 %v3838_v18  ;;  %v3842_v10 = vmul.f32 1.442695, %v3814_v6 }
 0x67a   : >> { %6386 = vpow2.f32 %v3842_v10 }
 0x67d   : >> { %6363 = vset.pattern.permute.xlu2 %v6958_v62  ;;  %6362 = vset.pattern.permute.xlu1 %v6957_v37  ;;  %v3785_v37 = vrot.slane %v9154_v5, 7 }
 0x67e   : >> { %v3900_v53 = vpop.permute.xlu2 %3899  ;;  %4053 = vperm.xlu2 %6363, %v9141_v11   ;;  %4036 = vperm.xlu1 %6362, %v9145_v43  }
 0x67f   : >> { %v9200_v56 = vmul.f32 %v3900_v53, %v3897_v47  ;;  %v9239_v58 = vperm.slane %v3785_v37, 0 }
 0x681   : >> { %v3816_v53 = vmul.f32 %v9239_v58, %v8866_v4 }
 0x684   : >> { %v3867_v39 = vpop.permute.xlu1 %3866 }
 0x685   : >> { %v3873_v19 = vmul.f32 %v3867_v39, %v3864_v27  ;;  %v3855_v15 = vpop.permute.xlu0 %3854 }
 0x686   : >> { %v3862_v7 = vmul.f32 %v3855_v15, %v3851_v45  ;;  %6365 = vset.pattern.permute.xlu2 %v6959_v3  ;;  %6364 = vset.pattern.permute.xlu1 %v6958_v62 }
 0x687   : >> { %v3911_v35 = vpop.permute.xlu2 %3910  ;;  %4074 = vperm.xlu2 %6365, %v9141_v11   ;;  %4057 = vperm.xlu1 %6364, %v9145_v43  }
 0x688   : >> { %v3917_v0 = vmul.f32 %v3911_v35, %v3908_v40  ;;  %v9225_v36 = vadd.f32 %v3941_v31, %v3862_v7 }
 0x68a   : >> { %v3964_v62 = vmul.f32 %v6373_v2, %v9225_v36 }
 0x68c   : >> { %v9233_v44 = vadd.f32 %v3964_v62, %v3873_v19  ;;  %v3840_v62 = vmul.f32 1.442695, %v3813_v12 }
 0x68d   : >> { %v3860_v13 = vpop.permute.xlu1 %3859 }
 0x68e   : >> { %v3863_v5 = vmul.f32 %v3860_v13, %v3851_v45  ;;  %v3985_v9 = vmul.f32 %v6377_v29, %v9233_v44  ;;  %v6385_v45 = vpop.eup %6384 }
 0x68f   : >> { %6367 = vset.pattern.permute.xlu2 %v6956_v49  ;;  %6366 = vset.pattern.permute.xlu1 %v6959_v3  ;;  %v6387_v19 = vpop.eup %6386 }
 0x690   : >> { %v3922_v21 = vpop.permute.xlu2 %3921  ;;  %4095 = vperm.xlu2 %6367, %v9141_v11   ;;  %4078 = vperm.xlu1 %6366, %v9145_v43   ;;  %v9247_v59 = vadd.f32 %v3985_v9, %v9169_v51  ;;  %v9249_v60 = vadd.f32 %v3942_v57, %v3863_v5  ;;  %v3846_v51 = vmul.f32 1.442695, %v3816_v53  ;;  %v3817_v5 = vmul.f32 %v9239_v58, %v8871_v38 }
 0x691   : >> { %v3928_v16 = vmul.f32 %v3922_v21, %v3919_v1 }
 0x692   : >> { %v4006_v3 = vmul.f32 %v6379_v34, %v9247_v59  ;;  %v3965_v11 = vmul.f32 %v6381_v24, %v9249_v60  ;;  %6388 = vpow2.f32 %v3846_v51  ;;  %v3848_v53 = vmul.f32 1.442695, %v3817_v5 }
 0x693   : >> { %6390 = vpow2.f32 %v3828_v48 }
 0x694   : >> { %v9258_v52 = vadd.f32 %v4006_v3, %v9181_v8 }
 0x696   : >> { %v3882_v26 = vpop.permute.xlu1 %3881  ;;  %v4027_v32 = vmul.f32 %v6383_v17, %v9258_v52 }
 0x697   : >> { %v3885_v61 = vmul.f32 %v3882_v26, %v3875_v25 }
 0x698   : >> { %6368 = vset.pattern.permute.xlu1 %v6956_v49  ;;  %v9268_v39 = vadd.f32 %v4027_v32, %v9200_v56  ;;  %v3832_v56 = vmul.f32 1.442695, %v3809_v33  ;;  %v6389_v15 = vpop.eup %6388 }
 0x699   : >> { %v3933_v8 = vpop.permute.xlu2 %3932  ;;  %4099 = vperm.xlu1 %6368, %v9145_v43   ;;  %v3811_v43 = vmul.f32 %v9204_v55, %v8871_v38  ;;  %v6391_v30 = vpop.eup %6390 }
 0x69a   : >> { %v3939_v31 = vmul.f32 %v3933_v8, %v3930_v54  ;;  %v4048_v20 = vmul.f32 %v6385_v45, %v9268_v39  ;;  %6392 = vpow2.f32 %v3832_v56 }
 0x69c   : >> { %v9276_v25 = vadd.f32 %v4048_v20, %v3917_v0  ;;  %v3836_v0 = vmul.f32 1.442695, %v3811_v43 }
 0x69e   : >> { %v4069_v49 = vmul.f32 %v6387_v19, %v9276_v25  ;;  %6394 = vpow2.f32 %v3836_v0 }
 0x69f   : >> { %v3893_v28 = vpop.permute.xlu1 %3892  ;;  %6396 = vpow2.f32 %v3840_v62 }
 0x6a0   : >> { %v3896_v2 = vmul.f32 %v3893_v28, %v3886_v14  ;;  %v9283_v7 = vadd.f32 %v4069_v49, %v3928_v16  ;;  %v3815_v14 = vmul.f32 %v9229_v41, %v8871_v38  ;;  %v6393_v57 = vpop.eup %6392 }
 0x6a2   : >> { %v3871_v35 = vpop.permute.xlu2 %3870  ;;  %v4090_v23 = vmul.f32 %v6389_v15, %v9283_v7  ;;  %v3844_v46 = vmul.f32 1.442695, %v3815_v14 }
 0x6a3   : >> { %v3874_v22 = vmul.f32 %v3871_v35, %v3864_v27 }
 0x6a4   : >> { %v9290_v35 = vadd.f32 %v4090_v23, %v3939_v31   ;;  %v6395_v27 = vpop.eup %6394  ;;  %6398 = vpow2.f32 %v3844_v46 }
 0x6a5   : >> { %v3967_v37 = vadd.f32 %v3965_v11, %v3874_v22  ;;  %v6397_v21 = vpop.eup %6396  ;;  %6400 = vpow2.f32 %v3848_v53 }
 0x6a6   : >> { %v9981_v55 = vmov %v9290_v35 }
 0x6a7   : >> { %v3986_v29 = vmul.f32 %v6391_v30, %v3967_v37  ;;  %4124 = vst [vmem:[#allocation10 + $0x10] sm:$0xff] (%p3728_p8), %v9981_v55 }
 0x6a8   : >> { %v3904_v34 = vpop.permute.xlu1 %3903 }
 0x6a9   : >> { %v3907_v13 = vmul.f32 %v3904_v34, %v3897_v47  ;;  %v3988_v18 = vadd.f32 %v3986_v29, %v3885_v61 }
 0x6aa   : >> { %v6399_v47 = vpop.eup %6398 }
 0x6ab   : >> { %v4007_v6 = vmul.f32 %v6393_v57, %v3988_v18  ;;  %v6401_v58 = vpop.eup %6400  ;;  %v3948_v45 = vpop.permute.xlu2 %3947 }
 0x6ac   : >> { %v3955_v20 = vmul.f32 %v3948_v45, %v9225_v36 }
 0x6ad   : >> { %v4009_v24 = vadd.f32 %v4007_v6, %v3896_v2 }
 0x6af   : >> { %v4028_v9 = vmul.f32 %v6395_v27, %v4009_v24 }
 0x6b1   : >> { %v3915_v16 = vpop.permute.xlu1 %3914  ;;  %v4030_v41 = vadd.f32 %v4028_v9, %v3907_v13 }
 0x6b2   : >> { %v3918_v10 = vmul.f32 %v3915_v16, %v3908_v40 }
 0x6b3   : >> { %v4049_v17 = vmul.f32 %v6397_v21, %v4030_v41 }
 0x6b4   : >> { %v3970_v48 = vpop.permute.xlu2 %3969 }
 0x6b5   : >> { %v9300_v3 = vadd.f32 %v4049_v17, %v3918_v10  ;;  %v3976_v43 = vmul.f32 %v3970_v48, %v9233_v44 }
 0x6b7   : >> { %v4070_v11 = vmul.f32 %v6399_v47, %v9300_v3 }
 0x6ba   : >> { %v3926_v51 = vpop.permute.xlu1 %3925 }
 0x6bb   : >> { %v3929_v26 = vmul.f32 %v3926_v51, %v3919_v1 }
 0x6bd   : >> { %v9305_v32 = vadd.f32 %v4070_v11, %v3929_v26  ;;  %v3991_v28 = vpop.permute.xlu2 %3990 }
 0x6be   : >> { %v3997_v36 = vmul.f32 %v3991_v28, %v9247_v59 }
 0x6bf   : >> { %v4091_v50 = vmul.f32 %v6401_v58, %v9305_v32 }
 0x6c3   : >> { %v3937_v61 = vpop.permute.xlu1 %3936 }
 0x6c4   : >> { %v3940_v40 = vmul.f32 %v3937_v61, %v3930_v54 }
 0x6c6   : >> { %v9310_v21 = vadd.f32 %v4091_v50, %v3940_v40   ;;  %v4012_v62 = vpop.permute.xlu2 %4011 }
 0x6c7   : >> { %v4018_v27 = vmul.f32 %v4012_v62, %v9258_v52 }
 0x6c8   : >> { %v9982_v8 = vmov %v9310_v21 }
 0x6c9   : > { %4125 = vst [vmem:[#allocation10] sm:$0xff] (%p3728_p8), %v9982_v8 }
 0x6cc   : >> { %v3953_v31 = vpop.permute.xlu1 %3952 }
 0x6cd   : >> { %v3956_v33 = vmul.f32 %v3953_v31, %v9249_v60 }
 0x6cf   : >> { %v3957_v19 = vadd.f32 %v3956_v33, %v3955_v20  ;;  %v4033_v59 = vpop.permute.xlu2 %4032 }
 0x6d0   : >> { %v4039_v51 = vmul.f32 %v4033_v59, %v9268_v39  ;;  %v5771_v59 = vld [vmem:[#allocation3 + $0x48] sm:$0xff] (%p3728_p8) }
 0x6d1   : >> { %v3958_v1 = vrot.slane %v3957_v19, 4  ;;  %4660 = vmatpush.bf16.msra.mxu0 (%p3728_p8), %v5771_v59 }
 0x6d3   : >> { %v3959_v49 = vadd.f32 %v3958_v1, %v3957_v19 }
 0x6d5   : >> { %v3974_v56 = vpop.permute.xlu1 %3973  ;;  %v3960_v2 = vrot.slane %v3959_v49, 2 }
 0x6d6   : >> { %v3977_v15 = vmul.f32 %v3974_v56, %v3967_v37 }
 0x6d7   : >> { %v3961_v54 = vadd.f32 %v3960_v2, %v3959_v49 }
 0x6d8   : >> { %v3978_v35 = vadd.f32 %v3977_v15, %v3976_v43  ;;  %v4054_v61 = vpop.permute.xlu2 %4053 }
 0x6d9   : >> { %v3962_v30 = vrot.slane %v3961_v54, 1  ;;  %v4060_v33 = vmul.f32 %v4054_v61, %v9276_v25 }
 0x6da   : >> { %v3979_v42 = vrot.slane %v3978_v35, 4 }
 0x6db   : >> { %v3963_v34 = vadd.f32 %v3962_v30, %v3961_v54 }
 0x6dc   : >> { %v3980_v23 = vadd.f32 %v3979_v42, %v3978_v35 }
 0x6de   : >> { %v3981_v0 = vrot.slane %v3980_v23, 2  ;;  %v3995_v12 = vpop.permute.xlu1 %3994 }
 0x6df   : >> { %v3998_v22 = vmul.f32 %v3995_v12, %v3988_v18 }
 0x6e0   : >> { %v3982_v60 = vadd.f32 %v3981_v0, %v3980_v23 }
 0x6e1   : >> { %v3999_v14 = vadd.f32 %v3998_v22, %v3997_v36 }
 0x6e2   : >> { %v3983_v29 = vrot.slane %v3982_v60, 1 }
 0x6e3   : >> { %v4000_v57 = vrot.slane %v3999_v14, 4 }
 0x6e4   : >> { %v3984_v44 = vadd.f32 %v3983_v29, %v3982_v60 }
 0x6e5   : >> { %v4001_v37 = vadd.f32 %v4000_v57, %v3999_v14 }
 0x6e6   : >> { %v4112_v13 = vsel %vm3709_vm11, %v3963_v34, %v3984_v44 }
 0x6e7   : >> { %v4002_v46 = vrot.slane %v4001_v37, 2  ;;  %v4016_v6 = vpop.permute.xlu1 %4015 }
 0x6e8   : >> { %v4019_v5 = vmul.f32 %v4016_v6, %v4009_v24 }
 0x6e9   : >> { %v4003_v9 = vadd.f32 %v4002_v46, %v4001_v37 }
 0x6ea   : >> { %v4020_v21 = vadd.f32 %v4019_v5, %v4018_v27 }
 0x6eb   : >> { %v4004_v18 = vrot.slane %v4003_v9, 1 }
 0x6ec   : >> { %v4021_v16 = vrot.slane %v4020_v21, 4 }
 0x6ed   : >> { %v4005_v10 = vadd.f32 %v4004_v18, %v4003_v9  ;;  %v5779_v18 = vld [vmem:[#allocation3 + $0x28] sm:$0xff] (%p3728_p8) }
 0x6ee   : >> { %v4022_v53 = vadd.f32 %v4021_v16, %v4020_v21  ;;  %v9983_v21 = vmov %v9982_v8  ;;  %4709 = vmatpush.bf16.msra.mxu1 (%p3728_p8), %v5779_v18  ;;  %v5770_v16 = vld [vmem:[#allocation3 + $0x8] sm:$0xff] (%p3728_p8) }
 0x6ef   : >> { %v4114_v17 = vsel %vm3711_vm12, %v4112_v13, %v4005_v10  ;;  %v5778_v10 = vld [vmem:[#allocation3 + $0x78] sm:$0xff] (%p3728_p8)  ;;  %4661 = vmatpush.bf16.msra.mxu0 (%p3728_p8), %v5770_v16  ;;  %v9349_v21 = vld [vmem:[#allocation5 + $0xb8] sm:$0xff] (%p3728_p8) }
 0x6f0   : >> { %v4023_v47 = vrot.slane %v4022_v53, 2  ;;  %v4037_v11 = vpop.permute.xlu1 %4036 }
 0x6f1   : >> { %v4040_v26 = vmul.f32 %v4037_v11, %v4030_v41  ;;  %v4075_v41 = vpop.permute.xlu2 %4074  ;;  %v9345_v11 = vld [vmem:[#allocation5 + $0xc8] sm:$0xff] (%p3728_p8) }
 0x6f2   : >> { %v4024_v58 = vadd.f32 %v4023_v47, %v4022_v53  ;;  %v4081_v42 = vmul.f32 %v4075_v41, %v9283_v7  ;;  %4710 = vmatpush.bf16.msra.mxu1 (%p3728_p8), %v5778_v10  ;;  %v5769_v53 = vld [vmem:[#allocation3 + $0x68] sm:$0xff] (%p3728_p8)  ;;  %v4294_v38 = vsub.f32 (%p3728_p8), 0.0, %v9345_v11  ;;  %v9382_v10 = vld [vmem:[#allocation5 + $0xb0] sm:$0xff] (%p3728_p8) }
 0x6f3   : >> { %v4041_v50 = vadd.f32 %v4040_v26, %v4039_v51  ;;  %v9343_v47 = vld [vmem:[#allocation5 + $0x98] sm:$0xff] (%p3728_p8)  ;;  %v5768_v51 = vld [vmem:[#allocation3 + $0x50] sm:$0xff] (%p3728_p8)  ;;  %4662 = vmatpush.bf16.msra.mxu0 (%p3728_p8), %v5769_v53 }
 0x6f4   : >> { %v4025_v45 = vrot.slane %v4024_v58, 1  ;;  %v4292_v4 = vsub.f32 (%p3728_p8), 0.0, %v9343_v47 }
 0x6f5   : >> { %v4042_v52 = vrot.slane %v4041_v50, 4 }
 0x6f6   : >> { %v4026_v24 = vadd.f32 %v4025_v45, %v4024_v58  ;;  %v4324_v26 = vmul.f32 (%p3728_p8), 1.442695, %v4292_v4  ;;  %v4328_v58 = vmul.f32 (%p3728_p8), 1.442695, %v4294_v38 }
 0x6f7   : >> { %v4043_v40 = vadd.f32 %v4042_v52, %v4041_v50  ;;  %v4293_v50 = vsub.f32 (%p3728_p8), 0.0, %v9349_v21  ;;  %4663 = vmatpush.bf16.msra.mxu0 (%p3728_p8), %v5768_v51 }
 0x6f8   : >> { %v4115_v31 = vsel %vm2036_vm3, %v4114_v17, %v4026_v24  ;;  %v5777_v17 = vld [vmem:[#allocation3 + $0x70] sm:$0xff] (%p3728_p8)  ;;  %6404 = vpow2.f32 (%p3728_p8), %v4324_v26  ;;  %v5772_v26 = vld [vmem:[#allocation3 + $0x40] sm:$0xff] (%p3728_p8) }
 0x6f9   : >> { %v4044_v20 = vrot.slane %v4043_v40, 2  ;;  %v4058_v48 = vpop.permute.xlu1 %4057  ;;  %v4096_v36 = vpop.permute.xlu2 %4095  ;;  %4711 = vmatpush.bf16.msra.mxu1 (%p3728_p8), %v5777_v17  ;;  %v4326_v61 = vmul.f32 (%p3728_p8), 1.442695, %v4293_v50  ;;  %v9355_v24 = vld [vmem:[#allocation5] sm:$0xff] (%p3728_p8)  ;;  %6406 = vpow2.f32 (%p3728_p8), %v4328_v58 }
 0x6fa   : >> { %v4061_v19 = vmul.f32 %v4058_v48, %v9300_v3  ;;  %v4102_v14 = vmul.f32 %v4096_v36, %v9981_v55  ;;  %v9361_v48 = vld [vmem:[#allocation5 + $0x30] sm:$0xff] (%p3728_p8) }
 0x6fb   : >> { %v4045_v1 = vadd.f32 %v4044_v20, %v4043_v40  ;;  %v9357_v40 = vld [vmem:[#allocation5 + $0x20] sm:$0xff] (%p3728_p8)  ;;  %6408 = vpow2.f32 (%p3728_p8), %v4326_v61  ;;  %v4297_v41 = vsub.f32 (%p3728_p8), 0.0, %v9361_v48 }
 0x6fc   : >> { %v4062_v49 = vadd.f32 %v4061_v19, %v4060_v33  ;;  %v4298_v20 = vsub.f32 (%p3728_p8), 0.0, %v9357_v40  ;;  %v5767_v33 = vld [vmem:[#allocation3 + $0x18] sm:$0xff] (%p3728_p8) }
 0x6fd   : >> { %v4046_v56 = vrot.slane %v4045_v1, 1  ;;  %v5775_v19 = vld [vmem:[#allocation3 + $0x38] sm:$0xff] (%p3728_p8)  ;;  %4664 = vmatpush.bf16.msra.mxu0 (%p3728_p8), %v5767_v33 }
 0x6fe   : >> { %v4063_v39 = vrot.slane %v4062_v49, 4 }
 0x6ff   : >> { %v4047_v43 = vadd.f32 %v4046_v56, %v4045_v1  ;;  %v9363_v1 = vld [vmem:[#allocation5 + $0x50] sm:$0xff] (%p3728_p8) }
 0x700   : >> { %v4064_v15 = vadd.f32 %v4063_v39, %v4062_v49  ;;  %v4190_v49 = vld [vmem:[#allocation19] sm:$0x3] (%p3728_p8)  ;;  %v4336_v39 = vmul.f32 (%p3728_p8), 1.442695, %v4298_v20  ;;  %v4303_v20 = vsub.f32 (%p3728_p8), 0.0, %v9382_v10 }
 0x701   : >> { %v4117_v28 = vsel %vm3714_vm13, %v4115_v31, %v4047_v43  ;;  %v4296_v31 = vsub.f32 (%p3728_p8), 0.0, %v9355_v24  ;;  %v4299_v43 = vsub.f32 (%p3728_p8), 0.0, %v9363_v1 }
 0x702   : >> { %v4065_v2 = vrot.slane %v4064_v15, 2  ;;  %v4079_v35 = vpop.permute.xlu1 %4078 }
 0x703   : >> { %v4082_v54 = vmul.f32 %v4079_v35, %v9305_v32  ;;  %v9984_v35 = vmov %v9981_v55  ;;  %v5776_v55 = vld [vmem:[#allocation3 + $0x60] sm:$0xff] (%p3728_p8)  ;;  %v4332_v56 = vmul.f32 (%p3728_p8), 1.442695, %v4296_v31 }
 0x704   : >> { %v4066_v23 = vadd.f32 %v4065_v2, %v4064_v15  ;;  %4712 = vmatpush.bf16.msra.mxu1 (%p3728_p8), %v5776_v55  ;;  %v6405_v15 = vpop.eup (%p3728_p8), %6404  ;;  %v5774_v2 = vld [vmem:[#allocation3 + $0x10] sm:$0xff] (%p3728_p8)  ;;  %v9367_v35 = vperm.slane (%p3728_p8), %v4190_v49, 0 }
 0x705   : >> { %v4083_v0 = vadd.f32 %v4082_v54, %v4081_v42  ;;  %v4334_v42 = vmul.f32 (%p3728_p8), 1.442695, %v4297_v41  ;;  %v6407_v54 = vpop.eup (%p3728_p8), %6406  ;;  %v5764_v55 = vld [vmem:[#allocation3 + $0x30] sm:$0xff] (%p3728_p8) }
 0x706   : >> { %v4067_v25 = vrot.slane %v4066_v23, 1  ;;  %v4390_v36 = vadd.f32 (%p3728_p8), 1.0, %v6407_v54  ;;  %v9390_v54 = vld [vmem:[#allocation5 + $0x88] sm:$0xff] (%p3728_p8) }
 0x707   : >> { %v4084_v12 = vrot.slane %v4083_v0, 4 }
 0x708   : >> { %v4068_v3 = vadd.f32 %v4067_v25, %v4066_v23  ;;  %4713 = vmatpush.bf16.msra.mxu1 (%p3728_p8), %v5775_v19  ;;  %v4158_v23 = vld [vmem:[#allocation7] sm:$0xff] (%p3728_p8)  ;;  %v9369_v25 = vld [vmem:[#allocation5 + $0x10] sm:$0xff] (%p3728_p8) }
 0x709   : >> { %v4085_v22 = vadd.f32 %v4084_v12, %v4083_v0  ;;  %v4388_v0 = vadd.f32 (%p3728_p8), 1.0, %v6405_v15  ;;  %v6409_v12 = vpop.eup (%p3728_p8), %6408 }
 0x70a   : >> { %v4118_v30 = vsel %vm1627_vm2, %v4117_v28, %v4068_v3  ;;  %v5766_v28 = vld [vmem:[#allocation3 + $0x58] sm:$0xff] (%p3728_p8)  ;;  %v4160_v3 = vld [vmem:[#allocation7 + $0x10] sm:$0xff] (%p3728_p8) }
 0x70b   : >> { %v4086_v60 = vrot.slane %v4085_v22, 2  ;;  %v4100_v62 = vpop.permute.xlu1 %4099  ;;  %4665 = vmatpush.bf16.msra.mxu0 (%p3728_p8), %v5766_v28 }
 0x70c   : >> { %v4103_v29 = vmul.f32 %v4100_v62, %v9982_v8  ;;  %v9351_v8 = vld [vmem:[#allocation5 + $0xc0] sm:$0xff] (%p3728_p8)  ;;  %v4159_v62 = vld [vmem:[#allocation7 + $0x8] sm:$0xff] (%p3728_p8)  ;;  %4714 = vmatpush.bf16.msra.mxu1 (%p3728_p8), %v5774_v2 }
 0x70d   : >> { %v4087_v57 = vadd.f32 %v4086_v60, %v4085_v22  ;;  %v4295_v45 = vsub.f32 (%p3728_p8), 0.0, %v9351_v8  ;;  %v9371_v22 = vperm.slane (%p3728_p8), %v4190_v49, 1  ;;  %v5765_v60 = vld [vmem:[#allocation3] sm:$0xff] (%p3728_p8) }
 0x70e   : >> { %v4104_v7 = vadd.f32 %v4103_v29, %v4102_v14  ;;  %v4389_v14 = vadd.f32 (%p3728_p8), 1.0, %v6409_v12  ;;  %v4338_v29 = vmul.f32 (%p3728_p8), 1.442695, %v4299_v43  ;;  %v4162_v12 = vld [vmem:[#allocation7 + $0x20] sm:$0xff] (%p3728_p8) }
 0x70f   : >> { %v4088_v34 = vrot.slane %v4087_v57, 1  ;;  %v4330_v52 = vmul.f32 (%p3728_p8), 1.442695, %v4295_v45  ;;  %v4197_v59 = vmul.f32 (%p3728_p8), %v9371_v22, %v4159_v62  ;;  %4666 = vmatpush.bf16.msra.mxu0 (%p3728_p8), %v5765_v60 }
 0x710   : >> { %v4105_v32 = vrot.slane %v4104_v7, 4 }
 0x711   : >> { %v4089_v44 = vadd.f32 %v4088_v34, %v4087_v57  ;;  %6410 = vpow2.f32 (%p3728_p8), %v4330_v52  ;;  %v9373_v57 = vld [vmem:[#allocation5 + $0x8] sm:$0xff] (%p3728_p8)  ;;  %v4196_v34 = vmul.f32 (%p3728_p8), %v9367_v35, %v4158_v23 }
 0x712   : >> { %v4106_v37 = vadd.f32 %v4105_v32, %v4104_v7  ;;  %6412 = vpow2.f32 (%p3728_p8), %v4332_v56  ;;  %v5773_v7 = vld [vmem:[#allocation3 + $0x20] sm:$0xff] (%p3728_p8)  ;;  %v4161_v32 = vld [vmem:[#allocation7 + $0x18] sm:$0xff] (%p3728_p8)  ;;  %v4302_v16 = vsub.f32 (%p3728_p8), 0.0, %v9373_v57 }
 0x713   : >> { %v4119_v13 = vsel %vm1422_vm1, %v4118_v30, %v4089_v44  ;;  %6414 = vpow2.f32 (%p3728_p8), %v4336_v39  ;;  %v4199_v17 = vmul.f32 (%p3728_p8), %v9371_v22, %v4161_v32  ;;  %4715 = vmatpush.bf16.msra.mxu1 (%p3728_p8), %v5773_v7  ;;  %4667 = vmatpush.bf16.msra.mxu0 (%p3728_p8), %v5764_v55  ;;  %v4304_v7 = vsub.f32 (%p3728_p8), 0.0, %v9390_v54 }
 0x714   : >> { %v4107_v46 = vrot.slane %v4106_v37, 2  ;;  %6416 = vpow2.f32 (%p3728_p8), %v4334_v42  ;;  %v4344_v56 = vmul.f32 (%p3728_p8), 1.442695, %v4302_v16 }
 0x715   : > { %6418 = vrcp.f32 (%p3728_p8), %v4388_v0 }
 0x716   : >> { %v4108_v6 = vadd.f32 %v4107_v46, %v4106_v37  ;;  %6420 = vrcp.f32 (%p3728_p8), %v4390_v36  ;;  %v4300_v37 = vsub.f32 (%p3728_p8), 0.0, %v9369_v25 }
 0x717   : > { %v6411_v30 = vpop.eup (%p3728_p8), %6410  ;;  %6422 = vrcp.f32 (%p3728_p8), %v4389_v14  ;;  %4716 = vmatpush.bf16.msra.mxu1 (%p3728_p8), %v5772_v26 }
 0x718   : >> { %v4109_v27 = vrot.slane %v4108_v6, 1  ;;  %v4391_v44 = vadd.f32 (%p3728_p8), 1.0, %v6411_v30  ;;  %v6413_v46 = vpop.eup (%p3728_p8), %6412  ;;  %v4340_v45 = vmul.f32 (%p3728_p8), 1.442695, %v4300_v37  ;;  %v4164_v30 = vld [vmem:[#allocation7 + $0x30] sm:$0xff] (%p3728_p8) }
 0x719   : > { %3730 = sbr.rel (!%p3728_p8) target bundleno = 1386 (0x56a), region = 191  ;;  %v4392_v18 = vadd.f32 (%p3728_p8), 1.0, %v6413_v46 }
 0x71a   : >> { %v4110_v5 = vadd.f32 %v4109_v27, %v4108_v6  ;;  %v4198_v27 = vmul.f32 (%p3728_p8), %v9367_v35, %v4160_v3  ;;  %6424 = vrcp.f32 (%p3728_p8), %v4391_v44  ;;  %v4346_v3 = vmul.f32 (%p3728_p8), 1.442695, %v4303_v20 }
 0x71b   : > { %6426 = vpow2.f32 (%p3728_p8), %v4338_v29  ;;  %v4163_v29 = vld [vmem:[#allocation7 + $0x28] sm:$0xff] (%p3728_p8) }
 0x71c   : >> { %v4120_v9 = vsel %vm1213_vm0, %v4119_v13, %v4110_v5  ;;  %v9377_v13 = vld [vmem:[#allocation5 + $0x80] sm:$0xff] (%p3728_p8)  ;;  %v6415_v5 = vpop.eup (%p3728_p8), %6414  ;;  %6428 = vrcp.f32 (%p3728_p8), %v4392_v18  ;;  %v4201_v18 = vmul.f32 (%p3728_p8), %v9371_v22, %v4163_v29 }
 0x71d   : >> { %4123 = vst [vmem:[%s4122_s20 + $0x8] sm:$0xff] %v4120_v9  ;;  %v4394_v51 = vadd.f32 (%p3728_p8), 1.0, %v6415_v5  ;;  %v4301_v4 = vsub.f32 (%p3728_p8), 0.0, %v9377_v13  ;;  %v6417_v38 = vpop.eup (%p3728_p8), %6416  ;;  %v9401_v5 = vld [vmem:[#allocation5 + $0xe0] sm:$0xff] (%p3728_p8)  ;;  %s6786_s20 = scalar_lea.hbm (%p3728_p8), %s6785_s14, 128 }
 0x71e   : > { %v6419_v61 = vpop.eup %6418  ;;  %v4393_v31 = vadd.f32 1.0, %v6417_v38  ;;  %v4348_v38 = vmul.f32 1.442695, %v4304_v7  ;;  %v9413_v7 = vld [vmem:[#allocation5 + $0x40] sm:$0xff]  ;;  %p6787_p9 = scmp.ne.s32.totalorder %s6785_s14, %s6786_s20  ;;  %p6792_p13 = scmp.lt.s32.totalorder %s6790_s15, %s6786_s20 }
 0x71f   : > { %v6421_v33 = vpop.eup %6420  ;;  %v4452_v19 = vmul.f32 %v6419_v61, %v9343_v47  ;;  %6430 = vrcp.f32 %v4394_v51  ;;  %v4342_v15 = vmul.f32 1.442695, %v4301_v4 }
 0x720   : > { %v6423_v39 = vpop.eup %6422  ;;  %v4454_v41 = vmul.f32 %v6421_v33, %v9345_v11  ;;  %6432 = vpow2.f32 %v4340_v45  ;;  %v9393_v11 = vld [vmem:[#allocation5 + $0xf0] sm:$0xff]  ;;  %p6788_p10 = pnand %p6787_p9, %p7143_p2  ;;  %p6793_p0 = por %p6792_p13, %p6791_p12 }
 0x721   : > { %v6425_v28 = vpop.eup %6424  ;;  %v4453_v42 = vmul.f32 %v6423_v39, %v9349_v21  ;;  %6434 = vrcp.f32 %v4393_v31  ;;  %v4165_v21 = vld [vmem:[#allocation7 + $0x38] sm:$0xff]  ;;  %v4306_v44 = vsub.f32 0.0, %v9393_v11 }
 0x722   : > { %v6427_v23 = vpop.eup %6426  ;;  %v4455_v0 = vmul.f32 %v6425_v28, %v9351_v8  ;;  %6436 = vpow2.f32 %v4344_v56  ;;  %v4200_v8 = vmul.f32 %v9367_v35, %v4162_v12  ;;  %v4203_v16 = vmul.f32 %v9371_v22, %v4165_v21  ;;  %p6789_p11 = pneg %p6788_p10 }
 0x723   : > { %v4395_v60 = vadd.f32 1.0, %v6427_v23  ;;  %6438 = vpow2.f32 %v4342_v15  ;;  %v6429_v32 = vpop.eup %6428 }
 0x724   : > { %v4126_v6 = vld [vmem:[#allocation8] sm:$0xff]  ;;  %v4128_v9 = vld [vmem:[#allocation8 + $0x10] sm:$0xff]  ;;  %v4127_v53 = vld [vmem:[#allocation8 + $0x8] sm:$0xff]  ;;  %p6794_p5 = pnand %p6793_p0, %p6789_p11 }
 0x725   : > { %v4228_v58 = vadd.f32 %v4196_v34, %v4126_v6  ;;  %v4129_v50 = vld [vmem:[#allocation8 + $0x18] sm:$0xff]  ;;  %v4230_v52 = vadd.f32 %v4198_v27, %v4128_v9  ;;  %v4229_v49 = vadd.f32 %v4197_v59, %v4127_v53  ;;  %v9396_v34 = vld [vmem:[#allocation5 + $0xa0] sm:$0xff]  ;;  %6440 = vrcp.f32 %v4395_v60  ;;  %v6431_v37 = vpop.eup %6430  ;;  %v4132_v59 = vld [vmem:[#allocation8 + $0x30] sm:$0xff] }
 0x726   : > { %v4231_v43 = vadd.f32 %v4199_v17, %v4129_v50  ;;  %v4130_v6 = vld [vmem:[#allocation8 + $0x20] sm:$0xff]  ;;  %v4202_v27 = vmul.f32 %v9367_v35, %v4164_v30  ;;  %6442 = vpow2.f32 %v4346_v3  ;;  %v6433_v9 = vpop.eup %6432  ;;  %v4305_v53 = vsub.f32 0.0, %v9396_v34  ;;  %v4131_v51 = vld [vmem:[#allocation8 + $0x28] sm:$0xff]  ;;  %v4133_v4 = vld [vmem:[#allocation8 + $0x38] sm:$0xff] }
 0x727   : > { %v4484_v2 = vmul.f32 %v4452_v19, %v4228_v58  ;;  %v4486_v47 = vmul.f32 %v4454_v41, %v4230_v52  ;;  %v4485_v36 = vmul.f32 %v4453_v42, %v4229_v49  ;;  %v6435_v17 = vpop.eup %6434  ;;  %v4232_v26 = vadd.f32 %v4200_v8, %v4130_v6  ;;  %v4166_v3 = vld [vmem:[#allocation7 + $0x40] sm:$0xff]  ;;  %v4167_v60 = vld [vmem:[#allocation7 + $0x48] sm:$0xff] }
 0x728   : > { %v4487_v14 = vmul.f32 %v4455_v0, %v4231_v43  ;;  %v6437_v55 = vpop.eup %6436  ;;  %v4352_v58 = vmul.f32 1.442695, %v4306_v44  ;;  %v4307_v50 = vsub.f32 0.0, %v9401_v5  ;;  %v4234_v61 = vadd.f32 %v4202_v27, %v4132_v59  ;;  %v4134_v8 = vld [vmem:[#allocation8 + $0x40] sm:$0xff]  ;;  %v4136_v44 = vld [vmem:[#allocation8 + $0x50] sm:$0xff] }
 0x729   : > { %v4516_v62 = vpack.c.bf16 %v4486_v47, %v4484_v2  ;;  %v6439_v45 = vpop.eup %6438  ;;  %v4456_v52 = vmul.f32 %v6429_v32, %v9355_v24  ;;  %v4458_v31 = vmul.f32 %v6431_v37, %v9357_v40  ;;  %v4396_v20 = vadd.f32 1.0, %v6433_v9  ;;  %v9415_v37 = vld [vmem:[#allocation5 + $0x70] sm:$0xff]  ;;  %v9419_v9 = vld [vmem:[#allocation5 + $0xf8] sm:$0xff] }
 0x72a   : > { %v4517_v46 = vpack.c.bf16 %v4487_v14, %v4485_v36  ;;  %v4233_v19 = vadd.f32 %v4201_v18, %v4131_v51  ;;  %v4235_v49 = vadd.f32 %v4203_v16, %v4133_v4  ;;  %v4350_v56 = vmul.f32 1.442695, %v4305_v53  ;;  %v4135_v18 = vld [vmem:[#allocation8 + $0x48] sm:$0xff]  ;;  %v4137_v16 = vld [vmem:[#allocation8 + $0x58] sm:$0xff] }
 0x72b   : > { %4668 = vmatmul.bf16.vlgmr.msra.gmra.mxu0 %v4516_v62  ;;  %v6441_v33 = vpop.eup %6440  ;;  %v4457_v41 = vmul.f32 %v6435_v17, %v9361_v48  ;;  %v4398_v15 = vadd.f32 1.0, %v6437_v55  ;;  %6444 = vpow2.f32 %v4348_v38  ;;  %v4354_v28 = vmul.f32 1.442695, %v4307_v50  ;;  %v4168_v48 = vld [vmem:[#allocation7 + $0x50] sm:$0xff]  ;;  %v4169_v62 = vld [vmem:[#allocation7 + $0x58] sm:$0xff] }
 0x72c   : > { %4717 = vmatmul.bf16.vlgmr.msra.gmra.mxu1 %v4517_v46  ;;  %v6443_v39 = vpop.eup %6442  ;;  %v4459_v43 = vmul.f32 %v6441_v33, %v9363_v1  ;;  %6446 = vpow2.f32 %v4352_v58  ;;  %v4488_v2 = vmul.f32 %v4456_v52, %v4232_v26  ;;  %v4490_v42 = vmul.f32 %v4458_v31, %v4234_v61  ;;  %v9422_v51 = vld [vmem:[#allocation5 + $0x78] sm:$0xff] }
 0x72d   : > { %6448 = vrcp.f32 %v4396_v20  ;;  %v4397_v24 = vadd.f32 1.0, %v6439_v45  ;;  %v4399_v23 = vadd.f32 1.0, %v6443_v39  ;;  %v4489_v40 = vmul.f32 %v4457_v41, %v4233_v19 }
 0x72e   : > { %6450 = vpow2.f32 %v4350_v56  ;;  %v4491_v47 = vmul.f32 %v4459_v43, %v4235_v49  ;;  %v4518_v12 = vpack.c.bf16 %v4490_v42, %v4488_v2  ;;  %v4204_v29 = vmul.f32 %v9367_v35, %v4166_v3 }
 0x72f   : > { %6452 = vrcp.f32 %v4398_v15  ;;  %v4206_v21 = vmul.f32 %v9367_v35, %v4168_v48  ;;  %v4205_v6 = vmul.f32 %v9371_v22, %v4167_v60  ;;  %v4207_v27 = vmul.f32 %v9371_v22, %v4169_v62  ;;  %v4140_v60 = vld [vmem:[#allocation8 + $0x70] sm:$0xff] }
 0x730   : > { %6454 = vpow2.f32 %v4354_v28  ;;  %v4519_v30 = vpack.c.bf16 %v4491_v47, %v4489_v40  ;;  %v4308_v17 = vsub.f32 0.0, %v9413_v7  ;;  %v4236_v38 = vadd.f32 %v4204_v29, %v4134_v8  ;;  %v9433_v62 = vld [vmem:[#allocation5 + $0xd0] sm:$0xff] }
 0x731   : > { %v6445_v0 = vpop.eup %6444  ;;  %6456 = vrcp.f32 %v4397_v24  ;;  %v4238_v55 = vadd.f32 %v4206_v21, %v4136_v44  ;;  %v4310_v58 = vsub.f32 0.0, %v9415_v37  ;;  %v4309_v52 = vsub.f32 0.0, %v9419_v9  ;;  %v4139_v44 = vld [vmem:[#allocation8 + $0x68] sm:$0xff] }
 0x732   : > { %v6447_v1 = vpop.eup %6446  ;;  %6458 = vrcp.f32 %v4399_v23  ;;  %v4400_v53 = vadd.f32 1.0, %v6445_v0  ;;  %v4237_v31 = vadd.f32 %v4205_v6, %v4135_v18  ;;  %v4239_v20 = vadd.f32 %v4207_v27, %v4137_v16  ;;  %v4170_v23 = vld [vmem:[#allocation7 + $0x60] sm:$0xff]  ;;  %v4171_v0 = vld [vmem:[#allocation7 + $0x68] sm:$0xff]  ;;  %v9439_v6 = vld [vmem:[#allocation5 + $0xd8] sm:$0xff] }
 0x733   : > { %v6449_v36 = vpop.eup %6448  ;;  %v4402_v26 = vadd.f32 1.0, %v6447_v1  ;;  %v4311_v19 = vsub.f32 0.0, %v9422_v51  ;;  %v4356_v39 = vmul.f32 1.442695, %v4308_v17  ;;  %v4360_v41 = vmul.f32 1.442695, %v4310_v58 }
 0x734   : > { %v6451_v14 = vpop.eup %6450  ;;  %v4460_v50 = vmul.f32 %v6449_v36, %v9369_v25  ;;  %6460 = vrcp.f32 %v4400_v53  ;;  %v4208_v48 = vmul.f32 %v9367_v35, %v4170_v23  ;;  %v4209_v29 = vmul.f32 %v9371_v22, %v4171_v0  ;;  %v9442_v17 = vld [vmem:[#allocation5 + $0x58] sm:$0xff] }
 0x735   : > { %v6453_v32 = vpop.eup %6452  ;;  %v4401_v61 = vadd.f32 1.0, %v6451_v14  ;;  %6462 = vrcp.f32 %v4402_v26  ;;  %v4362_v15 = vmul.f32 1.442695, %v4311_v19  ;;  %v4312_v53 = vsub.f32 0.0, %v9433_v62 }
 0x736   : > { %v6455_v46 = vpop.eup %6454  ;;  %v4462_v45 = vmul.f32 %v6453_v32, %v9373_v57  ;;  %v4492_v43 = vmul.f32 %v4460_v50, %v4236_v38  ;;  %v4358_v57 = vmul.f32 1.442695, %v4309_v52  ;;  %v9437_v32 = vld [vmem:[#allocation5 + $0x28] sm:$0xff]  ;;  %v4241_v58 = vadd.f32 %v4209_v29, %v4139_v44 }
 0x737   : > { %v6457_v59 = vpop.eup %6456  ;;  %v4403_v33 = vadd.f32 1.0, %v6455_v46  ;;  %6464 = vrcp.f32 %v4401_v61  ;;  %v4141_v46 = vld [vmem:[#allocation8 + $0x78] sm:$0xff]  ;;  %v4314_v26 = vsub.f32 0.0, %v9437_v32  ;;  %v4313_v61 = vsub.f32 0.0, %v9439_v6 }
 0x738   : > { %v6459_v4 = vpop.eup %6458  ;;  %v4461_v49 = vmul.f32 %v6457_v59, %v9377_v13  ;;  %v4494_v25 = vmul.f32 %v4462_v45, %v4238_v55  ;;  %v4172_v13 = vld [vmem:[#allocation7 + $0x70] sm:$0xff]  ;;  %v4364_v19 = vmul.f32 1.442695, %v4312_v53 }
 0x739   : > { %v4463_v56 = vmul.f32 %v6459_v4, %v9382_v10  ;;  %6466 = vrcp.f32 %v4403_v33  ;;  %v4210_v1 = vmul.f32 %v9367_v35, %v4172_v13  ;;  %v4315_v33 = vsub.f32 0.0, %v9442_v17 }
 0x73a   : > { %v4493_v28 = vmul.f32 %v4461_v49, %v4237_v31  ;;  %6468 = vpow2.f32 %v4356_v39  ;;  %v6461_v42 = vpop.eup %6460  ;;  %v4520_v24 = vpack.c.bf16 %v4494_v25, %v4492_v43 }
 0x73b   : > { %4673 = vmatmul.bf16.gmra.mxu0 %v4518_v12  ;;  %v4495_v2 = vmul.f32 %v4463_v56, %v4239_v20  ;;  %6470 = vpow2.f32 %v4360_v41  ;;  %v6463_v10 = vpop.eup %6462  ;;  %v4173_v12 = vld [vmem:[#allocation7 + $0x78] sm:$0xff]  ;;  %v4242_v18 = vadd.f32 %v4210_v1, %v4140_v60  ;;  %v4464_v4 = vmul.f32 %v6461_v42, %v9390_v54  ;;  %v9457_v60 = vld [vmem:[#allocation5 + $0x90] sm:$0xff] }
 0x73c   : > { %4722 = vmatmul.bf16.gmra.mxu1 %v4519_v30  ;;  %6472 = vpow2.f32 %v4358_v57  ;;  %v4138_v30 = vld [vmem:[#allocation8 + $0x60] sm:$0xff]  ;;  %v4211_v21 = vmul.f32 %v9371_v22, %v4173_v12  ;;  %v4466_v38 = vmul.f32 %v6463_v10, %v9393_v11  ;;  %v4368_v11 = vmul.f32 1.442695, %v4314_v26  ;;  %v4176_v57 = vld [vmem:[#allocation7 + $0x90] sm:$0xff]  ;;  %v4177_v42 = vld [vmem:[#allocation7 + $0x98] sm:$0xff] }
 0x73d   : > { %6474 = vpow2.f32 %v4362_v15  ;;  %v6465_v40 = vpop.eup %6464  ;;  %v4521_v47 = vpack.c.bf16 %v4495_v2, %v4493_v28  ;;  %v4240_v59 = vadd.f32 %v4208_v48, %v4138_v30  ;;  %v4366_v56 = vmul.f32 1.442695, %v4313_v61  ;;  %v4175_v2 = vld [vmem:[#allocation7 + $0x88] sm:$0xff]  ;;  %v4145_v30 = vld [vmem:[#allocation8 + $0x98] sm:$0xff] }
 0x73e   : > { %v4243_v50 = vadd.f32 %v4211_v21, %v4141_v46  ;;  %v4465_v52 = vmul.f32 %v6465_v40, %v9396_v34  ;;  %v4498_v49 = vmul.f32 %v4466_v38, %v4242_v18  ;;  %v4370_v43 = vmul.f32 1.442695, %v4315_v33  ;;  %v4174_v34 = vld [vmem:[#allocation7 + $0x80] sm:$0xff]  ;;  %v9455_v48 = vld [vmem:[#allocation5 + $0x48] sm:$0xff] }
 0x73f   : > { %v6467_v3 = vpop.eup %6466  ;;  %v4496_v54 = vmul.f32 %v4464_v4, %v4240_v59  ;;  %v4212_v23 = vmul.f32 %v9367_v35, %v4174_v34  ;;  %v4214_v13 = vmul.f32 %v9367_v35, %v4176_v57  ;;  %v4142_v40 = vld [vmem:[#allocation8 + $0x80] sm:$0xff]  ;;  %v4213_v12 = vmul.f32 %v9371_v22, %v4175_v2  ;;  %v4148_v2 = vld [vmem:[#allocation8 + $0xb0] sm:$0xff] }
 0x740   : > { %v6469_v36 = vpop.eup %6468  ;;  %v4467_v31 = vmul.f32 %v6467_v3, %v9401_v5  ;;  %v4497_v39 = vmul.f32 %v4465_v52, %v4241_v58  ;;  %v4215_v3 = vmul.f32 %v9371_v22, %v4177_v42  ;;  %v4316_v18 = vsub.f32 0.0, %v9455_v48 }
 0x741   : > { %v6471_v14 = vpop.eup %6470  ;;  %v4404_v16 = vadd.f32 1.0, %v6469_v36  ;;  %v4522_v25 = vpack.c.bf16 %v4498_v49, %v4496_v54  ;;  %v4143_v36 = vld [vmem:[#allocation8 + $0x88] sm:$0xff]  ;;  %v4244_v29 = vadd.f32 %v4212_v23, %v4142_v40 }
 0x742   : > { %v6473_v8 = vpop.eup %6472  ;;  %v4406_v55 = vadd.f32 1.0, %v6471_v14  ;;  %v4499_v41 = vmul.f32 %v4467_v31, %v4243_v50  ;;  %v4245_v53 = vadd.f32 %v4213_v12, %v4143_v36  ;;  %v4247_v4 = vadd.f32 %v4215_v3, %v4145_v30  ;;  %v9475_v40 = vld [vmem:[#allocation5 + $0xe8] sm:$0xff] }
 0x743   : > { %v6475_v27 = vpop.eup %6474  ;;  %v4405_v45 = vadd.f32 1.0, %v6473_v8  ;;  %6476 = vrcp.f32 %v4404_v16  ;;  %v9459_v8 = vld [vmem:[#allocation5 + $0x68] sm:$0xff]  ;;  %v9464_v16 = vld [vmem:[#allocation5 + $0x18] sm:$0xff]  ;;  %v4372_v31 = vmul.f32 1.442695, %v4316_v18 }
 0x744   : > { %v4407_v20 = vadd.f32 1.0, %v6475_v27  ;;  %6478 = vrcp.f32 %v4406_v55  ;;  %v4523_v28 = vpack.c.bf16 %v4499_v41, %v4497_v39  ;;  %v4318_v55 = vsub.f32 0.0, %v9457_v60  ;;  %v4179_v41 = vld [vmem:[#allocation7 + $0xa8] sm:$0xff] }
 0x745   : > { %6480 = vrcp.f32 %v4405_v45  ;;  %v4317_v45 = vsub.f32 0.0, %v9459_v8  ;;  %v4217_v42 = vmul.f32 %v9371_v22, %v4179_v41  ;;  %v4152_v41 = vld [vmem:[#allocation8 + $0xd0] sm:$0xff] }
 0x746   : > { %6482 = vrcp.f32 %v4407_v20  ;;  %v4376_v20 = vmul.f32 1.442695, %v4318_v55 }
 0x747   : > { %6484 = vpow2.f32 %v4364_v19  ;;  %v4374_v54 = vmul.f32 1.442695, %v4317_v45 }
 0x748   : > { %6486 = vpow2.f32 %v4368_v11  ;;  %v4180_v11 = vld [vmem:[#allocation7 + $0xb0] sm:$0xff] }
 0x749   : > { %v6477_v5 = vpop.eup %6476  ;;  %6488 = vpow2.f32 %v4366_v56 }
 0x74a   : > { %v6479_v15 = vpop.eup %6478  ;;  %6490 = vpow2.f32 %v4370_v43  ;;  %v4468_v46 = vmul.f32 %v6477_v5, %v9413_v7  ;;  %v4181_v43 = vld [vmem:[#allocation7 + $0xb8] sm:$0xff]  ;;  %v4218_v5 = vmul.f32 %v9367_v35, %v4180_v11 }
 0x74b   : > { %4678 = vmatmul.bf16.gmra.mxu0 %v4520_v24  ;;  %v6481_v24 = vpop.eup %6480  ;;  %v4470_v27 = vmul.f32 %v6479_v15, %v9415_v37  ;;  %v4319_v37 = vsub.f32 0.0, %v9464_v16 }
 0x74c   : > { %4727 = vmatmul.bf16.gmra.mxu1 %v4521_v47  ;;  %v6483_v10 = vpop.eup %6482  ;;  %v4144_v47 = vld [vmem:[#allocation8 + $0x90] sm:$0xff]  ;;  %v4469_v26 = vmul.f32 %v6481_v24, %v9419_v9  ;;  %v4500_v61 = vmul.f32 %v4468_v46, %v4244_v29  ;;  %v4219_v24 = vmul.f32 %v9371_v22, %v4181_v43 }
 0x74d   : > { %v6485_v0 = vpop.eup %6484  ;;  %v4246_v21 = vadd.f32 %v4214_v13, %v4144_v47  ;;  %v4471_v58 = vmul.f32 %v6483_v10, %v9422_v51  ;;  %v4378_v9 = vmul.f32 1.442695, %v4319_v37  ;;  %v4178_v51 = vld [vmem:[#allocation7 + $0xa0] sm:$0xff]  ;;  %v4147_v13 = vld [vmem:[#allocation8 + $0xa8] sm:$0xff]  ;;  %v4149_v10 = vld [vmem:[#allocation8 + $0xb8] sm:$0xff] }
 0x74e   : > { %v6487_v1 = vpop.eup %6486  ;;  %v4408_v59 = vadd.f32 1.0, %v6485_v0  ;;  %v4501_v33 = vmul.f32 %v4469_v26, %v4245_v53  ;;  %v4216_v57 = vmul.f32 %v9367_v35, %v4178_v51  ;;  %v9477_v0 = vld [vmem:[#allocation5 + $0x38] sm:$0xff] }
 0x74f   : > { %v6489_v14 = vpop.eup %6488  ;;  %v4410_v38 = vadd.f32 1.0, %v6487_v1  ;;  %v4502_v52 = vmul.f32 %v4470_v27, %v4246_v21  ;;  %v4503_v19 = vmul.f32 %v4471_v58, %v4247_v4  ;;  %v4250_v1 = vadd.f32 %v4218_v5, %v4148_v2 }
 0x750   : > { %v6491_v44 = vpop.eup %6490  ;;  %v4409_v50 = vadd.f32 1.0, %v6489_v14  ;;  %6492 = vrcp.f32 %v4408_v59  ;;  %v9481_v14 = vld [vmem:[#allocation5 + $0x60] sm:$0xff]  ;;  %v4249_v21 = vadd.f32 %v4217_v42, %v4147_v13  ;;  %v4320_v27 = vsub.f32 0.0, %v9475_v40  ;;  %v9484_v59 = vld [vmem:[#allocation5 + $0xa8] sm:$0xff] }
 0x751   : > { %v4411_v7 = vadd.f32 1.0, %v6491_v44  ;;  %6494 = vrcp.f32 %v4410_v38  ;;  %v4524_v49 = vpack.c.bf16 %v4502_v52, %v4500_v61  ;;  %v4525_v39 = vpack.c.bf16 %v4503_v19, %v4501_v33  ;;  %v4183_v19 = vld [vmem:[#allocation7 + $0xc8] sm:$0xff] }
 0x752   : > { %6496 = vrcp.f32 %v4409_v50  ;;  %v4251_v44 = vadd.f32 %v4219_v24, %v4149_v10  ;;  %v4322_v38 = vsub.f32 0.0, %v9477_v0  ;;  %v4323_v50 = vsub.f32 0.0, %v9484_v59 }
 0x753   : > { %6498 = vrcp.f32 %v4411_v7  ;;  %v4380_v45 = vmul.f32 1.442695, %v4320_v27  ;;  %v4221_v43 = vmul.f32 %v9371_v22, %v4183_v19 }
 0x754   : > { %6500 = vpow2.f32 %v4372_v31  ;;  %v4384_v61 = vmul.f32 1.442695, %v4322_v38  ;;  %v4386_v52 = vmul.f32 1.442695, %v4323_v50  ;;  %v4182_v31 = vld [vmem:[#allocation7 + $0xc0] sm:$0xff]  ;;  %v4187_v38 = vld [vmem:[#allocation7 + $0xe8] sm:$0xff] }
 0x755   : > { %6502 = vpow2.f32 %v4376_v20  ;;  %v4184_v20 = vld [vmem:[#allocation7 + $0xd0] sm:$0xff]  ;;  %v4220_v51 = vmul.f32 %v9367_v35, %v4182_v31 }
 0x756   : > { %v6493_v56 = vpop.eup %6492  ;;  %6504 = vpow2.f32 %v4374_v54  ;;  %v4222_v11 = vmul.f32 %v9367_v35, %v4184_v20 }
 0x757   : > { %6506 = vpow2.f32 %v4378_v9  ;;  %v4472_v36 = vmul.f32 %v6493_v56, %v9433_v62  ;;  %v4185_v9 = vld [vmem:[#allocation7 + $0xd8] sm:$0xff] }
 0x758   : > { %v4254_v42 = vadd.f32 %v4222_v11, %v4152_v41 }
 0x75b   : > { %4683 = vmatmul.bf16.gmra.mxu0 %v4522_v25  ;;  %v6495_v25 = vpop.eup %6494 }
 0x75c   : > { %4732 = vmatmul.bf16.gmra.mxu1 %v4523_v28  ;;  %v6497_v34 = vpop.eup %6496  ;;  %v4146_v28 = vld [vmem:[#allocation8 + $0xa0] sm:$0xff]  ;;  %v4474_v30 = vmul.f32 %v6495_v25, %v9437_v32  ;;  %v4321_v32 = vsub.f32 0.0, %v9481_v14 }
 0x75d   : > { %v6499_v15 = vpop.eup %6498  ;;  %v4248_v3 = vadd.f32 %v4216_v57, %v4146_v28  ;;  %v4473_v18 = vmul.f32 %v6497_v34, %v9439_v6  ;;  %v4151_v34 = vld [vmem:[#allocation8 + $0xc8] sm:$0xff]  ;;  %v4223_v57 = vmul.f32 %v9371_v22, %v4185_v9 }
 0x75e   : > { %v6501_v23 = vpop.eup %6500  ;;  %v4475_v53 = vmul.f32 %v6499_v15, %v9442_v17  ;;  %v4506_v26 = vmul.f32 %v4474_v30, %v4250_v1  ;;  %v4382_v6 = vmul.f32 1.442695, %v4321_v32  ;;  %v4153_v15 = vld [vmem:[#allocation8 + $0xd8] sm:$0xff]  ;;  %v4253_v10 = vadd.f32 %v4221_v43, %v4151_v34 }
 0x75f   : > { %v6503_v47 = vpop.eup %6502  ;;  %v4412_v46 = vadd.f32 1.0, %v6501_v23  ;;  %v4504_v55 = vmul.f32 %v4472_v36, %v4248_v3  ;;  %v4505_v7 = vmul.f32 %v4473_v18, %v4249_v21 }
 0x760   : > { %v6505_v12 = vpop.eup %6504  ;;  %v4414_v4 = vadd.f32 1.0, %v6503_v47  ;;  %v4507_v37 = vmul.f32 %v4475_v53, %v4251_v44  ;;  %v4188_v53 = vld [vmem:[#allocation7 + $0xf0] sm:$0xff] }
 0x761   : > { %v6507_v29 = vpop.eup %6506  ;;  %v4413_v62 = vadd.f32 1.0, %v6505_v12  ;;  %6508 = vrcp.f32 %v4412_v46  ;;  %v4526_v17 = vpack.c.bf16 %v4506_v26, %v4504_v55  ;;  %v4255_v12 = vadd.f32 %v4223_v57, %v4153_v15  ;;  %v4154_v26 = vld [vmem:[#allocation8 + $0xe0] sm:$0xff] }
 0x762   : > { %v4415_v58 = vadd.f32 1.0, %v6507_v29  ;;  %6510 = vrcp.f32 %v4414_v4  ;;  %v4527_v33 = vpack.c.bf16 %v4507_v37, %v4505_v7  ;;  %v4226_v32 = vmul.f32 %v9367_v35, %v4188_v53 }
 0x763   : > { %6512 = vrcp.f32 %v4413_v62 }
 0x764   : > { %6514 = vrcp.f32 %v4415_v58  ;;  %v4156_v58 = vld [vmem:[#allocation8 + $0xf0] sm:$0xff] }
 0x765   : > { %6516 = vpow2.f32 %v4380_v45  ;;  %v4225_v45 = vmul.f32 %v9371_v22, %v4187_v38 }
 0x766   : > { %6518 = vpow2.f32 %v4384_v61  ;;  %v4155_v61 = vld [vmem:[#allocation8 + $0xe8] sm:$0xff] }
 0x767   : > { %v6509_v54 = vpop.eup %6508  ;;  %6520 = vpow2.f32 %v4382_v6  ;;  %v4157_v6 = vld [vmem:[#allocation8 + $0xf8] sm:$0xff] }
 0x768   : > { %6522 = vpow2.f32 %v4386_v52  ;;  %v4476_v24 = vmul.f32 %v6509_v54, %v9455_v48  ;;  %v4258_v52 = vadd.f32 %v4226_v32, %v4156_v58 }
 0x76b   : > { %4688 = vmatmul.bf16.gmra.mxu0 %v4524_v49  ;;  %v6511_v49 = vpop.eup %6510 }
 0x76c   : > { %4737 = vmatmul.bf16.gmra.mxu1 %v4525_v39  ;;  %v6513_v56 = vpop.eup %6512  ;;  %v4150_v39 = vld [vmem:[#allocation8 + $0xc0] sm:$0xff]  ;;  %v4478_v23 = vmul.f32 %v6511_v49, %v9457_v60 }
 0x76d   : > { %v6515_v25 = vpop.eup %6514  ;;  %v4252_v2 = vadd.f32 %v4220_v51, %v4150_v39  ;;  %v4477_v3 = vmul.f32 %v6513_v56, %v9459_v8  ;;  %v4186_v60 = vld [vmem:[#allocation7 + $0xe0] sm:$0xff]  ;;  %v4189_v8 = vld [vmem:[#allocation7 + $0xf8] sm:$0xff] }
 0x76e   : > { %v6517_v5 = vpop.eup %6516  ;;  %v4479_v1 = vmul.f32 %v6515_v25, %v9464_v16  ;;  %v4510_v21 = vmul.f32 %v4478_v23, %v4254_v42  ;;  %v4224_v16 = vmul.f32 %v9367_v35, %v4186_v60  ;;  %v4227_v7 = vmul.f32 %v9371_v22, %v4189_v8  ;;  %v9987_v23 = vld [vmem:[#allocation48_spill] sm:$0xff] }
 0x76f   : > { %v6519_v28 = vpop.eup %6518  ;;  %v4416_v36 = vadd.f32 1.0, %v6517_v5  ;;  %v4508_v29 = vmul.f32 %v4476_v24, %v4252_v2  ;;  %v4509_v27 = vmul.f32 %v4477_v3, %v4253_v10  ;;  %v9988_v3 = vld [vmem:[#allocation51_spill] sm:$0xff]  ;;  %v9991_v8 = vld [vmem:[#allocation56_spill] sm:$0xff] }
 0x770   : > { %v6521_v13 = vpop.eup %6520  ;;  %v4418_v30 = vadd.f32 1.0, %v6519_v28  ;;  %v4511_v18 = vmul.f32 %v4479_v1, %v4255_v12  ;;  %v4259_v35 = vadd.f32 %v4227_v7, %v4157_v6  ;;  %v9986_v28 = vld [vmem:[#allocation47_spill] sm:$0xff] }
 0x771   : > { %v6523_v47 = vpop.eup %6522  ;;  %v4417_v44 = vadd.f32 1.0, %v6521_v13  ;;  %6524 = vrcp.f32 %v4416_v36  ;;  %v4528_v48 = vpack.c.bf16 %v4510_v21, %v4508_v29  ;;  %v9989_v21 = vld [vmem:[#allocation52_spill] sm:$0xff] }
 0x772   : > { %v4419_v46 = vadd.f32 1.0, %v6523_v47  ;;  %6526 = vrcp.f32 %v4418_v30  ;;  %v4529_v4 = vpack.c.bf16 %v4511_v18, %v4509_v27 }
 0x773   : > { %6528 = vrcp.f32 %v4417_v44 }
 0x774   : > { %6530 = vrcp.f32 %v4419_v46 }
 0x777   : > { %v6525_v62 = vpop.eup %6524 }
 0x778   : > { %v6527_v55 = vpop.eup %6526  ;;  %v4480_v31 = vmul.f32 %v6525_v62, %v9475_v40 }
 0x779   : > { %v6529_v50 = vpop.eup %6528  ;;  %v4482_v20 = vmul.f32 %v6527_v55, %v9477_v0 }
 0x77a   : > { %v6531_v37 = vpop.eup %6530  ;;  %v4481_v19 = vmul.f32 %v6529_v50, %v9481_v14 }
 0x77b   : > { %4693 = vmatmul.bf16.gmra.mxu0 %v4526_v17  ;;  %v4256_v17 = vadd.f32 %v4224_v16, %v4154_v26  ;;  %v4483_v54 = vmul.f32 %v6531_v37, %v9484_v59  ;;  %v4514_v49 = vmul.f32 %v4482_v20, %v4258_v52  ;;  %v9985_v59 = vld [vmem:[#allocation44_spill] sm:$0xff]  ;;  %v9992_v26 = vld [vmem:[#allocation45_spill] sm:$0xff]  ;;  %v9993_v37 = vld [vmem:[#allocation46_spill] sm:$0xff] }
 0x77c   : > { %4742 = vmatmul.bf16.gmra.mxu1 %v4527_v33  ;;  %v4257_v33 = vadd.f32 %v4225_v45, %v4155_v61 }
 0x77d   : > { %v4512_v9 = vmul.f32 %v4480_v31, %v4256_v17  ;;  %v4515_v11 = vmul.f32 %v4483_v54, %v4259_v35  ;;  %v9994_v31 = vld [vmem:[#allocation49_spill] sm:$0xff]  ;;  %v9995_v54 = vld [vmem:[#allocation50_spill] sm:$0xff] }
 0x77e   : > { %v4513_v51 = vmul.f32 %v4481_v19, %v4257_v33 }
 0x77f   : > { %v4530_v22 = vpack.c.bf16 %v4514_v49, %v4512_v9  ;;  %v6960_v49 = vmov 128.0  }
 0x780   : > { %v4531_v56 = vpack.c.bf16 %v4515_v11, %v4513_v51  ;;  %6532 = vrcp.f32 %v6960_v49 }
 0x78b   : > { %4698 = vmatmul.bf16.gmra.mxu0 %v4528_v48  ;;  %v9990_v48 = vld [vmem:[#allocation55_spill] sm:$0xff] }
 0x78c   : > { %4747 = vmatmul.bf16.gmra.mxu1 %v4529_v4 }
 0x79b   : > { %4703 = vmatmul.bf16.gmra.mxu0 %v4530_v22 }
 0x79c   : > { %4752 = vmatmul.bf16.gmra.mxu1 %v4531_v56  ;;  %v6533_v56 = vpop.eup %6532 }
 0x79d   : > { %vm4811_vm0 = vweird.f32 %v6533_v56 }
 0x7a8   : > { %v4669_v39 = vpop.f32.mrf.mxu0 }
 0x7a9   : > { %v4718_v41 = vpop.f32.mrf.mxu1 }
 0x7aa   : > { %v4719_v43 = vadd.f32 %v4718_v41, %v4669_v39  ;;  %v9996_v39 = vld [vmem:[#allocation53_spill] sm:$0xff] }
 0x7ac   : > { %v9508_v40 = vadd.f32 %v4719_v43, %v7245_v63 }
 0x7ae   : > { %4774 = vadd.xlane.f32.xlu0 %v9508_v40 }
 0x7b0   : > { %v4671_v0 = vpop.f32.mrf.mxu0 }
 0x7b1   : > { %v4720_v14 = vpop.f32.mrf.mxu1 }
 0x7b2   : > { %v4721_v25 = vadd.f32 %v4720_v14, %v4671_v0  ;;  %v4807_v0 = vmul.f32 128.0, %v6533_v56 }
 0x7b4   : > { %v9512_v34 = vadd.f32 %v4721_v25, %v9985_v59  ;;  %v4808_v59 = vsub.f32 1.0, %v4807_v0 }
 0x7b6   : > { %4776 = vadd.xlane.f32.xlu0 %v9512_v34 }
 0x7b8   : > { %v4674_v57 = vpop.f32.mrf.mxu0 }
 0x7b9   : > { %v4723_v5 = vpop.f32.mrf.mxu1 }
 0x7ba   : > { %v4724_v15 = vadd.f32 %v4723_v5, %v4674_v57  ;;  %v9997_v57 = vld [vmem:[#allocation54_spill] sm:$0xff] }
 0x7bc   : > { %v9516_v2 = vadd.f32 %v4724_v15, %v9986_v28  ;;  %v4809_v28 = vmul.f32 %v6533_v56, %v4808_v59 }
 0x7be   : > { %4778 = vadd.xlane.f32.xlu1 %v9516_v2 }
 0x7c0   : > { %v4676_v63 = vpop.f32.mrf.mxu0 }
 0x7c1   : > { %v4725_v42 = vpop.f32.mrf.mxu1 }
 0x7c2   : > { %v4726_v24 = vadd.f32 %v4725_v42, %v4676_v63 }
 0x7c4   : > { %v9520_v13 = vadd.f32 %v4726_v24, %v9987_v23  ;;  %v4810_v24 = vadd.f32 %v6533_v56, %v4809_v28  ;;  %v9998_v23 = vld [vmem:[#allocation57_spill] sm:$0xff] }
 0x7c6   : > { %4780 = vadd.xlane.f32.xlu1 %v9520_v13 }
 0x7c8   : > { %v4679_v10 = vpop.f32.mrf.mxu0 }
 0x7c9   : > { %v4728_v47 = vpop.f32.mrf.mxu1 }
 0x7ca   : > { %v4729_v12 = vadd.f32 %v4728_v47, %v4679_v10  ;;  %v9567_v47 = vsel %vm4811_vm0, %v6533_v56, %v4810_v24 }
 0x7cc   : > { %v9524_v1 = vadd.f32 %v4729_v12, %v9988_v3 }
 0x7ce   : > { %4782 = vadd.xlane.f32.xlu2 %v9524_v1 }
 0x7d0   : > { %v4681_v36 = vpop.f32.mrf.mxu0 }
 0x7d1   : > { %v4730_v30 = vpop.f32.mrf.mxu1 }
 0x7d2   : > { %v4731_v29 = vadd.f32 %v4730_v30, %v4681_v36 }
 0x7d4   : > { %v9528_v44 = vadd.f32 %v4731_v29, %v9989_v21 }
 0x7d6   : > { %4784 = vadd.xlane.f32.xlu2 %v9528_v44 }
 0x7d8   : > { %v4684_v46 = vpop.f32.mrf.mxu0 }
 0x7d9   : > { %v4733_v27 = vpop.f32.mrf.mxu1 }
 0x7da   : > { %v4734_v18 = vadd.f32 %v4733_v27, %v4684_v46  ;;  %v9999_v46 = vld [vmem:[#allocation58_spill] sm:$0xff] }
 0x7dc   : > { %v9532_v60 = vadd.f32 %v4734_v18, %v9990_v48 }
 0x7de   : > { %4786 = vadd.xlane.f32.xlu0 %v9532_v60 }
 0x7e0   : > { %v4686_v53 = vpop.f32.mrf.mxu0 }
 0x7e1   : > { %v4735_v4 = vpop.f32.mrf.mxu1 }
 0x7e2   : > { %v4736_v38 = vadd.f32 %v4735_v4, %v4686_v53 }
 0x7e4   : > { %v9536_v62 = vadd.f32 %v4736_v38, %v9991_v8 }
 0x7e6   : > { %4788 = vadd.xlane.f32.xlu1 %v9536_v62 }
 0x7e8   : > { %v4689_v16 = vpop.f32.mrf.mxu0 }
 0x7e9   : > { %v4738_v32 = vpop.f32.mrf.mxu1 }
 0x7ea   : > { %v4739_v55 = vadd.f32 %v4738_v32, %v4689_v16 }
 0x7ec   : > { %v9540_v58 = vadd.f32 %v4739_v55, %v9992_v26 }
 0x7ee   : > { %4790 = vadd.xlane.f32.xlu2 %v9540_v58 }
 0x7f0   : > { %v4691_v50 = vpop.f32.mrf.mxu0 }
 0x7f1   : > { %v4740_v45 = vpop.f32.mrf.mxu1 }
 0x7f2   : > { %v4741_v7 = vadd.f32 %v4740_v45, %v4691_v50 }
 0x7f4   : > { %v9544_v61 = vadd.f32 %v4741_v7, %v9993_v37 }
 0x7f6   : > { %4792 = vadd.xlane.f32.xlu0 %v9544_v61 }
 0x7f8   : > { %v4694_v6 = vpop.f32.mrf.mxu0 }
 0x7f9   : > { %v4743_v17 = vpop.f32.mrf.mxu1 }
 0x7fa   : > { %v4744_v52 = vadd.f32 %v4743_v17, %v4694_v6 }
 0x7fc   : > { %v9548_v20 = vadd.f32 %v4744_v52, %v9994_v31 }
 0x7fe   : > { %4794 = vadd.xlane.f32.xlu1 %v9548_v20 }
 0x800   : > { %v4696_v33 = vpop.f32.mrf.mxu0 }
 0x801   : > { %v4745_v35 = vpop.f32.mrf.mxu1 }
 0x802   : > { %v4746_v19 = vadd.f32 %v4745_v35, %v4696_v33 }
 0x804   : > { %v9552_v9 = vadd.f32 %v4746_v19, %v9995_v54 }
 0x806   : > { %4796 = vadd.xlane.f32.xlu2 %v9552_v9 }
 0x808   : > { %v4699_v51 = vpop.f32.mrf.mxu0 }
 0x809   : > { %v4748_v11 = vpop.f32.mrf.mxu1 }
 0x80a   : > { %v4749_v22 = vadd.f32 %v4748_v11, %v4699_v51 }
 0x80c   : > { %v9556_v41 = vadd.f32 %v4749_v22, %v9996_v39 }
 0x80e   : > { %4798 = vadd.xlane.f32.xlu0 %v9556_v41 }
 0x810   : > { %v4701_v43 = vpop.f32.mrf.mxu0 }
 0x811   : > { %v4750_v14 = vpop.f32.mrf.mxu1 }
 0x812   : > { %v4751_v25 = vadd.f32 %v4750_v14, %v4701_v43 }
 0x814   : > { %v9560_v5 = vadd.f32 %v4751_v25, %v9997_v57 }
 0x816   : > { %4800 = vadd.xlane.f32.xlu1 %v9560_v5 }
 0x818   : > { %v4704_v15 = vpop.f32.mrf.mxu0 }
 0x819   : > { %v4753_v63 = vpop.f32.mrf.mxu1 }
 0x81a   : > { %v4754_v42 = vadd.f32 %v4753_v63, %v4704_v15 }
 0x81c   : > { %v9564_v10 = vadd.f32 %v4754_v42, %v9998_v23 }
 0x81e   : > { %4802 = vadd.xlane.f32.xlu2 %v9564_v10 }
 0x820   : > { %v4706_v12 = vpop.f32.mrf.mxu0 }
 0x821   : > { %v4755_v3 = vpop.f32.mrf.mxu1  ;;  %v4775_v36 = vpop.xlane.xlu0 %4774 }
 0x822   : > { %v4813_v30 = vmul.f32 %v9567_v47, %v4775_v36  ;;  %v4756_v29 = vadd.f32 %v4755_v3, %v4706_v12 }
 0x824   : > { %v9571_v21 = vsub.f32 %v9508_v40, %v4813_v30  ;;  %v9574_v27 = vadd.f32 %v4756_v29, %v9999_v46 }
 0x826   : > { %4804 = vadd.xlane.f32.xlu0 %v9574_v27  ;;  %v4845_v18 = vmul.f32 %v9571_v21, %v9571_v21 }
 0x828   : > { %4861 = vadd.xlane.f32.xlu1 %v4845_v18 }
 0x829   : > { %v4777_v48 = vpop.xlane.xlu0 %4776 }
 0x82a   : > { %v4814_v53 = vmul.f32 %v9567_v47, %v4777_v48 }
 0x82c   : > { %v9581_v4 = vsub.f32 %v9512_v34, %v4814_v53 }
 0x82e   : > { %v4846_v38 = vmul.f32 %v9581_v4, %v9581_v4 }
 0x830   : > { %4863 = vadd.xlane.f32.xlu2 %v4846_v38 }
 0x831   : > { %v4779_v40 = vpop.xlane.xlu1 %4778 }
 0x832   : > { %v4815_v8 = vmul.f32 %v9567_v47, %v4779_v40 }
 0x834   : > { %v9587_v16 = vsub.f32 %v9516_v2, %v4815_v8 }
 0x836   : > { %v4847_v32 = vmul.f32 %v9587_v16, %v9587_v16 }
 0x838   : > { %4865 = vadd.xlane.f32.xlu0 %v4847_v32 }
 0x839   : > { %v4781_v55 = vpop.xlane.xlu1 %4780 }
 0x83a   : > { %v4816_v26 = vmul.f32 %v9567_v47, %v4781_v55 }
 0x83c   : > { %v9593_v34 = vsub.f32 %v9520_v13, %v4816_v26 }
 0x83e   : > { %v4848_v50 = vmul.f32 %v9593_v34, %v9593_v34 }
 0x840   : > { %4867 = vadd.xlane.f32.xlu1 %v4848_v50 }
 0x841   : > { %v4783_v45 = vpop.xlane.xlu2 %4782 }
 0x842   : > { %v4817_v7 = vmul.f32 %v9567_v47, %v4783_v45 }
 0x844   : > { %v9599_v2 = vsub.f32 %v9524_v1, %v4817_v7 }
 0x846   : > { %v4849_v37 = vmul.f32 %v9599_v2, %v9599_v2 }
 0x848   : > { %4869 = vadd.xlane.f32.xlu2 %v4849_v37 }
 0x849   : > { %v4785_v6 = vpop.xlane.xlu2 %4784 }
 0x84a   : > { %v4818_v17 = vmul.f32 %v9567_v47, %v4785_v6 }
 0x84c   : > { %v9605_v13 = vsub.f32 %v9528_v44, %v4818_v17 }
 0x84e   : > { %v4850_v52 = vmul.f32 %v9605_v13, %v9605_v13 }
 0x850   : > { %4871 = vadd.xlane.f32.xlu0 %v4850_v52 }
 0x851   : > { %v4787_v31 = vpop.xlane.xlu0 %4786 }
 0x852   : > { %v4819_v33 = vmul.f32 %v9567_v47, %v4787_v31  ;;  %v9675_v31 = vld [vmem:[%s10000_s13] ss:$0 sm:$0xff] }
 0x854   : > { %v9611_v1 = vsub.f32 %v9532_v60, %v4819_v33 }
 0x856   : > { %v4851_v35 = vmul.f32 %v9611_v1, %v9611_v1 }
 0x858   : > { %4873 = vadd.xlane.f32.xlu1 %v4851_v35 }
 0x859   : > { %v4789_v19 = vpop.xlane.xlu1 %4788 }
 0x85a   : > { %v4820_v54 = vmul.f32 %v9567_v47, %v4789_v19 }
 0x85c   : > { %v9617_v44 = vsub.f32 %v9536_v62, %v4820_v54  ;;  %v9678_v54 = vld [vmem:[#allocation20] ss:$0 sm:$0xff] }
 0x85e   : > { %v4852_v49 = vmul.f32 %v9617_v44, %v9617_v44 }
 0x860   : > { %4875 = vadd.xlane.f32.xlu2 %v4852_v49 }
 0x861   : > { %v4791_v51 = vpop.xlane.xlu2 %4790 }
 0x862   : > { %v4821_v11 = vmul.f32 %v9567_v47, %v4791_v51 }
 0x864   : > { %v9623_v60 = vsub.f32 %v9540_v58, %v4821_v11 }
 0x866   : > { %v4853_v22 = vmul.f32 %v9623_v60, %v9623_v60 }
 0x868   : > { %4877 = vadd.xlane.f32.xlu0 %v4853_v22 }
 0x869   : > { %v4793_v56 = vpop.xlane.xlu0 %4792 }
 0x86a   : > { %v4822_v39 = vmul.f32 %v9567_v47, %v4793_v56 }
 0x86c   : > { %v9629_v62 = vsub.f32 %v9544_v61, %v4822_v39 }
 0x86e   : > { %v4854_v43 = vmul.f32 %v9629_v62, %v9629_v62 }
 0x870   : > { %4879 = vadd.xlane.f32.xlu1 %v4854_v43 }
 0x871   : > { %v4795_v0 = vpop.xlane.xlu1 %4794 }
 0x872   : > { %v4823_v14 = vmul.f32 %v9567_v47, %v4795_v0 }
 0x874   : > { %v9635_v58 = vsub.f32 %v9548_v20, %v4823_v14 }
 0x876   : > { %v4855_v25 = vmul.f32 %v9635_v58, %v9635_v58 }
 0x878   : > { %4881 = vadd.xlane.f32.xlu2 %v4855_v25 }
 0x879   : > { %v4797_v59 = vpop.xlane.xlu2 %4796 }
 0x87a   : > { %v4824_v57 = vmul.f32 %v9567_v47, %v4797_v59 }
 0x87c   : > { %v9641_v61 = vsub.f32 %v9552_v9, %v4824_v57 }
 0x87e   : > { %v4856_v15 = vmul.f32 %v9641_v61, %v9641_v61 }
 0x880   : > { %4883 = vadd.xlane.f32.xlu0 %v4856_v15 }
 0x881   : > { %v4799_v28 = vpop.xlane.xlu0 %4798 }
 0x882   : > { %v4825_v63 = vmul.f32 %v9567_v47, %v4799_v28 }
 0x884   : > { %v9647_v20 = vsub.f32 %v9556_v41, %v4825_v63 }
 0x886   : > { %v4857_v42 = vmul.f32 %v9647_v20, %v9647_v20 }
 0x888   : > { %4885 = vadd.xlane.f32.xlu1 %v4857_v42 }
 0x889   : > { %v4801_v24 = vpop.xlane.xlu1 %4800 }
 0x88a   : > { %v4826_v23 = vmul.f32 %v9567_v47, %v4801_v24 }
 0x88c   : > { %v9653_v9 = vsub.f32 %v9560_v5, %v4826_v23 }
 0x88e   : > { %v4858_v12 = vmul.f32 %v9653_v9, %v9653_v9 }
 0x890   : > { %4887 = vadd.xlane.f32.xlu2 %v4858_v12 }
 0x891   : > { %v4803_v3 = vpop.xlane.xlu2 %4802 }
 0x892   : > { %v4827_v36 = vmul.f32 %v9567_v47, %v4803_v3 }
 0x894   : > { %v9659_v41 = vsub.f32 %v9564_v10, %v4827_v36 }
 0x896   : > { %v4859_v30 = vmul.f32 %v9659_v41, %v9659_v41 }
 0x898   : > { %4889 = vadd.xlane.f32.xlu0 %v4859_v30 }
 0x899   : > { %v4805_v29 = vpop.xlane.xlu0 %4804 }
 0x89a   : > { %v4828_v46 = vmul.f32 %v9567_v47, %v4805_v29 }
 0x89b   : > { %v4862_v18 = vpop.xlane.xlu1 %4861 }
 0x89c   : > { %v9665_v5 = vsub.f32 %v9574_v27, %v4828_v46  ;;  %v4893_v48 = vmul.f32 %v4862_v18, %v9567_v47 }
 0x89e   : > { %v4909_v53 = vadd.f32 1e-05, %v4893_v48  ;;  %v4860_v38 = vmul.f32 %v9665_v5, %v9665_v5 }
 0x8a0   : > { %6534 = vrsqrt.f32 %v4909_v53  ;;  %4891 = vadd.xlane.f32.xlu1 %v4860_v38  ;;  %vm4931_vm2 = vweird.f32 %v4909_v53 }
 0x8a3   : > { %v4864_v10 = vpop.xlane.xlu2 %4863 }
 0x8a4   : > { %v4894_v40 = vmul.f32 %v4864_v10, %v9567_v47 }
 0x8a6   : > { %v6535_v8 = vpop.eup %6534  ;;  %v4910_v32 = vadd.f32 1e-05, %v4894_v40 }
 0x8a7   : > { %v4926_v55 = vmul.f32 %v6535_v8, %v4909_v53  ;;  %vm4932_vm1 = vweird.f32 %v6535_v8 }
 0x8a8   : > { %6536 = vrsqrt.f32 %v4910_v32  ;;  %vm4933_vm3 = vmor %vm4931_vm2, %vm4932_vm1  ;;  %vm4941_vm15 = vweird.f32 %v4910_v32 }
 0x8a9   : > { %v4927_v26 = vmul.f32 %v6535_v8, %v4926_v55 }
 0x8ab   : > { %v4928_v50 = vmul.f32 0.5, %v4927_v26  ;;  %v4866_v45 = vpop.xlane.xlu0 %4865 }
 0x8ac   : > { %v4895_v27 = vmul.f32 %v4866_v45, %v9567_v47 }
 0x8ad   : > { %v4929_v7 = vsub.f32 1.5, %v4928_v50 }
 0x8ae   : > { %v6537_v37 = vpop.eup %6536  ;;  %v4911_v6 = vadd.f32 1e-05, %v4895_v27 }
 0x8af   : > { %v4930_v17 = vmul.f32 %v6535_v8, %v4929_v7  ;;  %v4936_v52 = vmul.f32 %v6537_v37, %v4910_v32  ;;  %vm4942_vm14 = vweird.f32 %v6537_v37 }
 0x8b0   : > { %6538 = vrsqrt.f32 %v4911_v6  ;;  %vm4943_vm4 = vmor %vm4941_vm15, %vm4942_vm14  ;;  %vm4951_vm6 = vweird.f32 %v4911_v6 }
 0x8b1   : > { %v4937_v33 = vmul.f32 %v6537_v37, %v4936_v52  ;;  %v4934_v35 = vsel %vm4933_vm3, %v6535_v8, %v4930_v17 }
 0x8b2   : > { %v5085_v19 = vmul.f32 %v4934_v35, %v9571_v21 }
 0x8b3   : > { %v4938_v49 = vmul.f32 0.5, %v4937_v33  ;;  %v4868_v51 = vpop.xlane.xlu1 %4867 }
 0x8b4   : > { %v4896_v11 = vmul.f32 %v4868_v51, %v9567_v47  ;;  %v5105_v22 = vmul.f32 %v9675_v31, %v5085_v19 }
 0x8b5   : > { %v4939_v56 = vsub.f32 1.5, %v4938_v49 }
 0x8b6   : > { %v6539_v39 = vpop.eup %6538  ;;  %v4912_v43 = vadd.f32 1e-05, %v4896_v11  ;;  %v5125_v0 = vadd.f32 %v9678_v54, %v5105_v22 }
 0x8b7   : > { %v4940_v14 = vmul.f32 %v6537_v37, %v4939_v56  ;;  %v4946_v25 = vmul.f32 %v6539_v39, %v4911_v6  ;;  %vm4952_vm5 = vweird.f32 %v6539_v39 }
 0x8b8   : > { %6540 = vrsqrt.f32 %v4912_v43  ;;  %vm4953_vm7 = vmor %vm4951_vm6, %vm4952_vm5  ;;  %vm4961_vm9 = vweird.f32 %v4912_v43 }
 0x8b9   : > { %v4944_v21 = vsel %vm4943_vm4, %v6537_v37, %v4940_v14  ;;  %v4947_v59 = vmul.f32 %v6539_v39, %v4946_v25  ;;  %5141 = vxpose.xlu2.b32.start [1/16] %v5125_v0, 128 }
 0x8ba   : > { %v5086_v57 = vmul.f32 %v4944_v21, %v9581_v4 }
 0x8bb   : > { %v4948_v15 = vmul.f32 0.5, %v4947_v59  ;;  %v4870_v28 = vpop.xlane.xlu2 %4869 }
 0x8bc   : > { %v4897_v63 = vmul.f32 %v4870_v28, %v9567_v47  ;;  %v5106_v42 = vmul.f32 %v9675_v31, %v5086_v57 }
 0x8bd   : > { %v4949_v24 = vsub.f32 1.5, %v4948_v15 }
 0x8be   : > { %v6541_v23 = vpop.eup %6540  ;;  %v4913_v12 = vadd.f32 1e-05, %v4897_v63  ;;  %v5126_v3 = vadd.f32 %v9678_v54, %v5106_v42 }
 0x8bf   : > { %v4950_v36 = vmul.f32 %v6539_v39, %v4949_v24  ;;  %v4956_v30 = vmul.f32 %v6541_v23, %v4912_v43  ;;  %vm4962_vm8 = vweird.f32 %v6541_v23 }
 0x8c0   : > { %6542 = vrsqrt.f32 %v4913_v12  ;;  %vm4963_vm10 = vmor %vm4961_vm9, %vm4962_vm8  ;;  %vm4971_vm12 = vweird.f32 %v4913_v12 }
 0x8c1   : > { %v4954_v29 = vsel %vm4953_vm7, %v6539_v39, %v4950_v36  ;;  %v4957_v46 = vmul.f32 %v6541_v23, %v4956_v30  ;;  %5142 = vxpose.xlu2.b32.cont [2/16] %v5126_v3, 128 }
 0x8c2   : > { %v5087_v4 = vmul.f32 %v4954_v29, %v9587_v16 }
 0x8c3   : > { %v4958_v18 = vmul.f32 0.5, %v4957_v46  ;;  %v4872_v48 = vpop.xlane.xlu0 %4871 }
 0x8c4   : > { %v4898_v53 = vmul.f32 %v4872_v48, %v9567_v47  ;;  %v5107_v38 = vmul.f32 %v9675_v31, %v5087_v4 }
 0x8c5   : > { %v4959_v10 = vsub.f32 1.5, %v4958_v18 }
 0x8c6   : > { %v6543_v40 = vpop.eup %6542  ;;  %v4914_v8 = vadd.f32 1e-05, %v4898_v53  ;;  %v5127_v32 = vadd.f32 %v9678_v54, %v5107_v38 }
 0x8c7   : > { %v4960_v55 = vmul.f32 %v6541_v23, %v4959_v10  ;;  %v4966_v26 = vmul.f32 %v6543_v40, %v4913_v12  ;;  %vm4972_vm11 = vweird.f32 %v6543_v40 }
 0x8c8   : > { %6544 = vrsqrt.f32 %v4914_v8  ;;  %vm4973_vm13 = vmor %vm4971_vm12, %vm4972_vm11  ;;  %vm4981_vm1 = vweird.f32 %v4914_v8 }
 0x8c9   : > { %v4964_v50 = vsel %vm4963_vm10, %v6541_v23, %v4960_v55  ;;  %v4967_v45 = vmul.f32 %v6543_v40, %v4966_v26  ;;  %5143 = vxpose.xlu2.b32.cont [3/16] %v5127_v32, 128 }
 0x8ca   : > { %v5088_v16 = vmul.f32 %v4964_v50, %v9593_v34 }
 0x8cb   : > { %v4968_v27 = vmul.f32 0.5, %v4967_v45  ;;  %v4874_v7 = vpop.xlane.xlu1 %4873 }
 0x8cc   : > { %v4899_v37 = vmul.f32 %v4874_v7, %v9567_v47  ;;  %v5108_v6 = vmul.f32 %v9675_v31, %v5088_v16 }
 0x8cd   : > { %v4969_v17 = vsub.f32 1.5, %v4968_v27 }
 0x8ce   : > { %v6545_v52 = vpop.eup %6544  ;;  %v4915_v33 = vadd.f32 1e-05, %v4899_v37  ;;  %v5128_v35 = vadd.f32 %v9678_v54, %v5108_v6 }
 0x8cf   : > { %v4970_v19 = vmul.f32 %v6543_v40, %v4969_v17  ;;  %v4976_v49 = vmul.f32 %v6545_v52, %v4914_v8  ;;  %vm4982_vm0 = vweird.f32 %v6545_v52 }
 0x8d0   : > { %6546 = vrsqrt.f32 %v4915_v33  ;;  %vm4983_vm2 = vmor %vm4981_vm1, %vm4982_vm0  ;;  %vm4991_vm14 = vweird.f32 %v4915_v33 }
 0x8d1   : > { %v4974_v51 = vsel %vm4973_vm13, %v6543_v40, %v4970_v19  ;;  %v4977_v11 = vmul.f32 %v6545_v52, %v4976_v49  ;;  %5144 = vxpose.xlu2.b32.cont [4/16] %v5128_v35, 128 }
 0x8d2   : > { %v5089_v34 = vmul.f32 %v4974_v51, %v9599_v2 }
 0x8d3   : > { %v4978_v22 = vmul.f32 0.5, %v4977_v11  ;;  %v4876_v56 = vpop.xlane.xlu2 %4875 }
 0x8d4   : > { %v4900_v39 = vmul.f32 %v4876_v56, %v9567_v47  ;;  %v5109_v43 = vmul.f32 %v9675_v31, %v5089_v34 }
 0x8d5   : > { %v4979_v0 = vsub.f32 1.5, %v4978_v22 }
 0x8d6   : > { %v6547_v14 = vpop.eup %6546  ;;  %v4916_v25 = vadd.f32 1e-05, %v4900_v39  ;;  %v5129_v21 = vadd.f32 %v9678_v54, %v5109_v43 }
 0x8d7   : > { %v4980_v59 = vmul.f32 %v6545_v52, %v4979_v0  ;;  %v4986_v57 = vmul.f32 %v6547_v14, %v4915_v33  ;;  %vm4992_vm3 = vweird.f32 %v6547_v14 }
 0x8d8   : > { %6548 = vrsqrt.f32 %v4916_v25  ;;  %vm4993_vm15 = vmor %vm4991_vm14, %vm4992_vm3  ;;  %vm5001_vm5 = vweird.f32 %v4916_v25 }
 0x8d9   : > { %v4984_v15 = vsel %vm4983_vm2, %v6545_v52, %v4980_v59  ;;  %v4987_v28 = vmul.f32 %v6547_v14, %v4986_v57  ;;  %5145 = vxpose.xlu2.b32.cont [5/16] %v5129_v21, 128 }
 0x8da   : > { %v5090_v2 = vmul.f32 %v4984_v15, %v9605_v13 }
 0x8db   : > { %v4988_v63 = vmul.f32 0.5, %v4987_v28  ;;  %v4878_v42 = vpop.xlane.xlu0 %4877 }
 0x8dc   : > { %v4901_v24 = vmul.f32 %v4878_v42, %v9567_v47  ;;  %v5110_v23 = vmul.f32 %v9675_v31, %v5090_v2 }
 0x8dd   : > { %v4989_v12 = vsub.f32 1.5, %v4988_v63 }
 0x8de   : > { %v6549_v3 = vpop.eup %6548  ;;  %v4917_v36 = vadd.f32 1e-05, %v4901_v24  ;;  %v5130_v30 = vadd.f32 %v9678_v54, %v5110_v23 }
 0x8df   : > { %v4990_v29 = vmul.f32 %v6547_v14, %v4989_v12  ;;  %v4996_v46 = vmul.f32 %v6549_v3, %v4916_v25  ;;  %vm5002_vm4 = vweird.f32 %v6549_v3 }
 0x8e0   : > { %6550 = vrsqrt.f32 %v4917_v36  ;;  %vm5003_vm6 = vmor %vm5001_vm5, %vm5002_vm4  ;;  %vm5011_vm8 = vweird.f32 %v4917_v36 }
 0x8e1   : > { %v4994_v4 = vsel %vm4993_vm15, %v6547_v14, %v4990_v29  ;;  %v4997_v18 = vmul.f32 %v6549_v3, %v4996_v46  ;;  %5146 = vxpose.xlu2.b32.cont [6/16] %v5130_v30, 128 }
 0x8e2   : > { %v5091_v13 = vmul.f32 %v4994_v4, %v9611_v1 }
 0x8e3   : > { %v4998_v48 = vmul.f32 0.5, %v4997_v18  ;;  %v4880_v53 = vpop.xlane.xlu1 %4879 }
 0x8e4   : > { %v4902_v38 = vmul.f32 %v4880_v53, %v9567_v47  ;;  %v5111_v10 = vmul.f32 %v9675_v31, %v5091_v13 }
 0x8e5   : > { %v4999_v40 = vsub.f32 1.5, %v4998_v48 }
 0x8e6   : > { %v6551_v8 = vpop.eup %6550  ;;  %v4918_v32 = vadd.f32 1e-05, %v4902_v38  ;;  %v5131_v55 = vadd.f32 %v9678_v54, %v5111_v10 }
 0x8e7   : > { %v5000_v26 = vmul.f32 %v6549_v3, %v4999_v40  ;;  %v5006_v50 = vmul.f32 %v6551_v8, %v4917_v36  ;;  %vm5012_vm7 = vweird.f32 %v6551_v8 }
 0x8e8   : > { %6552 = vrsqrt.f32 %v4918_v32  ;;  %vm5013_vm9 = vmor %vm5011_vm8, %vm5012_vm7  ;;  %vm5021_vm11 = vweird.f32 %v4918_v32 }
 0x8e9   : > { %v5004_v45 = vsel %vm5003_vm6, %v6549_v3, %v5000_v26  ;;  %v5007_v16 = vmul.f32 %v6551_v8, %v5006_v50  ;;  %5147 = vxpose.xlu2.b32.cont [7/16] %v5131_v55, 128 }
 0x8ea   : > { %v5092_v1 = vmul.f32 %v5004_v45, %v9617_v44 }
 0x8eb   : > { %v5008_v27 = vmul.f32 0.5, %v5007_v16  ;;  %v4882_v7 = vpop.xlane.xlu2 %4881 }
 0x8ec   : > { %v4903_v37 = vmul.f32 %v4882_v7, %v9567_v47  ;;  %v5112_v6 = vmul.f32 %v9675_v31, %v5092_v1 }
 0x8ed   : > { %v5009_v17 = vsub.f32 1.5, %v5008_v27 }
 0x8ee   : > { %v6553_v52 = vpop.eup %6552  ;;  %v4919_v33 = vadd.f32 1e-05, %v4903_v37  ;;  %v5132_v35 = vadd.f32 %v9678_v54, %v5112_v6 }
 0x8ef   : > { %v5010_v19 = vmul.f32 %v6551_v8, %v5009_v17  ;;  %v5016_v49 = vmul.f32 %v6553_v52, %v4918_v32  ;;  %vm5022_vm10 = vweird.f32 %v6553_v52 }
 0x8f0   : > { %6554 = vrsqrt.f32 %v4919_v33  ;;  %vm5023_vm12 = vmor %vm5021_vm11, %vm5022_vm10  ;;  %vm5031_vm0 = vweird.f32 %v4919_v33 }
 0x8f1   : > { %v5014_v51 = vsel %vm5013_vm9, %v6551_v8, %v5010_v19  ;;  %v5017_v11 = vmul.f32 %v6553_v52, %v5016_v49  ;;  %5148 = vxpose.xlu2.b32.cont [8/16] %v5132_v35, 128 }
 0x8f2   : > { %v5093_v44 = vmul.f32 %v5014_v51, %v9623_v60 }
 0x8f3   : > { %v5018_v34 = vmul.f32 0.5, %v5017_v11  ;;  %v4884_v22 = vpop.xlane.xlu0 %4883 }
 0x8f4   : > { %v4904_v56 = vmul.f32 %v4884_v22, %v9567_v47  ;;  %v5113_v39 = vmul.f32 %v9675_v31, %v5093_v44 }
 0x8f5   : > { %v5019_v43 = vsub.f32 1.5, %v5018_v34 }
 0x8f6   : > { %v6555_v0 = vpop.eup %6554  ;;  %v4920_v14 = vadd.f32 1e-05, %v4904_v56  ;;  %v5133_v25 = vadd.f32 %v9678_v54, %v5113_v39 }
 0x8f7   : > { %v5020_v21 = vmul.f32 %v6553_v52, %v5019_v43  ;;  %v5026_v59 = vmul.f32 %v6555_v0, %v4919_v33  ;;  %vm5032_vm13 = vweird.f32 %v6555_v0 }
 0x8f8   : > { %6556 = vrsqrt.f32 %v4920_v14  ;;  %vm5033_vm1 = vmor %vm5031_vm0, %vm5032_vm13  ;;  %vm5041_vm3 = vweird.f32 %v4920_v14 }
 0x8f9   : > { %v5024_v57 = vsel %vm5023_vm12, %v6553_v52, %v5020_v21  ;;  %v5027_v15 = vmul.f32 %v6555_v0, %v5026_v59  ;;  %5149 = vxpose.xlu2.b32.cont [9/16] %v5133_v25, 128 }
 0x8fa   : > { %v5094_v60 = vmul.f32 %v5024_v57, %v9629_v62 }
 0x8fb   : > { %v5028_v28 = vmul.f32 0.5, %v5027_v15  ;;  %v4886_v2 = vpop.xlane.xlu1 %4885 }
 0x8fc   : > { %v4905_v63 = vmul.f32 %v4886_v2, %v9567_v47  ;;  %v5114_v42 = vmul.f32 %v9675_v31, %v5094_v60 }
 0x8fd   : > { %v5029_v24 = vsub.f32 1.5, %v5028_v28 }
 0x8fe   : > { %v6557_v23 = vpop.eup %6556  ;;  %v4921_v12 = vadd.f32 1e-05, %v4905_v63  ;;  %v5134_v3 = vadd.f32 %v9678_v54, %v5114_v42 }
 0x8ff   : > { %v5030_v36 = vmul.f32 %v6555_v0, %v5029_v24  ;;  %v5036_v30 = vmul.f32 %v6557_v23, %v4920_v14  ;;  %vm5042_vm2 = vweird.f32 %v6557_v23 }
 0x900   : > { %6558 = vrsqrt.f32 %v4921_v12  ;;  %vm5043_vm14 = vmor %vm5041_vm3, %vm5042_vm2  ;;  %vm5051_vm4 = vweird.f32 %v4921_v12 }
 0x901   : > { %v5034_v29 = vsel %vm5033_vm1, %v6555_v0, %v5030_v36  ;;  %v5037_v46 = vmul.f32 %v6557_v23, %v5036_v30  ;;  %5150 = vxpose.xlu2.b32.cont [10/16] %v5134_v3, 128 }
 0x902   : > { %v5095_v62 = vmul.f32 %v5034_v29, %v9635_v58 }
 0x903   : > { %v5038_v4 = vmul.f32 0.5, %v5037_v46  ;;  %v4888_v18 = vpop.xlane.xlu2 %4887 }
 0x904   : > { %v4906_v13 = vmul.f32 %v4888_v18, %v9567_v47  ;;  %v5115_v48 = vmul.f32 %v9675_v31, %v5095_v62 }
 0x905   : > { %v5039_v53 = vsub.f32 1.5, %v5038_v4 }
 0x906   : > { %v6559_v38 = vpop.eup %6558  ;;  %v4922_v10 = vadd.f32 1e-05, %v4906_v13  ;;  %v5135_v40 = vadd.f32 %v9678_v54, %v5115_v48 }
 0x907   : > { %v5040_v8 = vmul.f32 %v6557_v23, %v5039_v53  ;;  %v5046_v32 = vmul.f32 %v6559_v38, %v4921_v12  ;;  %vm5052_vm15 = vweird.f32 %v6559_v38 }
 0x908   : > { %6560 = vrsqrt.f32 %v4922_v10  ;;  %vm5053_vm5 = vmor %vm5051_vm4, %vm5052_vm15  ;;  %vm5061_vm7 = vweird.f32 %v4922_v10 }
 0x909   : > { %v5044_v55 = vsel %vm5043_vm14, %v6557_v23, %v5040_v8  ;;  %v5047_v26 = vmul.f32 %v6559_v38, %v5046_v32  ;;  %5151 = vxpose.xlu2.b32.cont [11/16] %v5135_v40, 128 }
 0x90a   : > { %v5096_v58 = vmul.f32 %v5044_v55, %v9641_v61 }
 0x90b   : > { %v5048_v50 = vmul.f32 0.5, %v5047_v26  ;;  %v4890_v45 = vpop.xlane.xlu0 %4889 }
 0x90c   : > { %v4907_v16 = vmul.f32 %v4890_v45, %v9567_v47  ;;  %v5116_v1 = vmul.f32 %v9675_v31, %v5096_v58 }
 0x90d   : > { %v5049_v27 = vsub.f32 1.5, %v5048_v50 }
 0x90e   : > { %v6561_v7 = vpop.eup %6560  ;;  %v4923_v37 = vadd.f32 1e-05, %v4907_v16  ;;  %v5136_v6 = vadd.f32 %v9678_v54, %v5116_v1 }
 0x90f   : > { %v5050_v17 = vmul.f32 %v6559_v38, %v5049_v27  ;;  %v5056_v52 = vmul.f32 %v6561_v7, %v4922_v10  ;;  %vm5062_vm6 = vweird.f32 %v6561_v7 }
 0x910   : > { %6562 = vrsqrt.f32 %v4923_v37  ;;  %vm5063_vm8 = vmor %vm5061_vm7, %vm5062_vm6  ;;  %vm5071_vm10 = vweird.f32 %v4923_v37 }
 0x911   : > { %v5054_v33 = vsel %vm5053_vm5, %v6559_v38, %v5050_v17  ;;  %v5057_v35 = vmul.f32 %v6561_v7, %v5056_v52  ;;  %5152 = vxpose.xlu2.b32.cont [12/16] %v5136_v6, 128 }
 0x912   : > { %v5097_v61 = vmul.f32 %v5054_v33, %v9647_v20 }
 0x913   : > { %v5058_v19 = vmul.f32 0.5, %v5057_v35  ;;  %v4892_v49 = vpop.xlane.xlu1 %4891 }
 0x914   : > { %v4908_v51 = vmul.f32 %v4892_v49, %v9567_v47  ;;  %v5117_v11 = vmul.f32 %v9675_v31, %v5097_v61 }
 0x915   : > { %v5059_v44 = vsub.f32 1.5, %v5058_v19 }
 0x916   : > { %v6563_v34 = vpop.eup %6562  ;;  %v4924_v22 = vadd.f32 1e-05, %v4908_v51  ;;  %v5137_v56 = vadd.f32 %v9678_v54, %v5117_v11 }
 0x917   : > { %v5060_v39 = vmul.f32 %v6561_v7, %v5059_v44  ;;  %v5066_v43 = vmul.f32 %v6563_v34, %v4923_v37  ;;  %vm5072_vm9 = vweird.f32 %v6563_v34 }
 0x918   : > { %6564 = vrsqrt.f32 %v4924_v22  ;;  %vm5073_vm11 = vmor %vm5071_vm10, %vm5072_vm9  ;;  %vm5081_vm13 = vweird.f32 %v4924_v22 }
 0x919   : > { %v5064_v0 = vsel %vm5063_vm8, %v6561_v7, %v5060_v39  ;;  %v5067_v14 = vmul.f32 %v6563_v34, %v5066_v43  ;;  %5153 = vxpose.xlu2.b32.cont [13/16] %v5137_v56, 128 }
 0x91a   : > { %v5098_v20 = vmul.f32 %v5064_v0, %v9653_v9 }
 0x91b   : > { %v5068_v25 = vmul.f32 0.5, %v5067_v14 }
 0x91c   : > { %v5118_v47 = vmul.f32 %v9675_v31, %v5098_v20 }
 0x91d   : > { %v5069_v21 = vsub.f32 1.5, %v5068_v25 }
 0x91e   : > { %v6565_v59 = vpop.eup %6564  ;;  %v5138_v57 = vadd.f32 %v9678_v54, %v5118_v47 }
 0x91f   : > { %v5070_v15 = vmul.f32 %v6563_v34, %v5069_v21  ;;  %v5076_v60 = vmul.f32 %v6565_v59, %v4924_v22  ;;  %vm5082_vm12 = vweird.f32 %v6565_v59 }
 0x920   : > { %vm5083_vm0 = vmor %vm5081_vm13, %vm5082_vm12 }
 0x921   : > { %v5074_v28 = vsel %vm5073_vm11, %v6563_v34, %v5070_v15  ;;  %v5077_v2 = vmul.f32 %v6565_v59, %v5076_v60  ;;  %5154 = vxpose.xlu2.b32.cont [14/16] %v5138_v57, 128 }
 0x922   : > { %v5099_v63 = vmul.f32 %v5074_v28, %v9659_v41 }
 0x923   : > { %v5078_v42 = vmul.f32 0.5, %v5077_v2 }
 0x924   : > { %v5119_v9 = vmul.f32 %v9675_v31, %v5099_v63 }
 0x925   : > { %v5079_v24 = vsub.f32 1.5, %v5078_v42 }
 0x926   : > { %v5139_v23 = vadd.f32 %v9678_v54, %v5119_v9 }
 0x927   : > { %v5080_v12 = vmul.f32 %v6565_v59, %v5079_v24 }
 0x929   : > { %v5084_v3 = vsel %vm5083_vm0, %v6565_v59, %v5080_v12  ;;  %5155 = vxpose.xlu2.b32.cont [15/16] %v5139_v23, 128 }
 0x92a   : > { %v5100_v41 = vmul.f32 %v5084_v3, %v9665_v5 }
 0x92c   : > { %v5120_v36 = vmul.f32 %v9675_v31, %v5100_v41 }
 0x92e   : > { %v5140_v30 = vadd.f32 %v9678_v54, %v5120_v36 }
 0x931   : > { %5156 = vxpose.xlu2.b32.end [16/16] %v5140_v30, 128 }
 0x952   : > { %v5157_v29 = vpop.trf.xlu2 }
 0x953   : > { %5173 = vst [vmem:[%s7190_s11] sm:$0xff] %v5157_v29 }
 0x95a   : > { %v5158_v46 = vpop.trf.xlu2 }
 0x95b   : > { %5174 = vst [vmem:[%s7190_s11 + $0x8] sm:$0xff] %v5158_v46 }
 0x962   : > { %v5159_v62 = vpop.trf.xlu2 }
 0x963   : > { %5175 = vst [vmem:[%s7190_s11 + $0x10] sm:$0xff] %v5159_v62 }
 0x96a   : > { %v5160_v4 = vpop.trf.xlu2 }
 0x96b   : > { %5176 = vst [vmem:[%s7190_s11 + $0x18] sm:$0xff] %v5160_v4 }
 0x972   : > { %v5161_v5 = vpop.trf.xlu2 }
 0x973   : > { %5177 = vst [vmem:[%s7190_s11 + $0x20] sm:$0xff] %v5161_v5 }
 0x97a   : > { %v5162_v31 = vpop.trf.xlu2 }
 0x97b   : > { %5178 = vst [vmem:[%s7190_s11 + $0x28] sm:$0xff] %v5162_v31 }
 0x982   : > { %v5163_v54 = vpop.trf.xlu2 }
 0x983   : > { %5179 = vst [vmem:[%s7190_s11 + $0x30] sm:$0xff] %v5163_v54 }
 0x98a   : > { %v5164_v18 = vpop.trf.xlu2 }
 0x98b   : > { %5180 = vst [vmem:[%s7190_s11 + $0x38] sm:$0xff] %v5164_v18 }
 0x992   : > { %v5165_v13 = vpop.trf.xlu2 }
 0x993   : > { %5181 = vst [vmem:[%s7190_s11 + $0x40] sm:$0xff] %v5165_v13 }
 0x99a   : > { %v5166_v48 = vpop.trf.xlu2 }
 0x99b   : > { %5182 = vst [vmem:[%s7190_s11 + $0x48] sm:$0xff] %v5166_v48 }
 0x9a2   : > { %v5167_v53 = vpop.trf.xlu2 }
 0x9a3   : > { %5183 = vst [vmem:[%s7190_s11 + $0x50] sm:$0xff] %v5167_v53 }
 0x9aa   : > { %v5168_v38 = vpop.trf.xlu2 }
 0x9ab   : > { %5184 = vst [vmem:[%s7190_s11 + $0x58] sm:$0xff] %v5168_v38 }
 0x9b2   : > { %v5169_v10 = vpop.trf.xlu2 }
 0x9b3   : > { %5185 = vst [vmem:[%s7190_s11 + $0x60] sm:$0xff] %v5169_v10 }
 0x9ba   : > { %v5170_v40 = vpop.trf.xlu2 }
 0x9bb   : > { %5186 = vst [vmem:[%s7190_s11 + $0x68] sm:$0xff] %v5170_v40 }
 0x9c2   : > { %v5171_v8 = vpop.trf.xlu2 }
 0x9c3   : > { %5187 = vst [vmem:[%s7190_s11 + $0x70] sm:$0xff] %v5171_v8 }
 0x9ca   : > { %v5172_v32 = vpop.trf.xlu2 }
 0x9cb   : > { %5188 = vst [vmem:[%s7190_s11 + $0x78] sm:$0xff] %v5172_v32 }
 0x9cc   : > { %6797 = shalt.err (!%p6794_p5)
}
 0x9cd   : > { %s6961_s3 = smov 128   ;;  %s6962_s11 = smov 256  }
 0x9ce   : > { %s6963_s7 = smov 8  }
 0x9cf   : > { %5818 = dma.vmem_to_hbm [thread:$0]  (%p7143_p2), %s5204_s30, 2048, %s5206_s18, %s5190_s10, %s6961_s3, %s6962_s11, %s6963_s7  }
 0x9d0 PF: > { %s10004_s21 = sld [smem:[#allocation39_spill]] }
 0x9d1   : > { %s10005_s16 = sld [smem:[#allocation37_spill]] }
 0x9d6   : > { %p5855_p6 = scmp.ge.s32.totalorder %s10004_s21, 2 }
 0x9d7   : > { %s5220_s12 = sand.u32 1, %s10005_s16  }
 0x9d8   : > { %p5841_p7 = pnand %p5855_p6, %p7149_p4  ;;  %s5221_s25 = scalar_lea.sflag [#allocation13], %s5220_s12 }
 0x9da   : > { %p5842_p3 = pneg %p5841_p7 }
 0x9dc   : > { %6875 = dma.done.wait (%p5842_p3), %s5221_s25, 2048  }
 0x9dd   : > { %6877 = vsyncadd (%p5842_p3), %s5221_s25, 4294965248  ;;  %s31_s28 = sadd.s32 1, %s10004_s21   ;;  %s10007_s30 = sld [smem:[#allocation40_spill]] }
 0x9de   : > { %p28_p1 = scmp.ge.s32.totalorder %s31_s28, 6   ;;  %s10008_s18 = sld [smem:[#allocation41_spill]] }
 0x9df   : > { %s10009_s21 = smov %s6884_s22  ;;  %s10010_s22 = smov %s6888_s23 }
 0x9e0   : > { %s10011_s23 = smov %s7156_s2  ;;  %s10012_s24 = smov %s6900_s26 }
 0x9e1   : > { %s10013_s25 = smov %s6904_s27  ;;  %30 = sbr.rel (!%p28_p1) target bundleno = 19 (0x13), region = 202 }
 0x9e3   : > { %s10014_s26 = smov %s10007_s30 }
 0x9e4   : > { %s10015_s27 = smov %s10008_s18 }
 0x9e6   :  { %5227 = vsyncpa [#allocation12], 1 }
 0x9e7   :  { %5229 = vsyncpa [#allocation12 + $0x1], 1 }
 0x9e8   :  { %5230 = vsyncpa [#allocation15], 1 }
 0x9e9   :  { %5231 = vsyncpa [#allocation18], 1 }
 0x9ea   :  { %5232 = vsyncpa [#allocation21], 1 }
 0x9eb   :  { %5233 = vsyncpa [#allocation13], 1 }
 0x9ec   :  { %5235 = vsyncpa [#allocation13 + $0x1], 1 }

</bundles_post_ra>
